<compile_context>
chip_gen: v6e
topology: v6e:2x2x1
jax: 0.10.0
libtpu: 0.0.40
codegen_flags: <defaults>
</compile_context>

<pallas_src>
import functools

import jax
import jax.numpy as jnp
from jax.experimental import pallas as pl
from jax.experimental.pallas import tpu as pltpu


_EPS = 1e-5          # InstanceNorm2d default eps
_NEG_SLOPE = 0.2     # LeakyReLU slope of the pix2pix DisBlock


# ----------------------------- Pallas kernels ------------------------------- #

def _accumulate_conv(z_ref, w_ref, acc_ref, starts, band):
    """acc <- sum_t  z[start_t : start_t + band, :] @ w[t]   (bf16 MXU, f32 acc).

    Each kernel tap t is a statically shifted "band" view of the flattened
    (Ws-strided) input, so no in-kernel reshape/relayout is needed.
    """
    for t, s in enumerate(starts):
        part = z_ref[0, s:s + band, :]                                # (band, C) bf16
        contrib = jnp.dot(part, w_ref[t], preferred_element_type=jnp.float32)
        if t == 0:
            acc_ref[...] = contrib
        else:
            acc_ref[...] += contrib


def _conv_in_lrelu_kernel(z_ref, w_ref, o_ref, acc_ref, *,
                          starts, band, ws, wo, inv_count):
    """Fused Conv -> InstanceNorm2d(affine=False) -> LeakyReLU(0.2), one image.

    Rows with (row % ws) >= wo are halo junk: excluded from the statistics via
    a mask and sliced off on the host.  Stats are computed in f32 with a true
    centered second moment.
    """
    _accumulate_conv(z_ref, w_ref, acc_ref, starts, band)
    y = acc_ref[...]                                                  # (band, cb) f32
    col = jax.lax.broadcasted_iota(jnp.int32, (band, 1), 0) % ws
    valid = col < wo
    ym = jnp.where(valid, y, 0.0)
    mean = jnp.sum(ym, axis=0, keepdims=True) * inv_count             # (1, cb)
    yc = y - mean
    ycm = jnp.where(valid, yc, 0.0)
    var = jnp.sum(ycm * ycm, axis=0, keepdims=True) * inv_count       # (1, cb)
    xh = yc * jax.lax.rsqrt(var + _EPS)
    out = jnp.maximum(xh, _NEG_SLOPE * xh)                            # LeakyReLU(0.2)
    o_ref[0] = out.astype(o_ref.dtype)


def _conv_bias_act_kernel(z_ref, w_ref, b_ref, o_ref, acc_ref, *,
                          starts, band, act):
    """Conv + bias + activation (layers without InstanceNorm)."""
    _accumulate_conv(z_ref, w_ref, acc_ref, starts, band)
    y = acc_ref[...] + b_ref[...]                                     # (band, cb) f32
    if act == "leaky":
        out = jnp.maximum(y, _NEG_SLOPE * y)
    else:                                                             # sigmoid
        out = jax.nn.sigmoid(y)
    o_ref[0] = out.astype(o_ref.dtype)


# ------------------------------ Host-side prep ------------------------------- #

def _space_to_depth_form(x, w):
    """k=4/s=2/p=1 conv  ==  k=2/s=1/p=0 conv on space-to-depth(2) of pad(x, 1).

    Same contraction size (16*Cin); the transformed input has the same number of
    elements as the original -> no im2col HBM expansion.
    """
    n, h, wdt, cin = x.shape
    cout = w.shape[0]
    ho, wo = h // 2, wdt // 2
    xp = jnp.pad(x, ((0, 0), (1, 1), (1, 1), (0, 0)))
    z = xp.reshape(n, ho + 1, 2, wo + 1, 2, cin)                      # [n,p,r,q,s,ci]
    z = jnp.transpose(z, (0, 1, 3, 2, 4, 5)).reshape(n, ho + 1, wo + 1, 4 * cin)
    # (Cout, Cin, 4, 4) -> taps [dh, dw] with inner channel order (r, s, ci)
    wt = jnp.transpose(w, (2, 3, 1, 0)).reshape(2, 2, 2, 2, cin, cout)  # [dh,r,dw,s,ci,co]
    wt = jnp.transpose(wt, (0, 2, 1, 3, 4, 5)).reshape(4, 4 * cin, cout)
    return z, wt, ho, wo, 2


def _same_pad_form(x, w, k):
    """k x k stride-1 'same' conv: pad by (k-1)//2, per-tap decomposition."""
    n, h, wdt, cin = x.shape
    cout = w.shape[0]
    p = (k - 1) // 2
    z = jnp.pad(x, ((0, 0), (p, p), (p, p), (0, 0)))
    wt = jnp.transpose(w, (2, 3, 1, 0)).reshape(k * k, cin, cout)
    return z, wt, h, wdt, k


def conv_block(x_nhwc, w, b, *, stride, k, normalize, act):
    """One Conv2d(+InstanceNorm)(+activation) block, fused in one pallas_call."""
    x_nhwc = x_nhwc.astype(jnp.bfloat16)
    if stride == 2:
        z, wt, ho, wo, kk = _space_to_depth_form(x_nhwc, w)
    else:
        z, wt, ho, wo, kk = _same_pad_form(x_nhwc, w, k)

    n = z.shape[0]
    c = z.shape[-1]
    cout = w.shape[0]
    hs, ws = ho + kk - 1, wo + kk - 1
    band = ho * ws                                    # rows per image incl. halo cols
    starts = tuple(dh * ws + dw for dh in range(kk) for dw in range(kk))
    zrows = hs * ws + (kk - 1)                        # tail pad keeps every band in-bounds
    z_flat = jnp.pad(z.reshape(n, hs * ws, c), ((0, 0), (0, kk - 1), (0, 0)))

    # Pad a tiny Cout (final layer, Cout=1) to 128 lanes for unmasked stores.
    coutp = cout if cout >= 64 else 128
    if coutp != cout:
        wt = jnp.pad(wt, ((0, 0), (0, 0), (0, coutp - cout)))
    wt = wt.astype(jnp.bfloat16)

    # Output-channel blocking: both v7x TensorCores get work even at batch 1.
    cb = coutp if coutp <= 128 else 128
    n_cb = coutp // cb

    out_dtype = jnp.float32 if act == "sigmoid" else jnp.bfloat16
    osize = jnp.dtype(out_dtype).itemsize
    need = (2 * zrows * c * 2             # double-buffered input image
            + 2 * kk * kk * c * cb * 2    # double-buffered weight block
            + 2 * band * cb * osize       # double-buffered output block
            + band * cb * 4               # f32 accumulator scratch
            + band * c * 2                # per-tap shifted-band temp
            + band * cb * 4)              # matmul result temp
    limit = max(16 << 20, min(int(need * 1.5) + (4 << 20), 40 << 20))

    z_spec = pl.BlockSpec((1, zrows, c), lambda i, j: (i, 0, 0))
    w_spec = pl.BlockSpec((kk * kk, c, cb), lambda i, j: (0, 0, j))
    o_spec = pl.BlockSpec((1, band, cb), lambda i, j: (i, 0, j))
    scratch = [pltpu.VMEM((band, cb), jnp.float32)]
    cparams = pltpu.CompilerParams(
        dimension_semantics=("parallel", "parallel"),
        vmem_limit_bytes=limit)
    out_shape = jax.ShapeDtypeStruct((n, band, coutp), out_dtype)

    if normalize:
        # Conv bias is dropped: InstanceNorm2d(affine=False) subtracts the
        # per-(image, channel) mean, which cancels a constant bias exactly.
        kern = functools.partial(_conv_in_lrelu_kernel, starts=starts, band=band,
                                 ws=ws, wo=wo, inv_count=1.0 / float(ho * wo))
        out = pl.pallas_call(
            kern,
            out_shape=out_shape,
            grid_spec=pltpu.PrefetchScalarGridSpec(
                num_scalar_prefetch=0, grid=(n, n_cb),
                in_specs=[z_spec, w_spec], out_specs=o_spec,
                scratch_shapes=scratch),
            compiler_params=cparams,
        )(z_flat, wt)
    else:
        bp = jnp.pad(b, (0, coutp - cout)) if coutp != cout else b
        b_mat = bp.reshape(1, coutp).astype(jnp.float32)
        b_spec = pl.BlockSpec((1, cb), lambda i, j: (0, j))
        kern = functools.partial(_conv_bias_act_kernel, starts=starts,
                                 band=band, act=act)
        out = pl.pallas_call(
            kern,
            out_shape=out_shape,
            grid_spec=pltpu.PrefetchScalarGridSpec(
                num_scalar_prefetch=0, grid=(n, n_cb),
                in_specs=[z_spec, w_spec, b_spec], out_specs=o_spec,
                scratch_shapes=scratch),
            compiler_params=cparams,
        )(z_flat, wt, b_mat)

    # Drop halo columns + lane padding: (N, band, coutp) -> (N, Ho, Wo, Cout).
    # Under jit this slice fuses with the next layer's pad + space-to-depth.
    return out.reshape(n, ho, ws, coutp)[:, :, :wo, :cout]


# ------------------------------ Model forward -------------------------------- #

def init_params(key, in_channels=3):
    """Deterministic parameter init (PyTorch-default-style uniform bounds)."""
    specs = [
        (in_channels * 2, 64, 4),   # DisBlock 1 (normalize=False)
        (64, 128, 4),               # DisBlock 2
        (128, 256, 4),              # DisBlock 3
        (256, 512, 4),              # DisBlock 4
        (512, 1, 3),                # final Conv2d
    ]
    params = []
    for cin, cout, k in specs:
        key, kw, kb = jax.random.split(key, 3)
        fan_in = cin * k * k
        bound = float(1.0 / (fan_in ** 0.5))
        w = jax.random.uniform(kw, (cout, cin, k, k), jnp.float32, -bound, bound)
        bb = jax.random.uniform(kb, (cout,), jnp.float32, -bound, bound)
        params.append((w, bb))
    return params


def discriminator_forward(params, a, b):
    """a, b: NCHW (N, in_channels, H, W) -> (N, 1, H/16, W/16)."""
    x = jnp.concatenate([a, b], axis=1)          # (N, 2*in_channels, H, W)
    x = jnp.transpose(x, (0, 2, 3, 1))           # NHWC
    (w1, b1), (w2, b2), (w3, b3), (w4, b4), (w5, b5) = params
    x = conv_block(x, w1, b1, k=4, stride=2, normalize=False, act="leaky")
    x = conv_block(x, w2, b2, k=4, stride=2, normalize=True, act="leaky")
    x = conv_block(x, w3, b3, k=4, stride=2, normalize=True, act="leaky")
    x = conv_block(x, w4, b4, k=4, stride=2, normalize=True, act="leaky")
    x = conv_block(x, w5, b5, k=3, stride=1, normalize=False, act="sigmoid")
    return jnp.transpose(x, (0, 3, 1, 2))        # NCHW: (N, 1, H/16, W/16)


if __name__ == "__main__":
    key = jax.random.PRNGKey(0)
    kp, ka, kb = jax.random.split(key, 3)

    N, C, H, W = 2, 3, 32, 32    # small shapes; H, W divisible by 16
    params = init_params(kp, in_channels=C)
    a = jax.random.normal(ka, (N, C, H, W), jnp.float32)
    b = jax.random.normal(kb, (N, C, H, W), jnp.float32)

    fwd = jax.jit(discriminator_forward)
    out = jax.block_until_ready(fwd(params, a, b))

    assert out.shape == (N, 1, H // 16, W // 16), out.shape
    assert bool(jnp.all(jnp.isfinite(out)))
    assert bool(jnp.all((out >= 0.0) & (out <= 1.0)))   # sigmoid range
    print("KERNEL_OK")
</pallas_src>

<mosaic_0001>
module attributes {stable_mosaic.version = 11 : i64} {
  func.func @_conv_bias_act_kernel(%arg0: i32, %arg1: i32, %arg2: memref<1x290x24xbf16, #tpu.memory_space<vmem>>, %arg3: memref<4x24x64xbf16, #tpu.memory_space<vmem>>, %arg4: memref<1x64xf32, #tpu.memory_space<vmem>>, %arg5: memref<1x272x64xbf16, #tpu.memory_space<vmem>>, %arg6: memref<272x64xf32, #tpu.memory_space<vmem>>) attributes {dimension_semantics = [#tpu.dimension_semantics<parallel>, #tpu.dimension_semantics<parallel>], iteration_bounds = array<i64: 2, 1>, scalar_prefetch = 0 : i64, scratch_operands = 1 : i64, tpu.core_type = #tpu.core_type<tc>, window_params = [{transform_indices = @transform_0, window_bounds = array<i64: 1, 290, 24>}, {transform_indices = @transform_1, window_bounds = array<i64: 4, 24, 64>}, {transform_indices = @transform_2, window_bounds = array<i64: 1, 64>}, {transform_indices = @transform_3, window_bounds = array<i64: 1, 272, 64>}]} {
    %c0 = arith.constant 0 : index
    %c0_0 = arith.constant 0 : index
    %c0_1 = arith.constant 0 : index
    %0 = vector.load %arg2[%c0, %c0_0, %c0_1] : memref<1x290x24xbf16, #tpu.memory_space<vmem>>, vector<1x272x24xbf16>
    %1 = vector.shape_cast %0 : vector<1x272x24xbf16> to vector<272x24xbf16>
    %c0_2 = arith.constant 0 : index
    %c0_3 = arith.constant 0 : index
    %c0_4 = arith.constant 0 : index
    %2 = vector.load %arg3[%c0_2, %c0_3, %c0_4] : memref<4x24x64xbf16, #tpu.memory_space<vmem>>, vector<1x24x64xbf16>
    %3 = vector.shape_cast %2 : vector<1x24x64xbf16> to vector<24x64xbf16>
    %cst = arith.constant dense<0.000000e+00> : vector<272x64xf32>
    %4 = tpu.matmul %1, %3, %cst {dimension_numbers = #tpu.dot_dimension_numbers<[1], [0], [0], [1], [0, 0, 1, 1], [], []>} : vector<272x24xbf16>, vector<24x64xbf16>, vector<272x64xf32> -> vector<272x64xf32>
    %c0_5 = arith.constant 0 : index
    %c0_6 = arith.constant 0 : index
    %5 = vector.load %arg6[%c0_5, %c0_6] : memref<272x64xf32, #tpu.memory_space<vmem>>, vector<272x64xf32>
    tpu.vector_store %arg6[%c0_5, %c0_6], %4 {strides = array<i32>} : memref<272x64xf32, #tpu.memory_space<vmem>>, vector<272x64xf32>,
    %c0_7 = arith.constant 0 : index
    %c1 = arith.constant 1 : index
    %c0_8 = arith.constant 0 : index
    %6 = vector.load %arg2[%c0_7, %c1, %c0_8] : memref<1x290x24xbf16, #tpu.memory_space<vmem>>, vector<1x272x24xbf16>
    %7 = vector.shape_cast %6 : vector<1x272x24xbf16> to vector<272x24xbf16>
    %c1_9 = arith.constant 1 : index
    %c0_10 = arith.constant 0 : index
    %c0_11 = arith.constant 0 : index
    %8 = vector.load %arg3[%c1_9, %c0_10, %c0_11] : memref<4x24x64xbf16, #tpu.memory_space<vmem>>, vector<1x24x64xbf16>
    %9 = vector.shape_cast %8 : vector<1x24x64xbf16> to vector<24x64xbf16>
    %cst_12 = arith.constant dense<0.000000e+00> : vector<272x64xf32>
    %10 = tpu.matmul %7, %9, %cst_12 {dimension_numbers = #tpu.dot_dimension_numbers<[1], [0], [0], [1], [0, 0, 1, 1], [], []>} : vector<272x24xbf16>, vector<24x64xbf16>, vector<272x64xf32> -> vector<272x64xf32>
    %c0_13 = arith.constant 0 : index
    %c0_14 = arith.constant 0 : index
    %11 = vector.load %arg6[%c0_13, %c0_14] : memref<272x64xf32, #tpu.memory_space<vmem>>, vector<272x64xf32>
    %12 = arith.addf %11, %10 : vector<272x64xf32>
    %c0_15 = arith.constant 0 : index
    %c0_16 = arith.constant 0 : index
    %13 = vector.load %arg6[%c0_15, %c0_16] : memref<272x64xf32, #tpu.memory_space<vmem>>, vector<272x64xf32>
    tpu.vector_store %arg6[%c0_15, %c0_16], %12 {strides = array<i32>} : memref<272x64xf32, #tpu.memory_space<vmem>>, vector<272x64xf32>,
    %c0_17 = arith.constant 0 : index
    %c17 = arith.constant 17 : index
    %c0_18 = arith.constant 0 : index
    %14 = vector.load %arg2[%c0_17, %c17, %c0_18] : memref<1x290x24xbf16, #tpu.memory_space<vmem>>, vector<1x272x24xbf16>
    %15 = vector.shape_cast %14 : vector<1x272x24xbf16> to vector<272x24xbf16>
    %c2 = arith.constant 2 : index
    %c0_19 = arith.constant 0 : index
    %c0_20 = arith.constant 0 : index
    %16 = vector.load %arg3[%c2, %c0_19, %c0_20] : memref<4x24x64xbf16, #tpu.memory_space<vmem>>, vector<1x24x64xbf16>
    %17 = vector.shape_cast %16 : vector<1x24x64xbf16> to vector<24x64xbf16>
    %cst_21 = arith.constant dense<0.000000e+00> : vector<272x64xf32>
    %18 = tpu.matmul %15, %17, %cst_21 {dimension_numbers = #tpu.dot_dimension_numbers<[1], [0], [0], [1], [0, 0, 1, 1], [], []>} : vector<272x24xbf16>, vector<24x64xbf16>, vector<272x64xf32> -> vector<272x64xf32>
    %c0_22 = arith.constant 0 : index
    %c0_23 = arith.constant 0 : index
    %19 = vector.load %arg6[%c0_22, %c0_23] : memref<272x64xf32, #tpu.memory_space<vmem>>, vector<272x64xf32>
    %20 = arith.addf %19, %18 : vector<272x64xf32>
    %c0_24 = arith.constant 0 : index
    %c0_25 = arith.constant 0 : index
    %21 = vector.load %arg6[%c0_24, %c0_25] : memref<272x64xf32, #tpu.memory_space<vmem>>, vector<272x64xf32>
    tpu.vector_store %arg6[%c0_24, %c0_25], %20 {strides = array<i32>} : memref<272x64xf32, #tpu.memory_space<vmem>>, vector<272x64xf32>,
    %c0_26 = arith.constant 0 : index
    %c18 = arith.constant 18 : index
    %c0_27 = arith.constant 0 : index
    %22 = vector.load %arg2[%c0_26, %c18, %c0_27] : memref<1x290x24xbf16, #tpu.memory_space<vmem>>, vector<1x272x24xbf16>
    %23 = vector.shape_cast %22 : vector<1x272x24xbf16> to vector<272x24xbf16>
    %c3 = arith.constant 3 : index
    %c0_28 = arith.constant 0 : index
    %c0_29 = arith.constant 0 : index
    %24 = vector.load %arg3[%c3, %c0_28, %c0_29] : memref<4x24x64xbf16, #tpu.memory_space<vmem>>, vector<1x24x64xbf16>
    %25 = vector.shape_cast %24 : vector<1x24x64xbf16> to vector<24x64xbf16>
    %cst_30 = arith.constant dense<0.000000e+00> : vector<272x64xf32>
    %26 = tpu.matmul %23, %25, %cst_30 {dimension_numbers = #tpu.dot_dimension_numbers<[1], [0], [0], [1], [0, 0, 1, 1], [], []>} : vector<272x24xbf16>, vector<24x64xbf16>, vector<272x64xf32> -> vector<272x64xf32>
    %c0_31 = arith.constant 0 : index
    %c0_32 = arith.constant 0 : index
    %27 = vector.load %arg6[%c0_31, %c0_32] : memref<272x64xf32, #tpu.memory_space<vmem>>, vector<272x64xf32>
    %28 = arith.addf %27, %26 : vector<272x64xf32>
    %c0_33 = arith.constant 0 : index
    %c0_34 = arith.constant 0 : index
    %29 = vector.load %arg6[%c0_33, %c0_34] : memref<272x64xf32, #tpu.memory_space<vmem>>, vector<272x64xf32>
    tpu.vector_store %arg6[%c0_33, %c0_34], %28 {strides = array<i32>} : memref<272x64xf32, #tpu.memory_space<vmem>>, vector<272x64xf32>,
    %c0_35 = arith.constant 0 : index
    %c0_36 = arith.constant 0 : index
    %30 = vector.load %arg6[%c0_35, %c0_36] : memref<272x64xf32, #tpu.memory_space<vmem>>, vector<272x64xf32>
    %c0_37 = arith.constant 0 : index
    %c0_38 = arith.constant 0 : index
    %31 = vector.load %arg4[%c0_37, %c0_38] : memref<1x64xf32, #tpu.memory_space<vmem>>, vector<1x64xf32>
    %32 = vector.broadcast %31 : vector<1x64xf32> to vector<272x64xf32>
    %33 = arith.addf %30, %32 : vector<272x64xf32>
    %cst_39 = arith.constant 2.000000e-01 : f32
    %34 = vector.broadcast %cst_39 : f32 to vector<272x64xf32>
    %35 = arith.mulf %34, %33 : vector<272x64xf32>
    %36 = arith.maximumf %33, %35 : vector<272x64xf32>
    %37 = arith.truncf %36 : vector<272x64xf32> to vector<272x64xbf16>
    %c0_40 = arith.constant 0 : index
    %c0_41 = arith.constant 0 : index
    %c0_42 = arith.constant 0 : index
    %38 = vector.load %arg5[%c0_40, %c0_41, %c0_42] : memref<1x272x64xbf16, #tpu.memory_space<vmem>>, vector<1x272x64xbf16>
    %39 = vector.shape_cast %38 : vector<1x272x64xbf16> to vector<272x64xbf16>
    %40 = vector.shape_cast %37 : vector<272x64xbf16> to vector<1x272x64xbf16>
    tpu.vector_store %arg5[%c0_40, %c0_41, %c0_42], %40 {strides = array<i32>} : memref<1x272x64xbf16, #tpu.memory_space<vmem>>, vector<1x272x64xbf16>,
    return
  }
  func.func @transform_0(%arg0: i32, %arg1: i32) -> (i32, i32, i32) {
    %c0_i32 = arith.constant 0 : i32
    %c0_i32_0 = arith.constant 0 : i32
    %c0_i32_1 = arith.constant 0 : i32
    return %arg0, %c0_i32, %c0_i32_0 : i32, i32, i32
  }
  func.func @transform_1(%arg0: i32, %arg1: i32) -> (i32, i32, i32) {
    %c0_i32 = arith.constant 0 : i32
    %c0_i32_0 = arith.constant 0 : i32
    %c0_i32_1 = arith.constant 0 : i32
    return %c0_i32, %c0_i32_0, %arg1 : i32, i32, i32
  }
  func.func @transform_2(%arg0: i32, %arg1: i32) -> (i32, i32) {
    %c0_i32 = arith.constant 0 : i32
    %c0_i32_0 = arith.constant 0 : i32
    return %c0_i32, %arg1 : i32, i32
  }
  func.func @transform_3(%arg0: i32, %arg1: i32) -> (i32, i32, i32) {
    %c0_i32 = arith.constant 0 : i32
    %c0_i32_0 = arith.constant 0 : i32
    return %arg0, %c0_i32, %arg1 : i32, i32, i32
  }
}

module attributes {stable_mosaic.version = 11 : i64} {
  func.func @_conv_in_lrelu_kernel(%arg0: i32, %arg1: i32, %arg2: memref<1x82x256xbf16, #tpu.memory_space<vmem>>, %arg3: memref<4x256x128xbf16, #tpu.memory_space<vmem>>, %arg4: memref<1x72x128xbf16, #tpu.memory_space<vmem>>, %arg5: memref<72x128xf32, #tpu.memory_space<vmem>>) attributes {dimension_semantics = [#tpu.dimension_semantics<parallel>, #tpu.dimension_semantics<parallel>], iteration_bounds = array<i64: 2, 1>, scalar_prefetch = 0 : i64, scratch_operands = 1 : i64, tpu.core_type = #tpu.core_type<tc>, window_params = [{transform_indices = @transform_0, window_bounds = array<i64: 1, 82, 256>}, {transform_indices = @transform_1, window_bounds = array<i64: 4, 256, 128>}, {transform_indices = @transform_2, window_bounds = array<i64: 1, 72, 128>}]} {
    %c0 = arith.constant 0 : index
    %c0_0 = arith.constant 0 : index
    %c0_1 = arith.constant 0 : index
    %0 = vector.load %arg2[%c0, %c0_0, %c0_1] : memref<1x82x256xbf16, #tpu.memory_space<vmem>>, vector<1x72x256xbf16>
    %1 = vector.shape_cast %0 : vector<1x72x256xbf16> to vector<72x256xbf16>
    %c0_2 = arith.constant 0 : index
    %c0_3 = arith.constant 0 : index
    %c0_4 = arith.constant 0 : index
    %2 = vector.load %arg3[%c0_2, %c0_3, %c0_4] : memref<4x256x128xbf16, #tpu.memory_space<vmem>>, vector<1x256x128xbf16>
    %3 = vector.shape_cast %2 : vector<1x256x128xbf16> to vector<256x128xbf16>
    %cst = arith.constant dense<0.000000e+00> : vector<72x128xf32>
    %4 = tpu.matmul %1, %3, %cst {dimension_numbers = #tpu.dot_dimension_numbers<[1], [0], [0], [1], [0, 0, 1, 1], [], []>} : vector<72x256xbf16>, vector<256x128xbf16>, vector<72x128xf32> -> vector<72x128xf32>
    %c0_5 = arith.constant 0 : index
    %c0_6 = arith.constant 0 : index
    %5 = vector.load %arg5[%c0_5, %c0_6] : memref<72x128xf32, #tpu.memory_space<vmem>>, vector<72x128xf32>
    tpu.vector_store %arg5[%c0_5, %c0_6], %4 {strides = array<i32>} : memref<72x128xf32, #tpu.memory_space<vmem>>, vector<72x128xf32>,
    %c0_7 = arith.constant 0 : index
    %c1 = arith.constant 1 : index
    %c0_8 = arith.constant 0 : index
    %6 = vector.load %arg2[%c0_7, %c1, %c0_8] : memref<1x82x256xbf16, #tpu.memory_space<vmem>>, vector<1x72x256xbf16>
    %7 = vector.shape_cast %6 : vector<1x72x256xbf16> to vector<72x256xbf16>
    %c1_9 = arith.constant 1 : index
    %c0_10 = arith.constant 0 : index
    %c0_11 = arith.constant 0 : index
    %8 = vector.load %arg3[%c1_9, %c0_10, %c0_11] : memref<4x256x128xbf16, #tpu.memory_space<vmem>>, vector<1x256x128xbf16>
    %9 = vector.shape_cast %8 : vector<1x256x128xbf16> to vector<256x128xbf16>
    %cst_12 = arith.constant dense<0.000000e+00> : vector<72x128xf32>
    %10 = tpu.matmul %7, %9, %cst_12 {dimension_numbers = #tpu.dot_dimension_numbers<[1], [0], [0], [1], [0, 0, 1, 1], [], []>} : vector<72x256xbf16>, vector<256x128xbf16>, vector<72x128xf32> -> vector<72x128xf32>
    %c0_13 = arith.constant 0 : index
    %c0_14 = arith.constant 0 : index
    %11 = vector.load %arg5[%c0_13, %c0_14] : memref<72x128xf32, #tpu.memory_space<vmem>>, vector<72x128xf32>
    %12 = arith.addf %11, %10 : vector<72x128xf32>
    %c0_15 = arith.constant 0 : index
    %c0_16 = arith.constant 0 : index
    %13 = vector.load %arg5[%c0_15, %c0_16] : memref<72x128xf32, #tpu.memory_space<vmem>>, vector<72x128xf32>
    tpu.vector_store %arg5[%c0_15, %c0_16], %12 {strides = array<i32>} : memref<72x128xf32, #tpu.memory_space<vmem>>, vector<72x128xf32>,
    %c0_17 = arith.constant 0 : index
    %c9 = arith.constant 9 : index
    %c0_18 = arith.constant 0 : index
    %14 = vector.load %arg2[%c0_17, %c9, %c0_18] : memref<1x82x256xbf16, #tpu.memory_space<vmem>>, vector<1x72x256xbf16>
    %15 = vector.shape_cast %14 : vector<1x72x256xbf16> to vector<72x256xbf16>
    %c2 = arith.constant 2 : index
    %c0_19 = arith.constant 0 : index
    %c0_20 = arith.constant 0 : index
    %16 = vector.load %arg3[%c2, %c0_19, %c0_20] : memref<4x256x128xbf16, #tpu.memory_space<vmem>>, vector<1x256x128xbf16>
    %17 = vector.shape_cast %16 : vector<1x256x128xbf16> to vector<256x128xbf16>
    %cst_21 = arith.constant dense<0.000000e+00> : vector<72x128xf32>
    %18 = tpu.matmul %15, %17, %cst_21 {dimension_numbers = #tpu.dot_dimension_numbers<[1], [0], [0], [1], [0, 0, 1, 1], [], []>} : vector<72x256xbf16>, vector<256x128xbf16>, vector<72x128xf32> -> vector<72x128xf32>
    %c0_22 = arith.constant 0 : index
    %c0_23 = arith.constant 0 : index
    %19 = vector.load %arg5[%c0_22, %c0_23] : memref<72x128xf32, #tpu.memory_space<vmem>>, vector<72x128xf32>
    %20 = arith.addf %19, %18 : vector<72x128xf32>
    %c0_24 = arith.constant 0 : index
    %c0_25 = arith.constant 0 : index
    %21 = vector.load %arg5[%c0_24, %c0_25] : memref<72x128xf32, #tpu.memory_space<vmem>>, vector<72x128xf32>
    tpu.vector_store %arg5[%c0_24, %c0_25], %20 {strides = array<i32>} : memref<72x128xf32, #tpu.memory_space<vmem>>, vector<72x128xf32>,
    %c0_26 = arith.constant 0 : index
    %c10 = arith.constant 10 : index
    %c0_27 = arith.constant 0 : index
    %22 = vector.load %arg2[%c0_26, %c10, %c0_27] : memref<1x82x256xbf16, #tpu.memory_space<vmem>>, vector<1x72x256xbf16>
    %23 = vector.shape_cast %22 : vector<1x72x256xbf16> to vector<72x256xbf16>
    %c3 = arith.constant 3 : index
    %c0_28 = arith.constant 0 : index
    %c0_29 = arith.constant 0 : index
    %24 = vector.load %arg3[%c3, %c0_28, %c0_29] : memref<4x256x128xbf16, #tpu.memory_space<vmem>>, vector<1x256x128xbf16>
    %25 = vector.shape_cast %24 : vector<1x256x128xbf16> to vector<256x128xbf16>
    %cst_30 = arith.constant dense<0.000000e+00> : vector<72x128xf32>
    %26 = tpu.matmul %23, %25, %cst_30 {dimension_numbers = #tpu.dot_dimension_numbers<[1], [0], [0], [1], [0, 0, 1, 1], [], []>} : vector<72x256xbf16>, vector<256x128xbf16>, vector<72x128xf32> -> vector<72x128xf32>
    %c0_31 = arith.constant 0 : index
    %c0_32 = arith.constant 0 : index
    %27 = vector.load %arg5[%c0_31, %c0_32] : memref<72x128xf32, #tpu.memory_space<vmem>>, vector<72x128xf32>
    %28 = arith.addf %27, %26 : vector<72x128xf32>
    %c0_33 = arith.constant 0 : index
    %c0_34 = arith.constant 0 : index
    %29 = vector.load %arg5[%c0_33, %c0_34] : memref<72x128xf32, #tpu.memory_space<vmem>>, vector<72x128xf32>
    tpu.vector_store %arg5[%c0_33, %c0_34], %28 {strides = array<i32>} : memref<72x128xf32, #tpu.memory_space<vmem>>, vector<72x128xf32>,
    %c0_35 = arith.constant 0 : index
    %c0_36 = arith.constant 0 : index
    %30 = vector.load %arg5[%c0_35, %c0_36] : memref<72x128xf32, #tpu.memory_space<vmem>>, vector<72x128xf32>
    %31 = tpu.iota {dimensions = array<i32: 0>} : vector<72x1xi32>
    %c9_i32 = arith.constant 9 : i32
    %c0_i32 = arith.constant 0 : i32
    %32 = arith.cmpi eq, %c9_i32, %c0_i32 : i32
    %c1_i32 = arith.constant 1 : i32
    %33 = arith.select %32, %c1_i32, %c9_i32 : i32
    %34 = vector.broadcast %33 : i32 to vector<72x1xi32>
    %35 = arith.remsi %31, %34 : vector<72x1xi32>
    %c0_i32_37 = arith.constant 0 : i32
    %36 = vector.broadcast %c0_i32_37 : i32 to vector<72x1xi32>
    %37 = arith.cmpi ne, %35, %36 : vector<72x1xi32>
    %c0_i32_38 = arith.constant 0 : i32
    %38 = vector.broadcast %c0_i32_38 : i32 to vector<72x1xi32>
    %39 = arith.cmpi slt, %35, %38 : vector<72x1xi32>
    %c0_i32_39 = arith.constant 0 : i32
    %40 = arith.cmpi slt, %33, %c0_i32_39 : i32
    %41 = vector.broadcast %40 : i1 to vector<72x1xi1>
    %42 = vector.broadcast %41 : vector<72x1xi1> to vector<72x1xi1>
    %43 = arith.xori %39, %42 : vector<72x1xi1>
    %44 = arith.andi %43, %37 : vector<72x1xi1>
    %45 = vector.broadcast %33 : i32 to vector<72x1xi32>
    %46 = arith.addi %35, %45 : vector<72x1xi32>
    %47 = arith.select %44, %46, %35 : vector<72x1xi1>, vector<72x1xi32>
    %c8_i32 = arith.constant 8 : i32
    %48 = vector.broadcast %c8_i32 : i32 to vector<72x1xi32>
    %49 = arith.cmpi slt, %47, %48 : vector<72x1xi32>
    %cst_40 = arith.constant 0.000000e+00 : f32
    %50 = vector.shape_cast %49 : vector<72x1xi1> to vector<72x1xi1>
    %51 = vector.broadcast %50 : vector<72x1xi1> to vector<72x128xi1>
    %52 = vector.broadcast %cst_40 : f32 to vector<72x128xf32>
    %53 = arith.select %51, %30, %52 : vector<72x128xi1>, vector<72x128xf32>
    %cst_41 = arith.constant dense<0.000000e+00> : vector<128xf32>
    %54 = vector.multi_reduction <add>, %53, %cst_41 [0] : vector<72x128xf32> to vector<128xf32>
    %55 = vector.shape_cast %54 : vector<128xf32> to vector<1x128xf32>
    %cst_42 = arith.constant 1.562500e-02 : f32
    %56 = vector.broadcast %cst_42 : f32 to vector<1x128xf32>
    %57 = arith.mulf %55, %56 : vector<1x128xf32>
    %58 = vector.broadcast %57 : vector<1x128xf32> to vector<72x128xf32>
    %59 = arith.subf %30, %58 : vector<72x128xf32>
    %cst_43 = arith.constant 0.000000e+00 : f32
    %60 = vector.shape_cast %49 : vector<72x1xi1> to vector<72x1xi1>
    %61 = vector.broadcast %60 : vector<72x1xi1> to vector<72x128xi1>
    %62 = vector.broadcast %cst_43 : f32 to vector<72x128xf32>
    %63 = arith.select %61, %59, %62 : vector<72x128xi1>, vector<72x128xf32>
    %64 = arith.mulf %63, %63 : vector<72x128xf32>
    %cst_44 = arith.constant dense<0.000000e+00> : vector<128xf32>
    %65 = vector.multi_reduction <add>, %64, %cst_44 [0] : vector<72x128xf32> to vector<128xf32>
    %66 = vector.shape_cast %65 : vector<128xf32> to vector<1x128xf32>
    %cst_45 = arith.constant 1.562500e-02 : f32
    %67 = vector.broadcast %cst_45 : f32 to vector<1x128xf32>
    %68 = arith.mulf %66, %67 : vector<1x128xf32>
    %cst_46 = arith.constant 9.99999974E-6 : f32
    %69 = vector.broadcast %cst_46 : f32 to vector<1x128xf32>
    %70 = arith.addf %68, %69 : vector<1x128xf32>
    %71 = math.rsqrt %70 : vector<1x128xf32>
    %72 = vector.broadcast %71 : vector<1x128xf32> to vector<72x128xf32>
    %73 = arith.mulf %59, %72 : vector<72x128xf32>
    %cst_47 = arith.constant 2.000000e-01 : f32
    %74 = vector.broadcast %cst_47 : f32 to vector<72x128xf32>
    %75 = arith.mulf %74, %73 : vector<72x128xf32>
    %76 = arith.maximumf %73, %75 : vector<72x128xf32>
    %77 = arith.truncf %76 : vector<72x128xf32> to vector<72x128xbf16>
    %c0_48 = arith.constant 0 : index
    %c0_49 = arith.constant 0 : index
    %c0_50 = arith.constant 0 : index
    %78 = vector.load %arg4[%c0_48, %c0_49, %c0_50] : memref<1x72x128xbf16, #tpu.memory_space<vmem>>, vector<1x72x128xbf16>
    %79 = vector.shape_cast %78 : vector<1x72x128xbf16> to vector<72x128xbf16>
    %80 = vector.shape_cast %77 : vector<72x128xbf16> to vector<1x72x128xbf16>
    tpu.vector_store %arg4[%c0_48, %c0_49, %c0_50], %80 {strides = array<i32>} : memref<1x72x128xbf16, #tpu.memory_space<vmem>>, vector<1x72x128xbf16>,
    return
  }
  func.func @transform_0(%arg0: i32, %arg1: i32) -> (i32, i32, i32) {
    %c0_i32 = arith.constant 0 : i32
    %c0_i32_0 = arith.constant 0 : i32
    %c0_i32_1 = arith.constant 0 : i32
    return %arg0, %c0_i32, %c0_i32_0 : i32, i32, i32
  }
  func.func @transform_1(%arg0: i32, %arg1: i32) -> (i32, i32, i32) {
    %c0_i32 = arith.constant 0 : i32
    %c0_i32_0 = arith.constant 0 : i32
    %c0_i32_1 = arith.constant 0 : i32
    return %c0_i32, %c0_i32_0, %arg1 : i32, i32, i32
  }
  func.func @transform_2(%arg0: i32, %arg1: i32) -> (i32, i32, i32) {
    %c0_i32 = arith.constant 0 : i32
    %c0_i32_0 = arith.constant 0 : i32
    return %arg0, %c0_i32, %arg1 : i32, i32, i32
  }
}

module attributes {stable_mosaic.version = 11 : i64} {
  func.func @_conv_in_lrelu_kernel(%arg0: i32, %arg1: i32, %arg2: memref<1x26x512xbf16, #tpu.memory_space<vmem>>, %arg3: memref<4x512x128xbf16, #tpu.memory_space<vmem>>, %arg4: memref<1x20x128xbf16, #tpu.memory_space<vmem>>, %arg5: memref<20x128xf32, #tpu.memory_space<vmem>>) attributes {dimension_semantics = [#tpu.dimension_semantics<parallel>, #tpu.dimension_semantics<parallel>], iteration_bounds = array<i64: 2, 2>, scalar_prefetch = 0 : i64, scratch_operands = 1 : i64, tpu.core_type = #tpu.core_type<tc>, window_params = [{transform_indices = @transform_0, window_bounds = array<i64: 1, 26, 512>}, {transform_indices = @transform_1, window_bounds = array<i64: 4, 512, 128>}, {transform_indices = @transform_2, window_bounds = array<i64: 1, 20, 128>}]} {
    %c0 = arith.constant 0 : index
    %c0_0 = arith.constant 0 : index
    %c0_1 = arith.constant 0 : index
    %0 = vector.load %arg2[%c0, %c0_0, %c0_1] : memref<1x26x512xbf16, #tpu.memory_space<vmem>>, vector<1x20x512xbf16>
    %1 = vector.shape_cast %0 : vector<1x20x512xbf16> to vector<20x512xbf16>
    %c0_2 = arith.constant 0 : index
    %c0_3 = arith.constant 0 : index
    %c0_4 = arith.constant 0 : index
    %2 = vector.load %arg3[%c0_2, %c0_3, %c0_4] : memref<4x512x128xbf16, #tpu.memory_space<vmem>>, vector<1x512x128xbf16>
    %3 = vector.shape_cast %2 : vector<1x512x128xbf16> to vector<512x128xbf16>
    %cst = arith.constant dense<0.000000e+00> : vector<20x128xf32>
    %4 = tpu.matmul %1, %3, %cst {dimension_numbers = #tpu.dot_dimension_numbers<[1], [0], [0], [1], [0, 0, 1, 1], [], []>} : vector<20x512xbf16>, vector<512x128xbf16>, vector<20x128xf32> -> vector<20x128xf32>
    %c0_5 = arith.constant 0 : index
    %c0_6 = arith.constant 0 : index
    %5 = vector.load %arg5[%c0_5, %c0_6] : memref<20x128xf32, #tpu.memory_space<vmem>>, vector<20x128xf32>
    tpu.vector_store %arg5[%c0_5, %c0_6], %4 {strides = array<i32>} : memref<20x128xf32, #tpu.memory_space<vmem>>, vector<20x128xf32>,
    %c0_7 = arith.constant 0 : index
    %c1 = arith.constant 1 : index
    %c0_8 = arith.constant 0 : index
    %6 = vector.load %arg2[%c0_7, %c1, %c0_8] : memref<1x26x512xbf16, #tpu.memory_space<vmem>>, vector<1x20x512xbf16>
    %7 = vector.shape_cast %6 : vector<1x20x512xbf16> to vector<20x512xbf16>
    %c1_9 = arith.constant 1 : index
    %c0_10 = arith.constant 0 : index
    %c0_11 = arith.constant 0 : index
    %8 = vector.load %arg3[%c1_9, %c0_10, %c0_11] : memref<4x512x128xbf16, #tpu.memory_space<vmem>>, vector<1x512x128xbf16>
    %9 = vector.shape_cast %8 : vector<1x512x128xbf16> to vector<512x128xbf16>
    %cst_12 = arith.constant dense<0.000000e+00> : vector<20x128xf32>
    %10 = tpu.matmul %7, %9, %cst_12 {dimension_numbers = #tpu.dot_dimension_numbers<[1], [0], [0], [1], [0, 0, 1, 1], [], []>} : vector<20x512xbf16>, vector<512x128xbf16>, vector<20x128xf32> -> vector<20x128xf32>
    %c0_13 = arith.constant 0 : index
    %c0_14 = arith.constant 0 : index
    %11 = vector.load %arg5[%c0_13, %c0_14] : memref<20x128xf32, #tpu.memory_space<vmem>>, vector<20x128xf32>
    %12 = arith.addf %11, %10 : vector<20x128xf32>
    %c0_15 = arith.constant 0 : index
    %c0_16 = arith.constant 0 : index
    %13 = vector.load %arg5[%c0_15, %c0_16] : memref<20x128xf32, #tpu.memory_space<vmem>>, vector<20x128xf32>
    tpu.vector_store %arg5[%c0_15, %c0_16], %12 {strides = array<i32>} : memref<20x128xf32, #tpu.memory_space<vmem>>, vector<20x128xf32>,
    %c0_17 = arith.constant 0 : index
    %c5 = arith.constant 5 : index
    %c0_18 = arith.constant 0 : index
    %14 = vector.load %arg2[%c0_17, %c5, %c0_18] : memref<1x26x512xbf16, #tpu.memory_space<vmem>>, vector<1x20x512xbf16>
    %15 = vector.shape_cast %14 : vector<1x20x512xbf16> to vector<20x512xbf16>
    %c2 = arith.constant 2 : index
    %c0_19 = arith.constant 0 : index
    %c0_20 = arith.constant 0 : index
    %16 = vector.load %arg3[%c2, %c0_19, %c0_20] : memref<4x512x128xbf16, #tpu.memory_space<vmem>>, vector<1x512x128xbf16>
    %17 = vector.shape_cast %16 : vector<1x512x128xbf16> to vector<512x128xbf16>
    %cst_21 = arith.constant dense<0.000000e+00> : vector<20x128xf32>
    %18 = tpu.matmul %15, %17, %cst_21 {dimension_numbers = #tpu.dot_dimension_numbers<[1], [0], [0], [1], [0, 0, 1, 1], [], []>} : vector<20x512xbf16>, vector<512x128xbf16>, vector<20x128xf32> -> vector<20x128xf32>
    %c0_22 = arith.constant 0 : index
    %c0_23 = arith.constant 0 : index
    %19 = vector.load %arg5[%c0_22, %c0_23] : memref<20x128xf32, #tpu.memory_space<vmem>>, vector<20x128xf32>
    %20 = arith.addf %19, %18 : vector<20x128xf32>
    %c0_24 = arith.constant 0 : index
    %c0_25 = arith.constant 0 : index
    %21 = vector.load %arg5[%c0_24, %c0_25] : memref<20x128xf32, #tpu.memory_space<vmem>>, vector<20x128xf32>
    tpu.vector_store %arg5[%c0_24, %c0_25], %20 {strides = array<i32>} : memref<20x128xf32, #tpu.memory_space<vmem>>, vector<20x128xf32>,
    %c0_26 = arith.constant 0 : index
    %c6 = arith.constant 6 : index
    %c0_27 = arith.constant 0 : index
    %22 = vector.load %arg2[%c0_26, %c6, %c0_27] : memref<1x26x512xbf16, #tpu.memory_space<vmem>>, vector<1x20x512xbf16>
    %23 = vector.shape_cast %22 : vector<1x20x512xbf16> to vector<20x512xbf16>
    %c3 = arith.constant 3 : index
    %c0_28 = arith.constant 0 : index
    %c0_29 = arith.constant 0 : index
    %24 = vector.load %arg3[%c3, %c0_28, %c0_29] : memref<4x512x128xbf16, #tpu.memory_space<vmem>>, vector<1x512x128xbf16>
    %25 = vector.shape_cast %24 : vector<1x512x128xbf16> to vector<512x128xbf16>
    %cst_30 = arith.constant dense<0.000000e+00> : vector<20x128xf32>
    %26 = tpu.matmul %23, %25, %cst_30 {dimension_numbers = #tpu.dot_dimension_numbers<[1], [0], [0], [1], [0, 0, 1, 1], [], []>} : vector<20x512xbf16>, vector<512x128xbf16>, vector<20x128xf32> -> vector<20x128xf32>
    %c0_31 = arith.constant 0 : index
    %c0_32 = arith.constant 0 : index
    %27 = vector.load %arg5[%c0_31, %c0_32] : memref<20x128xf32, #tpu.memory_space<vmem>>, vector<20x128xf32>
    %28 = arith.addf %27, %26 : vector<20x128xf32>
    %c0_33 = arith.constant 0 : index
    %c0_34 = arith.constant 0 : index
    %29 = vector.load %arg5[%c0_33, %c0_34] : memref<20x128xf32, #tpu.memory_space<vmem>>, vector<20x128xf32>
    tpu.vector_store %arg5[%c0_33, %c0_34], %28 {strides = array<i32>} : memref<20x128xf32, #tpu.memory_space<vmem>>, vector<20x128xf32>,
    %c0_35 = arith.constant 0 : index
    %c0_36 = arith.constant 0 : index
    %30 = vector.load %arg5[%c0_35, %c0_36] : memref<20x128xf32, #tpu.memory_space<vmem>>, vector<20x128xf32>
    %31 = tpu.iota {dimensions = array<i32: 0>} : vector<20x1xi32>
    %c5_i32 = arith.constant 5 : i32
    %c0_i32 = arith.constant 0 : i32
    %32 = arith.cmpi eq, %c5_i32, %c0_i32 : i32
    %c1_i32 = arith.constant 1 : i32
    %33 = arith.select %32, %c1_i32, %c5_i32 : i32
    %34 = vector.broadcast %33 : i32 to vector<20x1xi32>
    %35 = arith.remsi %31, %34 : vector<20x1xi32>
    %c0_i32_37 = arith.constant 0 : i32
    %36 = vector.broadcast %c0_i32_37 : i32 to vector<20x1xi32>
    %37 = arith.cmpi ne, %35, %36 : vector<20x1xi32>
    %c0_i32_38 = arith.constant 0 : i32
    %38 = vector.broadcast %c0_i32_38 : i32 to vector<20x1xi32>
    %39 = arith.cmpi slt, %35, %38 : vector<20x1xi32>
    %c0_i32_39 = arith.constant 0 : i32
    %40 = arith.cmpi slt, %33, %c0_i32_39 : i32
    %41 = vector.broadcast %40 : i1 to vector<20x1xi1>
    %42 = vector.broadcast %41 : vector<20x1xi1> to vector<20x1xi1>
    %43 = arith.xori %39, %42 : vector<20x1xi1>
    %44 = arith.andi %43, %37 : vector<20x1xi1>
    %45 = vector.broadcast %33 : i32 to vector<20x1xi32>
    %46 = arith.addi %35, %45 : vector<20x1xi32>
    %47 = arith.select %44, %46, %35 : vector<20x1xi1>, vector<20x1xi32>
    %c4_i32 = arith.constant 4 : i32
    %48 = vector.broadcast %c4_i32 : i32 to vector<20x1xi32>
    %49 = arith.cmpi slt, %47, %48 : vector<20x1xi32>
    %cst_40 = arith.constant 0.000000e+00 : f32
    %50 = vector.shape_cast %49 : vector<20x1xi1> to vector<20x1xi1>
    %51 = vector.broadcast %50 : vector<20x1xi1> to vector<20x128xi1>
    %52 = vector.broadcast %cst_40 : f32 to vector<20x128xf32>
    %53 = arith.select %51, %30, %52 : vector<20x128xi1>, vector<20x128xf32>
    %cst_41 = arith.constant dense<0.000000e+00> : vector<128xf32>
    %54 = vector.multi_reduction <add>, %53, %cst_41 [0] : vector<20x128xf32> to vector<128xf32>
    %55 = vector.shape_cast %54 : vector<128xf32> to vector<1x128xf32>
    %cst_42 = arith.constant 6.250000e-02 : f32
    %56 = vector.broadcast %cst_42 : f32 to vector<1x128xf32>
    %57 = arith.mulf %55, %56 : vector<1x128xf32>
    %58 = vector.broadcast %57 : vector<1x128xf32> to vector<20x128xf32>
    %59 = arith.subf %30, %58 : vector<20x128xf32>
    %cst_43 = arith.constant 0.000000e+00 : f32
    %60 = vector.shape_cast %49 : vector<20x1xi1> to vector<20x1xi1>
    %61 = vector.broadcast %60 : vector<20x1xi1> to vector<20x128xi1>
    %62 = vector.broadcast %cst_43 : f32 to vector<20x128xf32>
    %63 = arith.select %61, %59, %62 : vector<20x128xi1>, vector<20x128xf32>
    %64 = arith.mulf %63, %63 : vector<20x128xf32>
    %cst_44 = arith.constant dense<0.000000e+00> : vector<128xf32>
    %65 = vector.multi_reduction <add>, %64, %cst_44 [0] : vector<20x128xf32> to vector<128xf32>
    %66 = vector.shape_cast %65 : vector<128xf32> to vector<1x128xf32>
    %cst_45 = arith.constant 6.250000e-02 : f32
    %67 = vector.broadcast %cst_45 : f32 to vector<1x128xf32>
    %68 = arith.mulf %66, %67 : vector<1x128xf32>
    %cst_46 = arith.constant 9.99999974E-6 : f32
    %69 = vector.broadcast %cst_46 : f32 to vector<1x128xf32>
    %70 = arith.addf %68, %69 : vector<1x128xf32>
    %71 = math.rsqrt %70 : vector<1x128xf32>
    %72 = vector.broadcast %71 : vector<1x128xf32> to vector<20x128xf32>
    %73 = arith.mulf %59, %72 : vector<20x128xf32>
    %cst_47 = arith.constant 2.000000e-01 : f32
    %74 = vector.broadcast %cst_47 : f32 to vector<20x128xf32>
    %75 = arith.mulf %74, %73 : vector<20x128xf32>
    %76 = arith.maximumf %73, %75 : vector<20x128xf32>
    %77 = arith.truncf %76 : vector<20x128xf32> to vector<20x128xbf16>
    %c0_48 = arith.constant 0 : index
    %c0_49 = arith.constant 0 : index
    %c0_50 = arith.constant 0 : index
    %78 = vector.load %arg4[%c0_48, %c0_49, %c0_50] : memref<1x20x128xbf16, #tpu.memory_space<vmem>>, vector<1x20x128xbf16>
    %79 = vector.shape_cast %78 : vector<1x20x128xbf16> to vector<20x128xbf16>
    %80 = vector.shape_cast %77 : vector<20x128xbf16> to vector<1x20x128xbf16>
    tpu.vector_store %arg4[%c0_48, %c0_49, %c0_50], %80 {strides = array<i32>} : memref<1x20x128xbf16, #tpu.memory_space<vmem>>, vector<1x20x128xbf16>,
    return
  }
  func.func @transform_0(%arg0: i32, %arg1: i32) -> (i32, i32, i32) {
    %c0_i32 = arith.constant 0 : i32
    %c0_i32_0 = arith.constant 0 : i32
    %c0_i32_1 = arith.constant 0 : i32
    return %arg0, %c0_i32, %c0_i32_0 : i32, i32, i32
  }
  func.func @transform_1(%arg0: i32, %arg1: i32) -> (i32, i32, i32) {
    %c0_i32 = arith.constant 0 : i32
    %c0_i32_0 = arith.constant 0 : i32
    %c0_i32_1 = arith.constant 0 : i32
    return %c0_i32, %c0_i32_0, %arg1 : i32, i32, i32
  }
  func.func @transform_2(%arg0: i32, %arg1: i32) -> (i32, i32, i32) {
    %c0_i32 = arith.constant 0 : i32
    %c0_i32_0 = arith.constant 0 : i32
    return %arg0, %c0_i32, %arg1 : i32, i32, i32
  }
}

module attributes {stable_mosaic.version = 11 : i64} {
  func.func @_conv_in_lrelu_kernel(%arg0: i32, %arg1: i32, %arg2: memref<1x10x1024xbf16, #tpu.memory_space<vmem>>, %arg3: memref<4x1024x128xbf16, #tpu.memory_space<vmem>>, %arg4: memref<1x6x128xbf16, #tpu.memory_space<vmem>>, %arg5: memref<6x128xf32, #tpu.memory_space<vmem>>) attributes {dimension_semantics = [#tpu.dimension_semantics<parallel>, #tpu.dimension_semantics<parallel>], iteration_bounds = array<i64: 2, 4>, scalar_prefetch = 0 : i64, scratch_operands = 1 : i64, tpu.core_type = #tpu.core_type<tc>, window_params = [{transform_indices = @transform_0, window_bounds = array<i64: 1, 10, 1024>}, {transform_indices = @transform_1, window_bounds = array<i64: 4, 1024, 128>}, {transform_indices = @transform_2, window_bounds = array<i64: 1, 6, 128>}]} {
    %c0 = arith.constant 0 : index
    %c0_0 = arith.constant 0 : index
    %c0_1 = arith.constant 0 : index
    %0 = vector.load %arg2[%c0, %c0_0, %c0_1] : memref<1x10x1024xbf16, #tpu.memory_space<vmem>>, vector<1x6x1024xbf16>
    %1 = vector.shape_cast %0 : vector<1x6x1024xbf16> to vector<6x1024xbf16>
    %c0_2 = arith.constant 0 : index
    %c0_3 = arith.constant 0 : index
    %c0_4 = arith.constant 0 : index
    %2 = vector.load %arg3[%c0_2, %c0_3, %c0_4] : memref<4x1024x128xbf16, #tpu.memory_space<vmem>>, vector<1x1024x128xbf16>
    %3 = vector.shape_cast %2 : vector<1x1024x128xbf16> to vector<1024x128xbf16>
    %cst = arith.constant dense<0.000000e+00> : vector<6x128xf32>
    %4 = tpu.matmul %1, %3, %cst {dimension_numbers = #tpu.dot_dimension_numbers<[1], [0], [0], [1], [0, 0, 1, 1], [], []>} : vector<6x1024xbf16>, vector<1024x128xbf16>, vector<6x128xf32> -> vector<6x128xf32>
    %c0_5 = arith.constant 0 : index
    %c0_6 = arith.constant 0 : index
    %5 = vector.load %arg5[%c0_5, %c0_6] : memref<6x128xf32, #tpu.memory_space<vmem>>, vector<6x128xf32>
    tpu.vector_store %arg5[%c0_5, %c0_6], %4 {strides = array<i32>} : memref<6x128xf32, #tpu.memory_space<vmem>>, vector<6x128xf32>,
    %c0_7 = arith.constant 0 : index
    %c1 = arith.constant 1 : index
    %c0_8 = arith.constant 0 : index
    %6 = vector.load %arg2[%c0_7, %c1, %c0_8] : memref<1x10x1024xbf16, #tpu.memory_space<vmem>>, vector<1x6x1024xbf16>
    %7 = vector.shape_cast %6 : vector<1x6x1024xbf16> to vector<6x1024xbf16>
    %c1_9 = arith.constant 1 : index
    %c0_10 = arith.constant 0 : index
    %c0_11 = arith.constant 0 : index
    %8 = vector.load %arg3[%c1_9, %c0_10, %c0_11] : memref<4x1024x128xbf16, #tpu.memory_space<vmem>>, vector<1x1024x128xbf16>
    %9 = vector.shape_cast %8 : vector<1x1024x128xbf16> to vector<1024x128xbf16>
    %cst_12 = arith.constant dense<0.000000e+00> : vector<6x128xf32>
    %10 = tpu.matmul %7, %9, %cst_12 {dimension_numbers = #tpu.dot_dimension_numbers<[1], [0], [0], [1], [0, 0, 1, 1], [], []>} : vector<6x1024xbf16>, vector<1024x128xbf16>, vector<6x128xf32> -> vector<6x128xf32>
    %c0_13 = arith.constant 0 : index
    %c0_14 = arith.constant 0 : index
    %11 = vector.load %arg5[%c0_13, %c0_14] : memref<6x128xf32, #tpu.memory_space<vmem>>, vector<6x128xf32>
    %12 = arith.addf %11, %10 : vector<6x128xf32>
    %c0_15 = arith.constant 0 : index
    %c0_16 = arith.constant 0 : index
    %13 = vector.load %arg5[%c0_15, %c0_16] : memref<6x128xf32, #tpu.memory_space<vmem>>, vector<6x128xf32>
    tpu.vector_store %arg5[%c0_15, %c0_16], %12 {strides = array<i32>} : memref<6x128xf32, #tpu.memory_space<vmem>>, vector<6x128xf32>,
    %c0_17 = arith.constant 0 : index
    %c3 = arith.constant 3 : index
    %c0_18 = arith.constant 0 : index
    %14 = vector.load %arg2[%c0_17, %c3, %c0_18] : memref<1x10x1024xbf16, #tpu.memory_space<vmem>>, vector<1x6x1024xbf16>
    %15 = vector.shape_cast %14 : vector<1x6x1024xbf16> to vector<6x1024xbf16>
    %c2 = arith.constant 2 : index
    %c0_19 = arith.constant 0 : index
    %c0_20 = arith.constant 0 : index
    %16 = vector.load %arg3[%c2, %c0_19, %c0_20] : memref<4x1024x128xbf16, #tpu.memory_space<vmem>>, vector<1x1024x128xbf16>
    %17 = vector.shape_cast %16 : vector<1x1024x128xbf16> to vector<1024x128xbf16>
    %cst_21 = arith.constant dense<0.000000e+00> : vector<6x128xf32>
    %18 = tpu.matmul %15, %17, %cst_21 {dimension_numbers = #tpu.dot_dimension_numbers<[1], [0], [0], [1], [0, 0, 1, 1], [], []>} : vector<6x1024xbf16>, vector<1024x128xbf16>, vector<6x128xf32> -> vector<6x128xf32>
    %c0_22 = arith.constant 0 : index
    %c0_23 = arith.constant 0 : index
    %19 = vector.load %arg5[%c0_22, %c0_23] : memref<6x128xf32, #tpu.memory_space<vmem>>, vector<6x128xf32>
    %20 = arith.addf %19, %18 : vector<6x128xf32>
    %c0_24 = arith.constant 0 : index
    %c0_25 = arith.constant 0 : index
    %21 = vector.load %arg5[%c0_24, %c0_25] : memref<6x128xf32, #tpu.memory_space<vmem>>, vector<6x128xf32>
    tpu.vector_store %arg5[%c0_24, %c0_25], %20 {strides = array<i32>} : memref<6x128xf32, #tpu.memory_space<vmem>>, vector<6x128xf32>,
    %c0_26 = arith.constant 0 : index
    %c4 = arith.constant 4 : index
    %c0_27 = arith.constant 0 : index
    %22 = vector.load %arg2[%c0_26, %c4, %c0_27] : memref<1x10x1024xbf16, #tpu.memory_space<vmem>>, vector<1x6x1024xbf16>
    %23 = vector.shape_cast %22 : vector<1x6x1024xbf16> to vector<6x1024xbf16>
    %c3_28 = arith.constant 3 : index
    %c0_29 = arith.constant 0 : index
    %c0_30 = arith.constant 0 : index
    %24 = vector.load %arg3[%c3_28, %c0_29, %c0_30] : memref<4x1024x128xbf16, #tpu.memory_space<vmem>>, vector<1x1024x128xbf16>
    %25 = vector.shape_cast %24 : vector<1x1024x128xbf16> to vector<1024x128xbf16>
    %cst_31 = arith.constant dense<0.000000e+00> : vector<6x128xf32>
    %26 = tpu.matmul %23, %25, %cst_31 {dimension_numbers = #tpu.dot_dimension_numbers<[1], [0], [0], [1], [0, 0, 1, 1], [], []>} : vector<6x1024xbf16>, vector<1024x128xbf16>, vector<6x128xf32> -> vector<6x128xf32>
    %c0_32 = arith.constant 0 : index
    %c0_33 = arith.constant 0 : index
    %27 = vector.load %arg5[%c0_32, %c0_33] : memref<6x128xf32, #tpu.memory_space<vmem>>, vector<6x128xf32>
    %28 = arith.addf %27, %26 : vector<6x128xf32>
    %c0_34 = arith.constant 0 : index
    %c0_35 = arith.constant 0 : index
    %29 = vector.load %arg5[%c0_34, %c0_35] : memref<6x128xf32, #tpu.memory_space<vmem>>, vector<6x128xf32>
    tpu.vector_store %arg5[%c0_34, %c0_35], %28 {strides = array<i32>} : memref<6x128xf32, #tpu.memory_space<vmem>>, vector<6x128xf32>,
    %c0_36 = arith.constant 0 : index
    %c0_37 = arith.constant 0 : index
    %30 = vector.load %arg5[%c0_36, %c0_37] : memref<6x128xf32, #tpu.memory_space<vmem>>, vector<6x128xf32>
    %31 = tpu.iota {dimensions = array<i32: 0>} : vector<6x1xi32>
    %c3_i32 = arith.constant 3 : i32
    %c0_i32 = arith.constant 0 : i32
    %32 = arith.cmpi eq, %c3_i32, %c0_i32 : i32
    %c1_i32 = arith.constant 1 : i32
    %33 = arith.select %32, %c1_i32, %c3_i32 : i32
    %34 = vector.broadcast %33 : i32 to vector<6x1xi32>
    %35 = arith.remsi %31, %34 : vector<6x1xi32>
    %c0_i32_38 = arith.constant 0 : i32
    %36 = vector.broadcast %c0_i32_38 : i32 to vector<6x1xi32>
    %37 = arith.cmpi ne, %35, %36 : vector<6x1xi32>
    %c0_i32_39 = arith.constant 0 : i32
    %38 = vector.broadcast %c0_i32_39 : i32 to vector<6x1xi32>
    %39 = arith.cmpi slt, %35, %38 : vector<6x1xi32>
    %c0_i32_40 = arith.constant 0 : i32
    %40 = arith.cmpi slt, %33, %c0_i32_40 : i32
    %41 = vector.broadcast %40 : i1 to vector<6x1xi1>
    %42 = vector.broadcast %41 : vector<6x1xi1> to vector<6x1xi1>
    %43 = arith.xori %39, %42 : vector<6x1xi1>
    %44 = arith.andi %43, %37 : vector<6x1xi1>
    %45 = vector.broadcast %33 : i32 to vector<6x1xi32>
    %46 = arith.addi %35, %45 : vector<6x1xi32>
    %47 = arith.select %44, %46, %35 : vector<6x1xi1>, vector<6x1xi32>
    %c2_i32 = arith.constant 2 : i32
    %48 = vector.broadcast %c2_i32 : i32 to vector<6x1xi32>
    %49 = arith.cmpi slt, %47, %48 : vector<6x1xi32>
    %cst_41 = arith.constant 0.000000e+00 : f32
    %50 = vector.shape_cast %49 : vector<6x1xi1> to vector<6x1xi1>
    %51 = vector.broadcast %50 : vector<6x1xi1> to vector<6x128xi1>
    %52 = vector.broadcast %cst_41 : f32 to vector<6x128xf32>
    %53 = arith.select %51, %30, %52 : vector<6x128xi1>, vector<6x128xf32>
    %cst_42 = arith.constant dense<0.000000e+00> : vector<128xf32>
    %54 = vector.multi_reduction <add>, %53, %cst_42 [0] : vector<6x128xf32> to vector<128xf32>
    %55 = vector.shape_cast %54 : vector<128xf32> to vector<1x128xf32>
    %cst_43 = arith.constant 2.500000e-01 : f32
    %56 = vector.broadcast %cst_43 : f32 to vector<1x128xf32>
    %57 = arith.mulf %55, %56 : vector<1x128xf32>
    %58 = vector.broadcast %57 : vector<1x128xf32> to vector<6x128xf32>
    %59 = arith.subf %30, %58 : vector<6x128xf32>
    %cst_44 = arith.constant 0.000000e+00 : f32
    %60 = vector.shape_cast %49 : vector<6x1xi1> to vector<6x1xi1>
    %61 = vector.broadcast %60 : vector<6x1xi1> to vector<6x128xi1>
    %62 = vector.broadcast %cst_44 : f32 to vector<6x128xf32>
    %63 = arith.select %61, %59, %62 : vector<6x128xi1>, vector<6x128xf32>
    %64 = arith.mulf %63, %63 : vector<6x128xf32>
    %cst_45 = arith.constant dense<0.000000e+00> : vector<128xf32>
    %65 = vector.multi_reduction <add>, %64, %cst_45 [0] : vector<6x128xf32> to vector<128xf32>
    %66 = vector.shape_cast %65 : vector<128xf32> to vector<1x128xf32>
    %cst_46 = arith.constant 2.500000e-01 : f32
    %67 = vector.broadcast %cst_46 : f32 to vector<1x128xf32>
    %68 = arith.mulf %66, %67 : vector<1x128xf32>
    %cst_47 = arith.constant 9.99999974E-6 : f32
    %69 = vector.broadcast %cst_47 : f32 to vector<1x128xf32>
    %70 = arith.addf %68, %69 : vector<1x128xf32>
    %71 = math.rsqrt %70 : vector<1x128xf32>
    %72 = vector.broadcast %71 : vector<1x128xf32> to vector<6x128xf32>
    %73 = arith.mulf %59, %72 : vector<6x128xf32>
    %cst_48 = arith.constant 2.000000e-01 : f32
    %74 = vector.broadcast %cst_48 : f32 to vector<6x128xf32>
    %75 = arith.mulf %74, %73 : vector<6x128xf32>
    %76 = arith.maximumf %73, %75 : vector<6x128xf32>
    %77 = arith.truncf %76 : vector<6x128xf32> to vector<6x128xbf16>
    %c0_49 = arith.constant 0 : index
    %c0_50 = arith.constant 0 : index
    %c0_51 = arith.constant 0 : index
    %78 = vector.load %arg4[%c0_49, %c0_50, %c0_51] : memref<1x6x128xbf16, #tpu.memory_space<vmem>>, vector<1x6x128xbf16>
    %79 = vector.shape_cast %78 : vector<1x6x128xbf16> to vector<6x128xbf16>
    %80 = vector.shape_cast %77 : vector<6x128xbf16> to vector<1x6x128xbf16>
    tpu.vector_store %arg4[%c0_49, %c0_50, %c0_51], %80 {strides = array<i32>} : memref<1x6x128xbf16, #tpu.memory_space<vmem>>, vector<1x6x128xbf16>,
    return
  }
  func.func @transform_0(%arg0: i32, %arg1: i32) -> (i32, i32, i32) {
    %c0_i32 = arith.constant 0 : i32
    %c0_i32_0 = arith.constant 0 : i32
    %c0_i32_1 = arith.constant 0 : i32
    return %arg0, %c0_i32, %c0_i32_0 : i32, i32, i32
  }
  func.func @transform_1(%arg0: i32, %arg1: i32) -> (i32, i32, i32) {
    %c0_i32 = arith.constant 0 : i32
    %c0_i32_0 = arith.constant 0 : i32
    %c0_i32_1 = arith.constant 0 : i32
    return %c0_i32, %c0_i32_0, %arg1 : i32, i32, i32
  }
  func.func @transform_2(%arg0: i32, %arg1: i32) -> (i32, i32, i32) {
    %c0_i32 = arith.constant 0 : i32
    %c0_i32_0 = arith.constant 0 : i32
    return %arg0, %c0_i32, %arg1 : i32, i32, i32
  }
}

module attributes {stable_mosaic.version = 11 : i64} {
  func.func @_conv_bias_act_kernel(%arg0: i32, %arg1: i32, %arg2: memref<1x18x512xbf16, #tpu.memory_space<vmem>>, %arg3: memref<9x512x128xbf16, #tpu.memory_space<vmem>>, %arg4: memref<1x128xf32, #tpu.memory_space<vmem>>, %arg5: memref<1x8x128xf32, #tpu.memory_space<vmem>>, %arg6: memref<8x128xf32, #tpu.memory_space<vmem>>) attributes {dimension_semantics = [#tpu.dimension_semantics<parallel>, #tpu.dimension_semantics<parallel>], iteration_bounds = array<i64: 2, 1>, scalar_prefetch = 0 : i64, scratch_operands = 1 : i64, tpu.core_type = #tpu.core_type<tc>, window_params = [{transform_indices = @transform_0, window_bounds = array<i64: 1, 18, 512>}, {transform_indices = @transform_1, window_bounds = array<i64: 9, 512, 128>}, {transform_indices = @transform_2, window_bounds = array<i64: 1, 128>}, {transform_indices = @transform_3, window_bounds = array<i64: 1, 8, 128>}]} {
    %c0 = arith.constant 0 : index
    %c0_0 = arith.constant 0 : index
    %c0_1 = arith.constant 0 : index
    %0 = vector.load %arg2[%c0, %c0_0, %c0_1] : memref<1x18x512xbf16, #tpu.memory_space<vmem>>, vector<1x8x512xbf16>
    %1 = vector.shape_cast %0 : vector<1x8x512xbf16> to vector<8x512xbf16>
    %c0_2 = arith.constant 0 : index
    %c0_3 = arith.constant 0 : index
    %c0_4 = arith.constant 0 : index
    %2 = vector.load %arg3[%c0_2, %c0_3, %c0_4] : memref<9x512x128xbf16, #tpu.memory_space<vmem>>, vector<1x512x128xbf16>
    %3 = vector.shape_cast %2 : vector<1x512x128xbf16> to vector<512x128xbf16>
    %cst = arith.constant dense<0.000000e+00> : vector<8x128xf32>
    %4 = tpu.matmul %1, %3, %cst {dimension_numbers = #tpu.dot_dimension_numbers<[1], [0], [0], [1], [0, 0, 1, 1], [], []>} : vector<8x512xbf16>, vector<512x128xbf16>, vector<8x128xf32> -> vector<8x128xf32>
    %c0_5 = arith.constant 0 : index
    %c0_6 = arith.constant 0 : index
    %5 = vector.load %arg6[%c0_5, %c0_6] : memref<8x128xf32, #tpu.memory_space<vmem>>, vector<8x128xf32>
    tpu.vector_store %arg6[%c0_5, %c0_6], %4 {strides = array<i32>} : memref<8x128xf32, #tpu.memory_space<vmem>>, vector<8x128xf32>,
    %c0_7 = arith.constant 0 : index
    %c1 = arith.constant 1 : index
    %c0_8 = arith.constant 0 : index
    %6 = vector.load %arg2[%c0_7, %c1, %c0_8] : memref<1x18x512xbf16, #tpu.memory_space<vmem>>, vector<1x8x512xbf16>
    %7 = vector.shape_cast %6 : vector<1x8x512xbf16> to vector<8x512xbf16>
    %c1_9 = arith.constant 1 : index
    %c0_10 = arith.constant 0 : index
    %c0_11 = arith.constant 0 : index
    %8 = vector.load %arg3[%c1_9, %c0_10, %c0_11] : memref<9x512x128xbf16, #tpu.memory_space<vmem>>, vector<1x512x128xbf16>
    %9 = vector.shape_cast %8 : vector<1x512x128xbf16> to vector<512x128xbf16>
    %cst_12 = arith.constant dense<0.000000e+00> : vector<8x128xf32>
    %10 = tpu.matmul %7, %9, %cst_12 {dimension_numbers = #tpu.dot_dimension_numbers<[1], [0], [0], [1], [0, 0, 1, 1], [], []>} : vector<8x512xbf16>, vector<512x128xbf16>, vector<8x128xf32> -> vector<8x128xf32>
    %c0_13 = arith.constant 0 : index
    %c0_14 = arith.constant 0 : index
    %11 = vector.load %arg6[%c0_13, %c0_14] : memref<8x128xf32, #tpu.memory_space<vmem>>, vector<8x128xf32>
    %12 = arith.addf %11, %10 : vector<8x128xf32>
    %c0_15 = arith.constant 0 : index
    %c0_16 = arith.constant 0 : index
    %13 = vector.load %arg6[%c0_15, %c0_16] : memref<8x128xf32, #tpu.memory_space<vmem>>, vector<8x128xf32>
    tpu.vector_store %arg6[%c0_15, %c0_16], %12 {strides = array<i32>} : memref<8x128xf32, #tpu.memory_space<vmem>>, vector<8x128xf32>,
    %c0_17 = arith.constant 0 : index
    %c2 = arith.constant 2 : index
    %c0_18 = arith.constant 0 : index
    %14 = vector.load %arg2[%c0_17, %c2, %c0_18] : memref<1x18x512xbf16, #tpu.memory_space<vmem>>, vector<1x8x512xbf16>
    %15 = vector.shape_cast %14 : vector<1x8x512xbf16> to vector<8x512xbf16>
    %c2_19 = arith.constant 2 : index
    %c0_20 = arith.constant 0 : index
    %c0_21 = arith.constant 0 : index
    %16 = vector.load %arg3[%c2_19, %c0_20, %c0_21] : memref<9x512x128xbf16, #tpu.memory_space<vmem>>, vector<1x512x128xbf16>
    %17 = vector.shape_cast %16 : vector<1x512x128xbf16> to vector<512x128xbf16>
    %cst_22 = arith.constant dense<0.000000e+00> : vector<8x128xf32>
    %18 = tpu.matmul %15, %17, %cst_22 {dimension_numbers = #tpu.dot_dimension_numbers<[1], [0], [0], [1], [0, 0, 1, 1], [], []>} : vector<8x512xbf16>, vector<512x128xbf16>, vector<8x128xf32> -> vector<8x128xf32>
    %c0_23 = arith.constant 0 : index
    %c0_24 = arith.constant 0 : index
    %19 = vector.load %arg6[%c0_23, %c0_24] : memref<8x128xf32, #tpu.memory_space<vmem>>, vector<8x128xf32>
    %20 = arith.addf %19, %18 : vector<8x128xf32>
    %c0_25 = arith.constant 0 : index
    %c0_26 = arith.constant 0 : index
    %21 = vector.load %arg6[%c0_25, %c0_26] : memref<8x128xf32, #tpu.memory_space<vmem>>, vector<8x128xf32>
    tpu.vector_store %arg6[%c0_25, %c0_26], %20 {strides = array<i32>} : memref<8x128xf32, #tpu.memory_space<vmem>>, vector<8x128xf32>,
    %c0_27 = arith.constant 0 : index
    %c4 = arith.constant 4 : index
    %c0_28 = arith.constant 0 : index
    %22 = vector.load %arg2[%c0_27, %c4, %c0_28] : memref<1x18x512xbf16, #tpu.memory_space<vmem>>, vector<1x8x512xbf16>
    %23 = vector.shape_cast %22 : vector<1x8x512xbf16> to vector<8x512xbf16>
    %c3 = arith.constant 3 : index
    %c0_29 = arith.constant 0 : index
    %c0_30 = arith.constant 0 : index
    %24 = vector.load %arg3[%c3, %c0_29, %c0_30] : memref<9x512x128xbf16, #tpu.memory_space<vmem>>, vector<1x512x128xbf16>
    %25 = vector.shape_cast %24 : vector<1x512x128xbf16> to vector<512x128xbf16>
    %cst_31 = arith.constant dense<0.000000e+00> : vector<8x128xf32>
    %26 = tpu.matmul %23, %25, %cst_31 {dimension_numbers = #tpu.dot_dimension_numbers<[1], [0], [0], [1], [0, 0, 1, 1], [], []>} : vector<8x512xbf16>, vector<512x128xbf16>, vector<8x128xf32> -> vector<8x128xf32>
    %c0_32 = arith.constant 0 : index
    %c0_33 = arith.constant 0 : index
    %27 = vector.load %arg6[%c0_32, %c0_33] : memref<8x128xf32, #tpu.memory_space<vmem>>, vector<8x128xf32>
    %28 = arith.addf %27, %26 : vector<8x128xf32>
    %c0_34 = arith.constant 0 : index
    %c0_35 = arith.constant 0 : index
    %29 = vector.load %arg6[%c0_34, %c0_35] : memref<8x128xf32, #tpu.memory_space<vmem>>, vector<8x128xf32>
    tpu.vector_store %arg6[%c0_34, %c0_35], %28 {strides = array<i32>} : memref<8x128xf32, #tpu.memory_space<vmem>>, vector<8x128xf32>,
    %c0_36 = arith.constant 0 : index
    %c5 = arith.constant 5 : index
    %c0_37 = arith.constant 0 : index
    %30 = vector.load %arg2[%c0_36, %c5, %c0_37] : memref<1x18x512xbf16, #tpu.memory_space<vmem>>, vector<1x8x512xbf16>
    %31 = vector.shape_cast %30 : vector<1x8x512xbf16> to vector<8x512xbf16>
    %c4_38 = arith.constant 4 : index
    %c0_39 = arith.constant 0 : index
    %c0_40 = arith.constant 0 : index
    %32 = vector.load %arg3[%c4_38, %c0_39, %c0_40] : memref<9x512x128xbf16, #tpu.memory_space<vmem>>, vector<1x512x128xbf16>
    %33 = vector.shape_cast %32 : vector<1x512x128xbf16> to vector<512x128xbf16>
    %cst_41 = arith.constant dense<0.000000e+00> : vector<8x128xf32>
    %34 = tpu.matmul %31, %33, %cst_41 {dimension_numbers = #tpu.dot_dimension_numbers<[1], [0], [0], [1], [0, 0, 1, 1], [], []>} : vector<8x512xbf16>, vector<512x128xbf16>, vector<8x128xf32> -> vector<8x128xf32>
    %c0_42 = arith.constant 0 : index
    %c0_43 = arith.constant 0 : index
    %35 = vector.load %arg6[%c0_42, %c0_43] : memref<8x128xf32, #tpu.memory_space<vmem>>, vector<8x128xf32>
    %36 = arith.addf %35, %34 : vector<8x128xf32>
    %c0_44 = arith.constant 0 : index
    %c0_45 = arith.constant 0 : index
    %37 = vector.load %arg6[%c0_44, %c0_45] : memref<8x128xf32, #tpu.memory_space<vmem>>, vector<8x128xf32>
    tpu.vector_store %arg6[%c0_44, %c0_45], %36 {strides = array<i32>} : memref<8x128xf32, #tpu.memory_space<vmem>>, vector<8x128xf32>,
    %c0_46 = arith.constant 0 : index
    %c6 = arith.constant 6 : index
    %c0_47 = arith.constant 0 : index
    %38 = vector.load %arg2[%c0_46, %c6, %c0_47] : memref<1x18x512xbf16, #tpu.memory_space<vmem>>, vector<1x8x512xbf16>
    %39 = vector.shape_cast %38 : vector<1x8x512xbf16> to vector<8x512xbf16>
    %c5_48 = arith.constant 5 : index
    %c0_49 = arith.constant 0 : index
    %c0_50 = arith.constant 0 : index
    %40 = vector.load %arg3[%c5_48, %c0_49, %c0_50] : memref<9x512x128xbf16, #tpu.memory_space<vmem>>, vector<1x512x128xbf16>
    %41 = vector.shape_cast %40 : vector<1x512x128xbf16> to vector<512x128xbf16>
    %cst_51 = arith.constant dense<0.000000e+00> : vector<8x128xf32>
    %42 = tpu.matmul %39, %41, %cst_51 {dimension_numbers = #tpu.dot_dimension_numbers<[1], [0], [0], [1], [0, 0, 1, 1], [], []>} : vector<8x512xbf16>, vector<512x128xbf16>, vector<8x128xf32> -> vector<8x128xf32>
    %c0_52 = arith.constant 0 : index
    %c0_53 = arith.constant 0 : index
    %43 = vector.load %arg6[%c0_52, %c0_53] : memref<8x128xf32, #tpu.memory_space<vmem>>, vector<8x128xf32>
    %44 = arith.addf %43, %42 : vector<8x128xf32>
    %c0_54 = arith.constant 0 : index
    %c0_55 = arith.constant 0 : index
    %45 = vector.load %arg6[%c0_54, %c0_55] : memref<8x128xf32, #tpu.memory_space<vmem>>, vector<8x128xf32>
    tpu.vector_store %arg6[%c0_54, %c0_55], %44 {strides = array<i32>} : memref<8x128xf32, #tpu.memory_space<vmem>>, vector<8x128xf32>,
    %c0_56 = arith.constant 0 : index
    %c8 = arith.constant 8 : index
    %c0_57 = arith.constant 0 : index
    %46 = vector.load %arg2[%c0_56, %c8, %c0_57] : memref<1x18x512xbf16, #tpu.memory_space<vmem>>, vector<1x8x512xbf16>
    %47 = vector.shape_cast %46 : vector<1x8x512xbf16> to vector<8x512xbf16>
    %c6_58 = arith.constant 6 : index
    %c0_59 = arith.constant 0 : index
    %c0_60 = arith.constant 0 : index
    %48 = vector.load %arg3[%c6_58, %c0_59, %c0_60] : memref<9x512x128xbf16, #tpu.memory_space<vmem>>, vector<1x512x128xbf16>
    %49 = vector.shape_cast %48 : vector<1x512x128xbf16> to vector<512x128xbf16>
    %cst_61 = arith.constant dense<0.000000e+00> : vector<8x128xf32>
    %50 = tpu.matmul %47, %49, %cst_61 {dimension_numbers = #tpu.dot_dimension_numbers<[1], [0], [0], [1], [0, 0, 1, 1], [], []>} : vector<8x512xbf16>, vector<512x128xbf16>, vector<8x128xf32> -> vector<8x128xf32>
    %c0_62 = arith.constant 0 : index
    %c0_63 = arith.constant 0 : index
    %51 = vector.load %arg6[%c0_62, %c0_63] : memref<8x128xf32, #tpu.memory_space<vmem>>, vector<8x128xf32>
    %52 = arith.addf %51, %50 : vector<8x128xf32>
    %c0_64 = arith.constant 0 : index
    %c0_65 = arith.constant 0 : index
    %53 = vector.load %arg6[%c0_64, %c0_65] : memref<8x128xf32, #tpu.memory_space<vmem>>, vector<8x128xf32>
    tpu.vector_store %arg6[%c0_64, %c0_65], %52 {strides = array<i32>} : memref<8x128xf32, #tpu.memory_space<vmem>>, vector<8x128xf32>,
    %c0_66 = arith.constant 0 : index
    %c9 = arith.constant 9 : index
    %c0_67 = arith.constant 0 : index
    %54 = vector.load %arg2[%c0_66, %c9, %c0_67] : memref<1x18x512xbf16, #tpu.memory_space<vmem>>, vector<1x8x512xbf16>
    %55 = vector.shape_cast %54 : vector<1x8x512xbf16> to vector<8x512xbf16>
    %c7 = arith.constant 7 : index
    %c0_68 = arith.constant 0 : index
    %c0_69 = arith.constant 0 : index
    %56 = vector.load %arg3[%c7, %c0_68, %c0_69] : memref<9x512x128xbf16, #tpu.memory_space<vmem>>, vector<1x512x128xbf16>
    %57 = vector.shape_cast %56 : vector<1x512x128xbf16> to vector<512x128xbf16>
    %cst_70 = arith.constant dense<0.000000e+00> : vector<8x128xf32>
    %58 = tpu.matmul %55, %57, %cst_70 {dimension_numbers = #tpu.dot_dimension_numbers<[1], [0], [0], [1], [0, 0, 1, 1], [], []>} : vector<8x512xbf16>, vector<512x128xbf16>, vector<8x128xf32> -> vector<8x128xf32>
    %c0_71 = arith.constant 0 : index
    %c0_72 = arith.constant 0 : index
    %59 = vector.load %arg6[%c0_71, %c0_72] : memref<8x128xf32, #tpu.memory_space<vmem>>, vector<8x128xf32>
    %60 = arith.addf %59, %58 : vector<8x128xf32>
    %c0_73 = arith.constant 0 : index
    %c0_74 = arith.constant 0 : index
    %61 = vector.load %arg6[%c0_73, %c0_74] : memref<8x128xf32, #tpu.memory_space<vmem>>, vector<8x128xf32>
    tpu.vector_store %arg6[%c0_73, %c0_74], %60 {strides = array<i32>} : memref<8x128xf32, #tpu.memory_space<vmem>>, vector<8x128xf32>,
    %c0_75 = arith.constant 0 : index
    %c10 = arith.constant 10 : index
    %c0_76 = arith.constant 0 : index
    %62 = vector.load %arg2[%c0_75, %c10, %c0_76] : memref<1x18x512xbf16, #tpu.memory_space<vmem>>, vector<1x8x512xbf16>
    %63 = vector.shape_cast %62 : vector<1x8x512xbf16> to vector<8x512xbf16>
    %c8_77 = arith.constant 8 : index
    %c0_78 = arith.constant 0 : index
    %c0_79 = arith.constant 0 : index
    %64 = vector.load %arg3[%c8_77, %c0_78, %c0_79] : memref<9x512x128xbf16, #tpu.memory_space<vmem>>, vector<1x512x128xbf16>
    %65 = vector.shape_cast %64 : vector<1x512x128xbf16> to vector<512x128xbf16>
    %cst_80 = arith.constant dense<0.000000e+00> : vector<8x128xf32>
    %66 = tpu.matmul %63, %65, %cst_80 {dimension_numbers = #tpu.dot_dimension_numbers<[1], [0], [0], [1], [0, 0, 1, 1], [], []>} : vector<8x512xbf16>, vector<512x128xbf16>, vector<8x128xf32> -> vector<8x128xf32>
    %c0_81 = arith.constant 0 : index
    %c0_82 = arith.constant 0 : index
    %67 = vector.load %arg6[%c0_81, %c0_82] : memref<8x128xf32, #tpu.memory_space<vmem>>, vector<8x128xf32>
    %68 = arith.addf %67, %66 : vector<8x128xf32>
    %c0_83 = arith.constant 0 : index
    %c0_84 = arith.constant 0 : index
    %69 = vector.load %arg6[%c0_83, %c0_84] : memref<8x128xf32, #tpu.memory_space<vmem>>, vector<8x128xf32>
    tpu.vector_store %arg6[%c0_83, %c0_84], %68 {strides = array<i32>} : memref<8x128xf32, #tpu.memory_space<vmem>>, vector<8x128xf32>,
    %c0_85 = arith.constant 0 : index
    %c0_86 = arith.constant 0 : index
    %70 = vector.load %arg6[%c0_85, %c0_86] : memref<8x128xf32, #tpu.memory_space<vmem>>, vector<8x128xf32>
    %c0_87 = arith.constant 0 : index
    %c0_88 = arith.constant 0 : index
    %71 = vector.load %arg4[%c0_87, %c0_88] : memref<1x128xf32, #tpu.memory_space<vmem>>, vector<1x128xf32>
    %72 = vector.broadcast %71 : vector<1x128xf32> to vector<8x128xf32>
    %73 = arith.addf %70, %72 : vector<8x128xf32>
    %74 = arith.negf %73 : vector<8x128xf32>
    %75 = math.exp %74 : vector<8x128xf32>
    %cst_89 = arith.constant 1.000000e+00 : f32
    %76 = vector.broadcast %cst_89 : f32 to vector<8x128xf32>
    %77 = arith.addf %76, %75 : vector<8x128xf32>
    %78 = arith.divf %76, %77 : vector<8x128xf32>
    %c0_90 = arith.constant 0 : index
    %c0_91 = arith.constant 0 : index
    %c0_92 = arith.constant 0 : index
    %79 = vector.load %arg5[%c0_90, %c0_91, %c0_92] : memref<1x8x128xf32, #tpu.memory_space<vmem>>, vector<1x8x128xf32>
    %80 = vector.shape_cast %79 : vector<1x8x128xf32> to vector<8x128xf32>
    %81 = vector.shape_cast %78 : vector<8x128xf32> to vector<1x8x128xf32>
    tpu.vector_store %arg5[%c0_90, %c0_91, %c0_92], %81 {strides = array<i32>} : memref<1x8x128xf32, #tpu.memory_space<vmem>>, vector<1x8x128xf32>,
    return
  }
  func.func @transform_0(%arg0: i32, %arg1: i32) -> (i32, i32, i32) {
    %c0_i32 = arith.constant 0 : i32
    %c0_i32_0 = arith.constant 0 : i32
    %c0_i32_1 = arith.constant 0 : i32
    return %arg0, %c0_i32, %c0_i32_0 : i32, i32, i32
  }
  func.func @transform_1(%arg0: i32, %arg1: i32) -> (i32, i32, i32) {
    %c0_i32 = arith.constant 0 : i32
    %c0_i32_0 = arith.constant 0 : i32
    %c0_i32_1 = arith.constant 0 : i32
    return %c0_i32, %c0_i32_0, %arg1 : i32, i32, i32
  }
  func.func @transform_2(%arg0: i32, %arg1: i32) -> (i32, i32) {
    %c0_i32 = arith.constant 0 : i32
    %c0_i32_0 = arith.constant 0 : i32
    return %c0_i32, %arg1 : i32, i32
  }
  func.func @transform_3(%arg0: i32, %arg1: i32) -> (i32, i32, i32) {
    %c0_i32 = arith.constant 0 : i32
    %c0_i32_0 = arith.constant 0 : i32
    return %arg0, %c0_i32, %arg1 : i32, i32, i32
  }
}

</mosaic_0001>

<bundles_post_ra>
// kernel: discriminator_forward.5
= control target key start
LH: loop header
LB: loop body
LE: loop exit
PB: predicated region body
PF: predicated region fallthrough
CT: control target
= control target key end

     0   :  { %s3486_s12 = smov 0   ;;  %s3488_s13 = smov 0   ;;  %s4132_s0 = inlined_call_operand.vmem [shape: bf16[2,290,24], index: 0, kind: input, shape index: {}]   ;;  %s4133_s1 = inlined_call_operand.vmem [shape: bf16[4,24,64], index: 1, kind: input, shape index: {}]   ;;  %s4134_s2 = inlined_call_operand.vmem [shape: f32[1,64], index: 2, kind: input, shape index: {}]   ;;  %s4135_s3 = inlined_call_operand.vmem [shape: bf16[2,272,64], index: 3, kind: output, shape index: {}]  }
   0x1   :  { %s3490_s14 = smov 0  }
   0x2 LB: > { %s25_s15 = sadd.s32 1, %s3458_s13  ;;  %p2739_p0 = scmp.ge.s32.totalorder %s3462_s14, 1  ;;  %s3462_s14 = sphi %s3490_s14, %s13_s14   ;;  %s3458_s13 = sphi %s3488_s13, %s4137_s13   ;;  %s3454_s12 = sphi %s3486_s12, %s4136_s12  }
   0x3   : > { %p27_p1 = scmp.ge.s32.totalorder %s25_s15, 2  ;;  %p168_p2 = scmp.lt.s32.totalorder %s3462_s14, 3 }
   0x5   : > { %s4139_s15 = smov (%p27_p1, %s25_s15), 0  ;;  %p169_p3 = pnand %p2739_p0, %p168_p2 }
   0x6   : > { %p202_p4 = scmp.lt.s32.totalorder (!%p169_p3), %s3454_s12, 1 }
   0x7   : > { %172 = sbr.rel (%p169_p3) target bundleno = 512 (0x200), region = 32 }
   0xc   : > { %v3361_v0 = vld [vmem:[%s4133_s1 + $0x8] ss:$0 sps:$4 sm:$0xff]   ;;  %vm406_vm0 = vcmask 1043456   ;;  %v3464_v1 = vmov 0.0   ;;  %vm3465_vm1 = vmmov 0   ;;  %v3362_v4 = vld [vmem:[%s4133_s1] sm:$0xff]  }
   0xd   : > { %3045 = vmatprep.subr.bf16.mxu0 %v3464_v1  ;;  %3117 = vmatprep.subr.bf16.mxu1 %v3464_v1  ;;  %v408_v2 = vsel %vm406_vm0, %v3361_v0, 0  ;;  %v3363_v3 = vld [vmem:[%s4133_s1 + $0x14] ss:$0 sps:$4 sm:$0xff]   ;;  %s4141_s12 = smov (!%p202_p4, %s3454_s12), 1  ;;  %v3365_v6 = vld [vmem:[%s4133_s1 + $0x20] ss:$0 sps:$4 sm:$0xff]  }
   0xe   : > { %3049 = vmatprep.mubr.msk.bf16.mxu0 %vm3465_vm1, %v3464_v1  ;;  %3121 = vmatprep.mubr.msk.bf16.mxu1 %vm3465_vm1, %v3464_v1  ;;  %v943_v5 = vsel %vm406_vm0, %v3363_v3, 0  ;;  %v3366_v7 = vld [vmem:[%s4133_s1 + $0xc] sm:$0xff]   ;;  %s3333_s26 = smul.u32 148, %s4141_s12  ;;  %vm354_vm2 = vcmask 195584   ;;  %v1544_v9 = vsel %vm406_vm0, %v3365_v6, 0  ;;  %v3385_v12 = vld [vmem:[%s4133_s1 + $0x18] sm:$0xff]  }
   0xf   : > { %3046 = vmatpush3.bf16.msra.mxu0 %v408_v2  ;;  %3118 = vmatpush3.bf16.msra.mxu1 %v943_v5  ;;  %v3370_v17 = vld [vmem:[%s4133_s1 + $0x2c] ss:$0 sps:$4 sm:$0xff]   ;;  %vm741_vm3 = vsmask.f32 7424  ;;  %v3389_v26 = vld [vmem:[%s4133_s1 + $0x24] sm:$0xff]   ;;  %vm1944_vm4 = vcmask 1046528  }
  0x10   : > { %3047 = vmatprep.subr.bf16.mxu0 %v3464_v1  ;;  %3119 = vmatprep.subr.bf16.mxu1 %v3464_v1  ;;  %s3535_s29 = scalar_lea.vmem %s4132_s0, %s3333_s26  ;;  %v2041_v24 = vsel %vm406_vm0, %v3370_v17, 0  ;;  %vm579_vm5 = vcmask 523264   ;;  %s3334_s11 = smul.u32 136, %s4141_s12  ;;  %vm2593_vm6 = vcmask 519168  }
  0x11   : > { %v3364_v8 = vld [vmem:[%s3535_s29] sm:$0xff]   ;;  %v3368_v11 = vld [vmem:[%s3535_s29 + $0x8] sm:$0xff]   ;;  %v3371_v16 = vld [vmem:[%s3535_s29 + $0x10] sm:$0xff]  }
  0x12   : > { %v3367_v10 = vld [vmem:[%s3535_s29] sm:$0xff]   ;;  %v750_v15 = vshll.u32 %v3368_v11, 16  ;;  %v3369_v20 = vld [vmem:[%s3535_s29 + $0x8] sm:$0xff]   ;;  %v754_v22 = vshrl.u32 %v3368_v11, 16  ;;  %v758_v23 = vshll.u32 %v3371_v16, 16  ;;  %v3373_v29 = vld [vmem:[%s3535_s29 + $0x18] sm:$0xff]   ;;  %s3963_s12 = scalar_lea.vmem %s4135_s3, %s3334_s11 }
  0x13   : > { %3048 = vmatpush3.bf16.msra.mxu0 %v3362_v4  ;;  %3120 = vmatpush3.bf16.msra.mxu1 %v3366_v7  ;;  %v743_v13 = vshrl.u32 %v3367_v10, 16  ;;  %v745_v14 = vshll.u32 %v3367_v10, 16  ;;  %v3372_v30 = vld [vmem:[%s3535_s29 + $0x10] sm:$0xff]   ;;  %v762_v32 = vshrl.u32 %v3371_v16, 16  ;;  %v766_v33 = vshll.u32 %v3373_v29, 16  ;;  %v3375_v34 = vld [vmem:[%s3535_s29 + $0x20] sm:$0xff]  }
  0x14   : > { %3189 = vmatprep.subr.bf16.mxu0 %v3464_v1  ;;  %3261 = vmatprep.subr.bf16.mxu1 %v3464_v1  ;;  %v752_v19 = vrot.slane %v750_v15, 1  ;;  %v760_v28 = vrot.slane %v758_v23, 1  ;;  %v3374_v37 = vld [vmem:[%s3535_s29 + $0x18] sm:$0xff]   ;;  %v774_v38 = vshll.u32 %v3375_v34, 16  ;;  %v770_v40 = vshrl.u32 %v3373_v29, 16  ;;  %v3377_v42 = vld [vmem:[%s3535_s29 + $0x28] sm:$0xff]  }
  0x15   : > { %v747_v18 = vrot.slane %v745_v14, 1  ;;  %v768_v36 = vrot.slane %v766_v33, 1  ;;  %v3376_v44 = vld [vmem:[%s3535_s29 + $0x20] sm:$0xff]   ;;  %v778_v46 = vshrl.u32 %v3375_v34, 16  ;;  %v782_v47 = vshll.u32 %v3377_v42, 16  ;;  %v3379_v50 = vld [vmem:[%s3535_s29 + $0x30] sm:$0xff]  }
  0x16   : > { %3050 = vmatmul.mubr.msk.bf16.vlgmr.msra.gmra.mxu0 %vm354_vm2, %v3364_v8  ;;  %v756_v27 = vor.u32 %v754_v22, %v752_v19  ;;  %v764_v35 = vor.u32 %v762_v32, %v760_v28  ;;  %v776_v41 = vrot.slane %v774_v38, 1  ;;  %v3378_v51 = vld [vmem:[%s3535_s29 + $0x28] sm:$0xff]   ;;  %v786_v53 = vshrl.u32 %v3377_v42, 16  ;;  %v3381_v57 = vld [vmem:[%s3535_s29 + $0x38] sm:$0xff]   ;;  %v3380_v58 = vld [vmem:[%s3535_s29 + $0x30] sm:$0xff]  }
  0x17   : > { %3190 = vmatpush3.bf16.msra.mxu0 %v1544_v9  ;;  %3053 = vmatprep.mubr.msk.bf16.mxu0 %vm3465_vm1, %v3464_v1  ;;  %v748_v21 = vor.u32 %v747_v18, %v743_v13  ;;  %v772_v43 = vor.u32 %v770_v40, %v768_v36  ;;  %v784_v49 = vrot.slane %v782_v47, 1  ;;  %v790_v54 = vshll.u32 %v3379_v50, 16  ;;  %v3383_v0 = vld [vmem:[%s3535_s29 + $0x40] sm:$0xff]   ;;  %v3382_v2 = vld [vmem:[%s3535_s29 + $0x38] sm:$0xff]   ;;  %v3386_v6 = vld [vmem:[%s3535_s29 + $0x48] sm:$0xff]  }
  0x18   : > { %3191 = vmatprep.subr.bf16.mxu0 %v3464_v1  ;;  %v761_v31 = vsel %vm741_vm3, %v756_v27, %v760_v28  ;;  %v769_v39 = vsel %vm741_vm3, %v764_v35, %v768_v36  ;;  %v780_v48 = vor.u32 %v778_v46, %v776_v41  ;;  %v794_v60 = vshrl.u32 %v3379_v50, 16  ;;  %v3384_v9 = vld [vmem:[%s3535_s29 + $0x40] sm:$0xff]   ;;  %v3388_v14 = vld [vmem:[%s3535_s29 + $0x50] sm:$0xff]   ;;  %v3387_v16 = vld [vmem:[%s3535_s29 + $0x48] sm:$0xff]  }
  0x19   : > { %v753_v25 = vsel %vm741_vm3, %v748_v21, %v752_v19  ;;  %v777_v45 = vsel %vm741_vm3, %v772_v43, %v776_v41  ;;  %v788_v55 = vor.u32 %v786_v53, %v784_v49  ;;  %v792_v56 = vrot.slane %v790_v54, 1  ;;  %v3391_v22 = vld [vmem:[%s3535_s29 + $0x58] sm:$0xff]   ;;  %v3390_v23 = vld [vmem:[%s3535_s29 + $0x50] sm:$0xff]   ;;  %v3393_v29 = vld [vmem:[%s3535_s29 + $0x60] sm:$0xff]  }
  0x1a   : > { %3122 = vmatmul.mubr.msk.bf16.vlgmr.msra.gmra.mxu1 %vm354_vm2, %v753_v25  ;;  %v785_v52 = vsel %vm741_vm3, %v780_v48, %v784_v49  ;;  %v798_v61 = vshll.u32 %v3381_v57, 16  ;;  %v802_v4 = vshrl.u32 %v3381_v57, 16  ;;  %v806_v5 = vshll.u32 %v3383_v0, 16  ;;  %v3395_v36 = vld [vmem:[%s3535_s29 + $0x68] sm:$0xff]   ;;  %v3397_v43 = vld [vmem:[%s3535_s29 + $0x70] sm:$0xff]   ;;  %v3399_v50 = vld [vmem:[%s3535_s29 + $0x78] sm:$0xff]  }
  0x1b   : > { %3192 = vmatpush3.bf16.msra.mxu0 %v3385_v12  ;;  %3262 = vmatpush3.bf16.msra.mxu1 %v2041_v24  ;;  %v793_v59 = vsel %vm741_vm3, %v788_v55, %v792_v56  ;;  %v796_v62 = vor.u32 %v794_v60, %v792_v56  ;;  %v814_v10 = vshll.u32 %v3386_v6, 16  ;;  %v810_v12 = vshrl.u32 %v3383_v0, 16  ;;  %v3401_v57 = vld [vmem:[%s3535_s29 + $0x80] sm:$0xff]  }
  0x1c   : > { %3125 = vmatprep.mubr.msk.bf16.mxu1 %vm3465_vm1, %v3464_v1  ;;  %3263 = vmatprep.subr.bf16.mxu1 %v3464_v1  ;;  %v800_v63 = vrot.slane %v798_v61, 1  ;;  %v808_v8 = vrot.slane %v806_v5, 1  ;;  %v818_v18 = vshrl.u32 %v3386_v6, 16  ;;  %v822_v19 = vshll.u32 %v3388_v14, 16  ;;  %v3402_v5 = vld [vmem:[%s3535_s29 + $0x80] sm:$0xff]  }
  0x1d   : > { %v816_v13 = vrot.slane %v814_v10, 1  ;;  %v826_v25 = vshrl.u32 %v3388_v14, 16  ;;  %v834_v32 = vshrl.u32 %v3391_v22, 16  ;;  %v838_v33 = vshll.u32 %v3393_v29, 16  ;;  %v3408_v14 = vld [vmem:[%s3535_s29 + $0x18] sm:$0xff]  }
  0x1e   : > { %3054 = vmatmul.mubr.msk.bf16.gmra.mxu0 %vm354_vm2, %v3369_v20  ;;  %v801_v3 = vsel %vm741_vm3, %v796_v62, %v800_v63  ;;  %v804_v7 = vor.u32 %v802_v4, %v800_v63  ;;  %v812_v15 = vor.u32 %v810_v12, %v808_v8  ;;  %v824_v21 = vrot.slane %v822_v19, 1  ;;  %v3405_v63 = vld [vmem:[%s3535_s29 + $0x10] sm:$0xff]   ;;  %v3403_v4 = vld [vmem:[%s3535_s29 + $0x88] ss:$0 sps:$4 sm:$0x11]  }
  0x1f   : > { %3057 = vmatprep.mubr.msk.bf16.mxu0 %vm3465_vm1, %v3464_v1  ;;  %3264 = vmatpush3.bf16.msra.mxu1 %v3389_v26  ;;  %v820_v20 = vor.u32 %v818_v18, %v816_v13  ;;  %v830_v26 = vshll.u32 %v3391_v22, 16  ;;  %v840_v35 = vrot.slane %v838_v33, 1  ;;  %v846_v40 = vshll.u32 %v3395_v36, 16  ;;  %v3407_v22 = vld [vmem:[%s3535_s29 + $0x10] sm:$0xff]  }
  0x20   : > { %v809_v11 = vsel %vm741_vm3, %v804_v7, %v808_v8  ;;  %v817_v17 = vsel %vm741_vm3, %v812_v15, %v816_v13  ;;  %v828_v27 = vor.u32 %v826_v25, %v824_v21  ;;  %v850_v46 = vshrl.u32 %v3395_v36, 16  ;;  %v3410_v25 = vld [vmem:[%s3535_s29 + $0x20] sm:$0xff]  }
  0x21   : > { %v825_v24 = vsel %vm741_vm3, %v820_v20, %v824_v21  ;;  %v832_v28 = vrot.slane %v830_v26, 1  ;;  %v848_v42 = vrot.slane %v846_v40, 1  ;;  %v854_v47 = vshll.u32 %v3397_v43, 16  ;;  %v3406_v21 = vld [vmem:[%s3535_s29 + $0x8] sm:$0xfe]  }
  0x22   : > { %3126 = vmatmul.mubr.msk.bf16.gmra.mxu1 %vm354_vm2, %v761_v31  ;;  %v858_v53 = vshrl.u32 %v3397_v43, 16  ;;  %v862_v54 = vshll.u32 %v3399_v50, 16  ;;  %v866_v61 = vshrl.u32 %v3399_v50, 16  ;;  %v870_v62 = vshll.u32 %v3401_v57, 16  ;;  %v3413_v50 = vld [vmem:[%s3535_s29 + $0x28] sm:$0xff]  }
  0x23   : > { %3129 = vmatprep.mubr.msk.bf16.mxu1 %vm3465_vm1, %v3464_v1  ;;  %v833_v31 = vsel %vm741_vm3, %v828_v27, %v832_v28  ;;  %v836_v34 = vor.u32 %v834_v32, %v832_v28  ;;  %v852_v48 = vor.u32 %v850_v46, %v848_v42  ;;  %v856_v49 = vrot.slane %v854_v47, 1  ;;  %v3409_v32 = vld [vmem:[%s3535_s29 + $0x18] sm:$0xff]  }
  0x24   : > { %v864_v56 = vrot.slane %v862_v54, 1  ;;  %v1351_v8 = vshll.u32 %v3405_v63, 16  ;;  %v874_v10 = vshrl.u32 %v3401_v57, 16  ;;  %v1355_v18 = vshrl.u32 %v3405_v63, 16 }
  0x25   : > { %v841_v38 = vsel %vm741_vm3, %v836_v34, %v840_v35  ;;  %v860_v55 = vor.u32 %v858_v53, %v856_v49  ;;  %v1359_v19 = vshll.u32 %v3408_v14, 16  ;;  %v1945_v26 = vrot.slane %v3406_v21, 1  ;;  %v3416_v53 = vld [vmem:[%s3535_s29 + $0x38] sm:$0xff]  }
  0x26   : > { %3058 = vmatmul.mubr.msk.bf16.gmra.mxu0 %vm354_vm2, %v3372_v30  ;;  %v3392_v30 = vld [vmem:[%s3535_s29 + $0x58] sm:$0xff]   ;;  %v1353_v13 = vrot.slane %v1351_v8, 1  ;;  %v1946_v27 = vrot.slane %v3407_v22, 1  ;;  %v1948_v36 = vrot.slane %v3409_v32, 1  ;;  %v1952_v54 = vrot.slane %v3413_v50, 1  ;;  %v3420_v8 = vld [vmem:[%s3535_s29 + $0x48] sm:$0xff]  }
  0x27   : > { %3061 = vmatprep.mubr.msk.bf16.mxu0 %vm3465_vm1, %v3464_v1  ;;  %v865_v60 = vsel %vm741_vm3, %v860_v55, %v864_v56  ;;  %v1391_v57 = vshll.u32 %v3416_v53, 16 }
  0x28   : > { %v1949_v40 = vsel %vm1944_vm4, %v1946_v27, %v1948_v36 }
  0x2a   : > { %3130 = vmatmul.mubr.msk.bf16.gmra.mxu1 %vm354_vm2, %v769_v39  ;;  %v842_v39 = vshrl.u32 %v3393_v29, 16  ;;  %v1363_v29 = vshrl.u32 %v3408_v14, 16  ;;  %v3419_v14 = vld [vmem:[%s3535_s29 + $0x40] sm:$0xff]  }
  0x2b   : > { %3133 = vmatprep.mubr.msk.bf16.mxu1 %vm3465_vm1, %v3464_v1 }
  0x2c   : > { %v844_v41 = vor.u32 %v842_v39, %v840_v35  ;;  %v3412_v35 = vld [vmem:[%s3535_s29 + $0x28] sm:$0xff]  }
  0x2d   : > { %v1375_v39 = vshll.u32 %v3412_v35, 16  ;;  %v1379_v47 = vshrl.u32 %v3412_v35, 16 }
  0x2e   : > { %3062 = vmatmul.mubr.msk.bf16.gmra.mxu0 %vm354_vm2, %v3374_v37  ;;  %v3394_v37 = vld [vmem:[%s3535_s29 + $0x60] sm:$0xff]  }
  0x2f   : > { %3065 = vmatprep.mubr.msk.bf16.mxu0 %vm3465_vm1, %v3464_v1  ;;  %v1377_v43 = vrot.slane %v1375_v39, 1 }
  0x32   : > { %3134 = vmatmul.mubr.msk.bf16.gmra.mxu1 %vm354_vm2, %v777_v45  ;;  %v849_v45 = vsel %vm741_vm3, %v844_v41, %v848_v42  ;;  %v3411_v41 = vld [vmem:[%s3535_s29 + $0x20] sm:$0xff]  }
  0x33   : > { %3137 = vmatprep.mubr.msk.bf16.mxu1 %vm3465_vm1, %v3464_v1 }
  0x36   : > { %3066 = vmatmul.mubr.msk.bf16.gmra.mxu0 %vm354_vm2, %v3376_v44  ;;  %v3396_v44 = vld [vmem:[%s3535_s29 + $0x68] sm:$0xff]  }
  0x37   : > { %3069 = vmatprep.mubr.msk.bf16.mxu0 %vm3465_vm1, %v3464_v1 }
  0x3a   : > { %3138 = vmatmul.mubr.msk.bf16.gmra.mxu1 %vm354_vm2, %v785_v52  ;;  %v857_v52 = vsel %vm741_vm3, %v852_v48, %v856_v49 }
  0x3b   : > { %3141 = vmatprep.mubr.msk.bf16.mxu1 %vm3465_vm1, %v3464_v1 }
  0x3e   : > { %3070 = vmatmul.mubr.msk.bf16.gmra.mxu0 %vm354_vm2, %v3378_v51  ;;  %v3398_v51 = vld [vmem:[%s3535_s29 + $0x70] sm:$0xff]  }
  0x3f   : > { %3073 = vmatprep.mubr.msk.bf16.mxu0 %vm3465_vm1, %v3464_v1 }
  0x42   : > { %3142 = vmatmul.mubr.msk.bf16.gmra.mxu1 %vm354_vm2, %v793_v59  ;;  %v3404_v59 = vld [vmem:[%s3535_s29 + $0x8] sm:$0xff]  }
  0x43   : > { %3145 = vmatprep.mubr.msk.bf16.mxu1 %vm3465_vm1, %v3464_v1  ;;  %v1346_v0 = vshll.u32 %v3404_v59, 16  ;;  %v1344_v6 = vshrl.u32 %v3404_v59, 16  ;;  %v3415_v59 = vld [vmem:[%s3535_s29 + $0x30] sm:$0xff]  }
  0x44   : > { %v1954_v63 = vrot.slane %v3415_v59, 1 }
  0x45   : > { %v1348_v7 = vrot.slane %v1346_v0, 1 }
  0x46   : > { %3074 = vmatmul.mubr.msk.bf16.gmra.mxu0 %vm354_vm2, %v3380_v58  ;;  %v3400_v58 = vld [vmem:[%s3535_s29 + $0x78] sm:$0xff]  }
  0x47   : > { %3077 = vmatprep.mubr.msk.bf16.mxu0 %vm3465_vm1, %v3464_v1  ;;  %v1349_v12 = vor.u32 %v1348_v7, %v1344_v6 }
  0x4a   : > { %3146 = vmatmul.mubr.msk.bf16.gmra.mxu1 %vm354_vm2, %v801_v3  ;;  %v872_v3 = vrot.slane %v870_v62, 1  ;;  %v3418_v62 = vld [vmem:[%s3535_s29 + $0x40] sm:$0xff]  }
  0x4b   : > { %3149 = vmatprep.mubr.msk.bf16.mxu1 %vm3465_vm1, %v3464_v1 }
  0x4c   : > { %v876_v15 = vor.u32 %v874_v10, %v872_v3 }
  0x4e   : > { %3078 = vmatmul.mubr.msk.bf16.gmra.mxu0 %vm354_vm2, %v3382_v2  ;;  %v868_v2 = vor.u32 %v866_v61, %v864_v56  ;;  %v1393_v61 = vrot.slane %v1391_v57, 1 }
  0x4f   : > { %3081 = vmatprep.mubr.msk.bf16.mxu0 %vm3465_vm1, %v3464_v1 }
  0x52   : > { %3150 = vmatmul.mubr.msk.bf16.gmra.mxu1 %vm354_vm2, %v809_v11  ;;  %v878_v11 = vshll.u32 %v3403_v4, 16  ;;  %v1955_v4 = vsel %vm1944_vm4, %v1952_v54, %v1954_v63 }
  0x53   : > { %3153 = vmatprep.mubr.msk.bf16.mxu1 %vm3465_vm1, %v3464_v1 }
  0x56   : > { %3082 = vmatmul.mubr.msk.bf16.gmra.mxu0 %vm354_vm2, %v3384_v9  ;;  %v873_v9 = vsel %vm741_vm3, %v868_v2, %v872_v3  ;;  %v1395_v2 = vshrl.u32 %v3416_v53, 16  ;;  %v1399_v3 = vshll.u32 %v3418_v62, 16 }
  0x57   : > { %3085 = vmatprep.mubr.msk.bf16.mxu0 %vm3465_vm1, %v3464_v1 }
  0x58   : > { %v1397_v6 = vor.u32 %v1395_v2, %v1393_v61  ;;  %v1401_v7 = vrot.slane %v1399_v3, 1 }
  0x5a   : > { %3154 = vmatmul.mubr.msk.bf16.gmra.mxu1 %vm354_vm2, %v817_v17  ;;  %v1354_v17 = vsel %vm741_vm3, %v1349_v12, %v1353_v13  ;;  %v1402_v10 = vsel %vm741_vm3, %v1397_v6, %v1401_v7  ;;  %v1407_v12 = vshll.u32 %v3420_v8, 16 }
  0x5b   : > { %3157 = vmatprep.mubr.msk.bf16.mxu1 %vm3465_vm1, %v3464_v1 }
  0x5e   : > { %3086 = vmatmul.mubr.msk.bf16.gmra.mxu0 %vm354_vm2, %v3387_v16  ;;  %v880_v16 = vrot.slane %v878_v11, 1  ;;  %v1403_v11 = vshrl.u32 %v3418_v62, 16 }
  0x5f   : > { %3089 = vmatprep.mubr.msk.bf16.mxu0 %vm3465_vm1, %v3464_v1 }
  0x60   : > { %v881_v20 = vsel %vm741_vm3, %v876_v15, %v880_v16  ;;  %v1405_v15 = vor.u32 %v1403_v11, %v1401_v7  ;;  %v1409_v16 = vrot.slane %v1407_v12, 1 }
  0x62   : > { %3158 = vmatmul.mubr.msk.bf16.gmra.mxu1 %vm354_vm2, %v825_v24  ;;  %v1361_v24 = vrot.slane %v1359_v19, 1  ;;  %v1410_v19 = vsel %vm741_vm3, %v1405_v15, %v1409_v16 }
  0x63   : > { %3161 = vmatprep.mubr.msk.bf16.mxu1 %vm3465_vm1, %v3464_v1 }
  0x64   : > { %v1365_v33 = vor.u32 %v1363_v29, %v1361_v24 }
  0x66   : > { %3090 = vmatmul.mubr.msk.bf16.gmra.mxu0 %vm354_vm2, %v3390_v23  ;;  %v1357_v23 = vor.u32 %v1355_v18, %v1353_v13  ;;  %v1958_v18 = vrot.slane %v3419_v14, 1  ;;  %v3427_v14 = vld [vmem:[%s3535_s29 + $0x60] sm:$0xff]  }
  0x67   : > { %3093 = vmatprep.mubr.msk.bf16.mxu0 %vm3465_vm1, %v3464_v1 }
  0x68   : > { %v1362_v28 = vsel %vm741_vm3, %v1357_v23, %v1361_v24  ;;  %v3421_v23 = vld [vmem:[%s3535_s29 + $0x48] sm:$0xff]  }
  0x69   : > { %v1960_v29 = vrot.slane %v3421_v23, 1 }
  0x6a   : > { %3162 = vmatmul.mubr.msk.bf16.gmra.mxu1 %vm354_vm2, %v833_v31  ;;  %v1947_v31 = vsel %vm1944_vm4, %v1945_v26, %v1946_v27  ;;  %v3424_v27 = vld [vmem:[%s3535_s29 + $0x58] sm:$0xff]  }
  0x6b   : > { %3165 = vmatprep.mubr.msk.bf16.mxu1 %vm3465_vm1, %v3464_v1  ;;  %v1961_v35 = vsel %vm1944_vm4, %v1958_v18, %v1960_v29 }
  0x6e   : > { %3094 = vmatmul.mubr.msk.bf16.gmra.mxu0 %vm354_vm2, %v3392_v30  ;;  %v1367_v30 = vshll.u32 %v3410_v25, 16 }
  0x6f   : > { %3097 = vmatprep.mubr.msk.bf16.mxu0 %vm3465_vm1, %v3464_v1 }
  0x70   : > { %v1369_v34 = vrot.slane %v1367_v30, 1 }
  0x72   : > { %3166 = vmatmul.mubr.msk.bf16.gmra.mxu1 %vm354_vm2, %v841_v38  ;;  %v1371_v38 = vshrl.u32 %v3410_v25, 16 }
  0x73   : > { %3169 = vmatprep.mubr.msk.bf16.mxu1 %vm3465_vm1, %v3464_v1 }
  0x74   : > { %v1373_v42 = vor.u32 %v1371_v38, %v1369_v34 }
  0x76   : > { %3098 = vmatmul.mubr.msk.bf16.gmra.mxu0 %vm354_vm2, %v3394_v37  ;;  %v1370_v37 = vsel %vm741_vm3, %v1365_v33, %v1369_v34  ;;  %v1378_v46 = vsel %vm741_vm3, %v1373_v42, %v1377_v43  ;;  %v1423_v33 = vshll.u32 %v3424_v27, 16  ;;  %v3426_v42 = vld [vmem:[%s3535_s29 + $0x60] sm:$0xff]  }
  0x77   : > { %3101 = vmatprep.mubr.msk.bf16.mxu0 %vm3465_vm1, %v3464_v1 }
  0x7a   : > { %3170 = vmatmul.mubr.msk.bf16.gmra.mxu1 %vm354_vm2, %v849_v45  ;;  %v1950_v45 = vrot.slane %v3411_v41, 1  ;;  %v1425_v41 = vrot.slane %v1423_v33, 1 }
  0x7b   : > { %3173 = vmatprep.mubr.msk.bf16.mxu1 %vm3465_vm1, %v3464_v1 }
  0x7c   : > { %v1951_v49 = vsel %vm1944_vm4, %v1948_v36, %v1950_v45  ;;  %v3423_v36 = vld [vmem:[%s3535_s29 + $0x50] sm:$0xff]  }
  0x7e   : > { %3102 = vmatmul.mubr.msk.bf16.gmra.mxu0 %vm354_vm2, %v3396_v44  ;;  %v3414_v44 = vld [vmem:[%s3535_s29 + $0x30] sm:$0xff]  }
  0x7f   : > { %3105 = vmatprep.mubr.msk.bf16.mxu0 %vm3465_vm1, %v3464_v1  ;;  %v1383_v48 = vshll.u32 %v3414_v44, 16  ;;  %v1387_v56 = vshrl.u32 %v3414_v44, 16 }
  0x82   : > { %3174 = vmatmul.mubr.msk.bf16.gmra.mxu1 %vm354_vm2, %v857_v52  ;;  %v1385_v52 = vrot.slane %v1383_v48, 1 }
  0x83   : > { %3177 = vmatprep.mubr.msk.bf16.mxu1 %vm3465_vm1, %v3464_v1 }
  0x86   : > { %3106 = vmatmul.mubr.msk.bf16.gmra.mxu0 %vm354_vm2, %v3398_v51  ;;  %v1381_v51 = vor.u32 %v1379_v47, %v1377_v43 }
  0x87   : > { %3109 = vmatprep.mubr.msk.bf16.mxu0 %vm3465_vm1, %v3464_v1 }
  0x88   : > { %v1386_v55 = vsel %vm741_vm3, %v1381_v51, %v1385_v52  ;;  %v1427_v51 = vshrl.u32 %v3424_v27, 16 }
  0x8a   : > { %3178 = vmatmul.mubr.msk.bf16.gmra.mxu1 %vm354_vm2, %v865_v60  ;;  %v1389_v60 = vor.u32 %v1387_v56, %v1385_v52  ;;  %v1431_v52 = vshll.u32 %v3426_v42, 16  ;;  %v3425_v56 = vld [vmem:[%s3535_s29 + $0x58] sm:$0xff]  }
  0x8b   : > { %3181 = vmatprep.mubr.msk.bf16.mxu1 %vm3465_vm1, %v3464_v1  ;;  %v1964_v3 = vrot.slane %v3425_v56, 1  ;;  %v3431_v56 = vld [vmem:[%s3535_s29 + $0x70] sm:$0xff]  }
  0x8c   : > { %v1394_v0 = vsel %vm741_vm3, %v1389_v60, %v1393_v61  ;;  %v1429_v61 = vor.u32 %v1427_v51, %v1425_v41  ;;  %v1433_v62 = vrot.slane %v1431_v52, 1 }
  0x8e   : > { %3110 = vmatmul.mubr.msk.bf16.gmra.mxu0 %vm354_vm2, %v3400_v58  ;;  %v1953_v58 = vsel %vm1944_vm4, %v1950_v45, %v1952_v54  ;;  %v1962_v45 = vrot.slane %v3423_v36, 1 }
  0x8f   : > { %3113 = vmatprep.mubr.msk.bf16.mxu0 %vm3465_vm1, %v3464_v1 }
  0x92   : > { %3182 = vmatmul.mubr.msk.bf16.gmra.mxu1 %vm354_vm2, %v873_v9 }
  0x93   : > { %3185 = vmatprep.mubr.msk.bf16.mxu1 %vm3465_vm1, %v3464_v1 }
  0x96   : > { %3114 = vmatmul.mubr.msk.bf16.gmra.mxu0 %vm354_vm2, %v3402_v5  ;;  %v3417_v5 = vld [vmem:[%s3535_s29 + $0x38] sm:$0xff]  }
  0x97   : > { %3193 = vmatprep.mubr.msk.bf16.mxu0 %vm3465_vm1, %v3464_v1  ;;  %v1956_v9 = vrot.slane %v3417_v5, 1 }
  0x99   : > { %v1957_v13 = vsel %vm1944_vm4, %v1954_v63, %v1956_v9  ;;  %v1959_v22 = vsel %vm1944_vm4, %v1956_v9, %v1958_v18  ;;  %v3428_v63 = vld [vmem:[%s3535_s29 + $0x68] sm:$0xff]   ;;  %v1435_v9 = vshrl.u32 %v3426_v42, 16  ;;  %v3432_v42 = vld [vmem:[%s3535_s29 + $0x78] sm:$0xff]  }
  0x9a   : > { %3186 = vmatmul.mubr.msk.bf16.gmra.mxu1 %vm354_vm2, %v881_v20  ;;  %v1411_v20 = vshrl.u32 %v3420_v8, 16  ;;  %v1434_v8 = vsel %vm741_vm3, %v1429_v61, %v1433_v62  ;;  %v1455_v52 = vshll.u32 %v3432_v42, 16 }
  0x9b   : > { %3265 = vmatprep.mubr.msk.bf16.mxu1 %vm3465_vm1, %v3464_v1 }
  0x9c   : > { %v1413_v25 = vor.u32 %v1411_v20, %v1409_v16 }
  0x9e   : > { %3194 = vmatmul.mubr.msk.bf16.vlgmr.msra.gmra.mxu0 %vm354_vm2, %v1354_v17  ;;  %v3422_v17 = vld [vmem:[%s3535_s29 + $0x50] sm:$0xff]  }
  0x9f   : > { %3197 = vmatprep.mubr.msk.bf16.mxu0 %vm3465_vm1, %v3464_v1  ;;  %v1415_v21 = vshll.u32 %v3422_v17, 16  ;;  %v1419_v32 = vshrl.u32 %v3422_v17, 16 }
  0xa1   : > { %v1417_v26 = vrot.slane %v1415_v21, 1  ;;  %v3430_v21 = vld [vmem:[%s3535_s29 + $0x70] sm:$0xff]  }
  0xa2   : > { %3266 = vmatmul.mubr.msk.bf16.vlgmr.msra.gmra.mxu1 %vm354_vm2, %v1947_v31  ;;  %v1451_v51 = vshrl.u32 %v3430_v21, 16 }
  0xa3   : > { %3269 = vmatprep.mubr.msk.bf16.mxu1 %vm3465_vm1, %v3464_v1  ;;  %v1418_v31 = vsel %vm741_vm3, %v1413_v25, %v1417_v26 }
  0xa6   : > { %3198 = vmatmul.mubr.msk.bf16.gmra.mxu0 %vm354_vm2, %v1362_v28 }
  0xa7   : > { %3201 = vmatprep.mubr.msk.bf16.mxu0 %vm3465_vm1, %v3464_v1 }
  0xaa   : > { %3270 = vmatmul.mubr.msk.bf16.gmra.mxu1 %vm354_vm2, %v1949_v40  ;;  %v1421_v40 = vor.u32 %v1419_v32, %v1417_v26 }
  0xab   : > { %3273 = vmatprep.mubr.msk.bf16.mxu1 %vm3465_vm1, %v3464_v1 }
  0xac   : > { %v1426_v50 = vsel %vm741_vm3, %v1421_v40, %v1425_v41 }
  0xae   : > { %3202 = vmatmul.mubr.msk.bf16.gmra.mxu0 %vm354_vm2, %v1370_v37 }
  0xaf   : > { %3205 = vmatprep.mubr.msk.bf16.mxu0 %vm3465_vm1, %v3464_v1 }
  0xb2   : > { %3274 = vmatmul.mubr.msk.bf16.gmra.mxu1 %vm354_vm2, %v1951_v49 }
  0xb3   : > { %3277 = vmatprep.mubr.msk.bf16.mxu1 %vm3465_vm1, %v3464_v1 }
  0xb6   : > { %3206 = vmatmul.mubr.msk.bf16.gmra.mxu0 %vm354_vm2, %v1378_v46 }
  0xb7   : > { %3209 = vmatprep.mubr.msk.bf16.mxu0 %vm3465_vm1, %v3464_v1 }
  0xba   : > { %3278 = vmatmul.mubr.msk.bf16.gmra.mxu1 %vm354_vm2, %v1953_v58 }
  0xbb   : > { %3281 = vmatprep.mubr.msk.bf16.mxu1 %vm3465_vm1, %v3464_v1 }
  0xbe   : > { %3210 = vmatmul.mubr.msk.bf16.gmra.mxu0 %vm354_vm2, %v1386_v55  ;;  %v1963_v55 = vsel %vm1944_vm4, %v1960_v29, %v1962_v45 }
  0xbf   : > { %3213 = vmatprep.mubr.msk.bf16.mxu0 %vm3465_vm1, %v3464_v1 }
  0xc2   : > { %3282 = vmatmul.mubr.msk.bf16.gmra.mxu1 %vm354_vm2, %v1955_v4 }
  0xc3   : > { %3285 = vmatprep.mubr.msk.bf16.mxu1 %vm3465_vm1, %v3464_v1 }
  0xc6   : > { %3214 = vmatmul.mubr.msk.bf16.gmra.mxu0 %vm354_vm2, %v1394_v0 }
  0xc7   : > { %3217 = vmatprep.mubr.msk.bf16.mxu0 %vm3465_vm1, %v3464_v1 }
  0xca   : > { %3286 = vmatmul.mubr.msk.bf16.gmra.mxu1 %vm354_vm2, %v1957_v13  ;;  %v1965_v13 = vsel %vm1944_vm4, %v1962_v45, %v1964_v3 }
  0xcb   : > { %3289 = vmatprep.mubr.msk.bf16.mxu1 %vm3465_vm1, %v3464_v1 }
  0xce   : > { %3218 = vmatmul.mubr.msk.bf16.gmra.mxu0 %vm354_vm2, %v1402_v10  ;;  %v1439_v10 = vshll.u32 %v3428_v63, 16 }
  0xcf   : > { %3221 = vmatprep.mubr.msk.bf16.mxu0 %vm3465_vm1, %v3464_v1 }
  0xd0   : > { %v1441_v20 = vrot.slane %v1439_v10, 1 }
  0xd2   : > { %3290 = vmatmul.mubr.msk.bf16.gmra.mxu1 %vm354_vm2, %v1959_v22 }
  0xd3   : > { %3293 = vmatprep.mubr.msk.bf16.mxu1 %vm3465_vm1, %v3464_v1 }
  0xd6   : > { %v444_v24 = vpop.f32.mrf.mxu0  ;;  %3222 = vmatmul.mubr.msk.bf16.gmra.mxu0 %vm354_vm2, %v1410_v19  ;;  %v1437_v19 = vor.u32 %v1435_v9, %v1433_v62  ;;  %v1457_v62 = vrot.slane %v1455_v52, 1  ;;  %v1459_v9 = vshrl.u32 %v3432_v42, 16  ;;  %v3438_v42 = vld [vmem:[%s3535_s29 + $0x90] ss:$0 sps:$4 sm:$0x11]  }
  0xd7   : > { %580 = vst.msk [vmem:[#allocation2] sm:$0xff] %vm579_vm5, %v444_v24  ;;  %3225 = vmatprep.mubr.msk.bf16.mxu0 %vm3465_vm1, %v3464_v1  ;;  %v1966_v24 = vrot.slane %v3427_v14, 1  ;;  %v3433_v14 = vld [vmem:[%s3535_s29 + $0x78] sm:$0xff]   ;;  %v1479_v52 = vshll.u32 %v3438_v42, 16 }
  0xd8   : > { %v3051_v28 = vpop.f32.mrf.mxu0  ;;  %v1442_v29 = vsel %vm741_vm3, %v1437_v19, %v1441_v20  ;;  %v1461_v19 = vor.u32 %v1459_v9, %v1457_v62 }
  0xda   : > { %v447_v30 = vpop.f32.mrf.mxu0  ;;  %v979_v39 = vpop.f32.mrf.mxu1  ;;  %3294 = vmatmul.mubr.msk.bf16.gmra.mxu1 %vm354_vm2, %v1961_v35  ;;  %v3429_v35 = vld [vmem:[%s3535_s29 + $0x68] sm:$0xff]  }
  0xdb   : > { %581 = vst.msk [vmem:[#allocation2 + $0x8] sm:$0xff] %vm579_vm5, %v447_v30  ;;  %3297 = vmatprep.mubr.msk.bf16.mxu1 %vm3465_vm1, %v3464_v1  ;;  %v1443_v30 = vshrl.u32 %v3428_v63, 16  ;;  %v1968_v45 = vrot.slane %v3429_v35, 1  ;;  %v3434_v63 = vld [vmem:[%s3535_s29 + $0x80] sm:$0xff]  }
  0xdc   : > { %v3052_v34 = vpop.f32.mrf.mxu0  ;;  %v3123_v46 = vpop.f32.mrf.mxu1  ;;  %v1463_v10 = vshll.u32 %v3434_v63, 16  ;;  %v3435_v35 = vld [vmem:[%s3535_s29 + $0x80] sm:$0xff]  }
  0xdd   : > { %v1967_v34 = vsel %vm1944_vm4, %v1964_v3, %v1966_v24  ;;  %v1445_v40 = vor.u32 %v1443_v30, %v1441_v20  ;;  %v1970_v3 = vrot.slane %v3431_v56, 1  ;;  %v1467_v30 = vshrl.u32 %v3434_v63, 16  ;;  %v3437_v56 = vld [vmem:[%s3535_s29 + $0x88] sm:$0xff]  }
  0xde   : > { %v1114_v37 = vld [vmem:[#allocation2] sm:$0xff]  ;;  %v452_v38 = vpop.f32.mrf.mxu0  ;;  %3226 = vmatmul.mubr.msk.bf16.gmra.mxu0 %vm354_vm2, %v1418_v31  ;;  %v982_v49 = vpop.f32.mrf.mxu1  ;;  %v1447_v31 = vshll.u32 %v3430_v21, 16  ;;  %v1465_v20 = vrot.slane %v1463_v10, 1  ;;  %v3436_v21 = vld [vmem:[%s3535_s29 + $0x88] sm:$0xff]  }
  0xdf   : > { %582 = vst.msk [vmem:[#allocation2 + $0x10] sm:$0xff] %vm579_vm5, %v452_v38  ;;  %3229 = vmatprep.mubr.msk.bf16.mxu0 %vm3465_vm1, %v3464_v1  ;;  %v1148_v43 = vadd.f32 %v1114_v37, %v979_v39 }
  0xe0   : > { %v3055_v44 = vpop.f32.mrf.mxu0  ;;  %v3124_v57 = vpop.f32.mrf.mxu1  ;;  %v1449_v41 = vrot.slane %v1447_v31, 1  ;;  %v1471_v31 = vshll.u32 %v3436_v21, 16 }
  0xe1   : > { %1182 = vst.msk [vmem:[#allocation2] sm:$0xff] %vm579_vm5, %v1148_v43 }
  0xe2   : > { %v1115_v47 = vld [vmem:[#allocation2 + $0x8] sm:$0xff]  ;;  %v455_v48 = vpop.f32.mrf.mxu0  ;;  %v987_v60 = vpop.f32.mrf.mxu1  ;;  %3298 = vmatmul.mubr.msk.bf16.gmra.mxu1 %vm354_vm2, %v1963_v55  ;;  %v1969_v55 = vsel %vm1944_vm4, %v1966_v24, %v1968_v45  ;;  %v1453_v61 = vor.u32 %v1451_v51, %v1449_v41  ;;  %v1972_v24 = vrot.slane %v3433_v14, 1  ;;  %v1475_v51 = vshrl.u32 %v3436_v21, 16 }
  0xe3   : > { %583 = vst.msk [vmem:[#allocation2 + $0x18] sm:$0xff] %vm579_vm5, %v455_v48  ;;  %v1149_v53 = vadd.f32 %v1115_v47, %v982_v49  ;;  %3301 = vmatprep.mubr.msk.bf16.mxu1 %vm3465_vm1, %v3464_v1 }
  0xe4   : > { %v3056_v54 = vpop.f32.mrf.mxu0  ;;  %v3127_v4 = vpop.f32.mrf.mxu1 }
  0xe5   : > { %1183 = vst.msk [vmem:[#allocation2 + $0x8] sm:$0xff] %vm579_vm5, %v1149_v53 }
  0xe6   : > { %v1116_v58 = vld [vmem:[#allocation2 + $0x10] sm:$0xff]  ;;  %v460_v59 = vpop.f32.mrf.mxu0  ;;  %3230 = vmatmul.mubr.msk.bf16.gmra.mxu0 %vm354_vm2, %v1426_v50  ;;  %v990_v7 = vpop.f32.mrf.mxu1  ;;  %v1450_v50 = vsel %vm741_vm3, %v1445_v40, %v1449_v41  ;;  %v1469_v40 = vor.u32 %v1467_v30, %v1465_v20  ;;  %v1473_v41 = vrot.slane %v1471_v31, 1 }
  0xe7   : > { %584 = vst.msk [vmem:[#allocation2 + $0x20] sm:$0xff] %vm579_vm5, %v460_v59  ;;  %3233 = vmatprep.mubr.msk.bf16.mxu0 %vm3465_vm1, %v3464_v1  ;;  %v1150_v0 = vadd.f32 %v1116_v58, %v987_v60 }
  0xe8   : > { %v3059_v2 = vpop.f32.mrf.mxu0  ;;  %v3128_v15 = vpop.f32.mrf.mxu1 }
  0xe9   : > { %1184 = vst.msk [vmem:[#allocation2 + $0x10] sm:$0xff] %vm579_vm5, %v1150_v0 }
  0xea   : > { %v1117_v5 = vld [vmem:[#allocation2 + $0x18] sm:$0xff]  ;;  %v463_v6 = vpop.f32.mrf.mxu0  ;;  %v995_v18 = vpop.f32.mrf.mxu1  ;;  %3302 = vmatmul.mubr.msk.bf16.gmra.mxu1 %vm354_vm2, %v1965_v13  ;;  %v1971_v13 = vsel %vm1944_vm4, %v1968_v45, %v1970_v3  ;;  %v1974_v45 = vrot.slane %v3435_v35, 1 }
  0xeb   : > { %585 = vst.msk [vmem:[#allocation2 + $0x28] sm:$0xff] %vm579_vm5, %v463_v6  ;;  %v1151_v11 = vadd.f32 %v1117_v5, %v990_v7  ;;  %3305 = vmatprep.mubr.msk.bf16.mxu1 %vm3465_vm1, %v3464_v1 }
  0xec   : > { %v3060_v12 = vpop.f32.mrf.mxu0  ;;  %v3131_v25 = vpop.f32.mrf.mxu1 }
  0xed   : > { %1185 = vst.msk [vmem:[#allocation2 + $0x18] sm:$0xff] %vm579_vm5, %v1151_v11 }
  0xee   : > { %v1118_v16 = vld [vmem:[#allocation2 + $0x20] sm:$0xff]  ;;  %v468_v17 = vpop.f32.mrf.mxu0  ;;  %3234 = vmatmul.mubr.msk.bf16.gmra.mxu0 %vm354_vm2, %v1434_v8  ;;  %v998_v28 = vpop.f32.mrf.mxu1  ;;  %v1458_v8 = vsel %vm741_vm3, %v1453_v61, %v1457_v62  ;;  %v1477_v61 = vor.u32 %v1475_v51, %v1473_v41  ;;  %v1481_v62 = vrot.slane %v1479_v52, 1 }
  0xef   : > { %586 = vst.msk [vmem:[#allocation2 + $0x30] sm:$0xff] %vm579_vm5, %v468_v17  ;;  %3237 = vmatprep.mubr.msk.bf16.mxu0 %vm3465_vm1, %v3464_v1  ;;  %v1152_v22 = vadd.f32 %v1118_v16, %v995_v18 }
  0xf0   : > { %v3063_v23 = vpop.f32.mrf.mxu0  ;;  %v3132_v36 = vpop.f32.mrf.mxu1 }
  0xf1   : > { %1186 = vst.msk [vmem:[#allocation2 + $0x20] sm:$0xff] %vm579_vm5, %v1152_v22 }
  0xf2   : > { %v1119_v26 = vld [vmem:[#allocation2 + $0x28] sm:$0xff]  ;;  %v471_v27 = vpop.f32.mrf.mxu0  ;;  %v1003_v39 = vpop.f32.mrf.mxu1  ;;  %3306 = vmatmul.mubr.msk.bf16.gmra.mxu1 %vm354_vm2, %v1967_v34  ;;  %v1973_v34 = vsel %vm1944_vm4, %v1970_v3, %v1972_v24 }
  0xf3   : > { %587 = vst.msk [vmem:[#allocation2 + $0x38] sm:$0xff] %vm579_vm5, %v471_v27  ;;  %v1153_v32 = vadd.f32 %v1119_v26, %v998_v28  ;;  %3309 = vmatprep.mubr.msk.bf16.mxu1 %vm3465_vm1, %v3464_v1 }
  0xf4   : > { %v3064_v33 = vpop.f32.mrf.mxu0  ;;  %v3135_v46 = vpop.f32.mrf.mxu1 }
  0xf5   : > { %1187 = vst.msk [vmem:[#allocation2 + $0x28] sm:$0xff] %vm579_vm5, %v1153_v32 }
  0xf6   : > { %v1120_v37 = vld [vmem:[#allocation2 + $0x30] sm:$0xff]  ;;  %v476_v38 = vpop.f32.mrf.mxu0  ;;  %3238 = vmatmul.mubr.msk.bf16.gmra.mxu0 %vm354_vm2, %v1442_v29  ;;  %v1006_v49 = vpop.f32.mrf.mxu1  ;;  %v1466_v29 = vsel %vm741_vm3, %v1461_v19, %v1465_v20 }
  0xf7   : > { %588 = vst.msk [vmem:[#allocation2 + $0x40] sm:$0xff] %vm579_vm5, %v476_v38  ;;  %3241 = vmatprep.mubr.msk.bf16.mxu0 %vm3465_vm1, %v3464_v1  ;;  %v1154_v43 = vadd.f32 %v1120_v37, %v1003_v39 }
  0xf8   : > { %v3067_v44 = vpop.f32.mrf.mxu0  ;;  %v3136_v57 = vpop.f32.mrf.mxu1 }
  0xf9   : > { %1188 = vst.msk [vmem:[#allocation2 + $0x30] sm:$0xff] %vm579_vm5, %v1154_v43 }
  0xfa   : > { %v1121_v47 = vld [vmem:[#allocation2 + $0x38] sm:$0xff]  ;;  %v479_v48 = vpop.f32.mrf.mxu0  ;;  %v1011_v60 = vpop.f32.mrf.mxu1  ;;  %3310 = vmatmul.mubr.msk.bf16.gmra.mxu1 %vm354_vm2, %v1969_v55  ;;  %v1975_v55 = vsel %vm1944_vm4, %v1972_v24, %v1974_v45 }
  0xfb   : > { %589 = vst.msk [vmem:[#allocation2 + $0x48] sm:$0xff] %vm579_vm5, %v479_v48  ;;  %v1155_v53 = vadd.f32 %v1121_v47, %v1006_v49  ;;  %3313 = vmatprep.mubr.msk.bf16.mxu1 %vm3465_vm1, %v3464_v1 }
  0xfc   : > { %v3068_v54 = vpop.f32.mrf.mxu0  ;;  %v3139_v4 = vpop.f32.mrf.mxu1 }
  0xfd   : > { %1189 = vst.msk [vmem:[#allocation2 + $0x38] sm:$0xff] %vm579_vm5, %v1155_v53 }
  0xfe   : > { %v1122_v58 = vld [vmem:[#allocation2 + $0x40] sm:$0xff]  ;;  %v484_v59 = vpop.f32.mrf.mxu0  ;;  %3242 = vmatmul.mubr.msk.bf16.gmra.mxu0 %vm354_vm2, %v1450_v50  ;;  %v1014_v7 = vpop.f32.mrf.mxu1  ;;  %v1474_v50 = vsel %vm741_vm3, %v1469_v40, %v1473_v41 }
  0xff   : > { %590 = vst.msk [vmem:[#allocation2 + $0x50] sm:$0xff] %vm579_vm5, %v484_v59  ;;  %3245 = vmatprep.mubr.msk.bf16.mxu0 %vm3465_vm1, %v3464_v1  ;;  %v1156_v0 = vadd.f32 %v1122_v58, %v1011_v60 }
 0x100   : > { %v3071_v2 = vpop.f32.mrf.mxu0  ;;  %v3140_v15 = vpop.f32.mrf.mxu1 }
 0x101   : > { %1190 = vst.msk [vmem:[#allocation2 + $0x40] sm:$0xff] %vm579_vm5, %v1156_v0  ;;  %v1976_v2 = vrot.slane %v3437_v56, 1 }
 0x102   : > { %v1123_v5 = vld [vmem:[#allocation2 + $0x48] sm:$0xff]  ;;  %v487_v6 = vpop.f32.mrf.mxu0  ;;  %v1019_v18 = vpop.f32.mrf.mxu1  ;;  %3314 = vmatmul.mubr.msk.bf16.gmra.mxu1 %vm354_vm2, %v1971_v13 }
 0x103   : > { %591 = vst.msk [vmem:[#allocation2 + $0x58] sm:$0xff] %vm579_vm5, %v487_v6  ;;  %v1157_v11 = vadd.f32 %v1123_v5, %v1014_v7  ;;  %3317 = vmatprep.mubr.msk.bf16.mxu1 %vm3465_vm1, %v3464_v1  ;;  %v1482_v7 = vsel %vm741_vm3, %v1477_v61, %v1481_v62  ;;  %v1977_v10 = vsel %vm1944_vm4, %v1974_v45, %v1976_v2 }
 0x104   : > { %v3072_v12 = vpop.f32.mrf.mxu0  ;;  %v3143_v25 = vpop.f32.mrf.mxu1 }
 0x105   : > { %1191 = vst.msk [vmem:[#allocation2 + $0x48] sm:$0xff] %vm579_vm5, %v1157_v11  ;;  %v3439_v11 = vld [vmem:[%s3535_s29 + $0x90] ss:$0 sps:$4 sm:$0x11]  }
 0x106   : > { %v1124_v16 = vld [vmem:[#allocation2 + $0x50] sm:$0xff]  ;;  %v492_v17 = vpop.f32.mrf.mxu0  ;;  %3246 = vmatmul.mubr.msk.bf16.gmra.mxu0 %vm354_vm2, %v1458_v8  ;;  %v1022_v28 = vpop.f32.mrf.mxu1 }
 0x107   : > { %592 = vst.msk [vmem:[#allocation2 + $0x60] sm:$0xff] %vm579_vm5, %v492_v17  ;;  %3249 = vmatprep.mubr.msk.bf16.mxu0 %vm3465_vm1, %v3464_v1  ;;  %v1158_v22 = vadd.f32 %v1124_v16, %v1019_v18  ;;  %v1978_v18 = vrot.slane %v3439_v11, 1 }
 0x108   : > { %v3075_v23 = vpop.f32.mrf.mxu0  ;;  %v3144_v36 = vpop.f32.mrf.mxu1 }
 0x109   : > { %1192 = vst.msk [vmem:[#allocation2 + $0x50] sm:$0xff] %vm579_vm5, %v1158_v22  ;;  %v1979_v25 = vsel %vm1944_vm4, %v1976_v2, %v1978_v18 }
 0x10a   : > { %v1125_v26 = vld [vmem:[#allocation2 + $0x58] sm:$0xff]  ;;  %v495_v27 = vpop.f32.mrf.mxu0  ;;  %v1027_v39 = vpop.f32.mrf.mxu1  ;;  %3318 = vmatmul.mubr.msk.bf16.gmra.mxu1 %vm354_vm2, %v1973_v34 }
 0x10b   : > { %593 = vst.msk [vmem:[#allocation2 + $0x68] sm:$0xff] %vm579_vm5, %v495_v27  ;;  %v1159_v32 = vadd.f32 %v1125_v26, %v1022_v28  ;;  %3321 = vmatprep.mubr.msk.bf16.mxu1 %vm3465_vm1, %v3464_v1 }
 0x10c   : > { %v3076_v33 = vpop.f32.mrf.mxu0  ;;  %v3147_v46 = vpop.f32.mrf.mxu1 }
 0x10d   : > { %1193 = vst.msk [vmem:[#allocation2 + $0x58] sm:$0xff] %vm579_vm5, %v1159_v32 }
 0x10e   : > { %v1126_v37 = vld [vmem:[#allocation2 + $0x60] sm:$0xff]  ;;  %v500_v38 = vpop.f32.mrf.mxu0  ;;  %3250 = vmatmul.mubr.msk.bf16.gmra.mxu0 %vm354_vm2, %v1466_v29  ;;  %v1030_v49 = vpop.f32.mrf.mxu1 }
 0x10f   : > { %594 = vst.msk [vmem:[#allocation2 + $0x70] sm:$0xff] %vm579_vm5, %v500_v38  ;;  %3253 = vmatprep.mubr.msk.bf16.mxu0 %vm3465_vm1, %v3464_v1  ;;  %v1160_v43 = vadd.f32 %v1126_v37, %v1027_v39 }
 0x110   : > { %v3079_v44 = vpop.f32.mrf.mxu0  ;;  %v3148_v57 = vpop.f32.mrf.mxu1 }
 0x111   : > { %1194 = vst.msk [vmem:[#allocation2 + $0x60] sm:$0xff] %vm579_vm5, %v1160_v43 }
 0x112   : > { %v1127_v47 = vld [vmem:[#allocation2 + $0x68] sm:$0xff]  ;;  %v503_v48 = vpop.f32.mrf.mxu0  ;;  %v1035_v60 = vpop.f32.mrf.mxu1  ;;  %3322 = vmatmul.mubr.msk.bf16.gmra.mxu1 %vm354_vm2, %v1975_v55 }
 0x113   : > { %595 = vst.msk [vmem:[#allocation2 + $0x78] sm:$0xff] %vm579_vm5, %v503_v48  ;;  %v1161_v53 = vadd.f32 %v1127_v47, %v1030_v49  ;;  %3325 = vmatprep.mubr.msk.bf16.mxu1 %vm3465_vm1, %v3464_v1 }
 0x114   : > { %v3080_v54 = vpop.f32.mrf.mxu0  ;;  %v3151_v3 = vpop.f32.mrf.mxu1 }
 0x115   : > { %1195 = vst.msk [vmem:[#allocation2 + $0x68] sm:$0xff] %vm579_vm5, %v1161_v53 }
 0x116   : > { %v1128_v58 = vld [vmem:[#allocation2 + $0x70] sm:$0xff]  ;;  %v508_v59 = vpop.f32.mrf.mxu0  ;;  %3254 = vmatmul.mubr.msk.bf16.gmra.mxu0 %vm354_vm2, %v1474_v50  ;;  %v1038_v6 = vpop.f32.mrf.mxu1 }
 0x117   : > { %596 = vst.msk [vmem:[#allocation2 + $0x80] sm:$0xff] %vm579_vm5, %v508_v59  ;;  %3257 = vmatprep.mubr.msk.bf16.mxu0 %vm3465_vm1, %v3464_v1  ;;  %v1162_v63 = vadd.f32 %v1128_v58, %v1035_v60 }
 0x118   : > { %v3083_v0 = vpop.f32.mrf.mxu0  ;;  %v3152_v12 = vpop.f32.mrf.mxu1 }
 0x119   : > { %1196 = vst.msk [vmem:[#allocation2 + $0x70] sm:$0xff] %vm579_vm5, %v1162_v63 }
 0x11a   : > { %v1129_v4 = vld [vmem:[#allocation2 + $0x78] sm:$0xff]  ;;  %v511_v5 = vpop.f32.mrf.mxu0  ;;  %v1043_v15 = vpop.f32.mrf.mxu1  ;;  %3326 = vmatmul.mubr.msk.bf16.gmra.mxu1 %vm354_vm2, %v1977_v10 }
 0x11b   : > { %597 = vst.msk [vmem:[#allocation2 + $0x88] sm:$0xff] %vm579_vm5, %v511_v5  ;;  %v1163_v8 = vadd.f32 %v1129_v4, %v1038_v6  ;;  %3329 = vmatprep.mubr.msk.bf16.mxu1 %vm3465_vm1, %v3464_v1 }
 0x11c   : > { %v3084_v9 = vpop.f32.mrf.mxu0  ;;  %v3155_v19 = vpop.f32.mrf.mxu1 }
 0x11d   : > { %1197 = vst.msk [vmem:[#allocation2 + $0x78] sm:$0xff] %vm579_vm5, %v1163_v8 }
 0x11e   : > { %v1130_v13 = vld [vmem:[#allocation2 + $0x80] sm:$0xff]  ;;  %v516_v14 = vpop.f32.mrf.mxu0  ;;  %3258 = vmatmul.mubr.msk.bf16.gmra.mxu0 %vm354_vm2, %v1482_v7  ;;  %v1046_v22 = vpop.f32.mrf.mxu1 }
 0x11f   : > { %598 = vst.msk [vmem:[#allocation2 + $0x90] sm:$0xff] %vm579_vm5, %v516_v14  ;;  %v1164_v16 = vadd.f32 %v1130_v13, %v1043_v15 }
 0x120   : > { %v3087_v17 = vpop.f32.mrf.mxu0  ;;  %v3156_v26 = vpop.f32.mrf.mxu1 }
 0x121   : > { %1198 = vst.msk [vmem:[#allocation2 + $0x80] sm:$0xff] %vm579_vm5, %v1164_v16 }
 0x122   : > { %v1131_v20 = vld [vmem:[#allocation2 + $0x88] sm:$0xff]  ;;  %v519_v21 = vpop.f32.mrf.mxu0  ;;  %v1051_v29 = vpop.f32.mrf.mxu1  ;;  %3330 = vmatmul.mubr.msk.bf16.gmra.mxu1 %vm354_vm2, %v1979_v25 }
 0x123   : > { %599 = vst.msk [vmem:[#allocation2 + $0x98] sm:$0xff] %vm579_vm5, %v519_v21  ;;  %v1165_v23 = vadd.f32 %v1131_v20, %v1046_v22 }
 0x124   : > { %v3088_v24 = vpop.f32.mrf.mxu0  ;;  %v3159_v31 = vpop.f32.mrf.mxu1 }
 0x125   : > { %1199 = vst.msk [vmem:[#allocation2 + $0x88] sm:$0xff] %vm579_vm5, %v1165_v23 }
 0x126   : > { %v1132_v27 = vld [vmem:[#allocation2 + $0x90] sm:$0xff]  ;;  %v524_v28 = vpop.f32.mrf.mxu0  ;;  %v1054_v34 = vpop.f32.mrf.mxu1 }
 0x127   : > { %600 = vst.msk [vmem:[#allocation2 + $0xa0] sm:$0xff] %vm579_vm5, %v524_v28  ;;  %v1166_v1 = vadd.f32 %v1132_v27, %v1051_v29 }
 0x128   : > { %v3091_v30 = vpop.f32.mrf.mxu0  ;;  %v3160_v37 = vpop.f32.mrf.mxu1 }
 0x129   : > { %1200 = vst.msk [vmem:[#allocation2 + $0x90] sm:$0xff] %vm579_vm5, %v1166_v1 }
 0x12a   : > { %v1133_v32 = vld [vmem:[#allocation2 + $0x98] sm:$0xff]  ;;  %v527_v33 = vpop.f32.mrf.mxu0  ;;  %v1059_v40 = vpop.f32.mrf.mxu1 }
 0x12b   : > { %601 = vst.msk [vmem:[#allocation2 + $0xa8] sm:$0xff] %vm579_vm5, %v527_v33  ;;  %v1167_v35 = vadd.f32 %v1133_v32, %v1054_v34 }
 0x12c   : > { %v3092_v36 = vpop.f32.mrf.mxu0  ;;  %v3163_v43 = vpop.f32.mrf.mxu1 }
 0x12d   : > { %1201 = vst.msk [vmem:[#allocation2 + $0x98] sm:$0xff] %vm579_vm5, %v1167_v35 }
 0x12e   : > { %v1134_v38 = vld [vmem:[#allocation2 + $0xa0] sm:$0xff]  ;;  %v532_v39 = vpop.f32.mrf.mxu0  ;;  %v1062_v46 = vpop.f32.mrf.mxu1 }
 0x12f   : > { %602 = vst.msk [vmem:[#allocation2 + $0xb0] sm:$0xff] %vm579_vm5, %v532_v39  ;;  %v1168_v41 = vadd.f32 %v1134_v38, %v1059_v40 }
 0x130   : > { %v3095_v42 = vpop.f32.mrf.mxu0  ;;  %v3164_v49 = vpop.f32.mrf.mxu1 }
 0x131   : > { %1202 = vst.msk [vmem:[#allocation2 + $0xa0] sm:$0xff] %vm579_vm5, %v1168_v41 }
 0x132   : > { %v1135_v44 = vld [vmem:[#allocation2 + $0xa8] sm:$0xff]  ;;  %v535_v45 = vpop.f32.mrf.mxu0  ;;  %v1067_v52 = vpop.f32.mrf.mxu1 }
 0x133   : > { %603 = vst.msk [vmem:[#allocation2 + $0xb8] sm:$0xff] %vm579_vm5, %v535_v45  ;;  %v1169_v47 = vadd.f32 %v1135_v44, %v1062_v46 }
 0x134   : > { %v3096_v48 = vpop.f32.mrf.mxu0  ;;  %v3167_v55 = vpop.f32.mrf.mxu1 }
 0x135   : > { %1203 = vst.msk [vmem:[#allocation2 + $0xa8] sm:$0xff] %vm579_vm5, %v1169_v47  ;;  %v1715_v48 = vld [vmem:[#allocation2] sm:$0xff] }
 0x136   : > { %v1136_v50 = vld [vmem:[#allocation2 + $0xb0] sm:$0xff]  ;;  %v540_v51 = vpop.f32.mrf.mxu0  ;;  %v1070_v58 = vpop.f32.mrf.mxu1 }
 0x137   : > { %604 = vst.msk [vmem:[#allocation2 + $0xc0] sm:$0xff] %vm579_vm5, %v540_v51  ;;  %v1170_v53 = vadd.f32 %v1136_v50, %v1067_v52 }
 0x138   : > { %v3099_v54 = vpop.f32.mrf.mxu0  ;;  %v3168_v61 = vpop.f32.mrf.mxu1 }
 0x139   : > { %1204 = vst.msk [vmem:[#allocation2 + $0xb0] sm:$0xff] %vm579_vm5, %v1170_v53 }
 0x13a   : > { %v1137_v56 = vld [vmem:[#allocation2 + $0xb8] sm:$0xff]  ;;  %v543_v57 = vpop.f32.mrf.mxu0  ;;  %v1075_v0 = vpop.f32.mrf.mxu1 }
 0x13b   : > { %605 = vst.msk [vmem:[#allocation2 + $0xc8] sm:$0xff] %vm579_vm5, %v543_v57  ;;  %v1171_v59 = vadd.f32 %v1137_v56, %v1070_v58  ;;  %v1716_v56 = vld [vmem:[#allocation2 + $0x8] sm:$0xff] }
 0x13c   : > { %v3100_v60 = vpop.f32.mrf.mxu0  ;;  %v3171_v4 = vpop.f32.mrf.mxu1 }
 0x13d   : > { %1205 = vst.msk [vmem:[#allocation2 + $0xb8] sm:$0xff] %vm579_vm5, %v1171_v59 }
 0x13e   : > { %v1138_v62 = vld [vmem:[#allocation2 + $0xc0] sm:$0xff]  ;;  %v548_v63 = vpop.f32.mrf.mxu0  ;;  %v1078_v7 = vpop.f32.mrf.mxu1 }
 0x13f   : > { %606 = vst.msk [vmem:[#allocation2 + $0xd0] sm:$0xff] %vm579_vm5, %v548_v63  ;;  %v1172_v2 = vadd.f32 %v1138_v62, %v1075_v0  ;;  %v1717_v63 = vld [vmem:[#allocation2 + $0x10] sm:$0xff] }
 0x140   : > { %v3103_v3 = vpop.f32.mrf.mxu0  ;;  %v3172_v10 = vpop.f32.mrf.mxu1 }
 0x141   : > { %1206 = vst.msk [vmem:[#allocation2 + $0xc0] sm:$0xff] %vm579_vm5, %v1172_v2 }
 0x142   : > { %v1139_v5 = vld [vmem:[#allocation2 + $0xc8] sm:$0xff]  ;;  %v551_v6 = vpop.f32.mrf.mxu0  ;;  %v1083_v13 = vpop.f32.mrf.mxu1 }
 0x143   : > { %607 = vst.msk [vmem:[#allocation2 + $0xd8] sm:$0xff] %vm579_vm5, %v551_v6  ;;  %v1173_v8 = vadd.f32 %v1139_v5, %v1078_v7 }
 0x144   : > { %v3104_v9 = vpop.f32.mrf.mxu0  ;;  %v3175_v16 = vpop.f32.mrf.mxu1 }
 0x145   : > { %1207 = vst.msk [vmem:[#allocation2 + $0xc8] sm:$0xff] %vm579_vm5, %v1173_v8  ;;  %v1718_v8 = vld [vmem:[#allocation2 + $0x18] sm:$0xff]  ;;  %v1719_v16 = vld [vmem:[#allocation2 + $0x20] sm:$0xff] }
 0x146   : > { %v1140_v11 = vld [vmem:[#allocation2 + $0xd0] sm:$0xff]  ;;  %v556_v12 = vpop.f32.mrf.mxu0  ;;  %v1086_v19 = vpop.f32.mrf.mxu1 }
 0x147   : > { %608 = vst.msk [vmem:[#allocation2 + $0xe0] sm:$0xff] %vm579_vm5, %v556_v12  ;;  %v1174_v14 = vadd.f32 %v1140_v11, %v1083_v13 }
 0x148   : > { %v3107_v15 = vpop.f32.mrf.mxu0  ;;  %v3176_v22 = vpop.f32.mrf.mxu1 }
 0x149   : > { %1208 = vst.msk [vmem:[#allocation2 + $0xd0] sm:$0xff] %vm579_vm5, %v1174_v14 }
 0x14a   : > { %v1141_v17 = vld [vmem:[#allocation2 + $0xd8] sm:$0xff]  ;;  %v559_v18 = vpop.f32.mrf.mxu0  ;;  %v1091_v25 = vpop.f32.mrf.mxu1 }
 0x14b   : > { %609 = vst.msk [vmem:[#allocation2 + $0xe8] sm:$0xff] %vm579_vm5, %v559_v18  ;;  %v1175_v20 = vadd.f32 %v1141_v17, %v1086_v19  ;;  %v3951_v19 = vld [vmem:[%s4134_s2] ss:$0 sm:$0xff] }
 0x14c   : > { %v3108_v21 = vpop.f32.mrf.mxu0  ;;  %v3179_v28 = vpop.f32.mrf.mxu1 }
 0x14d   : > { %1209 = vst.msk [vmem:[#allocation2 + $0xd8] sm:$0xff] %vm579_vm5, %v1175_v20 }
 0x14e   : > { %v1142_v23 = vld [vmem:[#allocation2 + $0xe0] sm:$0xff]  ;;  %v564_v24 = vpop.f32.mrf.mxu0  ;;  %v1094_v30 = vpop.f32.mrf.mxu1 }
 0x14f   : > { %610 = vst.msk [vmem:[#allocation2 + $0xf0] sm:$0xff] %vm579_vm5, %v564_v24  ;;  %v1176_v26 = vadd.f32 %v1142_v23, %v1091_v25 }
 0x150   : > { %v3111_v27 = vpop.f32.mrf.mxu0  ;;  %v3180_v33 = vpop.f32.mrf.mxu1 }
 0x151   : > { %1210 = vst.msk [vmem:[#allocation2 + $0xe0] sm:$0xff] %vm579_vm5, %v1176_v26  ;;  %v1720_v26 = vld [vmem:[#allocation2 + $0x28] sm:$0xff] }
 0x152   : > { %v1143_v29 = vld [vmem:[#allocation2 + $0xe8] sm:$0xff]  ;;  %v567_v1 = vpop.f32.mrf.mxu0  ;;  %v1099_v36 = vpop.f32.mrf.mxu1 }
 0x153   : > { %611 = vst.msk [vmem:[#allocation2 + $0xf8] sm:$0xff] %vm579_vm5, %v567_v1  ;;  %v1177_v31 = vadd.f32 %v1143_v29, %v1094_v30 }
 0x154   : > { %v3112_v32 = vpop.f32.mrf.mxu0  ;;  %v3183_v39 = vpop.f32.mrf.mxu1 }
 0x155   : > { %1211 = vst.msk [vmem:[#allocation2 + $0xe8] sm:$0xff] %vm579_vm5, %v1177_v31 }
 0x156   : > { %v1144_v34 = vld [vmem:[#allocation2 + $0xf0] sm:$0xff]  ;;  %v572_v35 = vpop.f32.mrf.mxu0  ;;  %v1102_v42 = vpop.f32.mrf.mxu1 }
 0x157   : > { %612 = vst.msk [vmem:[#allocation2 + $0x100] sm:$0xff] %vm579_vm5, %v572_v35  ;;  %v1178_v37 = vadd.f32 %v1144_v34, %v1099_v36  ;;  %v1721_v36 = vld [vmem:[#allocation2 + $0x30] sm:$0xff] }
 0x158   : > { %v3115_v38 = vpop.f32.mrf.mxu0  ;;  %v3184_v45 = vpop.f32.mrf.mxu1 }
 0x159   : > { %1212 = vst.msk [vmem:[#allocation2 + $0xf0] sm:$0xff] %vm579_vm5, %v1178_v37 }
 0x15a   : > { %v1145_v40 = vld [vmem:[#allocation2 + $0xf8] sm:$0xff]  ;;  %v575_v41 = vpop.f32.mrf.mxu0  ;;  %v1107_v49 = vpop.f32.mrf.mxu1 }
 0x15b   : > { %613 = vst.msk [vmem:[#allocation2 + $0x108] sm:$0xff] %vm579_vm5, %v575_v41  ;;  %v1179_v43 = vadd.f32 %v1145_v40, %v1102_v42 }
 0x15c   : > { %v3116_v44 = vpop.f32.mrf.mxu0  ;;  %v3187_v53 = vpop.f32.mrf.mxu1 }
 0x15d   : > { %1213 = vst.msk [vmem:[#allocation2 + $0xf8] sm:$0xff] %vm579_vm5, %v1179_v43 }
 0x15e   : > { %v1146_v46 = vld [vmem:[#allocation2 + $0x100] sm:$0xff]  ;;  %v1580_v47 = vpop.f32.mrf.mxu0  ;;  %v1110_v57 = vpop.f32.mrf.mxu1 }
 0x15f   : > { %v1749_v50 = vadd.f32 %v1715_v48, %v1580_v47  ;;  %v1180_v51 = vadd.f32 %v1146_v46, %v1107_v49  ;;  %v1722_v49 = vld [vmem:[#allocation2 + $0x38] sm:$0xff] }
 0x160   : > { %v3195_v52 = vpop.f32.mrf.mxu0  ;;  %v3188_v61 = vpop.f32.mrf.mxu1 }
 0x161   : > { %1783 = vst.msk [vmem:[#allocation2] sm:$0xff] %vm579_vm5, %v1749_v50  ;;  %1214 = vst.msk [vmem:[#allocation2 + $0x100] sm:$0xff] %vm579_vm5, %v1180_v51 }
 0x162   : > { %v1147_v54 = vld [vmem:[#allocation2 + $0x108] sm:$0xff]  ;;  %v1583_v55 = vpop.f32.mrf.mxu0  ;;  %v2077_v0 = vpop.f32.mrf.mxu1 }
 0x163   : > { %v1750_v58 = vadd.f32 %v1716_v56, %v1583_v55  ;;  %v1181_v59 = vadd.f32 %v1147_v54, %v1110_v57 }
 0x164   : > { %v3196_v60 = vpop.f32.mrf.mxu0  ;;  %v3267_v6 = vpop.f32.mrf.mxu1 }
 0x165   : > { %1784 = vst.msk [vmem:[#allocation2 + $0x8] sm:$0xff] %vm579_vm5, %v1750_v58  ;;  %1215 = vst.msk [vmem:[#allocation2 + $0x108] sm:$0xff] %vm579_vm5, %v1181_v59 }
 0x166   : > { %v1588_v62 = vpop.f32.mrf.mxu0  ;;  %v2080_v9 = vpop.f32.mrf.mxu1 }
 0x167   : > { %v1751_v2 = vadd.f32 %v1717_v63, %v1588_v62  ;;  %v1723_v62 = vld [vmem:[#allocation2 + $0x40] sm:$0xff] }
 0x168   : > { %v2212_v3 = vld [vmem:[#allocation2] sm:$0xff]  ;;  %v3199_v4 = vpop.f32.mrf.mxu0  ;;  %v3268_v14 = vpop.f32.mrf.mxu1 }
 0x169   : > { %v2246_v5 = vadd.f32 %v2212_v3, %v2077_v0  ;;  %1785 = vst.msk [vmem:[#allocation2 + $0x10] sm:$0xff] %vm579_vm5, %v1751_v2 }
 0x16a   : > { %v1591_v7 = vpop.f32.mrf.mxu0  ;;  %v2085_v17 = vpop.f32.mrf.mxu1 }
 0x16b   : > { %2280 = vst.msk [vmem:[#allocation2] sm:$0xff] %vm579_vm5, %v2246_v5  ;;  %v1752_v10 = vadd.f32 %v1718_v8, %v1591_v7 }
 0x16c   : > { %v2213_v11 = vld [vmem:[#allocation2 + $0x8] sm:$0xff]  ;;  %v3200_v12 = vpop.f32.mrf.mxu0  ;;  %v3271_v23 = vpop.f32.mrf.mxu1 }
 0x16d   : > { %v2247_v13 = vadd.f32 %v2213_v11, %v2080_v9  ;;  %1786 = vst.msk [vmem:[#allocation2 + $0x18] sm:$0xff] %vm579_vm5, %v1752_v10  ;;  %v1724_v12 = vld [vmem:[#allocation2 + $0x48] sm:$0xff] }
 0x16e   : > { %v1596_v15 = vpop.f32.mrf.mxu0  ;;  %v2088_v28 = vpop.f32.mrf.mxu1 }
 0x16f   : > { %2281 = vst.msk [vmem:[#allocation2 + $0x8] sm:$0xff] %vm579_vm5, %v2247_v13  ;;  %v1753_v18 = vadd.f32 %v1719_v16, %v1596_v15 }
 0x170   : > { %v2214_v20 = vld [vmem:[#allocation2 + $0x10] sm:$0xff]  ;;  %v3203_v21 = vpop.f32.mrf.mxu0  ;;  %v3272_v33 = vpop.f32.mrf.mxu1 }
 0x171   : > { %v2248_v22 = vadd.f32 %v2214_v20, %v2085_v17  ;;  %1787 = vst.msk [vmem:[#allocation2 + $0x20] sm:$0xff] %vm579_vm5, %v1753_v18 }
 0x172   : > { %v2314_v24 = vld [vmem:[#allocation2] sm:$0xff]  ;;  %v1599_v25 = vpop.f32.mrf.mxu0  ;;  %v2093_v39 = vpop.f32.mrf.mxu1 }
 0x173   : > { %v2355_v27 = vadd.f32 %v3951_v19, %v2314_v24  ;;  %2282 = vst.msk [vmem:[#allocation2 + $0x10] sm:$0xff] %vm579_vm5, %v2248_v22  ;;  %v1754_v29 = vadd.f32 %v1720_v26, %v1599_v25  ;;  %v1725_v26 = vld [vmem:[#allocation2 + $0x50] sm:$0xff] }
 0x174   : > { %v2215_v1 = vld [vmem:[#allocation2 + $0x18] sm:$0xff]  ;;  %v3204_v30 = vpop.f32.mrf.mxu0  ;;  %v3275_v46 = vpop.f32.mrf.mxu1 }
 0x175   : > { %v2389_v31 = vmul.f32 0.2, %v2355_v27  ;;  %v2249_v32 = vadd.f32 %v2215_v1, %v2088_v28  ;;  %1788 = vst.msk [vmem:[#allocation2 + $0x28] sm:$0xff] %vm579_vm5, %v1754_v29 }
 0x176   : > { %v2315_v34 = vld [vmem:[#allocation2 + $0x8] sm:$0xff]  ;;  %v1604_v35 = vpop.f32.mrf.mxu0  ;;  %v2096_v52 = vpop.f32.mrf.mxu1 }
 0x177   : > { %v2423_v37 = vmax.f32 %v2355_v27, %v2389_v31  ;;  %v2356_v38 = vadd.f32 %v3951_v19, %v2315_v34  ;;  %2283 = vst.msk [vmem:[#allocation2 + $0x18] sm:$0xff] %vm579_vm5, %v2249_v32  ;;  %v1755_v40 = vadd.f32 %v1721_v36, %v1604_v35 }
 0x178   : > { %v2216_v41 = vld [vmem:[#allocation2 + $0x20] sm:$0xff]  ;;  %v3207_v42 = vpop.f32.mrf.mxu0  ;;  %v3276_v59 = vpop.f32.mrf.mxu1 }
 0x179   : > { %v2935_v43 = vpack.c.bf16 %v2423_v37, %v2423_v37  ;;  %v2390_v44 = vmul.f32 0.2, %v2356_v38  ;;  %v2250_v45 = vadd.f32 %v2216_v41, %v2093_v39  ;;  %1789 = vst.msk [vmem:[#allocation2 + $0x30] sm:$0xff] %vm579_vm5, %v1755_v40 }
 0x17a   : > { %v2316_v47 = vld [vmem:[#allocation2 + $0x10] sm:$0xff]  ;;  %v1607_v48 = vpop.f32.mrf.mxu0  ;;  %v2101_v2 = vpop.f32.mrf.mxu1 }
 0x17b   : > { %2594 = vst.msk [vmem:[%s3963_s12] sm:$0xf] %vm2593_vm6, %v2935_v43  ;;  %v2424_v50 = vmax.f32 %v2356_v38, %v2390_v44  ;;  %v2357_v51 = vadd.f32 %v3951_v19, %v2316_v47  ;;  %v1756_v53 = vadd.f32 %v1722_v49, %v1607_v48  ;;  %v1726_v38 = vld [vmem:[#allocation2 + $0x58] sm:$0xff] }
 0x17c   : > { %2284 = vst.msk [vmem:[#allocation2 + $0x20] sm:$0xff] %vm579_vm5, %v2250_v45  ;;  %v2217_v54 = vld [vmem:[#allocation2 + $0x28] sm:$0xff]  ;;  %v3208_v55 = vpop.f32.mrf.mxu0  ;;  %v3279_v9 = vpop.f32.mrf.mxu1 }
 0x17d   : > { %v2936_v56 = vpack.c.bf16 %v2424_v50, %v2424_v50  ;;  %v2391_v57 = vmul.f32 0.2, %v2357_v51  ;;  %v2251_v58 = vadd.f32 %v2217_v54, %v2096_v52  ;;  %1790 = vst.msk [vmem:[#allocation2 + $0x38] sm:$0xff] %vm579_vm5, %v1756_v53 }
 0x17e   : > { %v2317_v60 = vld [vmem:[#allocation2 + $0x18] sm:$0xff]  ;;  %v1612_v61 = vpop.f32.mrf.mxu0  ;;  %v2104_v15 = vpop.f32.mrf.mxu1 }
 0x17f   : > { %2595 = vst.msk [vmem:[%s3963_s12 + $0x4] sm:$0xf] %vm2593_vm6, %v2936_v56  ;;  %v2425_v63 = vmax.f32 %v2357_v51, %v2391_v57  ;;  %v2358_v0 = vadd.f32 %v3951_v19, %v2317_v60  ;;  %v1757_v3 = vadd.f32 %v1723_v62, %v1612_v61  ;;  %v1727_v51 = vld [vmem:[#allocation2 + $0x60] sm:$0xff] }
 0x180   : > { %2285 = vst.msk [vmem:[#allocation2 + $0x28] sm:$0xff] %vm579_vm5, %v2251_v58  ;;  %v2218_v4 = vld [vmem:[#allocation2 + $0x30] sm:$0xff]  ;;  %v3211_v5 = vpop.f32.mrf.mxu0  ;;  %v3280_v23 = vpop.f32.mrf.mxu1 }
 0x181   : > { %v2937_v6 = vpack.c.bf16 %v2425_v63, %v2425_v63  ;;  %v2392_v7 = vmul.f32 0.2, %v2358_v0  ;;  %v2252_v8 = vadd.f32 %v2218_v4, %v2101_v2  ;;  %1791 = vst.msk [vmem:[#allocation2 + $0x40] sm:$0xff] %vm579_vm5, %v1757_v3 }
 0x182   : > { %v1615_v11 = vpop.f32.mrf.mxu0  ;;  %v2109_v29 = vpop.f32.mrf.mxu1 }
 0x183   : > { %v2318_v10 = vld [vmem:[#allocation2 + $0x20] sm:$0xff]  ;;  %2596 = vst.msk [vmem:[%s3963_s12 + $0x8] sm:$0xf] %vm2593_vm6, %v2937_v6  ;;  %v2426_v13 = vmax.f32 %v2358_v0, %v2392_v7  ;;  %v1758_v16 = vadd.f32 %v1724_v12, %v1615_v11  ;;  %v1728_v0 = vld [vmem:[#allocation2 + $0x68] sm:$0xff] }
 0x184   : > { %v2359_v14 = vadd.f32 %v3951_v19, %v2318_v10  ;;  %2286 = vst.msk [vmem:[#allocation2 + $0x30] sm:$0xff] %vm579_vm5, %v2252_v8  ;;  %v2219_v17 = vld [vmem:[#allocation2 + $0x38] sm:$0xff]  ;;  %v3212_v18 = vpop.f32.mrf.mxu0  ;;  %v3283_v35 = vpop.f32.mrf.mxu1 }
 0x185   : > { %v2938_v20 = vpack.c.bf16 %v2426_v13, %v2426_v13  ;;  %v2253_v22 = vadd.f32 %v2219_v17, %v2104_v15  ;;  %1792 = vst.msk [vmem:[#allocation2 + $0x48] sm:$0xff] %vm579_vm5, %v1758_v16 }
 0x186   : > { %v2393_v21 = vmul.f32 0.2, %v2359_v14  ;;  %v1620_v25 = vpop.f32.mrf.mxu0  ;;  %v2112_v41 = vpop.f32.mrf.mxu1 }
 0x187   : > { %v2319_v24 = vld [vmem:[#allocation2 + $0x28] sm:$0xff]  ;;  %2597 = vst.msk [vmem:[%s3963_s12 + $0xc] sm:$0xf] %vm2593_vm6, %v2938_v20  ;;  %v1759_v1 = vadd.f32 %v1725_v26, %v1620_v25 }
 0x188   : > { %v2427_v27 = vmax.f32 %v2359_v14, %v2393_v21  ;;  %v2360_v28 = vadd.f32 %v3951_v19, %v2319_v24  ;;  %2287 = vst.msk [vmem:[#allocation2 + $0x38] sm:$0xff] %vm579_vm5, %v2253_v22  ;;  %v2220_v30 = vld [vmem:[#allocation2 + $0x40] sm:$0xff]  ;;  %v3215_v31 = vpop.f32.mrf.mxu0  ;;  %v3284_v48 = vpop.f32.mrf.mxu1  ;;  %v1729_v14 = vld [vmem:[#allocation2 + $0x70] sm:$0xff] }
 0x189   : > { %v2254_v34 = vadd.f32 %v2220_v30, %v2109_v29  ;;  %1793 = vst.msk [vmem:[#allocation2 + $0x50] sm:$0xff] %vm579_vm5, %v1759_v1 }
 0x18a   : > { %v2939_v32 = vpack.c.bf16 %v2427_v27, %v2427_v27  ;;  %v2394_v33 = vmul.f32 0.2, %v2360_v28  ;;  %v1623_v37 = vpop.f32.mrf.mxu0  ;;  %v2117_v54 = vpop.f32.mrf.mxu1 }
 0x18b   : > { %v2320_v36 = vld [vmem:[#allocation2 + $0x30] sm:$0xff]  ;;  %2288 = vst.msk [vmem:[#allocation2 + $0x40] sm:$0xff] %vm579_vm5, %v2254_v34  ;;  %v1760_v42 = vadd.f32 %v1726_v38, %v1623_v37 }
 0x18c   : > { %2598 = vst.msk [vmem:[%s3963_s12 + $0x10] sm:$0xf] %vm2593_vm6, %v2939_v32  ;;  %v2428_v39 = vmax.f32 %v2360_v28, %v2394_v33  ;;  %v2361_v40 = vadd.f32 %v3951_v19, %v2320_v36  ;;  %v2221_v43 = vld [vmem:[#allocation2 + $0x48] sm:$0xff]  ;;  %v3216_v44 = vpop.f32.mrf.mxu0  ;;  %v3287_v61 = vpop.f32.mrf.mxu1  ;;  %v1730_v28 = vld [vmem:[#allocation2 + $0x78] sm:$0xff] }
 0x18d   : > { %v2255_v47 = vadd.f32 %v2221_v43, %v2112_v41  ;;  %1794 = vst.msk [vmem:[#allocation2 + $0x58] sm:$0xff] %vm579_vm5, %v1760_v42 }
 0x18e   : > { %v2940_v45 = vpack.c.bf16 %v2428_v39, %v2428_v39  ;;  %v2395_v46 = vmul.f32 0.2, %v2361_v40  ;;  %v1628_v50 = vpop.f32.mrf.mxu0  ;;  %v2120_v4 = vpop.f32.mrf.mxu1 }
 0x18f   : > { %v2321_v49 = vld [vmem:[#allocation2 + $0x38] sm:$0xff]  ;;  %2289 = vst.msk [vmem:[#allocation2 + $0x48] sm:$0xff] %vm579_vm5, %v2255_v47  ;;  %v1761_v55 = vadd.f32 %v1727_v51, %v1628_v50 }
 0x190   : > { %2599 = vst.msk [vmem:[%s3963_s12 + $0x14] sm:$0xf] %vm2593_vm6, %v2940_v45  ;;  %v2429_v52 = vmax.f32 %v2361_v40, %v2395_v46  ;;  %v2362_v53 = vadd.f32 %v3951_v19, %v2321_v49  ;;  %v2222_v56 = vld [vmem:[#allocation2 + $0x50] sm:$0xff]  ;;  %v3219_v57 = vpop.f32.mrf.mxu0  ;;  %v3288_v11 = vpop.f32.mrf.mxu1  ;;  %v1731_v40 = vld [vmem:[#allocation2 + $0x80] sm:$0xff] }
 0x191   : > { %v2256_v60 = vadd.f32 %v2222_v56, %v2117_v54  ;;  %1795 = vst.msk [vmem:[#allocation2 + $0x60] sm:$0xff] %vm579_vm5, %v1761_v55 }
 0x192   : > { %v2941_v58 = vpack.c.bf16 %v2429_v52, %v2429_v52  ;;  %v2396_v59 = vmul.f32 0.2, %v2362_v53  ;;  %v2322_v62 = vld [vmem:[#allocation2 + $0x40] sm:$0xff]  ;;  %v1631_v63 = vpop.f32.mrf.mxu0  ;;  %v2125_v17 = vpop.f32.mrf.mxu1 }
 0x193   : > { %v2363_v3 = vadd.f32 %v3951_v19, %v2322_v62  ;;  %2290 = vst.msk [vmem:[#allocation2 + $0x50] sm:$0xff] %vm579_vm5, %v2256_v60  ;;  %v1762_v5 = vadd.f32 %v1728_v0, %v1631_v63 }
 0x194   : > { %2600 = vst.msk [vmem:[%s3963_s12 + $0x18] sm:$0xf] %vm2593_vm6, %v2941_v58  ;;  %v2430_v2 = vmax.f32 %v2362_v53, %v2396_v59  ;;  %v2223_v6 = vld [vmem:[#allocation2 + $0x58] sm:$0xff]  ;;  %v3220_v7 = vpop.f32.mrf.mxu0  ;;  %v3291_v25 = vpop.f32.mrf.mxu1  ;;  %v1732_v53 = vld [vmem:[#allocation2 + $0x88] sm:$0xff] }
 0x195   : > { %v2397_v9 = vmul.f32 0.2, %v2363_v3  ;;  %v2257_v10 = vadd.f32 %v2223_v6, %v2120_v4  ;;  %1796 = vst.msk [vmem:[#allocation2 + $0x68] sm:$0xff] %vm579_vm5, %v1762_v5 }
 0x196   : > { %v2942_v8 = vpack.c.bf16 %v2430_v2, %v2430_v2  ;;  %v2323_v12 = vld [vmem:[#allocation2 + $0x48] sm:$0xff]  ;;  %v1636_v13 = vpop.f32.mrf.mxu0  ;;  %v2128_v30 = vpop.f32.mrf.mxu1 }
 0x197   : > { %v2431_v15 = vmax.f32 %v2363_v3, %v2397_v9  ;;  %v2364_v16 = vadd.f32 %v3951_v19, %v2323_v12  ;;  %2291 = vst.msk [vmem:[#allocation2 + $0x58] sm:$0xff] %vm579_vm5, %v2257_v10  ;;  %v1763_v18 = vadd.f32 %v1729_v14, %v1636_v13  ;;  %v1733_v3 = vld [vmem:[#allocation2 + $0x90] sm:$0xff] }
 0x198   : > { %2601 = vst.msk [vmem:[%s3963_s12 + $0x1c] sm:$0xf] %vm2593_vm6, %v2942_v8  ;;  %v2224_v20 = vld [vmem:[#allocation2 + $0x60] sm:$0xff]  ;;  %v3223_v21 = vpop.f32.mrf.mxu0  ;;  %v3292_v37 = vpop.f32.mrf.mxu1 }
 0x199   : > { %v2943_v22 = vpack.c.bf16 %v2431_v15, %v2431_v15  ;;  %v2398_v23 = vmul.f32 0.2, %v2364_v16  ;;  %v2258_v24 = vadd.f32 %v2224_v20, %v2125_v17  ;;  %1797 = vst.msk [vmem:[#allocation2 + $0x70] sm:$0xff] %vm579_vm5, %v1763_v18 }
 0x19a   : > { %v2324_v26 = vld [vmem:[#allocation2 + $0x50] sm:$0xff]  ;;  %v1639_v27 = vpop.f32.mrf.mxu0  ;;  %v2133_v43 = vpop.f32.mrf.mxu1 }
 0x19b   : > { %2602 = vst.msk [vmem:[%s3963_s12 + $0x20] sm:$0xf] %vm2593_vm6, %v2943_v22  ;;  %v2432_v29 = vmax.f32 %v2364_v16, %v2398_v23  ;;  %v2365_v1 = vadd.f32 %v3951_v19, %v2324_v26  ;;  %v1764_v31 = vadd.f32 %v1730_v28, %v1639_v27  ;;  %v1734_v16 = vld [vmem:[#allocation2 + $0x98] sm:$0xff] }
 0x19c   : > { %2292 = vst.msk [vmem:[#allocation2 + $0x60] sm:$0xff] %vm579_vm5, %v2258_v24  ;;  %v2225_v32 = vld [vmem:[#allocation2 + $0x68] sm:$0xff]  ;;  %v3224_v33 = vpop.f32.mrf.mxu0  ;;  %v3295_v50 = vpop.f32.mrf.mxu1 }
 0x19d   : > { %v2944_v34 = vpack.c.bf16 %v2432_v29, %v2432_v29  ;;  %v2399_v35 = vmul.f32 0.2, %v2365_v1  ;;  %v2259_v36 = vadd.f32 %v2225_v32, %v2128_v30  ;;  %1798 = vst.msk [vmem:[#allocation2 + $0x78] sm:$0xff] %vm579_vm5, %v1764_v31 }
 0x19e   : > { %v2325_v38 = vld [vmem:[#allocation2 + $0x58] sm:$0xff]  ;;  %v1644_v39 = vpop.f32.mrf.mxu0  ;;  %v2136_v56 = vpop.f32.mrf.mxu1 }
 0x19f   : > { %2603 = vst.msk [vmem:[%s3963_s12 + $0x24] sm:$0xf] %vm2593_vm6, %v2944_v34  ;;  %v2433_v41 = vmax.f32 %v2365_v1, %v2399_v35  ;;  %v2366_v42 = vadd.f32 %v3951_v19, %v2325_v38  ;;  %v1765_v44 = vadd.f32 %v1731_v40, %v1644_v39  ;;  %v1735_v1 = vld [vmem:[#allocation2 + $0xa0] sm:$0xff] }
 0x1a0   : > { %2293 = vst.msk [vmem:[#allocation2 + $0x68] sm:$0xff] %vm579_vm5, %v2259_v36  ;;  %v2226_v45 = vld [vmem:[#allocation2 + $0x70] sm:$0xff]  ;;  %v3227_v46 = vpop.f32.mrf.mxu0  ;;  %v3296_v63 = vpop.f32.mrf.mxu1 }
 0x1a1   : > { %v2945_v47 = vpack.c.bf16 %v2433_v41, %v2433_v41  ;;  %v2400_v48 = vmul.f32 0.2, %v2366_v42  ;;  %v2260_v49 = vadd.f32 %v2226_v45, %v2133_v43  ;;  %1799 = vst.msk [vmem:[#allocation2 + $0x80] sm:$0xff] %vm579_vm5, %v1765_v44 }
 0x1a2   : > { %v1647_v52 = vpop.f32.mrf.mxu0  ;;  %v2141_v6 = vpop.f32.mrf.mxu1 }
 0x1a3   : > { %v2326_v51 = vld [vmem:[#allocation2 + $0x60] sm:$0xff]  ;;  %2604 = vst.msk [vmem:[%s3963_s12 + $0x28] sm:$0xf] %vm2593_vm6, %v2945_v47  ;;  %v2434_v54 = vmax.f32 %v2366_v42, %v2400_v48  ;;  %v1766_v57 = vadd.f32 %v1732_v53, %v1647_v52  ;;  %v1736_v42 = vld [vmem:[#allocation2 + $0xa8] sm:$0xff] }
 0x1a4   : > { %v2367_v55 = vadd.f32 %v3951_v19, %v2326_v51  ;;  %2294 = vst.msk [vmem:[#allocation2 + $0x70] sm:$0xff] %vm579_vm5, %v2260_v49  ;;  %v2227_v58 = vld [vmem:[#allocation2 + $0x78] sm:$0xff]  ;;  %v3228_v59 = vpop.f32.mrf.mxu0  ;;  %v3299_v13 = vpop.f32.mrf.mxu1 }
 0x1a5   : > { %v2946_v60 = vpack.c.bf16 %v2434_v54, %v2434_v54  ;;  %v2261_v62 = vadd.f32 %v2227_v58, %v2136_v56  ;;  %1800 = vst.msk [vmem:[#allocation2 + $0x88] sm:$0xff] %vm579_vm5, %v1766_v57 }
 0x1a6   : > { %v2401_v61 = vmul.f32 0.2, %v2367_v55  ;;  %v1652_v2 = vpop.f32.mrf.mxu0  ;;  %v2144_v20 = vpop.f32.mrf.mxu1 }
 0x1a7   : > { %v2327_v0 = vld [vmem:[#allocation2 + $0x68] sm:$0xff]  ;;  %2605 = vst.msk [vmem:[%s3963_s12 + $0x2c] sm:$0xf] %vm2593_vm6, %v2946_v60  ;;  %v1767_v7 = vadd.f32 %v1733_v3, %v1652_v2 }
 0x1a8   : > { %v2435_v4 = vmax.f32 %v2367_v55, %v2401_v61  ;;  %v2368_v5 = vadd.f32 %v3951_v19, %v2327_v0  ;;  %2295 = vst.msk [vmem:[#allocation2 + $0x78] sm:$0xff] %vm579_vm5, %v2261_v62  ;;  %v2228_v8 = vld [vmem:[#allocation2 + $0x80] sm:$0xff]  ;;  %v3231_v9 = vpop.f32.mrf.mxu0  ;;  %v3300_v27 = vpop.f32.mrf.mxu1  ;;  %v1737_v55 = vld [vmem:[#allocation2 + $0xb0] sm:$0xff] }
 0x1a9   : > { %v2262_v12 = vadd.f32 %v2228_v8, %v2141_v6  ;;  %1801 = vst.msk [vmem:[#allocation2 + $0x90] sm:$0xff] %vm579_vm5, %v1767_v7 }
 0x1aa   : > { %v2947_v10 = vpack.c.bf16 %v2435_v4, %v2435_v4  ;;  %v2402_v11 = vmul.f32 0.2, %v2368_v5  ;;  %v1655_v15 = vpop.f32.mrf.mxu0  ;;  %v2149_v32 = vpop.f32.mrf.mxu1 }
 0x1ab   : > { %v2328_v14 = vld [vmem:[#allocation2 + $0x70] sm:$0xff]  ;;  %2296 = vst.msk [vmem:[#allocation2 + $0x80] sm:$0xff] %vm579_vm5, %v2262_v12  ;;  %v1768_v21 = vadd.f32 %v1734_v16, %v1655_v15 }
 0x1ac   : > { %2606 = vst.msk [vmem:[%s3963_s12 + $0x30] sm:$0xf] %vm2593_vm6, %v2947_v10  ;;  %v2436_v17 = vmax.f32 %v2368_v5, %v2402_v11  ;;  %v2369_v18 = vadd.f32 %v3951_v19, %v2328_v14  ;;  %v2229_v22 = vld [vmem:[#allocation2 + $0x88] sm:$0xff]  ;;  %v3232_v23 = vpop.f32.mrf.mxu0  ;;  %v3303_v39 = vpop.f32.mrf.mxu1  ;;  %v1738_v5 = vld [vmem:[#allocation2 + $0xb8] sm:$0xff] }
 0x1ad   : > { %v2263_v26 = vadd.f32 %v2229_v22, %v2144_v20  ;;  %1802 = vst.msk [vmem:[#allocation2 + $0x98] sm:$0xff] %vm579_vm5, %v1768_v21 }
 0x1ae   : > { %v2948_v24 = vpack.c.bf16 %v2436_v17, %v2436_v17  ;;  %v2403_v25 = vmul.f32 0.2, %v2369_v18  ;;  %v1660_v29 = vpop.f32.mrf.mxu0  ;;  %v2152_v45 = vpop.f32.mrf.mxu1 }
 0x1af   : > { %v2329_v28 = vld [vmem:[#allocation2 + $0x78] sm:$0xff]  ;;  %2297 = vst.msk [vmem:[#allocation2 + $0x88] sm:$0xff] %vm579_vm5, %v2263_v26  ;;  %v1769_v33 = vadd.f32 %v1735_v1, %v1660_v29 }
 0x1b0   : > { %2607 = vst.msk [vmem:[%s3963_s12 + $0x34] sm:$0xf] %vm2593_vm6, %v2948_v24  ;;  %v2437_v30 = vmax.f32 %v2369_v18, %v2403_v25  ;;  %v2370_v31 = vadd.f32 %v3951_v19, %v2329_v28  ;;  %v2230_v34 = vld [vmem:[#allocation2 + $0x90] sm:$0xff]  ;;  %v3235_v35 = vpop.f32.mrf.mxu0  ;;  %v3304_v52 = vpop.f32.mrf.mxu1  ;;  %v1739_v18 = vld [vmem:[#allocation2 + $0xc0] sm:$0xff] }
 0x1b1   : > { %v2264_v38 = vadd.f32 %v2230_v34, %v2149_v32  ;;  %1803 = vst.msk [vmem:[#allocation2 + $0xa0] sm:$0xff] %vm579_vm5, %v1769_v33 }
 0x1b2   : > { %v2949_v36 = vpack.c.bf16 %v2437_v30, %v2437_v30  ;;  %v2404_v37 = vmul.f32 0.2, %v2370_v31  ;;  %v2330_v40 = vld [vmem:[#allocation2 + $0x80] sm:$0xff]  ;;  %v1663_v41 = vpop.f32.mrf.mxu0  ;;  %v2157_v58 = vpop.f32.mrf.mxu1 }
 0x1b3   : > { %v2371_v44 = vadd.f32 %v3951_v19, %v2330_v40  ;;  %2298 = vst.msk [vmem:[#allocation2 + $0x90] sm:$0xff] %vm579_vm5, %v2264_v38  ;;  %v1770_v46 = vadd.f32 %v1736_v42, %v1663_v41 }
 0x1b4   : > { %2608 = vst.msk [vmem:[%s3963_s12 + $0x38] sm:$0xf] %vm2593_vm6, %v2949_v36  ;;  %v2438_v43 = vmax.f32 %v2370_v31, %v2404_v37  ;;  %v2231_v47 = vld [vmem:[#allocation2 + $0x98] sm:$0xff]  ;;  %v3236_v48 = vpop.f32.mrf.mxu0  ;;  %v3307_v2 = vpop.f32.mrf.mxu1  ;;  %v1740_v31 = vld [vmem:[#allocation2 + $0xc8] sm:$0xff] }
 0x1b5   : > { %v2405_v50 = vmul.f32 0.2, %v2371_v44  ;;  %v2265_v51 = vadd.f32 %v2231_v47, %v2152_v45  ;;  %1804 = vst.msk [vmem:[#allocation2 + $0xa8] sm:$0xff] %vm579_vm5, %v1770_v46 }
 0x1b6   : > { %v2950_v49 = vpack.c.bf16 %v2438_v43, %v2438_v43  ;;  %v2331_v53 = vld [vmem:[#allocation2 + $0x88] sm:$0xff]  ;;  %v1668_v54 = vpop.f32.mrf.mxu0  ;;  %v2160_v8 = vpop.f32.mrf.mxu1 }
 0x1b7   : > { %v2439_v56 = vmax.f32 %v2371_v44, %v2405_v50  ;;  %v2372_v57 = vadd.f32 %v3951_v19, %v2331_v53  ;;  %2299 = vst.msk [vmem:[#allocation2 + $0x98] sm:$0xff] %vm579_vm5, %v2265_v51  ;;  %v1771_v59 = vadd.f32 %v1737_v55, %v1668_v54  ;;  %v1741_v44 = vld [vmem:[#allocation2 + $0xd0] sm:$0xff] }
 0x1b8   : > { %2609 = vst.msk [vmem:[%s3963_s12 + $0x3c] sm:$0xf] %vm2593_vm6, %v2950_v49  ;;  %v2232_v60 = vld [vmem:[#allocation2 + $0xa0] sm:$0xff]  ;;  %v3239_v61 = vpop.f32.mrf.mxu0  ;;  %v3308_v15 = vpop.f32.mrf.mxu1 }
 0x1b9   : > { %v2951_v62 = vpack.c.bf16 %v2439_v56, %v2439_v56  ;;  %v2406_v63 = vmul.f32 0.2, %v2372_v57  ;;  %v2266_v0 = vadd.f32 %v2232_v60, %v2157_v58  ;;  %1805 = vst.msk [vmem:[#allocation2 + $0xb0] sm:$0xff] %vm579_vm5, %v1771_v59 }
 0x1ba   : > { %v2332_v3 = vld [vmem:[#allocation2 + $0x90] sm:$0xff]  ;;  %v1671_v4 = vpop.f32.mrf.mxu0  ;;  %v2165_v22 = vpop.f32.mrf.mxu1 }
 0x1bb   : > { %2610 = vst.msk [vmem:[%s3963_s12 + $0x40] sm:$0xf] %vm2593_vm6, %v2951_v62  ;;  %v2440_v6 = vmax.f32 %v2372_v57, %v2406_v63  ;;  %v2373_v7 = vadd.f32 %v3951_v19, %v2332_v3  ;;  %v1772_v9 = vadd.f32 %v1738_v5, %v1671_v4  ;;  %v1742_v57 = vld [vmem:[#allocation2 + $0xd8] sm:$0xff] }
 0x1bc   : > { %2300 = vst.msk [vmem:[#allocation2 + $0xa0] sm:$0xff] %vm579_vm5, %v2266_v0  ;;  %v2233_v10 = vld [vmem:[#allocation2 + $0xa8] sm:$0xff]  ;;  %v3240_v11 = vpop.f32.mrf.mxu0  ;;  %v3311_v29 = vpop.f32.mrf.mxu1 }
 0x1bd   : > { %v2952_v12 = vpack.c.bf16 %v2440_v6, %v2440_v6  ;;  %v2407_v13 = vmul.f32 0.2, %v2373_v7  ;;  %v2267_v14 = vadd.f32 %v2233_v10, %v2160_v8  ;;  %1806 = vst.msk [vmem:[#allocation2 + $0xb8] sm:$0xff] %vm579_vm5, %v1772_v9 }
 0x1be   : > { %v2333_v16 = vld [vmem:[#allocation2 + $0x98] sm:$0xff]  ;;  %v1676_v17 = vpop.f32.mrf.mxu0  ;;  %v2168_v34 = vpop.f32.mrf.mxu1 }
 0x1bf   : > { %2611 = vst.msk [vmem:[%s3963_s12 + $0x44] sm:$0xf] %vm2593_vm6, %v2952_v12  ;;  %v2441_v20 = vmax.f32 %v2373_v7, %v2407_v13  ;;  %v2374_v21 = vadd.f32 %v3951_v19, %v2333_v16  ;;  %v1773_v23 = vadd.f32 %v1739_v18, %v1676_v17  ;;  %v1743_v7 = vld [vmem:[#allocation2 + $0xe0] sm:$0xff] }
 0x1c0   : > { %2301 = vst.msk [vmem:[#allocation2 + $0xa8] sm:$0xff] %vm579_vm5, %v2267_v14  ;;  %v2234_v24 = vld [vmem:[#allocation2 + $0xb0] sm:$0xff]  ;;  %v3243_v25 = vpop.f32.mrf.mxu0  ;;  %v3312_v41 = vpop.f32.mrf.mxu1 }
 0x1c1   : > { %v2953_v26 = vpack.c.bf16 %v2441_v20, %v2441_v20  ;;  %v2408_v27 = vmul.f32 0.2, %v2374_v21  ;;  %v2268_v28 = vadd.f32 %v2234_v24, %v2165_v22  ;;  %1807 = vst.msk [vmem:[#allocation2 + $0xc0] sm:$0xff] %vm579_vm5, %v1773_v23 }
 0x1c2   : > { %v1679_v30 = vpop.f32.mrf.mxu0  ;;  %v2173_v47 = vpop.f32.mrf.mxu1 }
 0x1c3   : > { %v2334_v1 = vld [vmem:[#allocation2 + $0xa0] sm:$0xff]  ;;  %2612 = vst.msk [vmem:[%s3963_s12 + $0x48] sm:$0xf] %vm2593_vm6, %v2953_v26  ;;  %v2442_v32 = vmax.f32 %v2374_v21, %v2408_v27  ;;  %v1774_v35 = vadd.f32 %v1740_v31, %v1679_v30  ;;  %v1744_v21 = vld [vmem:[#allocation2 + $0xe8] sm:$0xff] }
 0x1c4   : > { %v2375_v33 = vadd.f32 %v3951_v19, %v2334_v1  ;;  %2302 = vst.msk [vmem:[#allocation2 + $0xb0] sm:$0xff] %vm579_vm5, %v2268_v28  ;;  %v2235_v36 = vld [vmem:[#allocation2 + $0xb8] sm:$0xff]  ;;  %v3244_v37 = vpop.f32.mrf.mxu0  ;;  %v3315_v54 = vpop.f32.mrf.mxu1 }
 0x1c5   : > { %v2954_v38 = vpack.c.bf16 %v2442_v32, %v2442_v32  ;;  %v2269_v40 = vadd.f32 %v2235_v36, %v2168_v34  ;;  %1808 = vst.msk [vmem:[#allocation2 + $0xc8] sm:$0xff] %vm579_vm5, %v1774_v35 }
 0x1c6   : > { %v2409_v39 = vmul.f32 0.2, %v2375_v33  ;;  %v1684_v43 = vpop.f32.mrf.mxu0  ;;  %v2176_v60 = vpop.f32.mrf.mxu1 }
 0x1c7   : > { %v2335_v42 = vld [vmem:[#allocation2 + $0xa8] sm:$0xff]  ;;  %2613 = vst.msk [vmem:[%s3963_s12 + $0x4c] sm:$0xf] %vm2593_vm6, %v2954_v38  ;;  %v1775_v48 = vadd.f32 %v1741_v44, %v1684_v43 }
 0x1c8   : > { %v2443_v45 = vmax.f32 %v2375_v33, %v2409_v39  ;;  %v2376_v46 = vadd.f32 %v3951_v19, %v2335_v42  ;;  %2303 = vst.msk [vmem:[#allocation2 + $0xb8] sm:$0xff] %vm579_vm5, %v2269_v40  ;;  %v2236_v49 = vld [vmem:[#allocation2 + $0xc0] sm:$0xff]  ;;  %v3247_v50 = vpop.f32.mrf.mxu0  ;;  %v3316_v4 = vpop.f32.mrf.mxu1  ;;  %v1745_v33 = vld [vmem:[#allocation2 + $0xf0] sm:$0xff] }
 0x1c9   : > { %v2270_v53 = vadd.f32 %v2236_v49, %v2173_v47  ;;  %1809 = vst.msk [vmem:[#allocation2 + $0xd0] sm:$0xff] %vm579_vm5, %v1775_v48 }
 0x1ca   : > { %v2955_v51 = vpack.c.bf16 %v2443_v45, %v2443_v45  ;;  %v2410_v52 = vmul.f32 0.2, %v2376_v46  ;;  %v1687_v56 = vpop.f32.mrf.mxu0  ;;  %v2181_v10 = vpop.f32.mrf.mxu1 }
 0x1cb   : > { %v2336_v55 = vld [vmem:[#allocation2 + $0xb0] sm:$0xff]  ;;  %2304 = vst.msk [vmem:[#allocation2 + $0xc0] sm:$0xff] %vm579_vm5, %v2270_v53  ;;  %v1776_v61 = vadd.f32 %v1742_v57, %v1687_v56 }
 0x1cc   : > { %2614 = vst.msk [vmem:[%s3963_s12 + $0x50] sm:$0xf] %vm2593_vm6, %v2955_v51  ;;  %v2444_v58 = vmax.f32 %v2376_v46, %v2410_v52  ;;  %v2377_v59 = vadd.f32 %v3951_v19, %v2336_v55  ;;  %v2237_v62 = vld [vmem:[#allocation2 + $0xc8] sm:$0xff]  ;;  %v3248_v63 = vpop.f32.mrf.mxu0  ;;  %v3319_v17 = vpop.f32.mrf.mxu1  ;;  %v1746_v46 = vld [vmem:[#allocation2 + $0xf8] sm:$0xff] }
 0x1cd   : > { %v2271_v3 = vadd.f32 %v2237_v62, %v2176_v60  ;;  %1810 = vst.msk [vmem:[#allocation2 + $0xd8] sm:$0xff] %vm579_vm5, %v1776_v61 }
 0x1ce   : > { %v2956_v0 = vpack.c.bf16 %v2444_v58, %v2444_v58  ;;  %v2411_v2 = vmul.f32 0.2, %v2377_v59  ;;  %v1692_v6 = vpop.f32.mrf.mxu0  ;;  %v2184_v24 = vpop.f32.mrf.mxu1 }
 0x1cf   : > { %v2337_v5 = vld [vmem:[#allocation2 + $0xb8] sm:$0xff]  ;;  %2305 = vst.msk [vmem:[#allocation2 + $0xc8] sm:$0xff] %vm579_vm5, %v2271_v3  ;;  %v1777_v11 = vadd.f32 %v1743_v7, %v1692_v6 }
 0x1d0   : > { %2615 = vst.msk [vmem:[%s3963_s12 + $0x54] sm:$0xf] %vm2593_vm6, %v2956_v0  ;;  %v2445_v8 = vmax.f32 %v2377_v59, %v2411_v2  ;;  %v2378_v9 = vadd.f32 %v3951_v19, %v2337_v5  ;;  %v2238_v12 = vld [vmem:[#allocation2 + $0xd0] sm:$0xff]  ;;  %v3251_v13 = vpop.f32.mrf.mxu0  ;;  %v3320_v30 = vpop.f32.mrf.mxu1  ;;  %v1747_v59 = vld [vmem:[#allocation2 + $0x100] sm:$0xff] }
 0x1d1   : > { %v2272_v16 = vadd.f32 %v2238_v12, %v2181_v10  ;;  %1811 = vst.msk [vmem:[#allocation2 + $0xe0] sm:$0xff] %vm579_vm5, %v1777_v11 }
 0x1d2   : > { %v2957_v14 = vpack.c.bf16 %v2445_v8, %v2445_v8  ;;  %v2412_v15 = vmul.f32 0.2, %v2378_v9  ;;  %v2338_v18 = vld [vmem:[#allocation2 + $0xc0] sm:$0xff]  ;;  %v1695_v20 = vpop.f32.mrf.mxu0  ;;  %v2189_v36 = vpop.f32.mrf.mxu1 }
 0x1d3   : > { %v2379_v23 = vadd.f32 %v3951_v19, %v2338_v18  ;;  %2306 = vst.msk [vmem:[#allocation2 + $0xd0] sm:$0xff] %vm579_vm5, %v2272_v16  ;;  %v1778_v25 = vadd.f32 %v1744_v21, %v1695_v20 }
 0x1d4   : > { %2616 = vst.msk [vmem:[%s3963_s12 + $0x58] sm:$0xf] %vm2593_vm6, %v2957_v14  ;;  %v2446_v22 = vmax.f32 %v2378_v9, %v2412_v15  ;;  %v2239_v26 = vld [vmem:[#allocation2 + $0xd8] sm:$0xff]  ;;  %v3252_v27 = vpop.f32.mrf.mxu0  ;;  %v3323_v43 = vpop.f32.mrf.mxu1  ;;  %v1748_v9 = vld [vmem:[#allocation2 + $0x108] sm:$0xff] }
 0x1d5   : > { %v2413_v29 = vmul.f32 0.2, %v2379_v23  ;;  %v2273_v1 = vadd.f32 %v2239_v26, %v2184_v24  ;;  %1812 = vst.msk [vmem:[#allocation2 + $0xe8] sm:$0xff] %vm579_vm5, %v1778_v25 }
 0x1d6   : > { %v2958_v28 = vpack.c.bf16 %v2446_v22, %v2446_v22  ;;  %v2339_v31 = vld [vmem:[#allocation2 + $0xc8] sm:$0xff]  ;;  %v1700_v32 = vpop.f32.mrf.mxu0  ;;  %v2192_v49 = vpop.f32.mrf.mxu1 }
 0x1d7   : > { %v2447_v34 = vmax.f32 %v2379_v23, %v2413_v29  ;;  %v2380_v35 = vadd.f32 %v3951_v19, %v2339_v31  ;;  %2307 = vst.msk [vmem:[#allocation2 + $0xd8] sm:$0xff] %vm579_vm5, %v2273_v1  ;;  %v1779_v37 = vadd.f32 %v1745_v33, %v1700_v32 }
 0x1d8   : > { %2617 = vst.msk [vmem:[%s3963_s12 + $0x5c] sm:$0xf] %vm2593_vm6, %v2958_v28  ;;  %v2240_v38 = vld [vmem:[#allocation2 + $0xe0] sm:$0xff]  ;;  %v3255_v39 = vpop.f32.mrf.mxu0  ;;  %v3324_v56 = vpop.f32.mrf.mxu1 }
 0x1d9   : > { %v2959_v40 = vpack.c.bf16 %v2447_v34, %v2447_v34  ;;  %v2414_v41 = vmul.f32 0.2, %v2380_v35  ;;  %v2274_v42 = vadd.f32 %v2240_v38, %v2189_v36  ;;  %1813 = vst.msk [vmem:[#allocation2 + $0xf0] sm:$0xff] %vm579_vm5, %v1779_v37 }
 0x1da   : > { %v2340_v44 = vld [vmem:[#allocation2 + $0xd0] sm:$0xff]  ;;  %v1703_v45 = vpop.f32.mrf.mxu0  ;;  %v2197_v62 = vpop.f32.mrf.mxu1 }
 0x1db   : > { %2618 = vst.msk [vmem:[%s3963_s12 + $0x60] sm:$0xf] %vm2593_vm6, %v2959_v40  ;;  %v2448_v47 = vmax.f32 %v2380_v35, %v2414_v41  ;;  %v2381_v48 = vadd.f32 %v3951_v19, %v2340_v44  ;;  %v1780_v50 = vadd.f32 %v1746_v46, %v1703_v45 }
 0x1dc   : > { %2308 = vst.msk [vmem:[#allocation2 + $0xe0] sm:$0xff] %vm579_vm5, %v2274_v42  ;;  %v2241_v51 = vld [vmem:[#allocation2 + $0xe8] sm:$0xff]  ;;  %v3256_v52 = vpop.f32.mrf.mxu0  ;;  %v3327_v6 = vpop.f32.mrf.mxu1 }
 0x1dd   : > { %v2960_v53 = vpack.c.bf16 %v2448_v47, %v2448_v47  ;;  %v2415_v54 = vmul.f32 0.2, %v2381_v48  ;;  %v2275_v55 = vadd.f32 %v2241_v51, %v2192_v49  ;;  %1814 = vst.msk [vmem:[#allocation2 + $0xf8] sm:$0xff] %vm579_vm5, %v1780_v50 }
 0x1de   : > { %v2341_v57 = vld [vmem:[#allocation2 + $0xd8] sm:$0xff]  ;;  %v1708_v58 = vpop.f32.mrf.mxu0  ;;  %v2200_v12 = vpop.f32.mrf.mxu1 }
 0x1df   : > { %2619 = vst.msk [vmem:[%s3963_s12 + $0x64] sm:$0xf] %vm2593_vm6, %v2960_v53  ;;  %v2449_v60 = vmax.f32 %v2381_v48, %v2415_v54  ;;  %v2382_v61 = vadd.f32 %v3951_v19, %v2341_v57  ;;  %v1781_v63 = vadd.f32 %v1747_v59, %v1708_v58 }
 0x1e0   : > { %2309 = vst.msk [vmem:[#allocation2 + $0xe8] sm:$0xff] %vm579_vm5, %v2275_v55  ;;  %v2242_v0 = vld [vmem:[#allocation2 + $0xf0] sm:$0xff]  ;;  %v3259_v2 = vpop.f32.mrf.mxu0  ;;  %v3328_v20 = vpop.f32.mrf.mxu1 }
 0x1e1   : > { %v2961_v3 = vpack.c.bf16 %v2449_v60, %v2449_v60  ;;  %v2416_v4 = vmul.f32 0.2, %v2382_v61  ;;  %v2276_v5 = vadd.f32 %v2242_v0, %v2197_v62  ;;  %1815 = vst.msk [vmem:[#allocation2 + $0x100] sm:$0xff] %vm579_vm5, %v1781_v63 }
 0x1e2   : > { %v1711_v8 = vpop.f32.mrf.mxu0  ;;  %v2205_v24 = vpop.f32.mrf.mxu1 }
 0x1e3   : > { %v2342_v7 = vld [vmem:[#allocation2 + $0xe0] sm:$0xff]  ;;  %2620 = vst.msk [vmem:[%s3963_s12 + $0x68] sm:$0xf] %vm2593_vm6, %v2961_v3  ;;  %v2450_v10 = vmax.f32 %v2382_v61, %v2416_v4  ;;  %v1782_v13 = vadd.f32 %v1748_v9, %v1711_v8 }
 0x1e4   : > { %v2383_v11 = vadd.f32 %v3951_v19, %v2342_v7  ;;  %2310 = vst.msk [vmem:[#allocation2 + $0xf0] sm:$0xff] %vm579_vm5, %v2276_v5  ;;  %v2243_v14 = vld [vmem:[#allocation2 + $0xf8] sm:$0xff]  ;;  %v3260_v15 = vpop.f32.mrf.mxu0  ;;  %v3331_v29 = vpop.f32.mrf.mxu1 }
 0x1e5   : > { %v2962_v16 = vpack.c.bf16 %v2450_v10, %v2450_v10  ;;  %v2277_v18 = vadd.f32 %v2243_v14, %v2200_v12  ;;  %1816 = vst.msk [vmem:[#allocation2 + $0x108] sm:$0xff] %vm579_vm5, %v1782_v13 }
 0x1e6   : > { %v2417_v17 = vmul.f32 0.2, %v2383_v11  ;;  %v2208_v32 = vpop.f32.mrf.mxu1 }
 0x1e7   : > { %v2343_v21 = vld [vmem:[#allocation2 + $0xe8] sm:$0xff]  ;;  %2621 = vst.msk [vmem:[%s3963_s12 + $0x6c] sm:$0xf] %vm2593_vm6, %v2962_v16 }
 0x1e8   : > { %v2451_v22 = vmax.f32 %v2383_v11, %v2417_v17  ;;  %v2384_v23 = vadd.f32 %v3951_v19, %v2343_v21  ;;  %2311 = vst.msk [vmem:[#allocation2 + $0xf8] sm:$0xff] %vm579_vm5, %v2277_v18  ;;  %v2244_v25 = vld [vmem:[#allocation2 + $0x100] sm:$0xff]  ;;  %v3332_v37 = vpop.f32.mrf.mxu1 }
 0x1e9   : > { %v2278_v28 = vadd.f32 %v2244_v25, %v2205_v24 }
 0x1ea   : > { %v2963_v26 = vpack.c.bf16 %v2451_v22, %v2451_v22  ;;  %v2418_v27 = vmul.f32 0.2, %v2384_v23 }
 0x1eb   : > { %v2344_v1 = vld [vmem:[#allocation2 + $0xf0] sm:$0xff]  ;;  %2312 = vst.msk [vmem:[#allocation2 + $0x100] sm:$0xff] %vm579_vm5, %v2278_v28 }
 0x1ec   : > { %2622 = vst.msk [vmem:[%s3963_s12 + $0x70] sm:$0xf] %vm2593_vm6, %v2963_v26  ;;  %v2452_v30 = vmax.f32 %v2384_v23, %v2418_v27  ;;  %v2385_v31 = vadd.f32 %v3951_v19, %v2344_v1  ;;  %v2245_v33 = vld [vmem:[#allocation2 + $0x108] sm:$0xff] }
 0x1ed   : > { %v2279_v36 = vadd.f32 %v2245_v33, %v2208_v32 }
 0x1ee   : > { %v2964_v34 = vpack.c.bf16 %v2452_v30, %v2452_v30  ;;  %v2419_v35 = vmul.f32 0.2, %v2385_v31 }
 0x1ef   : > { %v2345_v38 = vld [vmem:[#allocation2 + $0xf8] sm:$0xff]  ;;  %2313 = vst.msk [vmem:[#allocation2 + $0x108] sm:$0xff] %vm579_vm5, %v2279_v36 }
 0x1f0   : > { %2623 = vst.msk [vmem:[%s3963_s12 + $0x74] sm:$0xf] %vm2593_vm6, %v2964_v34  ;;  %v2453_v39 = vmax.f32 %v2385_v31, %v2419_v35  ;;  %v2386_v40 = vadd.f32 %v3951_v19, %v2345_v38 }
 0x1f2   : > { %v2965_v41 = vpack.c.bf16 %v2453_v39, %v2453_v39  ;;  %v2420_v42 = vmul.f32 0.2, %v2386_v40  ;;  %v2346_v43 = vld [vmem:[#allocation2 + $0x100] sm:$0xff] }
 0x1f3   : > { %v2387_v45 = vadd.f32 %v3951_v19, %v2346_v43 }
 0x1f4   : > { %2624 = vst.msk [vmem:[%s3963_s12 + $0x78] sm:$0xf] %vm2593_vm6, %v2965_v41  ;;  %v2454_v44 = vmax.f32 %v2386_v40, %v2420_v42 }
 0x1f5   : > { %v2421_v47 = vmul.f32 0.2, %v2387_v45 }
 0x1f6   : > { %v2966_v46 = vpack.c.bf16 %v2454_v44, %v2454_v44  ;;  %v2347_v48 = vld [vmem:[#allocation2 + $0x108] sm:$0xff] }
 0x1f7   : > { %v2455_v49 = vmax.f32 %v2387_v45, %v2421_v47  ;;  %v2388_v50 = vadd.f32 %v3951_v19, %v2347_v48 }
 0x1f8   : > { %2625 = vst.msk [vmem:[%s3963_s12 + $0x7c] sm:$0xf] %vm2593_vm6, %v2966_v46 }
 0x1f9   : > { %v2967_v51 = vpack.c.bf16 %v2455_v49, %v2455_v49  ;;  %v2422_v52 = vmul.f32 0.2, %v2388_v50 }
 0x1fb   : > { %2626 = vst.msk [vmem:[%s3963_s12 + $0x80] sm:$0xf] %vm2593_vm6, %v2967_v51  ;;  %v2456_v53 = vmax.f32 %v2388_v50, %v2422_v52 }
 0x1fd   : > { %v2968_v54 = vpack.c.bf16 %v2456_v53, %v2456_v53 }
 0x1ff   : > { %2627 = vst.msk [vmem:[%s3963_s12 + $0x84] sm:$0xf] %vm2593_vm6, %v2968_v54 }
 0x200 PF: > { %s13_s14 = sadd.s32 1, %s3462_s14   ;;  %s4136_s12 = smov %s3458_s13 }
 0x201   : > { %p10_p5 = scmp.ge.s32.totalorder %s13_s14, 4   ;;  %s4137_s13 = smov %s4139_s15 }
 0x203   :  { %12 = sbr.rel (!%p10_p5) target bundleno = 2 (0x2), region = 71 }

// kernel: discriminator_forward.6
= control target key start
LH: loop header
LB: loop body
LE: loop exit
PB: predicated region body
PF: predicated region fallthrough
CT: control target
= control target key end

     0   :  { %s2521_s9 = smov 0   ;;  %s2523_s10 = smov 0   ;;  %s3316_s0 = inlined_call_operand.vmem [shape: bf16[2,82,256], index: 0, kind: input, shape index: {}]   ;;  %s3317_s1 = inlined_call_operand.vmem [shape: bf16[4,256,128], index: 1, kind: input, shape index: {}]   ;;  %s3318_s2 = inlined_call_operand.vmem [shape: bf16[2,72,128], index: 2, kind: output, shape index: {}]  }
   0x1   :  { %s2525_s11 = smov 0  }
   0x2 LB: > { %s24_s12 = sadd.s32 1, %s2500_s10  ;;  %p1916_p0 = scmp.ge.s32.totalorder %s2504_s11, 1  ;;  %s2504_s11 = sphi %s2525_s11, %s12_s11   ;;  %s2500_s10 = sphi %s2523_s10, %s3372_s10   ;;  %s2496_s9 = sphi %s2521_s9, %s3371_s9  }
   0x3   : > { %p26_p1 = scmp.ge.s32.totalorder %s24_s12, 2  ;;  %p135_p2 = scmp.lt.s32.totalorder %s2504_s11, 3 }
   0x5   : > { %s3374_s12 = smov (%p26_p1, %s24_s12), 0  ;;  %p136_p3 = pnand %p1916_p0, %p135_p2 }
   0x7   : > { %139 = sbr.rel (%p136_p3) target bundleno = 399 (0x18f), region = 28 }
   0xc   : > { %v2390_v0 = vld [vmem:[%s3317_s1 + $0x78] sm:$0xff]   ;;  %v2394_v4 = vld [vmem:[%s3317_s1 + $0x70] sm:$0xff]   ;;  %v2398_v8 = vld [vmem:[%s3317_s1 + $0x68] sm:$0xff]   ;;  %p164_p4 = scmp.lt.s32.totalorder %s2496_s9, 1  ;;  %vm530_vm0 = vsmask.f32 7424 }
   0xd   : > { %v2391_v1 = vld [vmem:[%s3317_s1 + $0xf8] sm:$0xff]   ;;  %2162 = vmatprep.subr.bf16.mxu0 %v2390_v0  ;;  %v2395_v5 = vld [vmem:[%s3317_s1 + $0xf0] sm:$0xff]   ;;  %v2399_v9 = vld [vmem:[%s3317_s1 + $0xe8] sm:$0xff]   ;;  %vm1263_vm1 = vcmask 1046528  }
   0xe   : > { %v2392_v2 = vld [vmem:[%s3317_s1 + $0x38] sm:$0xff]   ;;  %2208 = vmatprep.subr.bf16.mxu1 %v2391_v1  ;;  %v2396_v6 = vld [vmem:[%s3317_s1 + $0x30] sm:$0xff]   ;;  %v2400_v10 = vld [vmem:[%s3317_s1 + $0x28] sm:$0xff]   ;;  %s3376_s9 = smov (!%p164_p4, %s2496_s9), 1 }
   0xf   : > { %v2393_v3 = vld [vmem:[%s3317_s1 + $0xb8] sm:$0xff]   ;;  %2163 = vmatpush3.bf16.msra.mxu0 %v2392_v2  ;;  %v2397_v7 = vld [vmem:[%s3317_s1 + $0xb0] sm:$0xff]   ;;  %v2401_v11 = vld [vmem:[%s3317_s1 + $0xa8] sm:$0xff]   ;;  %s2346_s17 = smul.u32 88, %s3376_s9 }
  0x10   : > { %2209 = vmatpush3.bf16.msra.mxu1 %v2393_v3  ;;  %2164 = vmatprep.subr.bf16.mxu0 %v2394_v4  ;;  %v2402_v12 = vld [vmem:[%s3317_s1 + $0x60] sm:$0xff]   ;;  %v2406_v16 = vld [vmem:[%s3317_s1 + $0x58] sm:$0xff]   ;;  %v2410_v20 = vld [vmem:[%s3317_s1 + $0x50] sm:$0xff]  }
  0x11   : > { %2210 = vmatprep.subr.bf16.mxu1 %v2395_v5  ;;  %v2403_v13 = vld [vmem:[%s3317_s1 + $0xe0] sm:$0xff]   ;;  %v2407_v17 = vld [vmem:[%s3317_s1 + $0xd8] sm:$0xff]   ;;  %v2411_v21 = vld [vmem:[%s3317_s1 + $0xd0] sm:$0xff]   ;;  %s2639_s28 = scalar_lea.vmem %s3316_s0, %s2346_s17 }
  0x12   : > { %v2404_v14 = vld [vmem:[%s3317_s1 + $0x20] sm:$0xff]   ;;  %v2408_v18 = vld [vmem:[%s3317_s1 + $0x18] sm:$0xff]   ;;  %v2412_v22 = vld [vmem:[%s3317_s1 + $0x10] sm:$0xff]  }
  0x13   : > { %2165 = vmatpush3.bf16.msra.mxu0 %v2396_v6  ;;  %v2405_v15 = vld [vmem:[%s3317_s1 + $0xa0] sm:$0xff]   ;;  %v2409_v19 = vld [vmem:[%s3317_s1 + $0x98] sm:$0xff]   ;;  %v2413_v23 = vld [vmem:[%s3317_s1 + $0x90] sm:$0xff]  }
  0x14   : > { %2211 = vmatpush3.bf16.msra.mxu1 %v2397_v7  ;;  %2166 = vmatprep.subr.bf16.mxu0 %v2398_v8  ;;  %v2414_v24 = vld [vmem:[%s3317_s1 + $0x48] sm:$0xff]   ;;  %v2418_v28 = vld [vmem:[%s3317_s1 + $0x40] sm:$0xff]   ;;  %v2652_v34 = vld [vmem:[%s2639_s28 + $0x10] sm:$0xff] }
  0x15   : > { %2212 = vmatprep.subr.bf16.mxu1 %v2399_v9  ;;  %v2415_v25 = vld [vmem:[%s3317_s1 + $0xc8] sm:$0xff]   ;;  %v2419_v29 = vld [vmem:[%s3317_s1 + $0xc0] sm:$0xff]   ;;  %v2657_v37 = vld [vmem:[%s2639_s28 + $0x18] sm:$0xff] }
  0x16   : > { %v2416_v26 = vld [vmem:[%s3317_s1 + $0x8] sm:$0xff]   ;;  %v2420_v30 = vld [vmem:[%s3317_s1] sm:$0xff]   ;;  %v1980_v38 = vcombine.high %v2652_v34, %v2657_v37  ;;  %v1979_v39 = vcombine.low %v2652_v34, %v2657_v37  ;;  %v2426_v40 = vld [vmem:[%s3317_s1 + $0x178] sm:$0xff]  }
  0x17   : > { %2167 = vmatpush3.bf16.msra.mxu0 %v2400_v10  ;;  %v2417_v27 = vld [vmem:[%s3317_s1 + $0x88] sm:$0xff]   ;;  %v2421_v31 = vld [vmem:[%s3317_s1 + $0x80] sm:$0xff]   ;;  %v2427_v45 = vld [vmem:[%s3317_s1 + $0x138] sm:$0xff]  }
  0x18   : > { %2213 = vmatpush3.bf16.msra.mxu1 %v2401_v11  ;;  %2168 = vmatprep.subr.bf16.mxu0 %v2402_v12  ;;  %v182_v32 = vld [vmem:[%s2639_s28] sm:$0xff]  ;;  %v2649_v33 = vld [vmem:[%s2639_s28 + $0x8] sm:$0xff]  ;;  %v2428_v46 = vld [vmem:[%s3317_s1 + $0x1f8] sm:$0xff]   ;;  %v551_v47 = vshll.u32 %v1980_v38, 16  ;;  %v539_v48 = vshll.u32 %v1979_v39, 16  ;;  %v563_v60 = vshrl.u32 %v1980_v38, 16 }
  0x19   : > { %2214 = vmatprep.subr.bf16.mxu1 %v2403_v13  ;;  %v1919_v35 = vcombine.low %v182_v32, %v2649_v33  ;;  %v1920_v36 = vcombine.high %v182_v32, %v2649_v33  ;;  %v2429_v53 = vld [vmem:[%s3317_s1 + $0x1b8] sm:$0xff]   ;;  %v2430_v54 = vld [vmem:[%s3317_s1 + $0x170] sm:$0xff]   ;;  %v2682_v58 = vld [vmem:[%s2639_s28 + $0x20] sm:$0xff]  ;;  %v555_v61 = vshrl.u32 %v1979_v39, 16 }
  0x1a   : > { %v553_v51 = vrot.slane %v551_v47, 1  ;;  %v541_v52 = vrot.slane %v539_v48, 1  ;;  %v2431_v57 = vld [vmem:[%s3317_s1 + $0x130] sm:$0xff]   ;;  %v2685_v59 = vld [vmem:[%s2639_s28 + $0x28] sm:$0xff] }
  0x1b   : > { %2169 = vmatpush3.bf16.msra.mxu0 %v2404_v14  ;;  %398 = vmatprep.mubr.bf16.mxu0 %v1920_v36  ;;  %v544_v41 = vshrl.u32 %v1920_v36, 16  ;;  %v546_v42 = vshll.u32 %v1920_v36, 16  ;;  %v532_v43 = vshrl.u32 %v1919_v35, 16  ;;  %v534_v44 = vshll.u32 %v1919_v35, 16  ;;  %v2433_v1 = vld [vmem:[%s3317_s1 + $0x1f0] sm:$0xff]   ;;  %v2436_v8 = vld [vmem:[%s3317_s1 + $0x168] sm:$0xff]  }
  0x1c   : > { %2215 = vmatpush3.bf16.msra.mxu1 %v2405_v15  ;;  %2170 = vmatprep.subr.bf16.mxu0 %v2406_v16  ;;  %v1982_v0 = vcombine.high %v2682_v58, %v2685_v59  ;;  %v1981_v2 = vcombine.low %v2682_v58, %v2685_v59  ;;  %v2435_v3 = vld [vmem:[%s3317_s1 + $0x1b0] sm:$0xff]   ;;  %v565_v4 = vor.u32 %v563_v60, %v553_v51  ;;  %v2437_v12 = vld [vmem:[%s3317_s1 + $0x128] sm:$0xff]  }
  0x1d   : > { %2216 = vmatprep.subr.bf16.mxu1 %v2407_v17  ;;  %v548_v49 = vrot.slane %v546_v42, 1  ;;  %v536_v50 = vrot.slane %v534_v44, 1  ;;  %v557_v7 = vor.u32 %v555_v61, %v541_v52  ;;  %v2438_v13 = vld [vmem:[%s3317_s1 + $0x1e8] sm:$0xff]   ;;  %v2710_v14 = vcombine.high %v2649_v33, %v2652_v34  ;;  %v2717_v17 = vld [vmem:[%s2639_s28 + $0x30] sm:$0xff]  ;;  %v2756_v44 = vld [vmem:[%s2639_s28 + $0x40] sm:$0xff] }
  0x1e   : > { %v567_v5 = vshll.u32 %v1982_v0, 16  ;;  %v559_v6 = vshll.u32 %v1981_v2, 16  ;;  %v579_v9 = vshrl.u32 %v1982_v0, 16  ;;  %v2439_v16 = vld [vmem:[%s3317_s1 + $0x1a8] sm:$0xff]   ;;  %v2453_v61 = vld [vmem:[%s3317_s1 + $0x110] sm:$0xff]  }
  0x1f   : > { %2171 = vmatpush3.bf16.msra.mxu0 %v2408_v18  ;;  %v549_v55 = vor.u32 %v548_v49, %v544_v41  ;;  %v537_v56 = vor.u32 %v536_v50, %v532_v43  ;;  %v2720_v18 = vld [vmem:[%s2639_s28 + $0x38] sm:$0xff] }
  0x20   : > { %2217 = vmatpush3.bf16.msra.mxu1 %v2409_v19  ;;  %2172 = vmatprep.subr.bf16.mxu0 %v2410_v20  ;;  %v569_v10 = vrot.slane %v567_v5, 1  ;;  %v561_v11 = vrot.slane %v559_v6, 1  ;;  %v2724_v19 = vcombine.high %v2657_v37, %v2682_v58  ;;  %v2447_v41 = vld [vmem:[%s3317_s1 + $0x118] sm:$0xff]   ;;  %v2787_v5 = vcombine.low %v2657_v37, %v2682_v58  ;;  %v2456_v6 = vld [vmem:[%s3317_s1 + $0x148] sm:$0xff]  }
  0x21   : > { %2218 = vmatprep.subr.bf16.mxu1 %v2411_v21  ;;  %v554_v62 = vsel %vm530_vm0, %v549_v55, %v553_v51  ;;  %v542_v63 = vsel %vm530_vm0, %v537_v56, %v541_v52  ;;  %v1984_v21 = vcombine.high %v2717_v17, %v2720_v18  ;;  %v2448_v43 = vld [vmem:[%s3317_s1 + $0x1d8] sm:$0xff]   ;;  %v2798_v37 = vcombine.high %v2685_v59, %v2717_v17 }
  0x22   : > { %747 = vmatprep.mubr.bf16.mxu1 %v554_v62  ;;  %v570_v15 = vsel %vm530_vm0, %v565_v4, %v569_v10  ;;  %v562_v20 = vsel %vm530_vm0, %v557_v7, %v561_v11  ;;  %v2450_v50 = vld [vmem:[%s3317_s1 + $0x198] sm:$0xff]   ;;  %v2455_v4 = vld [vmem:[%s3317_s1 + $0x190] sm:$0xff]  }
  0x23   : > { %2173 = vmatpush3.bf16.msra.mxu0 %v2412_v22  ;;  %v2441_v22 = vld [vmem:[%s3317_s1 + $0x160] sm:$0xff]   ;;  %v595_v42 = vshrl.u32 %v1984_v21, 16 }
  0x24   : > { %2219 = vmatpush3.bf16.msra.mxu1 %v2413_v23  ;;  %2174 = vmatprep.subr.bf16.mxu0 %v2414_v24  ;;  %v1983_v23 = vcombine.low %v2717_v17, %v2720_v18  ;;  %v571_v24 = vshrl.u32 %v1981_v2, 16 }
  0x25   : > { %2220 = vmatprep.subr.bf16.mxu1 %v2415_v25  ;;  %v2443_v25 = vld [vmem:[%s3317_s1 + $0x120] sm:$0xff]  }
  0x26   : > { %v587_v52 = vshrl.u32 %v1983_v23, 16 }
  0x27   : > { %2175 = vmatpush3.bf16.msra.mxu0 %v2416_v26  ;;  %v912_v26 = vshll.u32 %v2710_v14, 16 }
  0x28   : > { %2221 = vmatpush3.bf16.msra.mxu1 %v2417_v27  ;;  %2176 = vmatprep.subr.bf16.mxu0 %v2418_v28  ;;  %v581_v27 = vor.u32 %v579_v9, %v569_v10  ;;  %v583_v28 = vshll.u32 %v1984_v21, 16 }
  0x29   : > { %2222 = vmatprep.subr.bf16.mxu1 %v2419_v29  ;;  %v575_v29 = vshll.u32 %v1983_v23, 16  ;;  %v914_v47 = vrot.slane %v912_v26, 1  ;;  %v933_v26 = vshll.u32 %v2798_v37, 16 }
  0x2a   : > { %v585_v32 = vrot.slane %v583_v28, 1  ;;  %v1180_v28 = vld [vmem:[%s2639_s28 + $0x8] sm:$0xee] }
  0x2b   : > { %2177 = vmatpush3.bf16.msra.mxu0 %v2420_v30  ;;  %v2444_v30 = vld [vmem:[%s3317_s1 + $0x1e0] sm:$0xff]   ;;  %v577_v36 = vrot.slane %v575_v29, 1  ;;  %v1268_v29 = vrot.slane %v2724_v19, 1 }
  0x2c   : > { %2223 = vmatpush3.bf16.msra.mxu1 %v2421_v31  ;;  %2254 = vmatprep.subr.bf16.mxu0 %v2426_v40  ;;  %v917_v31 = vshll.u32 %v2724_v19, 16  ;;  %v586_v40 = vsel %vm530_vm0, %v581_v27, %v585_v32  ;;  %v597_v56 = vor.u32 %v595_v42, %v585_v32  ;;  %v2465_v27 = vld [vmem:[%s3317_s1 + $0x180] sm:$0xff]   ;;  %v2830_v32 = vcombine.low %v2685_v59, %v2717_v17 }
  0x2d   : > { %2300 = vmatprep.subr.bf16.mxu1 %v2428_v46  ;;  %v910_v46 = vshrl.u32 %v2710_v14, 16  ;;  %v905_v14 = vshll.u32 %v2787_v5, 16  ;;  %v921_v17 = vshrl.u32 %v2787_v5, 16 }
  0x2e   : > { %399 = vmatmul.mubr.bf16.vlgmr.msra.gmra.mxu0 %v1919_v35  ;;  %v573_v35 = vor.u32 %v571_v24, %v561_v11  ;;  %v919_v55 = vrot.slane %v917_v31, 1  ;;  %v2464_v24 = vld [vmem:[%s3317_s1 + $0x1c0] sm:$0xff]   ;;  %v925_v42 = vshll.u32 %v2830_v32, 16 }
  0x2f   : > { %2255 = vmatpush3.bf16.msra.mxu0 %v2427_v45  ;;  %406 = vmatprep.mubr.bf16.mxu0 %v1980_v38  ;;  %v2445_v38 = vld [vmem:[%s3317_s1 + $0x1a0] sm:$0xff]   ;;  %v456_v45 = vld [vmem:[%s2639_s28 + $0x48] sm:$0x11]  ;;  %v915_v9 = vor.u32 %v914_v47, %v910_v46  ;;  %v907_v31 = vrot.slane %v905_v14, 1  ;;  %v945_v46 = vshrl.u32 %v2798_v37, 16 }
  0x30   : > { %2256 = vmatprep.subr.bf16.mxu0 %v2430_v54  ;;  %748 = vmatmul.mubr.bf16.vlgmr.msra.gmra.mxu1 %v542_v63  ;;  %v578_v48 = vsel %vm530_vm0, %v573_v35, %v577_v36  ;;  %v1986_v49 = vcombine.high %v2756_v44, %v456_v45  ;;  %v2766_v51 = vcombine.low %v2756_v44, %v456_v45 }
  0x31   : > { %2301 = vmatpush3.bf16.msra.mxu1 %v2429_v53  ;;  %755 = vmatprep.mubr.bf16.mxu1 %v570_v15  ;;  %v2452_v53 = vld [vmem:[%s3317_s1 + $0x150] sm:$0xff]   ;;  %v1928_v54 = vcombine.high %v2756_v44, %v2756_v44  ;;  %v2035_v63 = vcombine.low %v2649_v33, %v2652_v34  ;;  %v2461_v15 = vld [vmem:[%s3317_s1 + $0x188] sm:$0xff]   ;;  %v2094_v35 = vcombine.high %v1180_v28, %v2652_v34 }
  0x32   : > { %2302 = vmatprep.subr.bf16.mxu1 %v2433_v1  ;;  %v591_v60 = vshll.u32 %v2766_v51, 16  ;;  %v606_v62 = vshrl.u32 %v1986_v49, 16  ;;  %v589_v1 = vor.u32 %v587_v52, %v577_v36  ;;  %v923_v52 = vor.u32 %v921_v17, %v907_v31 }
  0x33   : > { %2257 = vmatpush3.bf16.msra.mxu0 %v2431_v57  ;;  %v599_v57 = vshll.u32 %v1986_v49, 16  ;;  %v898_v7 = vshrl.u32 %v2035_v63, 16  ;;  %v900_v10 = vshll.u32 %v2035_v63, 16  ;;  %v823_v49 = vld [vmem:[%s2639_s28 + $0x50] sm:$0x11]  ;;  %v937_v63 = vshrl.u32 %v2830_v32, 16 }
  0x34   : > { %2258 = vmatprep.subr.bf16.mxu0 %v2436_v8  ;;  %v2458_v8 = vld [vmem:[%s3317_s1 + $0x108] sm:$0xff]  }
  0x35   : > { %2303 = vmatpush3.bf16.msra.mxu1 %v2435_v3  ;;  %v2454_v3 = vld [vmem:[%s3317_s1 + $0x1d0] sm:$0xff]  }
  0x36   : > { %407 = vmatmul.mubr.bf16.gmra.mxu0 %v1979_v39  ;;  %2304 = vmatprep.subr.bf16.mxu1 %v2438_v13  ;;  %v2446_v39 = vld [vmem:[%s3317_s1 + $0x158] sm:$0xff]   ;;  %v2460_v13 = vld [vmem:[%s3317_s1 + $0x1c8] sm:$0xff]  }
  0x37   : > { %414 = vmatprep.mubr.bf16.mxu0 %v1982_v0  ;;  %2259 = vmatpush3.bf16.msra.mxu0 %v2437_v12  ;;  %v601_v0 = vrot.slane %v599_v57, 1  ;;  %v1927_v12 = vcombine.low %v2756_v44, %v2756_v44 }
  0x38   : > { %2260 = vmatprep.subr.bf16.mxu0 %v2441_v22  ;;  %756 = vmatmul.mubr.bf16.gmra.mxu1 %v562_v20  ;;  %v603_v20 = vshrl.u32 %v2766_v51, 16  ;;  %v2463_v22 = vld [vmem:[%s3317_s1 + $0x100] sm:$0xff]   ;;  %v1272_v51 = vrot.slane %v2798_v37, 1 }
  0x39   : > { %2305 = vmatpush3.bf16.msra.mxu1 %v2439_v16  ;;  %763 = vmatprep.mubr.bf16.mxu1 %v586_v40  ;;  %v602_v33 = vsel %vm530_vm0, %v597_v56, %v601_v0  ;;  %v608_v11 = vor.u32 %v606_v62, %v601_v0  ;;  %v902_v16 = vrot.slane %v900_v10, 1 }
  0x3a   : > { %2306 = vmatprep.subr.bf16.mxu1 %v2444_v30 }
  0x3b   : > { %2261 = vmatpush3.bf16.msra.mxu0 %v2443_v25  ;;  %v920_v25 = vsel %vm530_vm0, %v915_v9, %v919_v55  ;;  %v903_v30 = vor.u32 %v902_v16, %v898_v7 }
  0x3c   : > { %2262 = vmatprep.subr.bf16.mxu0 %v2446_v39  ;;  %v2835_v39 = vcombine.high %v2720_v18, %v2756_v44 }
  0x3d   : > { %2307 = vmatpush3.bf16.msra.mxu1 %v2445_v38  ;;  %v935_v38 = vrot.slane %v933_v26, 1  ;;  %v908_v59 = vsel %vm530_vm0, %v903_v30, %v907_v31 }
  0x3e   : > { %415 = vmatmul.mubr.bf16.gmra.mxu0 %v1981_v2  ;;  %2308 = vmatprep.subr.bf16.mxu1 %v2448_v43  ;;  %v593_v2 = vrot.slane %v591_v60, 1  ;;  %v949_v47 = vshll.u32 %v2835_v39, 16 }
  0x3f   : > { %422 = vmatprep.mubr.bf16.mxu0 %v1984_v21  ;;  %2263 = vmatpush3.bf16.msra.mxu0 %v2447_v41  ;;  %v2462_v21 = vld [vmem:[%s3317_s1 + $0x140] sm:$0xff]   ;;  %v1267_v41 = vrot.slane %v2094_v35, 1 }
  0x40   : > { %764 = vmatmul.mubr.bf16.gmra.mxu1 %v578_v48  ;;  %2264 = vmatprep.subr.bf16.mxu0 %v2452_v53  ;;  %v594_v58 = vsel %vm530_vm0, %v589_v1, %v593_v2  ;;  %v605_v40 = vor.u32 %v603_v20, %v593_v2  ;;  %v822_v48 = vld [vmem:[%s2639_s28 + $0x48] sm:$0xff]  ;;  %v927_v53 = vrot.slane %v925_v42, 1  ;;  %v951_v56 = vrot.slane %v949_v47, 1 }
  0x41   : > { %2309 = vmatpush3.bf16.msra.mxu1 %v2450_v50  ;;  %771 = vmatprep.mubr.bf16.mxu1 %v602_v33  ;;  %v1269_v43 = vsel %vm1263_vm1, %v1267_v41, %v1268_v29  ;;  %v1265_v50 = vrot.slane %v2787_v5, 1  ;;  %v2044_v57 = vcombine.high %v822_v48, %v823_v49  ;;  %v961_v2 = vshrl.u32 %v2835_v39, 16 }
  0x42   : > { %2310 = vmatprep.subr.bf16.mxu1 %v2454_v3  ;;  %v928_v62 = vsel %vm530_vm0, %v923_v52, %v927_v53  ;;  %v2043_v33 = vcombine.low %v822_v48, %v823_v49  ;;  %v1496_v47 = vlaneseq }
  0x43   : > { %2265 = vmatpush3.bf16.msra.mxu0 %v2453_v61  ;;  %v1273_v61 = vsel %vm1263_vm1, %v1268_v29, %v1272_v51  ;;  %v965_v3 = vshll.u32 %v2044_v57, 16 }
  0x44   : > { %2266 = vmatprep.subr.bf16.mxu0 %v2456_v6  ;;  %v963_v6 = vor.u32 %v961_v2, %v951_v56 }
  0x45   : > { %2311 = vmatpush3.bf16.msra.mxu1 %v2455_v4  ;;  %v939_v4 = vor.u32 %v937_v63, %v927_v53  ;;  %v967_v7 = vrot.slane %v965_v3, 1 }
  0x46   : > { %423 = vmatmul.mubr.bf16.gmra.mxu0 %v1983_v23  ;;  %2312 = vmatprep.subr.bf16.mxu1 %v2460_v13  ;;  %v929_v23 = vshrl.u32 %v2724_v19, 16  ;;  %v2093_v19 = vcombine.low %v1180_v28, %v2652_v34  ;;  %v969_v28 = vshrl.u32 %v2043_v33, 16 }
  0x47   : > { %430 = vmatprep.mubr.bf16.mxu0 %v1928_v54  ;;  %2267 = vmatpush3.bf16.msra.mxu0 %v2458_v8  ;;  %v2041_v54 = vcombine.low %v2720_v18, %v2756_v44  ;;  %v1270_v18 = vrot.slane %v2830_v32, 1  ;;  %v1276_v44 = vrot.slane %v2835_v39, 1  ;;  %v1189_v8 = vld [vmem:[%s2639_s28 + $0x50] sm:$0x11]  ;;  %v968_v13 = vsel %vm530_vm0, %v963_v6, %v967_v7  ;;  %s2347_s28 = smul.u32 36, %s3376_s9 }
  0x48   : > { %772 = vmatmul.mubr.bf16.gmra.mxu1 %v594_v58  ;;  %2268 = vmatprep.subr.bf16.mxu0 %v2462_v21  ;;  %v931_v36 = vor.u32 %v929_v23, %v919_v55  ;;  %v1264_v34 = vrot.slane %v2093_v19, 1  ;;  %v947_v55 = vor.u32 %v945_v46, %v935_v38  ;;  %v2102_v58 = vcombine.high %v822_v48, %v1189_v8 }
  0x49   : > { %779 = vmatprep.mubr.bf16.mxu1 %v608_v11  ;;  %2313 = vmatpush3.bf16.msra.mxu1 %v2461_v15  ;;  %v941_v0 = vshll.u32 %v2041_v54, 16  ;;  %v1271_v9 = vsel %vm1263_vm1, %v1265_v50, %v1270_v18  ;;  %v1277_v10 = vsel %vm1263_vm1, %v1272_v51, %v1276_v44  ;;  %v953_v11 = vshrl.u32 %v2041_v54, 16  ;;  %s180_s29 = scalar_lea.vmem %s3318_s2, %s2347_s28 }
  0x4a   : > { %2314 = vmatprep.subr.bf16.mxu1 %v2464_v24  ;;  %v936_v45 = vsel %vm530_vm0, %v931_v36, %v935_v38  ;;  %v1266_v60 = vsel %vm1263_vm1, %v1264_v34, %v1265_v50  ;;  %v952_v1 = vsel %vm530_vm0, %v947_v55, %v951_v56  ;;  %v1274_v14 = vrot.slane %v2041_v54, 1 }
  0x4b   : > { %2269 = vmatpush3.bf16.msra.mxu0 %v2463_v22  ;;  %v943_v5 = vrot.slane %v941_v0, 1  ;;  %v1280_v15 = vrot.slane %v2102_v58, 1  ;;  %v972_v21 = vshrl.u32 %v2044_v57, 16  ;;  %v2101_v23 = vcombine.low %v822_v48, %v1189_v8 }
  0x4c   : > { %v1275_v22 = vsel %vm1263_vm1, %v1270_v18, %v1274_v14  ;;  %v2906_v51 = vshrl.u32 %v1496_v47, 7 }
  0x4d   : > { %2315 = vmatpush3.bf16.msra.mxu1 %v2465_v27  ;;  %v944_v37 = vsel %vm530_vm0, %v939_v4, %v943_v5  ;;  %v955_v16 = vor.u32 %v953_v11, %v943_v5  ;;  %v1281_v24 = vsel %vm1263_vm1, %v1276_v44, %v1280_v15  ;;  %v974_v26 = vor.u32 %v972_v21, %v967_v7 }
  0x4e   : > { %431 = vmatmul.mubr.bf16.gmra.mxu0 %v1927_v12  ;;  %v957_v12 = vshll.u32 %v2043_v33, 16  ;;  %v1278_v27 = vrot.slane %v2101_v23, 1  ;;  %v1498_v54 = vadd.s32 8, %v2906_v51  ;;  %v1499_v56 = vadd.s32 16, %v2906_v51 }
  0x4f   : > { %1113 = vmatprep.mubr.bf16.mxu0 %v920_v25  ;;  %v1500_v44 = vadd.s32 24, %v2906_v51  ;;  %v2938_v5 = vadd.s32 32, %v2906_v51  ;;  %v2943_v6 = vadd.s32 40, %v2906_v51  ;;  %v2948_v8 = vadd.s32 48, %v2906_v51 }
  0x50   : > { %780 = vmatmul.mubr.bf16.gmra.mxu1 %v605_v40  ;;  %v959_v20 = vrot.slane %v957_v12, 1  ;;  %v1279_v29 = vsel %vm1263_vm1, %v1274_v14, %v1278_v27  ;;  %v2931_v3 = vmul.u32.u64.low 3817748708, %v1499_v56  ;;  %v2932_v18 = vmul.u32.u64.high 3817748708, %v1499_v56, %v2931_v3 }
  0x51   : > { %1420 = vmatprep.mubr.bf16.mxu1 %v1269_v43  ;;  %v2958_v11 = vmul.u32.u64.low 3817748708, %v2938_v5  ;;  %v2959_v12 = vmul.u32.u64.high 3817748708, %v2938_v5, %v2958_v11 }
  0x52   : > { %v960_v25 = vsel %vm530_vm0, %v955_v16, %v959_v20  ;;  %v971_v30 = vor.u32 %v969_v28, %v959_v20 }
  0x53   : > { %v1556_v3 = vshrl.u32 %v2959_v12, 3 }
  0x56   : > { %1114 = vmatmul.mubr.bf16.vlgmr.msra.gmra.mxu0 %v908_v59 }
  0x57   : > { %1121 = vmatprep.mubr.bf16.mxu0 %v936_v45 }
  0x58   : > { %1421 = vmatmul.mubr.bf16.vlgmr.msra.gmra.mxu1 %v1266_v60 }
  0x59   : > { %1428 = vmatprep.mubr.bf16.mxu1 %v1273_v61 }
  0x5e   : > { %1122 = vmatmul.mubr.bf16.gmra.mxu0 %v928_v62  ;;  %v2921_v61 = vmul.u32.u64.low 3817748708, %v2906_v51  ;;  %v2922_v62 = vmul.u32.u64.high 3817748708, %v2906_v51, %v2921_v61 }
  0x5f   : > { %1129 = vmatprep.mubr.bf16.mxu0 %v952_v1  ;;  %v2926_v0 = vmul.u32.u64.low 3817748708, %v1498_v54  ;;  %v2927_v1 = vmul.u32.u64.high 3817748708, %v1498_v54, %v2926_v0 }
  0x60   : > { %1429 = vmatmul.mubr.bf16.gmra.mxu1 %v1271_v9  ;;  %v1512_v14 = vshrl.u32 %v2922_v62, 3  ;;  %v2984_v0 = vadd.s32 56, %v2906_v51 }
  0x61   : > { %1436 = vmatprep.mubr.bf16.mxu1 %v1277_v10  ;;  %v1523_v21 = vshrl.u32 %v2927_v1, 3 }
  0x62   : > { %v1513_v28 = vmul.u32 9, %v1512_v14 }
  0x66   : > { %1130 = vmatmul.mubr.bf16.gmra.mxu0 %v944_v37  ;;  %v2952_v10 = vmul.u32.u64.low 3817748708, %v1500_v44  ;;  %v2953_v37 = vmul.u32.u64.high 3817748708, %v1500_v44, %v2952_v10 }
  0x67   : > { %1137 = vmatprep.mubr.bf16.mxu0 %v968_v13  ;;  %v2992_v10 = vsub.s32 %v2906_v51, %v1513_v28 }
  0x68   : > { %1437 = vmatmul.mubr.bf16.gmra.mxu1 %v1275_v22  ;;  %v2972_v22 = vmul.u32.u64.low 3817748708, %v2948_v8  ;;  %v2973_v23 = vmul.u32.u64.high 3817748708, %v2948_v8, %v2972_v22  ;;  %v1545_v62 = vshrl.u32 %v2953_v37, 3 }
  0x69   : > { %1444 = vmatprep.mubr.bf16.mxu1 %v1281_v24  ;;  %vm1605_vm2 = vcmp.ne.s32.totalorder %v2992_v10, 0  ;;  %vm1614_vm3 = vcmp.lt.s32.totalorder %v2992_v10, 0 }
  0x6a   : > { %vm3023_vm8 = vmand %vm1614_vm3, %vm1605_vm2 }
  0x6e   : > { %1138 = vmatmul.mubr.bf16.gmra.mxu0 %v960_v25  ;;  %v1534_v25 = vshrl.u32 %v2932_v18, 3 }
  0x6f   : > { %1145 = vmatprep.mubr.bf16.mxu0 %v974_v26 }
  0x70   : > { %1445 = vmatmul.mubr.bf16.gmra.mxu1 %v1279_v29  ;;  %v1535_v61 = vmul.u32 9, %v1534_v25  ;;  %v3003_v25 = vmul.u32.u64.low 3817748708, %v2984_v0  ;;  %v3004_v12 = vmul.u32.u64.high 3817748708, %v2984_v0, %v3003_v25 }
  0x71   : > { %1452 = vmatprep.mubr.bf16.mxu1 %v1280_v15  ;;  %v2965_v15 = vmul.u32.u64.low 3817748708, %v2943_v6  ;;  %v2966_v16 = vmul.u32.u64.high 3817748708, %v2943_v6, %v2965_v15 }
  0x72   : > { %v3000_v22 = vsub.s32 %v1499_v56, %v1535_v61 }
  0x73   : > { %v1567_v11 = vshrl.u32 %v2966_v16, 3 }
  0x74   : > { %vm1607_vm6 = vcmp.ne.s32.totalorder %v3000_v22, 0  ;;  %vm1616_vm7 = vcmp.lt.s32.totalorder %v3000_v22, 0 }
  0x75   : > { %vm3042_vm10 = vmand %vm1616_vm7, %vm1607_vm6 }
  0x76   : > { %1146 = vmatmul.mubr.bf16.gmra.mxu0 %v971_v30  ;;  %v1524_v30 = vmul.u32 9, %v1523_v21  ;;  %v1578_v21 = vshrl.u32 %v2973_v23, 3  ;;  %v3013_v23 = vadd.s32 64, %v2906_v51 }
  0x78   : > { %1453 = vmatmul.mubr.bf16.gmra.mxu1 %v1278_v27  ;;  %v2995_v15 = vsub.s32 %v1498_v54, %v1524_v30  ;;  %v1568_v54 = vmul.u32 9, %v1567_v11  ;;  %v1579_v56 = vmul.u32 9, %v1578_v21  ;;  %v1632_v11 = vadd.s32 9, %v2992_v10 }
  0x7a   : > { %vm1606_vm4 = vcmp.ne.s32.totalorder %v2995_v15, 0  ;;  %vm1615_vm5 = vcmp.lt.s32.totalorder %v2995_v15, 0  ;;  %v1633_v51 = vadd.s32 9, %v2995_v15  ;;  %v3038_v25 = vsub.s32 %v2943_v6, %v1568_v54 }
  0x7b   : > { %vm3032_vm9 = vmand %vm1615_vm5, %vm1606_vm4  ;;  %v1589_v6 = vshrl.u32 %v3004_v12, 3  ;;  %v1641_v54 = vsel %vm3023_vm8, %v1632_v11, %v2992_v10 }
  0x7c   : > { %vm1610_vm15 = vcmp.ne.s32.totalorder %v3038_v25, 0  ;;  %vm1619_vm0 = vcmp.lt.s32.totalorder %v3038_v25, 0  ;;  %v3078_v11 = vadd.s32 9, %v3038_v25  ;;  %vm3139_vm8 = vcmp.lt.s32.totalorder %v1641_v54, 8 }
  0x7d   : > { %vm3109_vm5 = vmand %vm1619_vm0, %vm1610_vm15 }
  0xee   : > { %v2868_v31 = vpop.f32.mrf.mxu0 }
  0xf0   : > { %v2870_v32 = vpop.f32.mrf.mxu0  ;;  %v2876_v38 = vpop.f32.mrf.mxu1 }
  0xf2   : > { %v2872_v35 = vpop.f32.mrf.mxu0  ;;  %v2880_v40 = vpop.f32.mrf.mxu1 }
  0xf4   : > { %v2874_v36 = vpop.f32.mrf.mxu0  ;;  %v2884_v41 = vpop.f32.mrf.mxu1 }
  0xf6   : > { %v2878_v39 = vpop.f32.mrf.mxu0  ;;  %v2888_v17 = vpop.f32.mrf.mxu1 }
  0xf8   : > { %v2882_v19 = vpop.f32.mrf.mxu0  ;;  %v2892_v43 = vpop.f32.mrf.mxu1 }
  0xfa   : > { %v2886_v59 = vpop.f32.mrf.mxu0  ;;  %v2896_v46 = vpop.f32.mrf.mxu1 }
  0xfc   : > { %v2890_v42 = vpop.f32.mrf.mxu0  ;;  %v2900_v49 = vpop.f32.mrf.mxu1 }
  0xfe   : > { %v2894_v45 = vpop.f32.mrf.mxu0  ;;  %v2904_v50 = vpop.f32.mrf.mxu1 }
 0x100   : > { %v2898_v48 = vpop.f32.mrf.mxu0  ;;  %v2910_v53 = vpop.f32.mrf.mxu1 }
 0x102   : > { %v2902_v34 = vpop.f32.mrf.mxu0  ;;  %v2916_v57 = vpop.f32.mrf.mxu1 }
 0x103   : > { %v2238_v54 = vadd.f32 %v2916_v57, %v2910_v53 }
 0x104   : > { %v2908_v52 = vpop.f32.mrf.mxu0  ;;  %v2924_v63 = vpop.f32.mrf.mxu1 }
 0x106   : > { %v2913_v55 = vpop.f32.mrf.mxu0  ;;  %v2935_v4 = vpop.f32.mrf.mxu1 }
 0x108   : > { %v2918_v60 = vpop.f32.mrf.mxu0  ;;  %v2945_v7 = vpop.f32.mrf.mxu1 }
 0x10a   : > { %v2929_v2 = vpop.f32.mrf.mxu0  ;;  %v2955_v58 = vpop.f32.mrf.mxu1 }
 0x10b   : > { %3319 = vst [vmem:[#allocation3_spill] sm:$0xff] %v2929_v2 }
 0x10c   : > { %v2940_v33 = vpop.f32.mrf.mxu0  ;;  %v2968_v20 = vpop.f32.mrf.mxu1 }
 0x10d   : > { %3320 = vst [vmem:[#allocation4_spill] sm:$0xff] %v2940_v33  ;;  %3323 = vst [vmem:[#allocation7_spill] sm:$0xff] %v2968_v20  ;;  %v1590_v20 = vmul.u32 9, %v1589_v6  ;;  %v2180_v33 = vadd.f32 %v2870_v32, %v2868_v31  ;;  %v2189_v6 = vadd.f32 %v2890_v42, %v2886_v59 }
 0x10e   : > { %v2950_v9 = vpop.f32.mrf.mxu0  ;;  %v2976_v26 = vpop.f32.mrf.mxu1 }
 0x10f   : > { %3321 = vst [vmem:[#allocation5_spill] sm:$0xff] %v2950_v9  ;;  %3324 = vst [vmem:[#allocation8_spill] sm:$0xff] %v2976_v26 }
 0x110   : > { %v2961_v13 = vpop.f32.mrf.mxu0  ;;  %v2978_v29 = vpop.f32.mrf.mxu1 }
 0x111   : > { %3322 = vst [vmem:[#allocation6_spill] sm:$0xff] %v2961_v13  ;;  %3325 = vst [vmem:[#allocation9_spill] sm:$0xff] %v2978_v29  ;;  %v3047_v13 = vsub.s32 %v2948_v8, %v1579_v56  ;;  %v1642_v8 = vsel %vm3032_vm9, %v1633_v51, %v2995_v15  ;;  %v2183_v29 = vadd.f32 %v2874_v36, %v2872_v35 }
 0x112   : > { %v2205_v24 = vpop.f32.mrf.mxu0  ;;  %v2986_v1 = vpop.f32.mrf.mxu1  ;;  %v2226_v35 = vadd.f32 %v2880_v40, %v2876_v38  ;;  %v2186_v36 = vadd.f32 %v2882_v19, %v2878_v39  ;;  %vm3127_vm7 = vcmp.lt.s32.totalorder %v1642_v8, 8 }
 0x113   : > { %3326 = vst [vmem:[#allocation10_spill] sm:$0xff] %v2986_v1  ;;  %v1546_v24 = vmul.u32 9, %v1545_v62  ;;  %v1557_v1 = vmul.u32 9, %v1556_v3  ;;  %vm1611_vm2 = vcmp.ne.s32.totalorder %v3047_v13, 0  ;;  %vm1620_vm3 = vcmp.lt.s32.totalorder %v3047_v13, 0 }
 0x114   : > { %v2206_v27 = vpop.f32.mrf.mxu0  ;;  %v2251_v14 = vpop.f32.mrf.mxu1  ;;  %vm3121_vm6 = vmand %vm1620_vm3, %vm1611_vm2 }
 0x115   : > { %v3017_v61 = vsub.s32 %v1500_v44, %v1546_v24  ;;  %v3030_v14 = vsub.s32 %v2938_v5, %v1557_v1  ;;  %v1634_v24 = vadd.s32 9, %v3000_v22 }
 0x116   : > { %v2980_v47 = vpop.f32.mrf.mxu0  ;;  %v2252_v27 = vpop.f32.mrf.mxu1  ;;  %v3050_v5 = vmul.u32.u64.low 3817748708, %v3013_v23  ;;  %v3051_v1 = vmul.u32.u64.high 3817748708, %v3013_v23, %v3050_v5 }
 0x117   : > { %vm1608_vm11 = vcmp.ne.s32.totalorder %v3017_v61, 0  ;;  %vm1617_vm12 = vcmp.lt.s32.totalorder %v3017_v61, 0  ;;  %vm1609_vm13 = vcmp.ne.s32.totalorder %v3030_v14, 0  ;;  %vm1618_vm14 = vcmp.lt.s32.totalorder %v3030_v14, 0 }
 0x118   : > { %v2989_v18 = vpop.f32.mrf.mxu0  ;;  %v3008_v28 = vpop.f32.mrf.mxu1  ;;  %v1643_v56 = vsel %vm3042_vm10, %v1634_v24, %v3000_v22  ;;  %v1635_v12 = vadd.s32 9, %v3017_v61  ;;  %vm3072_vm1 = vmand %vm1617_vm12, %vm1608_vm11  ;;  %v1636_v15 = vadd.s32 9, %v3030_v14  ;;  %v2229_v22 = vadd.f32 %v2888_v17, %v2884_v41 }
 0x119   : > { %vm3090_vm4 = vmand %vm1618_vm14, %vm1609_vm13  ;;  %v3095_v24 = vadd.s32 9, %v3047_v13  ;;  %v2232_v41 = vadd.f32 %v2896_v46, %v2892_v43  ;;  %v2272_v40 = vadd.f32 %v2989_v18, %v2980_v47  ;;  %vm3143_vm9 = vcmp.lt.s32.totalorder %v1643_v56, 8 }
 0x11a   : > { %v2998_v37 = vpop.f32.mrf.mxu0  ;;  %v3019_v62 = vpop.f32.mrf.mxu1  ;;  %v1644_v32 = vsel %vm3072_vm1, %v1635_v12, %v3017_v61  ;;  %v797_v61 = vadd.f32 %v2229_v22, %v2183_v29  ;;  %v2235_v12 = vadd.f32 %v2904_v50, %v2900_v49  ;;  %v3156_v49 = vsub.s32 %v2984_v0, %v1590_v20 }
 0x11b   : > { %v1647_v42 = vsel %vm3121_vm6, %v3095_v24, %v3047_v13  ;;  %v2192_v50 = vadd.f32 %v2898_v48, %v2894_v45  ;;  %vm3164_vm10 = vcmp.lt.s32.totalorder %v1644_v32, 8  ;;  %v2241_v45 = vadd.f32 %v2935_v4, %v2924_v63  ;;  %v3351_v32 = vld [vmem:[#allocation3_spill] sm:$0xff] }
 0x11c   : > { %v2274_v16 = vpop.f32.mrf.mxu0  ;;  %v3040_v27 = vpop.f32.mrf.mxu1  ;;  %v799_v21 = vadd.f32 %v2235_v12, %v2189_v6  ;;  %vm1612_vm12 = vcmp.ne.s32.totalorder %v3156_v49, 0  ;;  %vm1621_vm13 = vcmp.lt.s32.totalorder %v3156_v49, 0  ;;  %vm3249_vm2 = vcmp.lt.s32.totalorder %v1647_v42, 8 }
 0x11d   : > { %v2275_v31 = vadd.f32 %v2274_v16, %v2998_v37  ;;  %v1645_v37 = vsel %vm3090_vm4, %v1636_v15, %v3030_v14  ;;  %v1600_v16 = vshrl.u32 %v3051_v1, 3  ;;  %v1646_v14 = vsel %vm3109_vm5, %v3078_v11, %v3038_v25  ;;  %vm3216_vm15 = vmand %vm1621_vm13, %vm1612_vm12 }
 0x11e   : > { %v2276_v30 = vpop.f32.mrf.mxu0  ;;  %v3059_v26 = vpop.f32.mrf.mxu1  ;;  %v798_v1 = vadd.f32 %v2232_v41, %v2186_v36  ;;  %vm3178_vm11 = vcmp.lt.s32.totalorder %v1645_v37, 8  ;;  %v800_v63 = vadd.f32 %v2238_v54, %v2192_v50  ;;  %v3354_v37 = vld [vmem:[#allocation8_spill] sm:$0xff]  ;;  %v1639_v50 = vadd.s32 9, %v3156_v49 }
 0x11f   : > { %v1163_v8 = vadd.f32 %v2275_v31, %v797_v61  ;;  %v1601_v0 = vmul.u32 9, %v1600_v16  ;;  %v2321_v48 = vadd.f32 %v3059_v26, %v3040_v27  ;;  %vm3233_vm1 = vcmp.lt.s32.totalorder %v1646_v14, 8 }
 0x120   : > { %v2277_v44 = vpop.f32.mrf.mxu0  ;;  %v2322_v10 = vpop.f32.mrf.mxu1 }
 0x121   : > { %v2278_v43 = vadd.f32 %v2277_v44, %v2276_v30  ;;  %v796_v44 = vadd.f32 %v2226_v35, %v2180_v33  ;;  %v2195_v33 = vadd.f32 %v2908_v52, %v2902_v34  ;;  %v2198_v34 = vadd.f32 %v2918_v60, %v2913_v55 }
 0x122   : > { %v2279_v9 = vpop.f32.mrf.mxu0  ;;  %v2323_v17 = vpop.f32.mrf.mxu1  ;;  %v2244_v52 = vadd.f32 %v2955_v58, %v2945_v7  ;;  %v3182_v4 = vadd.f32 %v2321_v48, %v1163_v8  ;;  %v3190_v7 = vsub.s32 %v3013_v23, %v1601_v0  ;;  %v3358_v0 = vld [vmem:[#allocation6_spill] sm:$0xff] }
 0x123   : > { %v1162_v15 = vadd.f32 %v2272_v40, %v796_v44  ;;  %v1164_v29 = vadd.f32 %v2278_v43, %v798_v1  ;;  %v801_v58 = vadd.f32 %v2241_v45, %v2195_v33  ;;  %v3353_v43 = vld [vmem:[#allocation7_spill] sm:$0xff] }
 0x124   : > { %v2280_v5 = vpop.f32.mrf.mxu0  ;;  %v2325_v46 = vpop.f32.mrf.mxu1  ;;  %v802_v31 = vadd.f32 %v2244_v52, %v2198_v34  ;;  %v2247_v16 = vadd.f32 %v3354_v37, %v3353_v43  ;;  %v1678_v23 = vsel %vm3127_vm7, %v3182_v4, 0.0  ;;  %vm1613_vm14 = vcmp.ne.s32.totalorder %v3190_v7, 0 }
 0x125   : > { %v2281_v56 = vadd.f32 %v2280_v5, %v2279_v9  ;;  %v2318_v9 = vadd.f32 %v3019_v62, %v3008_v28  ;;  %v2324_v5 = vadd.f32 %v2323_v17, %v2322_v10  ;;  %vm1622_vm0 = vcmp.lt.s32.totalorder %v3190_v7, 0 }
 0x126   : > { %v2282_v51 = vpop.f32.mrf.mxu0  ;;  %v2326_v59 = vpop.f32.mrf.mxu1  ;;  %vm3257_vm3 = vmand %vm1622_vm0, %vm1613_vm14 }
 0x127   : > { %v1165_v26 = vadd.f32 %v2281_v56, %v799_v21  ;;  %v3184_v41 = vadd.f32 %v2318_v9, %v1162_v15  ;;  %v3186_v55 = vadd.f32 %v2324_v5, %v1164_v29  ;;  %v2327_v28 = vadd.f32 %v2326_v59, %v2325_v46 }
 0x128   : > { %v2283_v38 = vpop.f32.mrf.mxu0  ;;  %v2328_v20 = vpop.f32.mrf.mxu1 }
 0x129   : > { %v2284_v53 = vadd.f32 %v2283_v38, %v2282_v51  ;;  %v3352_v38 = vld [vmem:[#allocation4_spill] sm:$0xff]  ;;  %v3200_v6 = vadd.f32 %v2327_v28, %v1165_v26  ;;  %v1677_v44 = vsel %vm3139_vm8, %v3184_v41, 0.0  ;;  %v1679_v1 = vsel %vm3143_vm9, %v3186_v55, 0.0 }
 0x12a   : > { %v2285_v30 = vpop.f32.mrf.mxu0  ;;  %v2329_v35 = vpop.f32.mrf.mxu1  ;;  %v2201_v40 = vadd.f32 %v3352_v38, %v3351_v32  ;;  %v1686_v45 = vadd.f32 %v1678_v23, %v1677_v44 }
 0x12b   : > { %v1166_v62 = vadd.f32 %v2284_v53, %v800_v63  ;;  %v2330_v46 = vadd.f32 %v2329_v35, %v2328_v20  ;;  %v3357_v20 = vld [vmem:[#allocation5_spill] sm:$0xff]  ;;  %v1680_v52 = vsel %vm3164_vm10, %v3200_v6, 0.0 }
 0x12c   : > { %v2286_v3 = vpop.f32.mrf.mxu0  ;;  %v2331_v60 = vpop.f32.mrf.mxu1  ;;  %v803_v29 = vadd.f32 %v2247_v16, %v2201_v40  ;;  %v2204_v21 = vadd.f32 %v3358_v0, %v3357_v20  ;;  %v3359_v53 = vld [vmem:[#allocation9_spill] sm:$0xff]  ;;  %v1687_v63 = vadd.f32 %v1686_v45, %v1679_v1 }
 0x12d   : > { %v2287_v27 = vadd.f32 %v2286_v3, %v2285_v30  ;;  %v3210_v54 = vadd.f32 %v2330_v46, %v1166_v62 }
 0x12e   : > { %v2288_v57 = vpop.f32.mrf.mxu0  ;;  %v2332_v61 = vpop.f32.mrf.mxu1  ;;  %v1688_v25 = vadd.f32 %v1687_v63, %v1680_v52 }
 0x12f   : > { %v1167_v12 = vadd.f32 %v2287_v27, %v801_v58  ;;  %v2333_v8 = vadd.f32 %v2332_v61, %v2331_v60  ;;  %v1640_v60 = vadd.s32 9, %v3190_v7  ;;  %v1681_v58 = vsel %vm3178_vm11, %v3210_v54, 0.0 }
 0x130   : > { %v2289_v51 = vpop.f32.mrf.mxu0  ;;  %v2334_v59 = vpop.f32.mrf.mxu1  ;;  %v1689_v13 = vadd.f32 %v1688_v25, %v1681_v58 }
 0x131   : > { %v2290_v10 = vadd.f32 %v2289_v51, %v2288_v57  ;;  %v3360_v57 = vld [vmem:[#allocation10_spill] sm:$0xff]  ;;  %v1474_v9 = vadd.f32 %v2333_v8, %v1167_v12  ;;  %v1648_v51 = vsel %vm3216_vm15, %v1639_v50, %v3156_v49  ;;  %v1649_v37 = vsel %vm3257_vm3, %v1640_v60, %v3190_v7 }
 0x132   : > { %v2291_v17 = vpop.f32.mrf.mxu0  ;;  %v2335_v48 = vpop.f32.mrf.mxu1  ;;  %v2250_v34 = vadd.f32 %v3360_v57, %v3359_v53  ;;  %vm3263_vm4 = vcmp.lt.s32.totalorder %v1648_v51, 8  ;;  %vm3274_vm5 = vcmp.lt.s32.totalorder %v1649_v37, 8 }
 0x133   : > { %v1168_v56 = vadd.f32 %v2290_v10, %v802_v31  ;;  %v2336_v5 = vadd.f32 %v2335_v48, %v2334_v59  ;;  %v1682_v39 = vsel %vm3233_vm1, %v1474_v9, 0.0 }
 0x134   : > { %v2292_v30 = vpop.f32.mrf.mxu0  ;;  %v2337_v27 = vpop.f32.mrf.mxu1  ;;  %v1690_v16 = vadd.f32 %v1689_v13, %v1682_v39 }
 0x135   : > { %v2293_v3 = vadd.f32 %v2292_v30, %v2291_v17  ;;  %v1475_v28 = vadd.f32 %v2336_v5, %v1168_v56  ;;  %v804_v17 = vadd.f32 %v2250_v34, %v2204_v21 }
 0x136   : > { %v2294_v15 = vpop.f32.mrf.mxu0  ;;  %v2338_v14 = vpop.f32.mrf.mxu1 }
 0x137   : > { %v1169_v2 = vadd.f32 %v2293_v3, %v803_v29  ;;  %v2339_v31 = vadd.f32 %v2338_v14, %v2337_v27  ;;  %v1683_v38 = vsel %vm3249_vm2, %v1475_v28, 0.0 }
 0x138   : > { %v2295_v35 = vpop.f32.mrf.mxu0  ;;  %v2340_v42 = vpop.f32.mrf.mxu1  ;;  %v1691_v12 = vadd.f32 %v1690_v16, %v1683_v38 }
 0x139   : > { %v2296_v62 = vadd.f32 %v2295_v35, %v2294_v15  ;;  %v1476_v40 = vadd.f32 %v2339_v31, %v1169_v2 }
 0x13a   : > { %v2297_v10 = vpop.f32.mrf.mxu0  ;;  %v2341_v61 = vpop.f32.mrf.mxu1 }
 0x13b   : > { %v1170_v43 = vadd.f32 %v2296_v62, %v804_v17  ;;  %v1684_v23 = vsel %vm3263_vm4, %v1476_v40, 0.0  ;;  %v2342_v46 = vadd.f32 %v2341_v61, %v2340_v42 }
 0x13c   : > { %v2298_v32 = vpop.f32.mrf.mxu0  ;;  %v2343_v44 = vpop.f32.mrf.mxu1  ;;  %v1692_v59 = vadd.f32 %v1691_v12, %v1684_v23 }
 0x13d   : > { %v1477_v1 = vadd.f32 %v2342_v46, %v1170_v43 }
 0x13e   : > { %v2344_v50 = vpop.f32.mrf.mxu1 }
 0x13f   : > { %v1685_v8 = vsel %vm3274_vm5, %v1477_v1, 0.0 }
 0x140   : > { %v1693_v56 = vadd.f32 %v1692_v59, %v1685_v8 }
 0x142   : > { %v1694_v7 = vrot.slane %v1693_v56, 4 }
 0x144   : > { %v1695_v3 = vadd.f32 %v1694_v7, %v1693_v56 }
 0x146   : > { %v1696_v33 = vrot.slane %v1695_v3, 2 }
 0x148   : > { %v1697_v15 = vadd.f32 %v1696_v33, %v1695_v3 }
 0x14a   : > { %v1698_v29 = vrot.slane %v1697_v15, 1 }
 0x14c   : > { %v1699_v20 = vadd.f32 %v1698_v29, %v1697_v15 }
 0x14e   : > { %v1700_v0 = vmul.f32 0.015625, %v1699_v20 }
 0x150   : > { %v1701_v21 = vsub.f32 %v3184_v41, %v1700_v0  ;;  %v1702_v45 = vsub.f32 %v3182_v4, %v1700_v0  ;;  %v1703_v48 = vsub.f32 %v3186_v55, %v1700_v0  ;;  %v1704_v53 = vsub.f32 %v3200_v6, %v1700_v0 }
 0x151   : > { %v1705_v52 = vsub.f32 %v3210_v54, %v1700_v0  ;;  %v1706_v41 = vsub.f32 %v1474_v9, %v1700_v0  ;;  %v1707_v6 = vsub.f32 %v1475_v28, %v1700_v0  ;;  %v1708_v60 = vsub.f32 %v1476_v40, %v1700_v0 }
 0x152   : > { %v1710_v57 = vsel %vm3139_vm8, %v1701_v21, 0.0  ;;  %v1711_v34 = vsel %vm3127_vm7, %v1702_v45, 0.0  ;;  %v1712_v5 = vsel %vm3143_vm9, %v1703_v48, 0.0  ;;  %v1713_v4 = vsel %vm3164_vm10, %v1704_v53, 0.0 }
 0x153   : > { %v1719_v35 = vmul.f32 %v1710_v57, %v1710_v57  ;;  %v1720_v63 = vmul.f32 %v1711_v34, %v1711_v34  ;;  %v1721_v55 = vmul.f32 %v1712_v5, %v1712_v5  ;;  %v1714_v47 = vsel %vm3178_vm11, %v1705_v52, 0.0 }
 0x154   : > { %v1722_v51 = vmul.f32 %v1713_v4, %v1713_v4  ;;  %v1715_v54 = vsel %vm3233_vm1, %v1706_v41, 0.0  ;;  %v1723_v18 = vmul.f32 %v1714_v47, %v1714_v47  ;;  %v1709_v2 = vsub.f32 %v1477_v1, %v1700_v0 }
 0x155   : > { %v1728_v27 = vadd.f32 %v1720_v63, %v1719_v35  ;;  %v1716_v9 = vsel %vm3249_vm2, %v1707_v6, 0.0  ;;  %v1724_v22 = vmul.f32 %v1715_v54, %v1715_v54  ;;  %v1717_v28 = vsel %vm3263_vm4, %v1708_v60, 0.0 }
 0x156   : > { %v1725_v10 = vmul.f32 %v1716_v9, %v1716_v9  ;;  %v1718_v25 = vsel %vm3274_vm5, %v1709_v2, 0.0  ;;  %v1726_v14 = vmul.f32 %v1717_v28, %v1717_v28 }
 0x157   : > { %v1729_v19 = vadd.f32 %v1728_v27, %v1721_v55  ;;  %v1727_v26 = vmul.f32 %v1718_v25, %v1718_v25 }
 0x159   : > { %v1730_v58 = vadd.f32 %v1729_v19, %v1722_v51 }
 0x15b   : > { %v1731_v62 = vadd.f32 %v1730_v58, %v1723_v18 }
 0x15d   : > { %v1732_v36 = vadd.f32 %v1731_v62, %v1724_v22 }
 0x15f   : > { %v1733_v49 = vadd.f32 %v1732_v36, %v1725_v10 }
 0x161   : > { %v1734_v17 = vadd.f32 %v1733_v49, %v1726_v14 }
 0x163   : > { %v1735_v39 = vadd.f32 %v1734_v17, %v1727_v26 }
 0x165   : > { %v1736_v31 = vrot.slane %v1735_v39, 4 }
 0x167   : > { %v1737_v32 = vadd.f32 %v1736_v31, %v1735_v39 }
 0x169   : > { %v1738_v11 = vrot.slane %v1737_v32, 2 }
 0x16b   : > { %v1739_v13 = vadd.f32 %v1738_v11, %v1737_v32 }
 0x16d   : > { %v1740_v42 = vrot.slane %v1739_v13, 1 }
 0x16f   : > { %v1741_v38 = vadd.f32 %v1740_v42, %v1739_v13 }
 0x171   : > { %v1742_v40 = vmul.f32 0.015625, %v1741_v38 }
 0x173   : > { %v1743_v24 = vadd.f32 1e-05, %v1742_v40 }
 0x175   : > { %2480 = vrsqrt.f32 %v1743_v24 }
 0x182   : > { %v2481_v43 = vpop.eup %2480 }
 0x183   : > { %v1745_v37 = vmul.f32 %v2481_v43, %v1701_v21  ;;  %v1746_v16 = vmul.f32 %v2481_v43, %v1702_v45  ;;  %v1747_v61 = vmul.f32 %v2481_v43, %v1703_v48  ;;  %v1748_v23 = vmul.f32 %v2481_v43, %v1704_v53 }
 0x184   : > { %v1749_v46 = vmul.f32 %v2481_v43, %v1705_v52  ;;  %v1750_v12 = vmul.f32 %v2481_v43, %v1706_v41  ;;  %v1751_v30 = vmul.f32 %v2481_v43, %v1707_v6  ;;  %v1752_v44 = vmul.f32 %v2481_v43, %v1708_v60 }
 0x185   : > { %v1753_v1 = vmul.f32 %v2481_v43, %v1709_v2  ;;  %v1754_v59 = vmul.f32 0.2, %v1745_v37  ;;  %v1755_v50 = vmul.f32 0.2, %v1746_v16  ;;  %v1756_v8 = vmul.f32 0.2, %v1747_v61 }
 0x186   : > { %v1757_v56 = vmul.f32 0.2, %v1748_v23  ;;  %v1758_v7 = vmul.f32 0.2, %v1749_v46  ;;  %v1759_v3 = vmul.f32 0.2, %v1750_v12 }
 0x187   : > { %v1760_v33 = vmul.f32 0.2, %v1751_v30  ;;  %v1761_v15 = vmul.f32 0.2, %v1752_v44  ;;  %v1762_v29 = vmul.f32 0.2, %v1753_v1  ;;  %v1763_v20 = vmax.f32 %v1745_v37, %v1754_v59 }
 0x188   : > { %v1764_v0 = vmax.f32 %v1746_v16, %v1755_v50  ;;  %v1765_v21 = vmax.f32 %v1747_v61, %v1756_v8  ;;  %v1766_v45 = vmax.f32 %v1748_v23, %v1757_v56  ;;  %v1767_v48 = vmax.f32 %v1749_v46, %v1758_v7 }
 0x189   : > { %v1768_v53 = vmax.f32 %v1750_v12, %v1759_v3  ;;  %v1769_v57 = vmax.f32 %v1751_v30, %v1760_v33  ;;  %v1770_v34 = vmax.f32 %v1752_v44, %v1761_v15  ;;  %v1771_v52 = vmax.f32 %v1753_v1, %v1762_v29 }
 0x18a   : > { %v2142_v5 = vpack.c.bf16 %v1764_v0, %v1763_v20  ;;  %v2147_v35 = vpack.c.bf16 %v1766_v45, %v1765_v21 }
 0x18b   : > { %v2138_v63 = vpack.c.bf16 %v1771_v52, %v1771_v52  ;;  %v2152_v41 = vpack.c.bf16 %v1768_v53, %v1767_v48  ;;  %v2157_v4 = vpack.c.bf16 %v1770_v34, %v1769_v57 }
 0x18c   : > { %2143 = vst [vmem:[%s180_s29] sm:$0xff] %v2142_v5   ;;  %2159 = vst [vmem:[%s180_s29 + $0x8] sm:$0xff] %v2147_v35  }
 0x18d   : > { %2160 = vst [vmem:[%s180_s29 + $0x10] sm:$0xff] %v2152_v41   ;;  %2161 = vst [vmem:[%s180_s29 + $0x18] sm:$0xff] %v2157_v4  }
 0x18e   : > { %1817 = vst [vmem:[%s180_s29 + $0x20] sm:$0xf] %v2138_v63 }
 0x18f PF: > { %s12_s11 = sadd.s32 1, %s2504_s11   ;;  %s3371_s9 = smov %s2500_s10 }
 0x190   : > { %p9_p5 = scmp.ge.s32.totalorder %s12_s11, 4   ;;  %s3372_s10 = smov %s3374_s12 }
 0x192   :  { %11 = sbr.rel (!%p9_p5) target bundleno = 2 (0x2), region = 64 }

// kernel: discriminator_forward.7
= control target key start
LH: loop header
LB: loop body
LE: loop exit
PB: predicated region body
PF: predicated region fallthrough
CT: control target
= control target key end

     0   :  { %s4190_s9 = smov 0   ;;  %s4192_s10 = smov 0   ;;  %s5094_s0 = inlined_call_operand.vmem [shape: bf16[2,26,512], index: 0, kind: input, shape index: {}]   ;;  %s5095_s1 = inlined_call_operand.vmem [shape: bf16[4,512,256], index: 1, kind: input, shape index: {}]   ;;  %s5096_s2 = inlined_call_operand.vmem [shape: bf16[2,20,256], index: 2, kind: output, shape index: {}]  }
   0x1   :  { %s4194_s11 = smov 0   ;;  %s4196_s12 = smov 0  }
   0x2   :  { %s4198_s13 = smov 0   ;;  %s4200_s14 = smov 0  }
   0x3   :  { %s4202_s15 = smov 0   ;;  %s4204_s16 = smov 0  }
   0x4   :  { %s4206_s17 = smov 0  }
   0x5 LB: > { %s3262_s18 = sadd.s32 4294967295, %s4173_s17   ;;  %s21_s19 = sadd.s32 1, %s4165_s15  ;;  %s4173_s17 = sphi %s4206_s17, %s12_s17   ;;  %s4169_s16 = sphi %s4204_s16, %s5115_s16   ;;  %s4165_s15 = sphi %s4202_s15, %s5114_s15   ;;  %s4161_s14 = sphi %s4200_s14, %s5113_s14   ;;  %s4157_s13 = sphi %s4198_s13, %s5112_s13   ;;  %s4153_s12 = sphi %s4196_s12, %s5111_s12   ;;  %s4149_s11 = sphi %s4194_s11, %s5110_s11   ;;  %s4145_s10 = sphi %s4192_s10, %s5109_s10   ;;  %s4141_s9 = sphi %s4190_s9, %s5108_s9  }
   0x6   : > { %p22_p0 = scmp.ge.s32.totalorder %s21_s19, 2  ;;  %s24_s20 = sadd.s32 1, %s4169_s16 }
   0x7   : > { %s57_s21 = sadd.s32 1, %s4153_s12  ;;  %p64_p1 = scmp.ne.s32.totalorder %s4153_s12, %s4149_s11 }
   0x8   : > { %s5117_s19 = smov (%p22_p0, %s21_s19), 0  ;;  %s5119_s20 = smov (!%p22_p0, %s24_s20), %s4169_s16 }
   0x9   : > { %s54_s22 = ssub.s32 %s4165_s15, %s5117_s19  ;;  %p65_p2 = scmp.eq.s32.totalorder %s4173_s17, 0 }
   0xa   : > { %p26_p3 = scmp.ge.s32.totalorder %s5119_s20, 2  ;;  %p55_p4 = scmp.eq.s32.totalorder %s54_s22, 0 }
   0xb   : > { %p66_p5 = por %p65_p2, %p64_p1  ;;  %s85_s23 = sadd.s32 1, %s4145_s10 }
   0xc   : > { %s5121_s20 = smov (%p26_p3, %s5119_s20), 0  ;;  %p95_p6 = scmp.ne.s32.totalorder %s4145_s10, %s4141_s9 }
   0xd   : > { %s4251_s24 = scalar_select %p55_p4, %s4153_s12, %s57_s21  }
   0xe   : > { %s80_s25 = ssub.s32 %s4169_s16, %s5121_s20  ;;  %p96_p7 = scmp.eq.s32.totalorder %s3262_s18, 3 }
   0xf   : > { %s82_s26 = sor.u32 %s80_s25, %s54_s22  ;;  %p3265_p10 = scmp.ge.s32.totalorder %s4173_s17, 4 }
  0x10   : > { %p83_p8 = scmp.eq.s32.totalorder %s82_s26, 0  ;;  %p4257_p9 = por %p96_p7, %p95_p6 }
  0x11   : > { %118 = sbr.rel (%p3265_p10) target bundleno = 196 (0xc4), region = 16 }
  0x12   : > { %s4262_s28 = scalar_select %p83_p8, %s4145_s10, %s85_s23  }
  0x16   : > { %129 = sbr.rel (!%p66_p5) target bundleno = 196 (0xc4), region = 24  ;;  %s131_s29 = sand.u32 (%p66_p5), 1, %s4153_s12  }
  0x17   : > { %s3267_s30 = sshll.u32 (%p66_p5), %s4165_s15, 2  ;;  %s3266_s3 = sshll.u32 (%p66_p5), %s131_s29, 10 }
  0x18   : > { %s4270_s6 = scalar_lea.vmem (%p66_p5), %s5095_s1, %s3267_s30  ;;  %s4274_s7 = scalar_lea.vmem (%p66_p5), [#allocation3], %s3266_s3 }
  0x19   : > { %v152_v0 = vld [vmem:[%s4270_s6] sm:$0xf] (%p66_p5)  ;;  %v154_v1 = vld [vmem:[%s4270_s6 + $0x8] sm:$0xf] (%p66_p5)  ;;  %v156_v2 = vld [vmem:[%s4270_s6 + $0x10] sm:$0xf] (%p66_p5) }
  0x1a   : > { %153 = vst [vmem:[%s4274_s7] sm:$0xf] (%p66_p5), %v152_v0  ;;  %155 = vst [vmem:[%s4274_s7 + $0x4] sm:$0xf] (%p66_p5), %v154_v1  ;;  %v158_v3 = vld [vmem:[%s4270_s6 + $0x18] sm:$0xf] (%p66_p5) }
  0x1b   : > { %v160_v4 = vld [vmem:[%s4270_s6 + $0x20] sm:$0xf]  ;;  %157 = vst [vmem:[%s4274_s7 + $0x8] sm:$0xf] %v156_v2  ;;  %159 = vst [vmem:[%s4274_s7 + $0xc] sm:$0xf] %v158_v3 }
  0x1c   : > { %161 = vst [vmem:[%s4274_s7 + $0x10] sm:$0xf] %v160_v4  ;;  %v162_v5 = vld [vmem:[%s4270_s6 + $0x28] sm:$0xf]  ;;  %v164_v6 = vld [vmem:[%s4270_s6 + $0x30] sm:$0xf] }
  0x1d   : > { %v166_v7 = vld [vmem:[%s4270_s6 + $0x38] sm:$0xf]  ;;  %163 = vst [vmem:[%s4274_s7 + $0x14] sm:$0xf] %v162_v5  ;;  %165 = vst [vmem:[%s4274_s7 + $0x18] sm:$0xf] %v164_v6 }
  0x1e   : > { %167 = vst [vmem:[%s4274_s7 + $0x1c] sm:$0xf] %v166_v7  ;;  %v168_v8 = vld [vmem:[%s4270_s6 + $0x40] sm:$0xf]  ;;  %v170_v9 = vld [vmem:[%s4270_s6 + $0x48] sm:$0xf] }
  0x1f   : > { %v172_v10 = vld [vmem:[%s4270_s6 + $0x50] sm:$0xf]  ;;  %169 = vst [vmem:[%s4274_s7 + $0x20] sm:$0xf] %v168_v8  ;;  %171 = vst [vmem:[%s4274_s7 + $0x24] sm:$0xf] %v170_v9 }
  0x20   : > { %173 = vst [vmem:[%s4274_s7 + $0x28] sm:$0xf] %v172_v10  ;;  %v174_v11 = vld [vmem:[%s4270_s6 + $0x58] sm:$0xf]  ;;  %v176_v12 = vld [vmem:[%s4270_s6 + $0x60] sm:$0xf] }
  0x21   : > { %v178_v13 = vld [vmem:[%s4270_s6 + $0x68] sm:$0xf]  ;;  %175 = vst [vmem:[%s4274_s7 + $0x2c] sm:$0xf] %v174_v11  ;;  %177 = vst [vmem:[%s4274_s7 + $0x30] sm:$0xf] %v176_v12 }
  0x22   : > { %179 = vst [vmem:[%s4274_s7 + $0x34] sm:$0xf] %v178_v13  ;;  %v180_v14 = vld [vmem:[%s4270_s6 + $0x70] sm:$0xf]  ;;  %v182_v15 = vld [vmem:[%s4270_s6 + $0x78] sm:$0xf] }
  0x23   : > { %v184_v16 = vld [vmem:[%s4270_s6 + $0x80] sm:$0xf]  ;;  %181 = vst [vmem:[%s4274_s7 + $0x38] sm:$0xf] %v180_v14  ;;  %183 = vst [vmem:[%s4274_s7 + $0x3c] sm:$0xf] %v182_v15 }
  0x24   : > { %185 = vst [vmem:[%s4274_s7 + $0x40] sm:$0xf] %v184_v16  ;;  %v186_v17 = vld [vmem:[%s4270_s6 + $0x88] sm:$0xf]  ;;  %v188_v18 = vld [vmem:[%s4270_s6 + $0x90] sm:$0xf] }
  0x25   : > { %v190_v19 = vld [vmem:[%s4270_s6 + $0x98] sm:$0xf]  ;;  %187 = vst [vmem:[%s4274_s7 + $0x44] sm:$0xf] %v186_v17  ;;  %189 = vst [vmem:[%s4274_s7 + $0x48] sm:$0xf] %v188_v18 }
  0x26   : > { %191 = vst [vmem:[%s4274_s7 + $0x4c] sm:$0xf] %v190_v19  ;;  %v192_v20 = vld [vmem:[%s4270_s6 + $0xa0] sm:$0xf]  ;;  %v194_v21 = vld [vmem:[%s4270_s6 + $0xa8] sm:$0xf] }
  0x27   : > { %v196_v22 = vld [vmem:[%s4270_s6 + $0xb0] sm:$0xf]  ;;  %193 = vst [vmem:[%s4274_s7 + $0x50] sm:$0xf] %v192_v20  ;;  %195 = vst [vmem:[%s4274_s7 + $0x54] sm:$0xf] %v194_v21 }
  0x28   : > { %197 = vst [vmem:[%s4274_s7 + $0x58] sm:$0xf] %v196_v22  ;;  %v198_v23 = vld [vmem:[%s4270_s6 + $0xb8] sm:$0xf]  ;;  %v200_v24 = vld [vmem:[%s4270_s6 + $0xc0] sm:$0xf] }
  0x29   : > { %v202_v25 = vld [vmem:[%s4270_s6 + $0xc8] sm:$0xf]  ;;  %199 = vst [vmem:[%s4274_s7 + $0x5c] sm:$0xf] %v198_v23  ;;  %201 = vst [vmem:[%s4274_s7 + $0x60] sm:$0xf] %v200_v24 }
  0x2a   : > { %203 = vst [vmem:[%s4274_s7 + $0x64] sm:$0xf] %v202_v25  ;;  %v204_v26 = vld [vmem:[%s4270_s6 + $0xd0] sm:$0xf]  ;;  %v206_v27 = vld [vmem:[%s4270_s6 + $0xd8] sm:$0xf] }
  0x2b   : > { %v208_v28 = vld [vmem:[%s4270_s6 + $0xe0] sm:$0xf]  ;;  %205 = vst [vmem:[%s4274_s7 + $0x68] sm:$0xf] %v204_v26  ;;  %207 = vst [vmem:[%s4274_s7 + $0x6c] sm:$0xf] %v206_v27 }
  0x2c   : > { %209 = vst [vmem:[%s4274_s7 + $0x70] sm:$0xf] %v208_v28  ;;  %v210_v29 = vld [vmem:[%s4270_s6 + $0xe8] sm:$0xf]  ;;  %v212_v30 = vld [vmem:[%s4270_s6 + $0xf0] sm:$0xf] }
  0x2d   : > { %v214_v31 = vld [vmem:[%s4270_s6 + $0xf8] sm:$0xf]  ;;  %211 = vst [vmem:[%s4274_s7 + $0x74] sm:$0xf] %v210_v29  ;;  %213 = vst [vmem:[%s4274_s7 + $0x78] sm:$0xf] %v212_v30 }
  0x2e   : > { %215 = vst [vmem:[%s4274_s7 + $0x7c] sm:$0xf] %v214_v31  ;;  %v216_v32 = vld [vmem:[%s4270_s6 + $0x100] sm:$0xf]  ;;  %v218_v33 = vld [vmem:[%s4270_s6 + $0x108] sm:$0xf] }
  0x2f   : > { %v220_v34 = vld [vmem:[%s4270_s6 + $0x110] sm:$0xf]  ;;  %217 = vst [vmem:[%s4274_s7 + $0x80] sm:$0xf] %v216_v32  ;;  %219 = vst [vmem:[%s4274_s7 + $0x84] sm:$0xf] %v218_v33 }
  0x30   : > { %221 = vst [vmem:[%s4274_s7 + $0x88] sm:$0xf] %v220_v34  ;;  %v222_v35 = vld [vmem:[%s4270_s6 + $0x118] sm:$0xf]  ;;  %v224_v36 = vld [vmem:[%s4270_s6 + $0x120] sm:$0xf] }
  0x31   : > { %v226_v37 = vld [vmem:[%s4270_s6 + $0x128] sm:$0xf]  ;;  %223 = vst [vmem:[%s4274_s7 + $0x8c] sm:$0xf] %v222_v35  ;;  %225 = vst [vmem:[%s4274_s7 + $0x90] sm:$0xf] %v224_v36 }
  0x32   : > { %227 = vst [vmem:[%s4274_s7 + $0x94] sm:$0xf] %v226_v37  ;;  %v228_v38 = vld [vmem:[%s4270_s6 + $0x130] sm:$0xf]  ;;  %v230_v39 = vld [vmem:[%s4270_s6 + $0x138] sm:$0xf] }
  0x33   : > { %v232_v40 = vld [vmem:[%s4270_s6 + $0x140] sm:$0xf]  ;;  %229 = vst [vmem:[%s4274_s7 + $0x98] sm:$0xf] %v228_v38  ;;  %231 = vst [vmem:[%s4274_s7 + $0x9c] sm:$0xf] %v230_v39 }
  0x34   : > { %233 = vst [vmem:[%s4274_s7 + $0xa0] sm:$0xf] %v232_v40  ;;  %v234_v41 = vld [vmem:[%s4270_s6 + $0x148] sm:$0xf]  ;;  %v236_v42 = vld [vmem:[%s4270_s6 + $0x150] sm:$0xf] }
  0x35   : > { %v238_v43 = vld [vmem:[%s4270_s6 + $0x158] sm:$0xf]  ;;  %235 = vst [vmem:[%s4274_s7 + $0xa4] sm:$0xf] %v234_v41  ;;  %237 = vst [vmem:[%s4274_s7 + $0xa8] sm:$0xf] %v236_v42 }
  0x36   : > { %239 = vst [vmem:[%s4274_s7 + $0xac] sm:$0xf] %v238_v43  ;;  %v240_v44 = vld [vmem:[%s4270_s6 + $0x160] sm:$0xf]  ;;  %v242_v45 = vld [vmem:[%s4270_s6 + $0x168] sm:$0xf] }
  0x37   : > { %v244_v46 = vld [vmem:[%s4270_s6 + $0x170] sm:$0xf]  ;;  %241 = vst [vmem:[%s4274_s7 + $0xb0] sm:$0xf] %v240_v44  ;;  %243 = vst [vmem:[%s4274_s7 + $0xb4] sm:$0xf] %v242_v45 }
  0x38   : > { %245 = vst [vmem:[%s4274_s7 + $0xb8] sm:$0xf] %v244_v46  ;;  %v246_v47 = vld [vmem:[%s4270_s6 + $0x178] sm:$0xf]  ;;  %v248_v48 = vld [vmem:[%s4270_s6 + $0x180] sm:$0xf] }
  0x39   : > { %v250_v49 = vld [vmem:[%s4270_s6 + $0x188] sm:$0xf]  ;;  %247 = vst [vmem:[%s4274_s7 + $0xbc] sm:$0xf] %v246_v47  ;;  %249 = vst [vmem:[%s4274_s7 + $0xc0] sm:$0xf] %v248_v48 }
  0x3a   : > { %251 = vst [vmem:[%s4274_s7 + $0xc4] sm:$0xf] %v250_v49  ;;  %v252_v50 = vld [vmem:[%s4270_s6 + $0x190] sm:$0xf]  ;;  %v254_v51 = vld [vmem:[%s4270_s6 + $0x198] sm:$0xf] }
  0x3b   : > { %v256_v52 = vld [vmem:[%s4270_s6 + $0x1a0] sm:$0xf]  ;;  %253 = vst [vmem:[%s4274_s7 + $0xc8] sm:$0xf] %v252_v50  ;;  %255 = vst [vmem:[%s4274_s7 + $0xcc] sm:$0xf] %v254_v51 }
  0x3c   : > { %257 = vst [vmem:[%s4274_s7 + $0xd0] sm:$0xf] %v256_v52  ;;  %v258_v53 = vld [vmem:[%s4270_s6 + $0x1a8] sm:$0xf]  ;;  %v260_v54 = vld [vmem:[%s4270_s6 + $0x1b0] sm:$0xf] }
  0x3d   : > { %v262_v55 = vld [vmem:[%s4270_s6 + $0x1b8] sm:$0xf]  ;;  %259 = vst [vmem:[%s4274_s7 + $0xd4] sm:$0xf] %v258_v53  ;;  %261 = vst [vmem:[%s4274_s7 + $0xd8] sm:$0xf] %v260_v54 }
  0x3e   : > { %263 = vst [vmem:[%s4274_s7 + $0xdc] sm:$0xf] %v262_v55  ;;  %v264_v56 = vld [vmem:[%s4270_s6 + $0x1c0] sm:$0xf]  ;;  %v266_v57 = vld [vmem:[%s4270_s6 + $0x1c8] sm:$0xf] }
  0x3f   : > { %v268_v58 = vld [vmem:[%s4270_s6 + $0x1d0] sm:$0xf]  ;;  %265 = vst [vmem:[%s4274_s7 + $0xe0] sm:$0xf] %v264_v56  ;;  %267 = vst [vmem:[%s4274_s7 + $0xe4] sm:$0xf] %v266_v57 }
  0x40   : > { %269 = vst [vmem:[%s4274_s7 + $0xe8] sm:$0xf] %v268_v58  ;;  %v270_v59 = vld [vmem:[%s4270_s6 + $0x1d8] sm:$0xf]  ;;  %v272_v60 = vld [vmem:[%s4270_s6 + $0x1e0] sm:$0xf] }
  0x41   : > { %v274_v61 = vld [vmem:[%s4270_s6 + $0x1e8] sm:$0xf]  ;;  %271 = vst [vmem:[%s4274_s7 + $0xec] sm:$0xf] %v270_v59  ;;  %273 = vst [vmem:[%s4274_s7 + $0xf0] sm:$0xf] %v272_v60 }
  0x42   : > { %275 = vst [vmem:[%s4274_s7 + $0xf4] sm:$0xf] %v274_v61  ;;  %v276_v62 = vld [vmem:[%s4270_s6 + $0x1f0] sm:$0xf]  ;;  %v278_v63 = vld [vmem:[%s4270_s6 + $0x1f8] sm:$0xf] }
  0x43   : > { %v280_v0 = vld [vmem:[%s4270_s6 + $0x200] sm:$0xf]  ;;  %277 = vst [vmem:[%s4274_s7 + $0xf8] sm:$0xf] %v276_v62  ;;  %279 = vst [vmem:[%s4274_s7 + $0xfc] sm:$0xf] %v278_v63 }
  0x44   : > { %281 = vst [vmem:[%s4274_s7 + $0x100] sm:$0xf] %v280_v0  ;;  %v282_v1 = vld [vmem:[%s4270_s6 + $0x208] sm:$0xf]  ;;  %v284_v2 = vld [vmem:[%s4270_s6 + $0x210] sm:$0xf] }
  0x45   : > { %v286_v3 = vld [vmem:[%s4270_s6 + $0x218] sm:$0xf]  ;;  %283 = vst [vmem:[%s4274_s7 + $0x104] sm:$0xf] %v282_v1  ;;  %285 = vst [vmem:[%s4274_s7 + $0x108] sm:$0xf] %v284_v2 }
  0x46   : > { %287 = vst [vmem:[%s4274_s7 + $0x10c] sm:$0xf] %v286_v3  ;;  %v288_v4 = vld [vmem:[%s4270_s6 + $0x220] sm:$0xf]  ;;  %v290_v5 = vld [vmem:[%s4270_s6 + $0x228] sm:$0xf] }
  0x47   : > { %v292_v6 = vld [vmem:[%s4270_s6 + $0x230] sm:$0xf]  ;;  %289 = vst [vmem:[%s4274_s7 + $0x110] sm:$0xf] %v288_v4  ;;  %291 = vst [vmem:[%s4274_s7 + $0x114] sm:$0xf] %v290_v5 }
  0x48   : > { %293 = vst [vmem:[%s4274_s7 + $0x118] sm:$0xf] %v292_v6  ;;  %v294_v7 = vld [vmem:[%s4270_s6 + $0x238] sm:$0xf]  ;;  %v296_v8 = vld [vmem:[%s4270_s6 + $0x240] sm:$0xf] }
  0x49   : > { %v298_v9 = vld [vmem:[%s4270_s6 + $0x248] sm:$0xf]  ;;  %295 = vst [vmem:[%s4274_s7 + $0x11c] sm:$0xf] %v294_v7  ;;  %297 = vst [vmem:[%s4274_s7 + $0x120] sm:$0xf] %v296_v8 }
  0x4a   : > { %299 = vst [vmem:[%s4274_s7 + $0x124] sm:$0xf] %v298_v9  ;;  %v300_v10 = vld [vmem:[%s4270_s6 + $0x250] sm:$0xf]  ;;  %v302_v11 = vld [vmem:[%s4270_s6 + $0x258] sm:$0xf] }
  0x4b   : > { %v304_v12 = vld [vmem:[%s4270_s6 + $0x260] sm:$0xf]  ;;  %301 = vst [vmem:[%s4274_s7 + $0x128] sm:$0xf] %v300_v10  ;;  %303 = vst [vmem:[%s4274_s7 + $0x12c] sm:$0xf] %v302_v11 }
  0x4c   : > { %305 = vst [vmem:[%s4274_s7 + $0x130] sm:$0xf] %v304_v12  ;;  %v306_v13 = vld [vmem:[%s4270_s6 + $0x268] sm:$0xf]  ;;  %v308_v14 = vld [vmem:[%s4270_s6 + $0x270] sm:$0xf] }
  0x4d   : > { %v310_v15 = vld [vmem:[%s4270_s6 + $0x278] sm:$0xf]  ;;  %307 = vst [vmem:[%s4274_s7 + $0x134] sm:$0xf] %v306_v13  ;;  %309 = vst [vmem:[%s4274_s7 + $0x138] sm:$0xf] %v308_v14 }
  0x4e   : > { %311 = vst [vmem:[%s4274_s7 + $0x13c] sm:$0xf] %v310_v15  ;;  %v312_v16 = vld [vmem:[%s4270_s6 + $0x280] sm:$0xf]  ;;  %v314_v17 = vld [vmem:[%s4270_s6 + $0x288] sm:$0xf] }
  0x4f   : > { %v316_v18 = vld [vmem:[%s4270_s6 + $0x290] sm:$0xf]  ;;  %313 = vst [vmem:[%s4274_s7 + $0x140] sm:$0xf] %v312_v16  ;;  %315 = vst [vmem:[%s4274_s7 + $0x144] sm:$0xf] %v314_v17 }
  0x50   : > { %317 = vst [vmem:[%s4274_s7 + $0x148] sm:$0xf] %v316_v18  ;;  %v318_v19 = vld [vmem:[%s4270_s6 + $0x298] sm:$0xf]  ;;  %v320_v20 = vld [vmem:[%s4270_s6 + $0x2a0] sm:$0xf] }
  0x51   : > { %v322_v21 = vld [vmem:[%s4270_s6 + $0x2a8] sm:$0xf]  ;;  %319 = vst [vmem:[%s4274_s7 + $0x14c] sm:$0xf] %v318_v19  ;;  %321 = vst [vmem:[%s4274_s7 + $0x150] sm:$0xf] %v320_v20 }
  0x52   : > { %323 = vst [vmem:[%s4274_s7 + $0x154] sm:$0xf] %v322_v21  ;;  %v324_v22 = vld [vmem:[%s4270_s6 + $0x2b0] sm:$0xf]  ;;  %v326_v23 = vld [vmem:[%s4270_s6 + $0x2b8] sm:$0xf] }
  0x53   : > { %v328_v24 = vld [vmem:[%s4270_s6 + $0x2c0] sm:$0xf]  ;;  %325 = vst [vmem:[%s4274_s7 + $0x158] sm:$0xf] %v324_v22  ;;  %327 = vst [vmem:[%s4274_s7 + $0x15c] sm:$0xf] %v326_v23 }
  0x54   : > { %329 = vst [vmem:[%s4274_s7 + $0x160] sm:$0xf] %v328_v24  ;;  %v330_v25 = vld [vmem:[%s4270_s6 + $0x2c8] sm:$0xf]  ;;  %v332_v26 = vld [vmem:[%s4270_s6 + $0x2d0] sm:$0xf] }
  0x55   : > { %v334_v27 = vld [vmem:[%s4270_s6 + $0x2d8] sm:$0xf]  ;;  %331 = vst [vmem:[%s4274_s7 + $0x164] sm:$0xf] %v330_v25  ;;  %333 = vst [vmem:[%s4274_s7 + $0x168] sm:$0xf] %v332_v26 }
  0x56   : > { %335 = vst [vmem:[%s4274_s7 + $0x16c] sm:$0xf] %v334_v27  ;;  %v336_v28 = vld [vmem:[%s4270_s6 + $0x2e0] sm:$0xf]  ;;  %v338_v29 = vld [vmem:[%s4270_s6 + $0x2e8] sm:$0xf] }
  0x57   : > { %v340_v30 = vld [vmem:[%s4270_s6 + $0x2f0] sm:$0xf]  ;;  %337 = vst [vmem:[%s4274_s7 + $0x170] sm:$0xf] %v336_v28  ;;  %339 = vst [vmem:[%s4274_s7 + $0x174] sm:$0xf] %v338_v29 }
  0x58   : > { %341 = vst [vmem:[%s4274_s7 + $0x178] sm:$0xf] %v340_v30  ;;  %v342_v31 = vld [vmem:[%s4270_s6 + $0x2f8] sm:$0xf]  ;;  %v344_v32 = vld [vmem:[%s4270_s6 + $0x300] sm:$0xf] }
  0x59   : > { %v346_v33 = vld [vmem:[%s4270_s6 + $0x308] sm:$0xf]  ;;  %343 = vst [vmem:[%s4274_s7 + $0x17c] sm:$0xf] %v342_v31  ;;  %345 = vst [vmem:[%s4274_s7 + $0x180] sm:$0xf] %v344_v32 }
  0x5a   : > { %347 = vst [vmem:[%s4274_s7 + $0x184] sm:$0xf] %v346_v33  ;;  %v348_v34 = vld [vmem:[%s4270_s6 + $0x310] sm:$0xf]  ;;  %v350_v35 = vld [vmem:[%s4270_s6 + $0x318] sm:$0xf] }
  0x5b   : > { %v352_v36 = vld [vmem:[%s4270_s6 + $0x320] sm:$0xf]  ;;  %349 = vst [vmem:[%s4274_s7 + $0x188] sm:$0xf] %v348_v34  ;;  %351 = vst [vmem:[%s4274_s7 + $0x18c] sm:$0xf] %v350_v35 }
  0x5c   : > { %353 = vst [vmem:[%s4274_s7 + $0x190] sm:$0xf] %v352_v36  ;;  %v354_v37 = vld [vmem:[%s4270_s6 + $0x328] sm:$0xf]  ;;  %v356_v38 = vld [vmem:[%s4270_s6 + $0x330] sm:$0xf] }
  0x5d   : > { %v358_v39 = vld [vmem:[%s4270_s6 + $0x338] sm:$0xf]  ;;  %355 = vst [vmem:[%s4274_s7 + $0x194] sm:$0xf] %v354_v37  ;;  %357 = vst [vmem:[%s4274_s7 + $0x198] sm:$0xf] %v356_v38 }
  0x5e   : > { %359 = vst [vmem:[%s4274_s7 + $0x19c] sm:$0xf] %v358_v39  ;;  %v360_v40 = vld [vmem:[%s4270_s6 + $0x340] sm:$0xf]  ;;  %v362_v41 = vld [vmem:[%s4270_s6 + $0x348] sm:$0xf] }
  0x5f   : > { %v364_v42 = vld [vmem:[%s4270_s6 + $0x350] sm:$0xf]  ;;  %361 = vst [vmem:[%s4274_s7 + $0x1a0] sm:$0xf] %v360_v40  ;;  %363 = vst [vmem:[%s4274_s7 + $0x1a4] sm:$0xf] %v362_v41 }
  0x60   : > { %365 = vst [vmem:[%s4274_s7 + $0x1a8] sm:$0xf] %v364_v42  ;;  %v366_v43 = vld [vmem:[%s4270_s6 + $0x358] sm:$0xf]  ;;  %v368_v44 = vld [vmem:[%s4270_s6 + $0x360] sm:$0xf] }
  0x61   : > { %v370_v45 = vld [vmem:[%s4270_s6 + $0x368] sm:$0xf]  ;;  %367 = vst [vmem:[%s4274_s7 + $0x1ac] sm:$0xf] %v366_v43  ;;  %369 = vst [vmem:[%s4274_s7 + $0x1b0] sm:$0xf] %v368_v44 }
  0x62   : > { %371 = vst [vmem:[%s4274_s7 + $0x1b4] sm:$0xf] %v370_v45  ;;  %v372_v46 = vld [vmem:[%s4270_s6 + $0x370] sm:$0xf]  ;;  %v374_v47 = vld [vmem:[%s4270_s6 + $0x378] sm:$0xf] }
  0x63   : > { %v376_v48 = vld [vmem:[%s4270_s6 + $0x380] sm:$0xf]  ;;  %373 = vst [vmem:[%s4274_s7 + $0x1b8] sm:$0xf] %v372_v46  ;;  %375 = vst [vmem:[%s4274_s7 + $0x1bc] sm:$0xf] %v374_v47 }
  0x64   : > { %377 = vst [vmem:[%s4274_s7 + $0x1c0] sm:$0xf] %v376_v48  ;;  %v378_v49 = vld [vmem:[%s4270_s6 + $0x388] sm:$0xf]  ;;  %v380_v50 = vld [vmem:[%s4270_s6 + $0x390] sm:$0xf] }
  0x65   : > { %v382_v51 = vld [vmem:[%s4270_s6 + $0x398] sm:$0xf]  ;;  %379 = vst [vmem:[%s4274_s7 + $0x1c4] sm:$0xf] %v378_v49  ;;  %381 = vst [vmem:[%s4274_s7 + $0x1c8] sm:$0xf] %v380_v50 }
  0x66   : > { %383 = vst [vmem:[%s4274_s7 + $0x1cc] sm:$0xf] %v382_v51  ;;  %v384_v52 = vld [vmem:[%s4270_s6 + $0x3a0] sm:$0xf]  ;;  %v386_v53 = vld [vmem:[%s4270_s6 + $0x3a8] sm:$0xf] }
  0x67   : > { %v388_v54 = vld [vmem:[%s4270_s6 + $0x3b0] sm:$0xf]  ;;  %385 = vst [vmem:[%s4274_s7 + $0x1d0] sm:$0xf] %v384_v52  ;;  %387 = vst [vmem:[%s4274_s7 + $0x1d4] sm:$0xf] %v386_v53 }
  0x68   : > { %389 = vst [vmem:[%s4274_s7 + $0x1d8] sm:$0xf] %v388_v54  ;;  %v390_v55 = vld [vmem:[%s4270_s6 + $0x3b8] sm:$0xf]  ;;  %v392_v56 = vld [vmem:[%s4270_s6 + $0x3c0] sm:$0xf] }
  0x69   : > { %v394_v57 = vld [vmem:[%s4270_s6 + $0x3c8] sm:$0xf]  ;;  %391 = vst [vmem:[%s4274_s7 + $0x1dc] sm:$0xf] %v390_v55  ;;  %393 = vst [vmem:[%s4274_s7 + $0x1e0] sm:$0xf] %v392_v56 }
  0x6a   : > { %395 = vst [vmem:[%s4274_s7 + $0x1e4] sm:$0xf] %v394_v57  ;;  %v396_v58 = vld [vmem:[%s4270_s6 + $0x3d0] sm:$0xf]  ;;  %v398_v59 = vld [vmem:[%s4270_s6 + $0x3d8] sm:$0xf] }
  0x6b   : > { %v400_v60 = vld [vmem:[%s4270_s6 + $0x3e0] sm:$0xf]  ;;  %397 = vst [vmem:[%s4274_s7 + $0x1e8] sm:$0xf] %v396_v58  ;;  %399 = vst [vmem:[%s4274_s7 + $0x1ec] sm:$0xf] %v398_v59 }
  0x6c   : > { %401 = vst [vmem:[%s4274_s7 + $0x1f0] sm:$0xf] %v400_v60  ;;  %v402_v61 = vld [vmem:[%s4270_s6 + $0x3e8] sm:$0xf]  ;;  %v404_v62 = vld [vmem:[%s4270_s6 + $0x3f0] sm:$0xf] }
  0x6d   : > { %v406_v63 = vld [vmem:[%s4270_s6 + $0x3f8] sm:$0xf]  ;;  %403 = vst [vmem:[%s4274_s7 + $0x1f4] sm:$0xf] %v402_v61  ;;  %405 = vst [vmem:[%s4274_s7 + $0x1f8] sm:$0xf] %v404_v62 }
  0x6e   : > { %407 = vst [vmem:[%s4274_s7 + $0x1fc] sm:$0xf] %v406_v63  ;;  %v408_v0 = vld [vmem:[%s4270_s6 + $0x400] sm:$0xf]  ;;  %v410_v1 = vld [vmem:[%s4270_s6 + $0x408] sm:$0xf] }
  0x6f   : > { %v412_v2 = vld [vmem:[%s4270_s6 + $0x410] sm:$0xf]  ;;  %409 = vst [vmem:[%s4274_s7 + $0x200] sm:$0xf] %v408_v0  ;;  %411 = vst [vmem:[%s4274_s7 + $0x204] sm:$0xf] %v410_v1 }
  0x70   : > { %413 = vst [vmem:[%s4274_s7 + $0x208] sm:$0xf] %v412_v2  ;;  %v414_v3 = vld [vmem:[%s4270_s6 + $0x418] sm:$0xf]  ;;  %v416_v4 = vld [vmem:[%s4270_s6 + $0x420] sm:$0xf] }
  0x71   : > { %v418_v5 = vld [vmem:[%s4270_s6 + $0x428] sm:$0xf]  ;;  %415 = vst [vmem:[%s4274_s7 + $0x20c] sm:$0xf] %v414_v3  ;;  %417 = vst [vmem:[%s4274_s7 + $0x210] sm:$0xf] %v416_v4 }
  0x72   : > { %419 = vst [vmem:[%s4274_s7 + $0x214] sm:$0xf] %v418_v5  ;;  %v420_v6 = vld [vmem:[%s4270_s6 + $0x430] sm:$0xf]  ;;  %v422_v7 = vld [vmem:[%s4270_s6 + $0x438] sm:$0xf] }
  0x73   : > { %v424_v8 = vld [vmem:[%s4270_s6 + $0x440] sm:$0xf]  ;;  %421 = vst [vmem:[%s4274_s7 + $0x218] sm:$0xf] %v420_v6  ;;  %423 = vst [vmem:[%s4274_s7 + $0x21c] sm:$0xf] %v422_v7 }
  0x74   : > { %425 = vst [vmem:[%s4274_s7 + $0x220] sm:$0xf] %v424_v8  ;;  %v426_v9 = vld [vmem:[%s4270_s6 + $0x448] sm:$0xf]  ;;  %v428_v10 = vld [vmem:[%s4270_s6 + $0x450] sm:$0xf] }
  0x75   : > { %v430_v11 = vld [vmem:[%s4270_s6 + $0x458] sm:$0xf]  ;;  %427 = vst [vmem:[%s4274_s7 + $0x224] sm:$0xf] %v426_v9  ;;  %429 = vst [vmem:[%s4274_s7 + $0x228] sm:$0xf] %v428_v10 }
  0x76   : > { %431 = vst [vmem:[%s4274_s7 + $0x22c] sm:$0xf] %v430_v11  ;;  %v432_v12 = vld [vmem:[%s4270_s6 + $0x460] sm:$0xf]  ;;  %v434_v13 = vld [vmem:[%s4270_s6 + $0x468] sm:$0xf] }
  0x77   : > { %v436_v14 = vld [vmem:[%s4270_s6 + $0x470] sm:$0xf]  ;;  %433 = vst [vmem:[%s4274_s7 + $0x230] sm:$0xf] %v432_v12  ;;  %435 = vst [vmem:[%s4274_s7 + $0x234] sm:$0xf] %v434_v13 }
  0x78   : > { %437 = vst [vmem:[%s4274_s7 + $0x238] sm:$0xf] %v436_v14  ;;  %v438_v15 = vld [vmem:[%s4270_s6 + $0x478] sm:$0xf]  ;;  %v440_v16 = vld [vmem:[%s4270_s6 + $0x480] sm:$0xf] }
  0x79   : > { %v442_v17 = vld [vmem:[%s4270_s6 + $0x488] sm:$0xf]  ;;  %439 = vst [vmem:[%s4274_s7 + $0x23c] sm:$0xf] %v438_v15  ;;  %441 = vst [vmem:[%s4274_s7 + $0x240] sm:$0xf] %v440_v16 }
  0x7a   : > { %443 = vst [vmem:[%s4274_s7 + $0x244] sm:$0xf] %v442_v17  ;;  %v444_v18 = vld [vmem:[%s4270_s6 + $0x490] sm:$0xf]  ;;  %v446_v19 = vld [vmem:[%s4270_s6 + $0x498] sm:$0xf] }
  0x7b   : > { %v448_v20 = vld [vmem:[%s4270_s6 + $0x4a0] sm:$0xf]  ;;  %445 = vst [vmem:[%s4274_s7 + $0x248] sm:$0xf] %v444_v18  ;;  %447 = vst [vmem:[%s4274_s7 + $0x24c] sm:$0xf] %v446_v19 }
  0x7c   : > { %449 = vst [vmem:[%s4274_s7 + $0x250] sm:$0xf] %v448_v20  ;;  %v450_v21 = vld [vmem:[%s4270_s6 + $0x4a8] sm:$0xf]  ;;  %v452_v22 = vld [vmem:[%s4270_s6 + $0x4b0] sm:$0xf] }
  0x7d   : > { %v454_v23 = vld [vmem:[%s4270_s6 + $0x4b8] sm:$0xf]  ;;  %451 = vst [vmem:[%s4274_s7 + $0x254] sm:$0xf] %v450_v21  ;;  %453 = vst [vmem:[%s4274_s7 + $0x258] sm:$0xf] %v452_v22 }
  0x7e   : > { %455 = vst [vmem:[%s4274_s7 + $0x25c] sm:$0xf] %v454_v23  ;;  %v456_v24 = vld [vmem:[%s4270_s6 + $0x4c0] sm:$0xf]  ;;  %v458_v25 = vld [vmem:[%s4270_s6 + $0x4c8] sm:$0xf] }
  0x7f   : > { %v460_v26 = vld [vmem:[%s4270_s6 + $0x4d0] sm:$0xf]  ;;  %457 = vst [vmem:[%s4274_s7 + $0x260] sm:$0xf] %v456_v24  ;;  %459 = vst [vmem:[%s4274_s7 + $0x264] sm:$0xf] %v458_v25 }
  0x80   : > { %461 = vst [vmem:[%s4274_s7 + $0x268] sm:$0xf] %v460_v26  ;;  %v462_v27 = vld [vmem:[%s4270_s6 + $0x4d8] sm:$0xf]  ;;  %v464_v28 = vld [vmem:[%s4270_s6 + $0x4e0] sm:$0xf] }
  0x81   : > { %v466_v29 = vld [vmem:[%s4270_s6 + $0x4e8] sm:$0xf]  ;;  %463 = vst [vmem:[%s4274_s7 + $0x26c] sm:$0xf] %v462_v27  ;;  %465 = vst [vmem:[%s4274_s7 + $0x270] sm:$0xf] %v464_v28 }
  0x82   : > { %467 = vst [vmem:[%s4274_s7 + $0x274] sm:$0xf] %v466_v29  ;;  %v468_v30 = vld [vmem:[%s4270_s6 + $0x4f0] sm:$0xf]  ;;  %v470_v31 = vld [vmem:[%s4270_s6 + $0x4f8] sm:$0xf] }
  0x83   : > { %v472_v32 = vld [vmem:[%s4270_s6 + $0x500] sm:$0xf]  ;;  %469 = vst [vmem:[%s4274_s7 + $0x278] sm:$0xf] %v468_v30  ;;  %471 = vst [vmem:[%s4274_s7 + $0x27c] sm:$0xf] %v470_v31 }
  0x84   : > { %473 = vst [vmem:[%s4274_s7 + $0x280] sm:$0xf] %v472_v32  ;;  %v474_v33 = vld [vmem:[%s4270_s6 + $0x508] sm:$0xf]  ;;  %v476_v34 = vld [vmem:[%s4270_s6 + $0x510] sm:$0xf] }
  0x85   : > { %v478_v35 = vld [vmem:[%s4270_s6 + $0x518] sm:$0xf]  ;;  %475 = vst [vmem:[%s4274_s7 + $0x284] sm:$0xf] %v474_v33  ;;  %477 = vst [vmem:[%s4274_s7 + $0x288] sm:$0xf] %v476_v34 }
  0x86   : > { %479 = vst [vmem:[%s4274_s7 + $0x28c] sm:$0xf] %v478_v35  ;;  %v480_v36 = vld [vmem:[%s4270_s6 + $0x520] sm:$0xf]  ;;  %v482_v37 = vld [vmem:[%s4270_s6 + $0x528] sm:$0xf] }
  0x87   : > { %v484_v38 = vld [vmem:[%s4270_s6 + $0x530] sm:$0xf]  ;;  %481 = vst [vmem:[%s4274_s7 + $0x290] sm:$0xf] %v480_v36  ;;  %483 = vst [vmem:[%s4274_s7 + $0x294] sm:$0xf] %v482_v37 }
  0x88   : > { %485 = vst [vmem:[%s4274_s7 + $0x298] sm:$0xf] %v484_v38  ;;  %v486_v39 = vld [vmem:[%s4270_s6 + $0x538] sm:$0xf]  ;;  %v488_v40 = vld [vmem:[%s4270_s6 + $0x540] sm:$0xf] }
  0x89   : > { %v490_v41 = vld [vmem:[%s4270_s6 + $0x548] sm:$0xf]  ;;  %487 = vst [vmem:[%s4274_s7 + $0x29c] sm:$0xf] %v486_v39  ;;  %489 = vst [vmem:[%s4274_s7 + $0x2a0] sm:$0xf] %v488_v40 }
  0x8a   : > { %491 = vst [vmem:[%s4274_s7 + $0x2a4] sm:$0xf] %v490_v41  ;;  %v492_v42 = vld [vmem:[%s4270_s6 + $0x550] sm:$0xf]  ;;  %v494_v43 = vld [vmem:[%s4270_s6 + $0x558] sm:$0xf] }
  0x8b   : > { %v496_v44 = vld [vmem:[%s4270_s6 + $0x560] sm:$0xf]  ;;  %493 = vst [vmem:[%s4274_s7 + $0x2a8] sm:$0xf] %v492_v42  ;;  %495 = vst [vmem:[%s4274_s7 + $0x2ac] sm:$0xf] %v494_v43 }
  0x8c   : > { %497 = vst [vmem:[%s4274_s7 + $0x2b0] sm:$0xf] %v496_v44  ;;  %v498_v45 = vld [vmem:[%s4270_s6 + $0x568] sm:$0xf]  ;;  %v500_v46 = vld [vmem:[%s4270_s6 + $0x570] sm:$0xf] }
  0x8d   : > { %v502_v47 = vld [vmem:[%s4270_s6 + $0x578] sm:$0xf]  ;;  %499 = vst [vmem:[%s4274_s7 + $0x2b4] sm:$0xf] %v498_v45  ;;  %501 = vst [vmem:[%s4274_s7 + $0x2b8] sm:$0xf] %v500_v46 }
  0x8e   : > { %503 = vst [vmem:[%s4274_s7 + $0x2bc] sm:$0xf] %v502_v47  ;;  %v504_v48 = vld [vmem:[%s4270_s6 + $0x580] sm:$0xf]  ;;  %v506_v49 = vld [vmem:[%s4270_s6 + $0x588] sm:$0xf] }
  0x8f   : > { %v508_v50 = vld [vmem:[%s4270_s6 + $0x590] sm:$0xf]  ;;  %505 = vst [vmem:[%s4274_s7 + $0x2c0] sm:$0xf] %v504_v48  ;;  %507 = vst [vmem:[%s4274_s7 + $0x2c4] sm:$0xf] %v506_v49 }
  0x90   : > { %509 = vst [vmem:[%s4274_s7 + $0x2c8] sm:$0xf] %v508_v50  ;;  %v510_v51 = vld [vmem:[%s4270_s6 + $0x598] sm:$0xf]  ;;  %v512_v52 = vld [vmem:[%s4270_s6 + $0x5a0] sm:$0xf] }
  0x91   : > { %v514_v53 = vld [vmem:[%s4270_s6 + $0x5a8] sm:$0xf]  ;;  %511 = vst [vmem:[%s4274_s7 + $0x2cc] sm:$0xf] %v510_v51  ;;  %513 = vst [vmem:[%s4274_s7 + $0x2d0] sm:$0xf] %v512_v52 }
  0x92   : > { %515 = vst [vmem:[%s4274_s7 + $0x2d4] sm:$0xf] %v514_v53  ;;  %v516_v54 = vld [vmem:[%s4270_s6 + $0x5b0] sm:$0xf]  ;;  %v518_v55 = vld [vmem:[%s4270_s6 + $0x5b8] sm:$0xf] }
  0x93   : > { %v520_v56 = vld [vmem:[%s4270_s6 + $0x5c0] sm:$0xf]  ;;  %517 = vst [vmem:[%s4274_s7 + $0x2d8] sm:$0xf] %v516_v54  ;;  %519 = vst [vmem:[%s4274_s7 + $0x2dc] sm:$0xf] %v518_v55 }
  0x94   : > { %521 = vst [vmem:[%s4274_s7 + $0x2e0] sm:$0xf] %v520_v56  ;;  %v522_v57 = vld [vmem:[%s4270_s6 + $0x5c8] sm:$0xf]  ;;  %v524_v58 = vld [vmem:[%s4270_s6 + $0x5d0] sm:$0xf] }
  0x95   : > { %v526_v59 = vld [vmem:[%s4270_s6 + $0x5d8] sm:$0xf]  ;;  %523 = vst [vmem:[%s4274_s7 + $0x2e4] sm:$0xf] %v522_v57  ;;  %525 = vst [vmem:[%s4274_s7 + $0x2e8] sm:$0xf] %v524_v58 }
  0x96   : > { %527 = vst [vmem:[%s4274_s7 + $0x2ec] sm:$0xf] %v526_v59  ;;  %v528_v60 = vld [vmem:[%s4270_s6 + $0x5e0] sm:$0xf]  ;;  %v530_v61 = vld [vmem:[%s4270_s6 + $0x5e8] sm:$0xf] }
  0x97   : > { %v532_v62 = vld [vmem:[%s4270_s6 + $0x5f0] sm:$0xf]  ;;  %529 = vst [vmem:[%s4274_s7 + $0x2f0] sm:$0xf] %v528_v60  ;;  %531 = vst [vmem:[%s4274_s7 + $0x2f4] sm:$0xf] %v530_v61 }
  0x98   : > { %533 = vst [vmem:[%s4274_s7 + $0x2f8] sm:$0xf] %v532_v62  ;;  %v534_v63 = vld [vmem:[%s4270_s6 + $0x5f8] sm:$0xf]  ;;  %v536_v0 = vld [vmem:[%s4270_s6 + $0x600] sm:$0xf] }
  0x99   : > { %v538_v1 = vld [vmem:[%s4270_s6 + $0x608] sm:$0xf]  ;;  %535 = vst [vmem:[%s4274_s7 + $0x2fc] sm:$0xf] %v534_v63  ;;  %537 = vst [vmem:[%s4274_s7 + $0x300] sm:$0xf] %v536_v0 }
  0x9a   : > { %539 = vst [vmem:[%s4274_s7 + $0x304] sm:$0xf] %v538_v1  ;;  %v540_v2 = vld [vmem:[%s4270_s6 + $0x610] sm:$0xf]  ;;  %v542_v3 = vld [vmem:[%s4270_s6 + $0x618] sm:$0xf] }
  0x9b   : > { %v544_v4 = vld [vmem:[%s4270_s6 + $0x620] sm:$0xf]  ;;  %541 = vst [vmem:[%s4274_s7 + $0x308] sm:$0xf] %v540_v2  ;;  %543 = vst [vmem:[%s4274_s7 + $0x30c] sm:$0xf] %v542_v3 }
  0x9c   : > { %545 = vst [vmem:[%s4274_s7 + $0x310] sm:$0xf] %v544_v4  ;;  %v546_v5 = vld [vmem:[%s4270_s6 + $0x628] sm:$0xf]  ;;  %v548_v6 = vld [vmem:[%s4270_s6 + $0x630] sm:$0xf] }
  0x9d   : > { %v550_v7 = vld [vmem:[%s4270_s6 + $0x638] sm:$0xf]  ;;  %547 = vst [vmem:[%s4274_s7 + $0x314] sm:$0xf] %v546_v5  ;;  %549 = vst [vmem:[%s4274_s7 + $0x318] sm:$0xf] %v548_v6 }
  0x9e   : > { %551 = vst [vmem:[%s4274_s7 + $0x31c] sm:$0xf] %v550_v7  ;;  %v552_v8 = vld [vmem:[%s4270_s6 + $0x640] sm:$0xf]  ;;  %v554_v9 = vld [vmem:[%s4270_s6 + $0x648] sm:$0xf] }
  0x9f   : > { %v556_v10 = vld [vmem:[%s4270_s6 + $0x650] sm:$0xf]  ;;  %553 = vst [vmem:[%s4274_s7 + $0x320] sm:$0xf] %v552_v8  ;;  %555 = vst [vmem:[%s4274_s7 + $0x324] sm:$0xf] %v554_v9 }
  0xa0   : > { %557 = vst [vmem:[%s4274_s7 + $0x328] sm:$0xf] %v556_v10  ;;  %v558_v11 = vld [vmem:[%s4270_s6 + $0x658] sm:$0xf]  ;;  %v560_v12 = vld [vmem:[%s4270_s6 + $0x660] sm:$0xf] }
  0xa1   : > { %v562_v13 = vld [vmem:[%s4270_s6 + $0x668] sm:$0xf]  ;;  %559 = vst [vmem:[%s4274_s7 + $0x32c] sm:$0xf] %v558_v11  ;;  %561 = vst [vmem:[%s4274_s7 + $0x330] sm:$0xf] %v560_v12 }
  0xa2   : > { %563 = vst [vmem:[%s4274_s7 + $0x334] sm:$0xf] %v562_v13  ;;  %v564_v14 = vld [vmem:[%s4270_s6 + $0x670] sm:$0xf]  ;;  %v566_v15 = vld [vmem:[%s4270_s6 + $0x678] sm:$0xf] }
  0xa3   : > { %v568_v16 = vld [vmem:[%s4270_s6 + $0x680] sm:$0xf]  ;;  %565 = vst [vmem:[%s4274_s7 + $0x338] sm:$0xf] %v564_v14  ;;  %567 = vst [vmem:[%s4274_s7 + $0x33c] sm:$0xf] %v566_v15 }
  0xa4   : > { %569 = vst [vmem:[%s4274_s7 + $0x340] sm:$0xf] %v568_v16  ;;  %v570_v17 = vld [vmem:[%s4270_s6 + $0x688] sm:$0xf]  ;;  %v572_v18 = vld [vmem:[%s4270_s6 + $0x690] sm:$0xf] }
  0xa5   : > { %v574_v19 = vld [vmem:[%s4270_s6 + $0x698] sm:$0xf]  ;;  %571 = vst [vmem:[%s4274_s7 + $0x344] sm:$0xf] %v570_v17  ;;  %573 = vst [vmem:[%s4274_s7 + $0x348] sm:$0xf] %v572_v18 }
  0xa6   : > { %575 = vst [vmem:[%s4274_s7 + $0x34c] sm:$0xf] %v574_v19  ;;  %v576_v20 = vld [vmem:[%s4270_s6 + $0x6a0] sm:$0xf]  ;;  %v578_v21 = vld [vmem:[%s4270_s6 + $0x6a8] sm:$0xf] }
  0xa7   : > { %v580_v22 = vld [vmem:[%s4270_s6 + $0x6b0] sm:$0xf]  ;;  %577 = vst [vmem:[%s4274_s7 + $0x350] sm:$0xf] %v576_v20  ;;  %579 = vst [vmem:[%s4274_s7 + $0x354] sm:$0xf] %v578_v21 }
  0xa8   : > { %581 = vst [vmem:[%s4274_s7 + $0x358] sm:$0xf] %v580_v22  ;;  %v582_v23 = vld [vmem:[%s4270_s6 + $0x6b8] sm:$0xf]  ;;  %v584_v24 = vld [vmem:[%s4270_s6 + $0x6c0] sm:$0xf] }
  0xa9   : > { %v586_v25 = vld [vmem:[%s4270_s6 + $0x6c8] sm:$0xf]  ;;  %583 = vst [vmem:[%s4274_s7 + $0x35c] sm:$0xf] %v582_v23  ;;  %585 = vst [vmem:[%s4274_s7 + $0x360] sm:$0xf] %v584_v24 }
  0xaa   : > { %587 = vst [vmem:[%s4274_s7 + $0x364] sm:$0xf] %v586_v25  ;;  %v588_v26 = vld [vmem:[%s4270_s6 + $0x6d0] sm:$0xf]  ;;  %v590_v27 = vld [vmem:[%s4270_s6 + $0x6d8] sm:$0xf] }
  0xab   : > { %v592_v28 = vld [vmem:[%s4270_s6 + $0x6e0] sm:$0xf]  ;;  %589 = vst [vmem:[%s4274_s7 + $0x368] sm:$0xf] %v588_v26  ;;  %591 = vst [vmem:[%s4274_s7 + $0x36c] sm:$0xf] %v590_v27 }
  0xac   : > { %593 = vst [vmem:[%s4274_s7 + $0x370] sm:$0xf] %v592_v28  ;;  %v594_v29 = vld [vmem:[%s4270_s6 + $0x6e8] sm:$0xf]  ;;  %v596_v30 = vld [vmem:[%s4270_s6 + $0x6f0] sm:$0xf] }
  0xad   : > { %v598_v31 = vld [vmem:[%s4270_s6 + $0x6f8] sm:$0xf]  ;;  %595 = vst [vmem:[%s4274_s7 + $0x374] sm:$0xf] %v594_v29  ;;  %597 = vst [vmem:[%s4274_s7 + $0x378] sm:$0xf] %v596_v30 }
  0xae   : > { %599 = vst [vmem:[%s4274_s7 + $0x37c] sm:$0xf] %v598_v31  ;;  %v600_v32 = vld [vmem:[%s4270_s6 + $0x700] sm:$0xf]  ;;  %v602_v33 = vld [vmem:[%s4270_s6 + $0x708] sm:$0xf] }
  0xaf   : > { %v604_v34 = vld [vmem:[%s4270_s6 + $0x710] sm:$0xf]  ;;  %601 = vst [vmem:[%s4274_s7 + $0x380] sm:$0xf] %v600_v32  ;;  %603 = vst [vmem:[%s4274_s7 + $0x384] sm:$0xf] %v602_v33 }
  0xb0   : > { %605 = vst [vmem:[%s4274_s7 + $0x388] sm:$0xf] %v604_v34  ;;  %v606_v35 = vld [vmem:[%s4270_s6 + $0x718] sm:$0xf]  ;;  %v608_v36 = vld [vmem:[%s4270_s6 + $0x720] sm:$0xf] }
  0xb1   : > { %v610_v37 = vld [vmem:[%s4270_s6 + $0x728] sm:$0xf]  ;;  %607 = vst [vmem:[%s4274_s7 + $0x38c] sm:$0xf] %v606_v35  ;;  %609 = vst [vmem:[%s4274_s7 + $0x390] sm:$0xf] %v608_v36 }
  0xb2   : > { %611 = vst [vmem:[%s4274_s7 + $0x394] sm:$0xf] %v610_v37  ;;  %v612_v38 = vld [vmem:[%s4270_s6 + $0x730] sm:$0xf]  ;;  %v614_v39 = vld [vmem:[%s4270_s6 + $0x738] sm:$0xf] }
  0xb3   : > { %v616_v40 = vld [vmem:[%s4270_s6 + $0x740] sm:$0xf]  ;;  %613 = vst [vmem:[%s4274_s7 + $0x398] sm:$0xf] %v612_v38  ;;  %615 = vst [vmem:[%s4274_s7 + $0x39c] sm:$0xf] %v614_v39 }
  0xb4   : > { %617 = vst [vmem:[%s4274_s7 + $0x3a0] sm:$0xf] %v616_v40  ;;  %v618_v41 = vld [vmem:[%s4270_s6 + $0x748] sm:$0xf]  ;;  %v620_v42 = vld [vmem:[%s4270_s6 + $0x750] sm:$0xf] }
  0xb5   : > { %v622_v43 = vld [vmem:[%s4270_s6 + $0x758] sm:$0xf]  ;;  %619 = vst [vmem:[%s4274_s7 + $0x3a4] sm:$0xf] %v618_v41  ;;  %621 = vst [vmem:[%s4274_s7 + $0x3a8] sm:$0xf] %v620_v42 }
  0xb6   : > { %623 = vst [vmem:[%s4274_s7 + $0x3ac] sm:$0xf] %v622_v43  ;;  %v624_v44 = vld [vmem:[%s4270_s6 + $0x760] sm:$0xf]  ;;  %v626_v45 = vld [vmem:[%s4270_s6 + $0x768] sm:$0xf] }
  0xb7   : > { %v628_v46 = vld [vmem:[%s4270_s6 + $0x770] sm:$0xf]  ;;  %625 = vst [vmem:[%s4274_s7 + $0x3b0] sm:$0xf] %v624_v44  ;;  %627 = vst [vmem:[%s4274_s7 + $0x3b4] sm:$0xf] %v626_v45 }
  0xb8   : > { %629 = vst [vmem:[%s4274_s7 + $0x3b8] sm:$0xf] %v628_v46  ;;  %v630_v47 = vld [vmem:[%s4270_s6 + $0x778] sm:$0xf]  ;;  %v632_v48 = vld [vmem:[%s4270_s6 + $0x780] sm:$0xf] }
  0xb9   : > { %v634_v49 = vld [vmem:[%s4270_s6 + $0x788] sm:$0xf]  ;;  %631 = vst [vmem:[%s4274_s7 + $0x3bc] sm:$0xf] %v630_v47  ;;  %633 = vst [vmem:[%s4274_s7 + $0x3c0] sm:$0xf] %v632_v48 }
  0xba   : > { %635 = vst [vmem:[%s4274_s7 + $0x3c4] sm:$0xf] %v634_v49  ;;  %v636_v50 = vld [vmem:[%s4270_s6 + $0x790] sm:$0xf]  ;;  %v638_v51 = vld [vmem:[%s4270_s6 + $0x798] sm:$0xf] }
  0xbb   : > { %v640_v52 = vld [vmem:[%s4270_s6 + $0x7a0] sm:$0xf]  ;;  %637 = vst [vmem:[%s4274_s7 + $0x3c8] sm:$0xf] %v636_v50  ;;  %639 = vst [vmem:[%s4274_s7 + $0x3cc] sm:$0xf] %v638_v51 }
  0xbc   : > { %641 = vst [vmem:[%s4274_s7 + $0x3d0] sm:$0xf] %v640_v52  ;;  %v642_v53 = vld [vmem:[%s4270_s6 + $0x7a8] sm:$0xf]  ;;  %v644_v54 = vld [vmem:[%s4270_s6 + $0x7b0] sm:$0xf] }
  0xbd   : > { %v646_v55 = vld [vmem:[%s4270_s6 + $0x7b8] sm:$0xf]  ;;  %643 = vst [vmem:[%s4274_s7 + $0x3d4] sm:$0xf] %v642_v53  ;;  %645 = vst [vmem:[%s4274_s7 + $0x3d8] sm:$0xf] %v644_v54 }
  0xbe   : > { %647 = vst [vmem:[%s4274_s7 + $0x3dc] sm:$0xf] %v646_v55  ;;  %v648_v56 = vld [vmem:[%s4270_s6 + $0x7c0] sm:$0xf]  ;;  %v650_v57 = vld [vmem:[%s4270_s6 + $0x7c8] sm:$0xf] }
  0xbf   : > { %v652_v58 = vld [vmem:[%s4270_s6 + $0x7d0] sm:$0xf]  ;;  %649 = vst [vmem:[%s4274_s7 + $0x3e0] sm:$0xf] %v648_v56  ;;  %651 = vst [vmem:[%s4274_s7 + $0x3e4] sm:$0xf] %v650_v57 }
  0xc0   : > { %653 = vst [vmem:[%s4274_s7 + $0x3e8] sm:$0xf] %v652_v58  ;;  %v654_v59 = vld [vmem:[%s4270_s6 + $0x7d8] sm:$0xf]  ;;  %v656_v60 = vld [vmem:[%s4270_s6 + $0x7e0] sm:$0xf] }
  0xc1   : > { %v658_v61 = vld [vmem:[%s4270_s6 + $0x7e8] sm:$0xf]  ;;  %655 = vst [vmem:[%s4274_s7 + $0x3ec] sm:$0xf] %v654_v59  ;;  %657 = vst [vmem:[%s4274_s7 + $0x3f0] sm:$0xf] %v656_v60 }
  0xc2   : > { %659 = vst [vmem:[%s4274_s7 + $0x3f4] sm:$0xf] %v658_v61  ;;  %v660_v62 = vld [vmem:[%s4270_s6 + $0x7f0] sm:$0xf]  ;;  %v662_v63 = vld [vmem:[%s4270_s6 + $0x7f8] sm:$0xf] }
  0xc3   : > { %661 = vst [vmem:[%s4274_s7 + $0x3f8] sm:$0xf] %v660_v62  ;;  %663 = vst [vmem:[%s4274_s7 + $0x3fc] sm:$0xf] %v662_v63 }
  0xc4 PF: > { %p3268_p11 = scmp.ge.s32.totalorder %s4173_s17, 1  ;;  %p1198_p12 = scmp.lt.s32.totalorder %s4173_s17, 5 }
  0xc6   : > { %p1199_p13 = pnand %p3268_p11, %p1198_p12 }
  0xc7   : > { %s1205_s8 = sand.u32 (!%p1199_p13), 1, %s4149_s11   ;;  %p1230_p0 = scmp.lt.s32.totalorder (!%p1199_p13), %s4161_s14, 1 }
  0xc8   : > { %1202 = sbr.rel (%p1199_p13) target bundleno = 629 (0x275), region = 65  ;;  %s3269_s18 = sshll.u32 (!%p1199_p13), %s1205_s8, 10 }
  0xc9   : > { %s4789_s21 = scalar_lea.vmem (!%p1199_p13), [#allocation3], %s3269_s18  ;;  %s1227_s29 = sand.u32 (!%p1199_p13), 1, %s4141_s9  }
  0xca   : > { %s3863_s30 = smul.u32 (!%p1199_p13), 12, %s1227_s29 }
  0xcc   : > { %s1229_s3 = scalar_lea.vmem (!%p1199_p13), [#allocation4], %s3863_s30 }
  0xcd   : > { %v3943_v0 = vld [vmem:[%s4789_s21 + $0x78] sm:$0xff]   ;;  %v3947_v4 = vld [vmem:[%s4789_s21 + $0x70] sm:$0xff]   ;;  %v3951_v8 = vld [vmem:[%s4789_s21 + $0x68] sm:$0xff]   ;;  %s1231_s11 = scalar_select %p1230_p0, %s4161_s14, 1  ;;  %vm1728_vm0 = vsmask.f32 7424 }
  0xce   : > { %v3944_v1 = vld [vmem:[%s4789_s21 + $0xf8] sm:$0xff]   ;;  %3639 = vmatprep.subr.bf16.mxu0 %v3943_v0  ;;  %v3948_v5 = vld [vmem:[%s4789_s21 + $0xf0] sm:$0xff]   ;;  %v3952_v9 = vld [vmem:[%s4789_s21 + $0xe8] sm:$0xff]   ;;  %vm2199_vm1 = vsmask.f32 5376  ;;  %vm2678_vm2 = vcmask 1044480  }
  0xcf   : > { %v3945_v2 = vld [vmem:[%s4789_s21 + $0x38] sm:$0xff]   ;;  %3667 = vmatprep.subr.bf16.mxu1 %v3944_v1  ;;  %v3949_v6 = vld [vmem:[%s4789_s21 + $0x30] sm:$0xff]   ;;  %v3953_v10 = vld [vmem:[%s4789_s21 + $0x28] sm:$0xff]   ;;  %s3630_s22 = sshll.u32 %s1231_s11, 6  ;;  %vm3064_vm15 = vcmask 1043456   ;;  %s3870_s9 = smul.u32 (%p4257_p9), 6, %s4161_s14 }
  0xd0   : > { %v3946_v3 = vld [vmem:[%s4789_s21 + $0xb8] sm:$0xff]   ;;  %3640 = vmatpush3.bf16.msra.mxu0 %v3945_v2  ;;  %v3950_v7 = vld [vmem:[%s4789_s21 + $0xb0] sm:$0xff]   ;;  %v3954_v11 = vld [vmem:[%s4789_s21 + $0xa8] sm:$0xff]   ;;  %s4826_s26 = scalar_lea.vmem %s5094_s0, %s3630_s22 }
  0xd1   : > { %3668 = vmatpush3.bf16.msra.mxu1 %v3946_v3  ;;  %3641 = vmatprep.subr.bf16.mxu0 %v3947_v4  ;;  %v3955_v12 = vld [vmem:[%s4789_s21 + $0x60] sm:$0xff]   ;;  %v3959_v16 = vld [vmem:[%s4789_s21 + $0x58] sm:$0xff]   ;;  %v3963_v20 = vld [vmem:[%s4789_s21 + $0x50] sm:$0xff]   ;;  %s3128_s4 = sadd.s32 (%p4257_p9), %s4157_s13, %s3870_s9 }
  0xd2   : > { %3669 = vmatprep.subr.bf16.mxu1 %v3948_v5  ;;  %v3956_v13 = vld [vmem:[%s4789_s21 + $0xe0] sm:$0xff]   ;;  %v3960_v17 = vld [vmem:[%s4789_s21 + $0xd8] sm:$0xff]   ;;  %v3964_v21 = vld [vmem:[%s4789_s21 + $0xd0] sm:$0xff]   ;;  %s3627_s5 = sshll.u32 (%p4257_p9), %s3128_s4, 2 }
  0xd3   : > { %v3957_v14 = vld [vmem:[%s4789_s21 + $0x20] sm:$0xff]   ;;  %v3961_v18 = vld [vmem:[%s4789_s21 + $0x18] sm:$0xff]   ;;  %v3965_v22 = vld [vmem:[%s4789_s21 + $0x10] sm:$0xff]   ;;  %s3130_s8 = scalar_lea.vmem (%p4257_p9), %s5096_s2, %s3627_s5 }
  0xd4   : > { %3642 = vmatpush3.bf16.msra.mxu0 %v3949_v6  ;;  %v3958_v15 = vld [vmem:[%s4789_s21 + $0xa0] sm:$0xff]   ;;  %v3962_v19 = vld [vmem:[%s4789_s21 + $0x98] sm:$0xff]   ;;  %v3966_v23 = vld [vmem:[%s4789_s21 + $0x90] sm:$0xff]  }
  0xd5   : > { %3670 = vmatpush3.bf16.msra.mxu1 %v3950_v7  ;;  %3643 = vmatprep.subr.bf16.mxu0 %v3951_v8  ;;  %v3967_v24 = vld [vmem:[%s4789_s21 + $0x48] sm:$0xff]   ;;  %v3971_v28 = vld [vmem:[%s4789_s21 + $0x40] sm:$0xff]   ;;  %v4832_v33 = vld [vmem:[%s4826_s26 + $0x10] sm:$0xff] }
  0xd6   : > { %3671 = vmatprep.subr.bf16.mxu1 %v3952_v9  ;;  %v3968_v25 = vld [vmem:[%s4789_s21 + $0xc8] sm:$0xff]   ;;  %v3972_v29 = vld [vmem:[%s4789_s21 + $0xc0] sm:$0xff]   ;;  %v1237_v34 = vld [vmem:[%s4826_s26 + $0x8] sm:$0xff] }
  0xd7   : > { %v3969_v26 = vld [vmem:[%s4789_s21 + $0x8] sm:$0xff]   ;;  %v3973_v30 = vld [vmem:[%s4789_s21] sm:$0xff]   ;;  %v3979_v40 = vld [vmem:[%s4789_s21 + $0x178] sm:$0xff]  }
  0xd8   : > { %3644 = vmatpush3.bf16.msra.mxu0 %v3953_v10  ;;  %v3970_v27 = vld [vmem:[%s4789_s21 + $0x88] sm:$0xff]   ;;  %v3974_v31 = vld [vmem:[%s4789_s21 + $0x80] sm:$0xff]   ;;  %v3980_v41 = vld [vmem:[%s4789_s21 + $0x1f8] sm:$0xff]  }
  0xd9   : > { %3672 = vmatpush3.bf16.msra.mxu1 %v3954_v11  ;;  %3645 = vmatprep.subr.bf16.mxu0 %v3955_v12  ;;  %v1236_v32 = vld [vmem:[%s4826_s26] sm:$0xff]  ;;  %v4842_v37 = vld [vmem:[%s4826_s26 + $0x18] sm:$0xff]  ;;  %v3981_v42 = vld [vmem:[%s4789_s21 + $0x138] sm:$0xff]  }
  0xda   : > { %3673 = vmatprep.subr.bf16.mxu1 %v3956_v13  ;;  %v4836_v35 = vcombine.low %v1236_v32, %v4832_v33  ;;  %v4839_v36 = vcombine.high %v1236_v32, %v4832_v33  ;;  %v4845_v38 = vcombine.low %v1237_v34, %v4842_v37  ;;  %v4848_v39 = vcombine.high %v1237_v34, %v4842_v37  ;;  %v3982_v43 = vld [vmem:[%s4789_s21 + $0x1b8] sm:$0xff]   ;;  %v3983_v44 = vld [vmem:[%s4789_s21 + $0x170] sm:$0xff]   ;;  %v3987_v48 = vld [vmem:[%s4789_s21 + $0x168] sm:$0xff]  }
  0xdb   : > { %v3984_v45 = vld [vmem:[%s4789_s21 + $0x1f0] sm:$0xff]   ;;  %v3988_v49 = vld [vmem:[%s4789_s21 + $0x1e8] sm:$0xff]   ;;  %v3991_v52 = vld [vmem:[%s4789_s21 + $0x160] sm:$0xff]  }
  0xdc   : > { %3646 = vmatpush3.bf16.msra.mxu0 %v3957_v14  ;;  %1564 = vmatprep.mubr.bf16.mxu0 %v4839_v36  ;;  %v3985_v46 = vld [vmem:[%s4789_s21 + $0x130] sm:$0xff]   ;;  %v3989_v50 = vld [vmem:[%s4789_s21 + $0x128] sm:$0xff]   ;;  %v3992_v53 = vld [vmem:[%s4789_s21 + $0x1e0] sm:$0xff]   ;;  %v1744_v62 = vshll.u32 %v4839_v36, 16  ;;  %v1742_v5 = vshrl.u32 %v4839_v36, 16  ;;  %v1766_v7 = vshrl.u32 %v4848_v39, 16 }
  0xdd   : > { %3674 = vmatpush3.bf16.msra.mxu1 %v3958_v15  ;;  %3647 = vmatprep.subr.bf16.mxu0 %v3959_v16  ;;  %v3986_v47 = vld [vmem:[%s4789_s21 + $0x1b0] sm:$0xff]   ;;  %v3990_v51 = vld [vmem:[%s4789_s21 + $0x1a8] sm:$0xff]   ;;  %v3993_v54 = vld [vmem:[%s4789_s21 + $0x120] sm:$0xff]   ;;  %v1768_v11 = vshll.u32 %v4848_v39, 16  ;;  %v1730_v13 = vshrl.u32 %v4836_v35, 16  ;;  %v1732_v15 = vshll.u32 %v4836_v35, 16 }
  0xde   : > { %3675 = vmatprep.subr.bf16.mxu1 %v3960_v17  ;;  %1612 = vmatprep.mubr.bf16.mxu1 %v4848_v39  ;;  %v3994_v55 = vld [vmem:[%s4789_s21 + $0x1a0] sm:$0xff]   ;;  %v3995_v56 = vld [vmem:[%s4789_s21 + $0x158] sm:$0xff]   ;;  %v1240_v60 = vld [vmem:[%s4826_s26 + $0x20] sm:$0x33]  ;;  %v1746_v9 = vrot.slane %v1744_v62, 1  ;;  %v1756_v17 = vshll.u32 %v4845_v38, 16 }
  0xdf   : > { %v3996_v57 = vld [vmem:[%s4789_s21 + $0x1d8] sm:$0xff]   ;;  %v1241_v61 = vld [vmem:[%s4826_s26 + $0x28] sm:$0x33]  ;;  %v3277_v63 = vcombine.high %v1240_v60, %v1240_v60  ;;  %v3276_v1 = vcombine.low %v1240_v60, %v1240_v60  ;;  %v4007_v10 = vld [vmem:[%s4789_s21 + $0x148] sm:$0xff]  }
  0xe0   : > { %3648 = vmatpush3.bf16.msra.mxu0 %v3961_v18  ;;  %v3997_v58 = vld [vmem:[%s4789_s21 + $0x118] sm:$0xff]   ;;  %v3279_v0 = vcombine.high %v1241_v61, %v1241_v61  ;;  %v3278_v2 = vcombine.low %v1241_v61, %v1241_v61  ;;  %v4003_v3 = vld [vmem:[%s4789_s21 + $0x150] sm:$0xff]   ;;  %v4008_v12 = vld [vmem:[%s4789_s21 + $0x1c8] sm:$0xff]   ;;  %v1747_v32 = vor.u32 %v1746_v9, %v1742_v5 }
  0xe1   : > { %3676 = vmatpush3.bf16.msra.mxu1 %v3962_v19  ;;  %3649 = vmatprep.subr.bf16.mxu0 %v3963_v20  ;;  %v3998_v59 = vld [vmem:[%s4789_s21 + $0x198] sm:$0xff]   ;;  %v4004_v4 = vld [vmem:[%s4789_s21 + $0x1d0] sm:$0xff]   ;;  %v4009_v14 = vld [vmem:[%s4789_s21 + $0x108] sm:$0xff]   ;;  %v1770_v19 = vrot.slane %v1768_v11, 1 }
  0xe2   : > { %3677 = vmatprep.subr.bf16.mxu1 %v3964_v21  ;;  %v4005_v6 = vld [vmem:[%s4789_s21 + $0x110] sm:$0xff]   ;;  %v4010_v16 = vld [vmem:[%s4789_s21 + $0x188] sm:$0xff]   ;;  %v4011_v18 = vld [vmem:[%s4789_s21 + $0x140] sm:$0xff]   ;;  %v1754_v21 = vshrl.u32 %v4845_v38, 16 }
  0xe3   : > { %v4006_v8 = vld [vmem:[%s4789_s21 + $0x190] sm:$0xff]   ;;  %v4012_v20 = vld [vmem:[%s4789_s21 + $0x1c0] sm:$0xff]   ;;  %v4020_v36 = vld [vmem:[%s4789_s21 + $0x2f8] sm:$0xff]  }
  0xe4   : > { %3650 = vmatpush3.bf16.msra.mxu0 %v3965_v22  ;;  %v4013_v22 = vld [vmem:[%s4789_s21 + $0x100] sm:$0xff]   ;;  %v4036_v11 = vld [vmem:[%s4789_s21 + $0x2d8] sm:$0xff]  }
  0xe5   : > { %3678 = vmatpush3.bf16.msra.mxu1 %v3966_v23  ;;  %3651 = vmatprep.subr.bf16.mxu0 %v3967_v24  ;;  %v1734_v23 = vrot.slane %v1732_v15, 1  ;;  %v4014_v24 = vld [vmem:[%s4789_s21 + $0x180] sm:$0xff]   ;;  %v4040_v15 = vld [vmem:[%s4789_s21 + $0x2d0] sm:$0xff]  }
  0xe6   : > { %3679 = vmatprep.subr.bf16.mxu1 %v3968_v25  ;;  %v1758_v25 = vrot.slane %v1756_v17, 1  ;;  %v4034_v9 = vld [vmem:[%s4789_s21 + $0x2a0] sm:$0xff]   ;;  %v4042_v17 = vld [vmem:[%s4789_s21 + $0x290] sm:$0xff]  }
  0xe8   : > { %3652 = vmatpush3.bf16.msra.mxu0 %v3969_v26  ;;  %v1635_v26 = vld [vmem:[%s4826_s26 + $0x20] sm:$0x77] }
  0xe9   : > { %3680 = vmatpush3.bf16.msra.mxu1 %v3970_v27  ;;  %3653 = vmatprep.subr.bf16.mxu0 %v3971_v28  ;;  %v1636_v27 = vld [vmem:[%s4826_s26 + $0x28] sm:$0x77]  ;;  %v3380_v28 = vcombine.low %v1635_v26, %v1635_v26 }
  0xea   : > { %3681 = vmatprep.subr.bf16.mxu1 %v3972_v29  ;;  %v3381_v29 = vcombine.high %v1635_v26, %v1635_v26  ;;  %v3383_v34 = vcombine.high %v1636_v27, %v1636_v27  ;;  %v2094_v26 = vld [vmem:[%s4826_s26] sm:$0xcc] }
  0xeb   : > { %v1737_v39 = vshll.u32 %v3380_v28, 16  ;;  %v1777_v60 = vshrl.u32 %v3380_v28, 16  ;;  %v2100_v28 = vld [vmem:[%s4826_s26 + $0x30] sm:$0x11] }
  0xec   : > { %3654 = vmatpush3.bf16.msra.mxu0 %v3973_v30  ;;  %v3382_v30 = vcombine.low %v1636_v27, %v1636_v27  ;;  %v4936_v27 = vld [vmem:[%s4826_s26 + $0x20] sm:$0xff] }
  0xed   : > { %3682 = vmatpush3.bf16.msra.mxu1 %v3974_v31  ;;  %3695 = vmatprep.subr.bf16.mxu0 %v3979_v40  ;;  %v4019_v31 = vld [vmem:[%s4789_s21 + $0x278] sm:$0xff]   ;;  %v1759_v40 = vor.u32 %v1758_v25, %v1754_v21  ;;  %v4046_v21 = vld [vmem:[%s4789_s21 + $0x288] sm:$0xff]   ;;  %v4050_v25 = vld [vmem:[%s4789_s21 + $0x280] sm:$0xff]  }
  0xee   : > { %3723 = vmatprep.subr.bf16.mxu1 %v3980_v41  ;;  %v1761_v41 = vshll.u32 %v3382_v30, 16  ;;  %v1783_v62 = vshrl.u32 %v3382_v30, 16  ;;  %v3481_v30 = vcombine.high %v2094_v26, %v4832_v33 }
  0xef   : > { %1565 = vmatmul.mubr.bf16.vlgmr.msra.gmra.mxu0 %v4836_v35  ;;  %v1735_v35 = vor.u32 %v1734_v23, %v1730_v13  ;;  %v4038_v13 = vld [vmem:[%s4789_s21 + $0x298] sm:$0xff]   ;;  %v4048_v23 = vld [vmem:[%s4789_s21 + $0x2c0] sm:$0xff]  }
  0xf0   : > { %1613 = vmatmul.mubr.bf16.vlgmr.msra.gmra.mxu1 %v4845_v38  ;;  %3696 = vmatpush3.bf16.msra.mxu0 %v3981_v42  ;;  %v1749_v38 = vshll.u32 %v3381_v29, 16  ;;  %v1771_v42 = vor.u32 %v1770_v19, %v1766_v7  ;;  %v4032_v7 = vld [vmem:[%s4789_s21 + $0x2e0] sm:$0xff]   ;;  %v4044_v19 = vld [vmem:[%s4789_s21 + $0x2c8] sm:$0xff]  }
  0xf1   : > { %3724 = vmatpush3.bf16.msra.mxu1 %v3982_v43  ;;  %3697 = vmatprep.subr.bf16.mxu0 %v3983_v44  ;;  %v1773_v43 = vshll.u32 %v3383_v34, 16  ;;  %v4021_v44 = vld [vmem:[%s4789_s21 + $0x238] sm:$0xff]  }
  0xf2   : > { %3725 = vmatprep.subr.bf16.mxu1 %v3984_v45  ;;  %1572 = vmatprep.mubr.bf16.mxu0 %v3277_v63  ;;  %v1751_v45 = vrot.slane %v1749_v38, 1  ;;  %v4027_v63 = vld [vmem:[%s4789_s21 + $0x268] sm:$0xff]  }
  0xf3   : > { %1620 = vmatprep.mubr.bf16.mxu1 %v3279_v0 }
  0xf4   : > { %3698 = vmatpush3.bf16.msra.mxu0 %v3985_v46  ;;  %v1739_v46 = vrot.slane %v1737_v39, 1  ;;  %v2218_v39 = vshrl.u32 %v3481_v30, 16 }
  0xf5   : > { %3726 = vmatpush3.bf16.msra.mxu1 %v3986_v47  ;;  %3699 = vmatprep.subr.bf16.mxu0 %v3987_v48  ;;  %v1763_v47 = vrot.slane %v1761_v41, 1  ;;  %v4022_v48 = vld [vmem:[%s4789_s21 + $0x2b8] sm:$0xff]  }
  0xf6   : > { %3727 = vmatprep.subr.bf16.mxu1 %v3988_v49  ;;  %v1775_v49 = vrot.slane %v1773_v43, 1  ;;  %v4060_v43 = vld [vmem:[%s4789_s21 + $0x3f8] sm:$0xff]  }
  0xf7   : > { %1573 = vmatmul.mubr.bf16.gmra.mxu0 %v3276_v1  ;;  %v4028_v1 = vld [vmem:[%s4789_s21 + $0x2e8] sm:$0xff]   ;;  %v1785_v5 = vor.u32 %v1783_v62, %v1763_v47 }
  0xf8   : > { %3700 = vmatpush3.bf16.msra.mxu0 %v3989_v50  ;;  %1621 = vmatmul.mubr.bf16.gmra.mxu1 %v3278_v2  ;;  %v4023_v50 = vld [vmem:[%s4789_s21 + $0x270] sm:$0xff]   ;;  %v4029_v2 = vld [vmem:[%s4789_s21 + $0x228] sm:$0xff]  }
  0xf9   : > { %3728 = vmatpush3.bf16.msra.mxu1 %v3990_v51  ;;  %3701 = vmatprep.subr.bf16.mxu0 %v3991_v52  ;;  %v1752_v51 = vsel %vm1728_vm0, %v1747_v32, %v1751_v45  ;;  %v1740_v52 = vsel %vm1728_vm0, %v1735_v35, %v1739_v46  ;;  %v3484_v32 = vcombine.low %v4936_v27, %v2100_v28  ;;  %v4945_v35 = vld [vmem:[%s4826_s26 + $0x28] sm:$0xff] }
  0xfa   : > { %3729 = vmatprep.subr.bf16.mxu1 %v3992_v53  ;;  %v1764_v53 = vsel %vm1728_vm0, %v1759_v40, %v1763_v47  ;;  %2021 = vmatprep.mubr.bf16.mxu0 %v1752_v51  ;;  %v2221_v40 = vshll.u32 %v3481_v30, 16  ;;  %v4068_v30 = vld [vmem:[%s4789_s21 + $0x3e8] sm:$0xff]  }
  0xfc   : > { %3702 = vmatpush3.bf16.msra.mxu0 %v3993_v54  ;;  %v1776_v54 = vsel %vm1728_vm0, %v1771_v42, %v1775_v49 }
  0xfd   : > { %3730 = vmatpush3.bf16.msra.mxu1 %v3994_v55  ;;  %3703 = vmatprep.subr.bf16.mxu0 %v3995_v56  ;;  %v4024_v55 = vld [vmem:[%s4789_s21 + $0x2f0] sm:$0xff]   ;;  %v1780_v56 = vshrl.u32 %v3381_v29, 16  ;;  %v3480_v29 = vcombine.low %v2094_v26, %v4832_v33  ;;  %v4059_v33 = vld [vmem:[%s4789_s21 + $0x378] sm:$0xff]  }
  0xfe   : > { %3731 = vmatprep.subr.bf16.mxu1 %v3996_v57  ;;  %2069 = vmatprep.mubr.bf16.mxu1 %v1776_v54  ;;  %v4025_v57 = vld [vmem:[%s4789_s21 + $0x230] sm:$0xff]  }
  0xff   : > { %v1782_v61 = vor.u32 %v1780_v56, %v1751_v45  ;;  %v2201_v47 = vshrl.u32 %v3480_v29, 16  ;;  %v2204_v62 = vshll.u32 %v3480_v29, 16  ;;  %v4066_v29 = vld [vmem:[%s4789_s21 + $0x3b0] sm:$0xff]  }
 0x100   : > { %3704 = vmatpush3.bf16.msra.mxu0 %v3997_v58  ;;  %v4026_v58 = vld [vmem:[%s4789_s21 + $0x2b0] sm:$0xff]  }
 0x101   : > { %3732 = vmatpush3.bf16.msra.mxu1 %v3998_v59  ;;  %3705 = vmatprep.subr.bf16.mxu0 %v4003_v3  ;;  %v1786_v59 = vshrl.u32 %v3383_v34, 16  ;;  %v1779_v3 = vor.u32 %v1777_v60, %v1739_v46  ;;  %v3485_v34 = vcombine.high %v4936_v27, %v2100_v28  ;;  %v4067_v28 = vld [vmem:[%s4789_s21 + $0x368] sm:$0xff]  }
 0x102   : > { %3733 = vmatprep.subr.bf16.mxu1 %v4004_v4  ;;  %v4030_v4 = vld [vmem:[%s4789_s21 + $0x2a8] sm:$0xff]  }
 0x103   : > { %v1788_v0 = vor.u32 %v1786_v59, %v1775_v49  ;;  %v2229_v45 = vshll.u32 %v3485_v34, 16  ;;  %v2223_v49 = vrot.slane %v2221_v40, 3  ;;  %v4074_v40 = vld [vmem:[%s4789_s21 + $0x3a0] sm:$0xff]  }
 0x104   : > { %3706 = vmatpush3.bf16.msra.mxu0 %v4005_v6  ;;  %v4031_v6 = vld [vmem:[%s4789_s21 + $0x260] sm:$0xff]  }
 0x105   : > { %3734 = vmatpush3.bf16.msra.mxu1 %v4006_v8  ;;  %3707 = vmatprep.subr.bf16.mxu0 %v4007_v10  ;;  %v4033_v8 = vld [vmem:[%s4789_s21 + $0x220] sm:$0xff]   ;;  %v4035_v10 = vld [vmem:[%s4789_s21 + $0x258] sm:$0xff]  }
 0x106   : > { %3735 = vmatprep.subr.bf16.mxu1 %v4008_v12  ;;  %v4037_v12 = vld [vmem:[%s4789_s21 + $0x218] sm:$0xff]  }
 0x108   : > { %3708 = vmatpush3.bf16.msra.mxu0 %v4009_v14  ;;  %v4039_v14 = vld [vmem:[%s4789_s21 + $0x250] sm:$0xff]  }
 0x109   : > { %3736 = vmatpush3.bf16.msra.mxu1 %v4010_v16  ;;  %3709 = vmatprep.subr.bf16.mxu0 %v4011_v18  ;;  %v4041_v16 = vld [vmem:[%s4789_s21 + $0x210] sm:$0xff]   ;;  %v4043_v18 = vld [vmem:[%s4789_s21 + $0x248] sm:$0xff]  }
 0x10a   : > { %3737 = vmatprep.subr.bf16.mxu1 %v4012_v20  ;;  %v4045_v20 = vld [vmem:[%s4789_s21 + $0x208] sm:$0xff]  }
 0x10c   : > { %3710 = vmatpush3.bf16.msra.mxu0 %v4013_v22  ;;  %v4047_v22 = vld [vmem:[%s4789_s21 + $0x240] sm:$0xff]  }
 0x10d   : > { %3738 = vmatpush3.bf16.msra.mxu1 %v4014_v24  ;;  %3751 = vmatprep.subr.bf16.mxu0 %v4019_v31  ;;  %v4049_v24 = vld [vmem:[%s4789_s21 + $0x200] sm:$0xff]   ;;  %v2095_v31 = vld [vmem:[%s4826_s26 + $0x8] sm:$0xcc] }
 0x10e   : > { %3779 = vmatprep.subr.bf16.mxu1 %v4020_v36  ;;  %v2101_v36 = vld [vmem:[%s4826_s26 + $0x38] sm:$0x11]  ;;  %v3482_v38 = vcombine.low %v2095_v31, %v4842_v37  ;;  %v3483_v41 = vcombine.high %v2095_v31, %v4842_v37  ;;  %v4069_v31 = vld [vmem:[%s4789_s21 + $0x328] sm:$0xff]  }
 0x10f   : > { %2022 = vmatmul.mubr.bf16.vlgmr.msra.gmra.mxu0 %v1740_v52  ;;  %v3486_v42 = vcombine.low %v4945_v35, %v2101_v36  ;;  %v3487_v46 = vcombine.high %v4945_v35, %v2101_v36  ;;  %v4072_v36 = vld [vmem:[%s4789_s21 + $0x3e0] sm:$0xff]  }
 0x110   : > { %2070 = vmatmul.mubr.bf16.vlgmr.msra.gmra.mxu1 %v1764_v53  ;;  %3752 = vmatpush3.bf16.msra.mxu0 %v4021_v44  ;;  %v2226_v44 = vshrl.u32 %v3485_v34, 16  ;;  %v2255_v51 = vshll.u32 %v3483_v41, 16  ;;  %v2231_v53 = vrot.slane %v2229_v45, 3  ;;  %v4070_v34 = vld [vmem:[%s4789_s21 + $0x3a8] sm:$0xff]   ;;  %v4081_v45 = vld [vmem:[%s4789_s21 + $0x310] sm:$0xff]  }
 0x111   : > { %3780 = vmatpush3.bf16.msra.mxu1 %v4022_v48  ;;  %3753 = vmatprep.subr.bf16.mxu0 %v4023_v50  ;;  %v2220_v48 = vrot.slane %v2218_v39, 2  ;;  %v2252_v50 = vshrl.u32 %v3483_v41, 16  ;;  %v2260_v54 = vshrl.u32 %v3487_v46, 16  ;;  %v4075_v39 = vld [vmem:[%s4789_s21 + $0x358] sm:$0xff]  }
 0x112   : > { %3781 = vmatprep.subr.bf16.mxu1 %v4024_v55  ;;  %2029 = vmatprep.mubr.bf16.mxu0 %v1782_v61  ;;  %v2228_v52 = vrot.slane %v2226_v44, 2  ;;  %v2263_v55 = vshll.u32 %v3487_v46, 16  ;;  %v4076_v41 = vld [vmem:[%s4789_s21 + $0x3d8] sm:$0xff]   ;;  %v4080_v44 = vld [vmem:[%s4789_s21 + $0x3d0] sm:$0xff]   ;;  %v4083_v46 = vld [vmem:[%s4789_s21 + $0x348] sm:$0xff]  }
 0x113   : > { %2077 = vmatprep.mubr.bf16.mxu1 %v1788_v0  ;;  %v2224_v37 = vor.u32 %v2223_v49, %v2220_v48  ;;  %v2254_v56 = vrot.slane %v2252_v50, 2  ;;  %v2262_v60 = vrot.slane %v2260_v54, 2  ;;  %v2209_v0 = vshrl.u32 %v3484_v32, 16  ;;  %v4084_v48 = vld [vmem:[%s4789_s21 + $0x3c8] sm:$0xff]   ;;  %v2579_v54 = vld [vmem:[%s4826_s26 + $0x30] sm:$0x11] }
 0x114   : > { %3754 = vmatpush3.bf16.msra.mxu0 %v4025_v57  ;;  %v2257_v57 = vrot.slane %v2255_v51, 3  ;;  %v2232_v59 = vor.u32 %v2231_v53, %v2228_v52  ;;  %v2265_v61 = vrot.slane %v2263_v55, 3  ;;  %v4085_v49 = vld [vmem:[%s4789_s21 + $0x308] sm:$0xff]   ;;  %v4087_v51 = vld [vmem:[%s4789_s21 + $0x340] sm:$0xff]  }
 0x115   : > { %3782 = vmatpush3.bf16.msra.mxu1 %v4026_v58  ;;  %3755 = vmatprep.subr.bf16.mxu0 %v4027_v63  ;;  %v2203_v58 = vrot.slane %v2201_v47, 2  ;;  %v4082_v47 = vld [vmem:[%s4789_s21 + $0x390] sm:$0xff]   ;;  %v4086_v50 = vld [vmem:[%s4789_s21 + $0x388] sm:$0xff]   ;;  %v4088_v52 = vld [vmem:[%s4789_s21 + $0x3c0] sm:$0xff]  }
 0x116   : > { %3783 = vmatprep.subr.bf16.mxu1 %v4028_v1  ;;  %v2258_v63 = vor.u32 %v2257_v57, %v2254_v56  ;;  %v2212_v1 = vshll.u32 %v3484_v32, 16  ;;  %v4071_v32 = vld [vmem:[%s4789_s21 + $0x360] sm:$0xff]   ;;  %v4091_v55 = vld [vmem:[%s4826_s26] ss:$16 sps:$4 sm:$0xf8]   ;;  %v3588_v56 = vcombine.low %v4936_v27, %v2579_v54  ;;  %v3589_v57 = vcombine.high %v4936_v27, %v2579_v54 }
 0x117   : > { %2030 = vmatmul.mubr.bf16.gmra.mxu0 %v1779_v3  ;;  %v2233_v3 = vsel %vm2199_vm1, %v2224_v37, %v2232_v59  ;;  %v4089_v53 = vld [vmem:[%s4789_s21 + $0x300] sm:$0xff]   ;;  %v4093_v37 = vld [vmem:[%s4826_s26 + $0x4] ss:$16 sps:$4 sm:$0xf8]  }
 0x118   : > { %2078 = vmatmul.mubr.bf16.gmra.mxu1 %v1785_v5  ;;  %3756 = vmatpush3.bf16.msra.mxu0 %v4029_v2  ;;  %v2235_v2 = vshrl.u32 %v3482_v38, 16  ;;  %v2206_v5 = vrot.slane %v2204_v62, 3  ;;  %v2682_v62 = vrot.slane %v4093_v37, 3 }
 0x119   : > { %3784 = vmatpush3.bf16.msra.mxu1 %v4030_v4  ;;  %3757 = vmatprep.subr.bf16.mxu0 %v4031_v6  ;;  %v2266_v4 = vor.u32 %v2265_v61, %v2262_v60  ;;  %v2238_v6 = vshll.u32 %v3482_v38, 16  ;;  %v4073_v38 = vld [vmem:[%s4789_s21 + $0x320] sm:$0xff]   ;;  %v2680_v61 = vrot.slane %v3588_v56, 3 }
 0x11a   : > { %3785 = vmatprep.subr.bf16.mxu1 %v4032_v7  ;;  %2500 = vmatprep.mubr.bf16.mxu0 %v2233_v3  ;;  %v2211_v7 = vrot.slane %v2209_v0, 2  ;;  %v4096_v60 = vld [vmem:[%s4826_s26 + $0x8] ss:$16 sps:$4 sm:$0xf8]  }
 0x11b   : > { %v4098_v0 = vld [vmem:[%s4826_s26 + $0xc] ss:$16 sps:$4 sm:$0xf8]  }
 0x11c   : > { %3758 = vmatpush3.bf16.msra.mxu0 %v4033_v8  ;;  %v2214_v8 = vrot.slane %v2212_v1, 3  ;;  %v4090_v3 = vld [vmem:[%s4789_s21 + $0x380] sm:$0xff]  }
 0x11d   : > { %3786 = vmatpush3.bf16.msra.mxu1 %v4034_v9  ;;  %3759 = vmatprep.subr.bf16.mxu0 %v4035_v10  ;;  %v2237_v9 = vrot.slane %v2235_v2, 2  ;;  %v2243_v10 = vshrl.u32 %v3486_v42, 16 }
 0x11e   : > { %3787 = vmatprep.subr.bf16.mxu1 %v4036_v11  ;;  %v2267_v11 = vsel %vm2199_vm1, %v2258_v63, %v2266_v4  ;;  %v2683_v63 = vrot.slane %v3589_v57, 3 }
 0x11f   : > { %2548 = vmatprep.mubr.bf16.mxu1 %v2267_v11 }
 0x120   : > { %3760 = vmatpush3.bf16.msra.mxu0 %v4037_v12  ;;  %v2207_v12 = vor.u32 %v2206_v5, %v2203_v58  ;;  %v2679_v58 = vrot.slane %v4091_v55, 3  ;;  %v2685_v5 = vrot.slane %v4096_v60, 3 }
 0x121   : > { %3788 = vmatpush3.bf16.msra.mxu1 %v4038_v13  ;;  %3761 = vmatprep.subr.bf16.mxu0 %v4039_v14  ;;  %v2240_v13 = vrot.slane %v2238_v6, 3  ;;  %v2246_v14 = vshll.u32 %v3486_v42, 16  ;;  %v4077_v42 = vld [vmem:[%s4789_s21 + $0x318] sm:$0xff]   ;;  %v2688_v6 = vrot.slane %v4098_v0, 3 }
 0x122   : > { %3789 = vmatprep.subr.bf16.mxu1 %v4040_v15  ;;  %v2215_v15 = vor.u32 %v2214_v8, %v2211_v7  ;;  %v2681_v8 = vsel %vm2678_vm2, %v2679_v58, %v2680_v61 }
 0x124   : > { %3762 = vmatpush3.bf16.msra.mxu0 %v4041_v16  ;;  %v2245_v16 = vrot.slane %v2243_v10, 2 }
 0x125   : > { %3790 = vmatpush3.bf16.msra.mxu1 %v4042_v17  ;;  %3763 = vmatprep.subr.bf16.mxu0 %v4043_v18  ;;  %v4061_v17 = vld [vmem:[%s4789_s21 + $0x338] sm:$0xff]   ;;  %v2241_v18 = vor.u32 %v2240_v13, %v2237_v9 }
 0x126   : > { %3791 = vmatprep.subr.bf16.mxu1 %v4044_v19  ;;  %v2248_v19 = vrot.slane %v2246_v14, 3 }
 0x128   : > { %3764 = vmatpush3.bf16.msra.mxu0 %v4045_v20  ;;  %v4063_v20 = vld [vmem:[%s4789_s21 + $0x370] sm:$0xff]  }
 0x129   : > { %3792 = vmatpush3.bf16.msra.mxu1 %v4046_v21  ;;  %3765 = vmatprep.subr.bf16.mxu0 %v4047_v22  ;;  %v2216_v21 = vsel %vm2199_vm1, %v2207_v12, %v2215_v15  ;;  %v4062_v22 = vld [vmem:[%s4789_s21 + $0x3b8] sm:$0xff]  }
 0x12a   : > { %3793 = vmatprep.subr.bf16.mxu1 %v4048_v23  ;;  %v2249_v23 = vor.u32 %v2248_v19, %v2245_v16 }
 0x12c   : > { %3766 = vmatpush3.bf16.msra.mxu0 %v4049_v24  ;;  %v4064_v24 = vld [vmem:[%s4789_s21 + $0x3f0] sm:$0xff]   ;;  %v2250_v26 = vsel %vm2199_vm1, %v2241_v18, %v2249_v23 }
 0x12d   : > { %3794 = vmatpush3.bf16.msra.mxu1 %v4050_v25  ;;  %3807 = vmatprep.subr.bf16.mxu0 %v4059_v33  ;;  %v4065_v25 = vld [vmem:[%s4789_s21 + $0x330] sm:$0xff]  }
 0x12e   : > { %3835 = vmatprep.subr.bf16.mxu1 %v4060_v43  ;;  %v4079_v33 = vld [vmem:[%s4789_s21 + $0x350] sm:$0xff]   ;;  %v4078_v43 = vld [vmem:[%s4789_s21 + $0x398] sm:$0xff]  }
 0x12f   : > { %2501 = vmatmul.mubr.bf16.vlgmr.msra.gmra.mxu0 %v2216_v21 }
 0x130   : > { %3808 = vmatpush3.bf16.msra.mxu0 %v4061_v17  ;;  %2508 = vmatprep.mubr.bf16.mxu0 %v2232_v59  ;;  %v2580_v59 = vld [vmem:[%s4826_s26 + $0x38] sm:$0x11] }
 0x131   : > { %3809 = vmatprep.subr.bf16.mxu0 %v4063_v20  ;;  %2549 = vmatmul.mubr.bf16.vlgmr.msra.gmra.mxu1 %v2250_v26  ;;  %v3590_v1 = vcombine.low %v4945_v35, %v2580_v59  ;;  %v3591_v2 = vcombine.high %v4945_v35, %v2580_v59 }
 0x132   : > { %3836 = vmatpush3.bf16.msra.mxu1 %v4062_v22  ;;  %2556 = vmatprep.mubr.bf16.mxu1 %v2266_v4  ;;  %v2684_v4 = vsel %vm2678_vm2, %v2682_v62, %v2683_v63 }
 0x133   : > { %3837 = vmatprep.subr.bf16.mxu1 %v4064_v24  ;;  %v2686_v27 = vrot.slane %v3590_v1, 3  ;;  %v2689_v7 = vrot.slane %v3591_v2, 3 }
 0x134   : > { %3810 = vmatpush3.bf16.msra.mxu0 %v4065_v25 }
 0x135   : > { %3811 = vmatprep.subr.bf16.mxu0 %v4067_v28  ;;  %v2690_v9 = vsel %vm2678_vm2, %v2688_v6, %v2689_v7  ;;  %v2687_v10 = vsel %vm2678_vm2, %v2685_v5, %v2686_v27  ;;  %v2999_v6 = vlaneseq }
 0x136   : > { %3838 = vmatpush3.bf16.msra.mxu1 %v4066_v29 }
 0x137   : > { %2509 = vmatmul.mubr.bf16.gmra.mxu0 %v2215_v15  ;;  %3839 = vmatprep.subr.bf16.mxu1 %v4068_v30 }
 0x138   : > { %3812 = vmatpush3.bf16.msra.mxu0 %v4069_v31  ;;  %2923 = vmatprep.mubr.bf16.mxu0 %v2684_v4 }
 0x139   : > { %3813 = vmatprep.subr.bf16.mxu0 %v4071_v32  ;;  %2557 = vmatmul.mubr.bf16.gmra.mxu1 %v2249_v23 }
 0x13a   : > { %3840 = vmatpush3.bf16.msra.mxu1 %v4070_v34  ;;  %2971 = vmatprep.mubr.bf16.mxu1 %v2690_v9 }
 0x13b   : > { %3841 = vmatprep.subr.bf16.mxu1 %v4072_v36 }
 0x13c   : > { %3814 = vmatpush3.bf16.msra.mxu0 %v4073_v38 }
 0x13d   : > { %3815 = vmatprep.subr.bf16.mxu0 %v4075_v39 }
 0x13e   : > { %3842 = vmatpush3.bf16.msra.mxu1 %v4074_v40 }
 0x13f   : > { %3843 = vmatprep.subr.bf16.mxu1 %v4076_v41 }
 0x140   : > { %3816 = vmatpush3.bf16.msra.mxu0 %v4077_v42 }
 0x141   : > { %3817 = vmatprep.subr.bf16.mxu0 %v4079_v33 }
 0x142   : > { %3844 = vmatpush3.bf16.msra.mxu1 %v4078_v43 }
 0x143   : > { %3845 = vmatprep.subr.bf16.mxu1 %v4080_v44 }
 0x144   : > { %3818 = vmatpush3.bf16.msra.mxu0 %v4081_v45 }
 0x145   : > { %3819 = vmatprep.subr.bf16.mxu0 %v4083_v46 }
 0x146   : > { %3846 = vmatpush3.bf16.msra.mxu1 %v4082_v47 }
 0x147   : > { %3847 = vmatprep.subr.bf16.mxu1 %v4084_v48 }
 0x148   : > { %3820 = vmatpush3.bf16.msra.mxu0 %v4085_v49 }
 0x149   : > { %3821 = vmatprep.subr.bf16.mxu0 %v4087_v51 }
 0x14a   : > { %3848 = vmatpush3.bf16.msra.mxu1 %v4086_v50 }
 0x14b   : > { %3849 = vmatprep.subr.bf16.mxu1 %v4088_v52 }
 0x14c   : > { %3822 = vmatpush3.bf16.msra.mxu0 %v4089_v53 }
 0x14e   : > { %3850 = vmatpush3.bf16.msra.mxu1 %v4090_v3 }
 0x14f   : > { %2924 = vmatmul.mubr.bf16.vlgmr.msra.gmra.mxu0 %v2681_v8 }
 0x150   : > { %2931 = vmatprep.mubr.bf16.mxu0 %v2683_v63 }
 0x151   : > { %2972 = vmatmul.mubr.bf16.vlgmr.msra.gmra.mxu1 %v2687_v10 }
 0x152   : > { %2979 = vmatprep.mubr.bf16.mxu1 %v2689_v7 }
 0x157   : > { %2932 = vmatmul.mubr.bf16.gmra.mxu0 %v2680_v61 }
 0x159   : > { %2980 = vmatmul.mubr.bf16.gmra.mxu1 %v2686_v27 }
 0x1af   : > { %v3655_v35 = vpop.f32.mrf.mxu0 }
 0x1b0   : > { %v3683_v11 = vpop.f32.mrf.mxu1 }
 0x1b1   : > { %v3656_v12 = vpop.f32.mrf.mxu0 }
 0x1b2   : > { %v3657_v13 = vadd.f32 %v3656_v12, %v3655_v35  ;;  %v3684_v14 = vpop.f32.mrf.mxu1  ;;  %v3000_v35 = vshrl.u32 %v2999_v6, 7 }
 0x1b3   : > { %v3685_v15 = vadd.f32 %v3684_v14, %v3683_v11  ;;  %v3658_v16 = vpop.f32.mrf.mxu0 }
 0x1b4   : > { %v3686_v17 = vpop.f32.mrf.mxu1 }
 0x1b5   : > { %v1615_v18 = vadd.f32 %v3685_v15, %v3657_v13  ;;  %v3659_v19 = vpop.f32.mrf.mxu0  ;;  %v3001_v13 = vadd.s32 8, %v3000_v35 }
 0x1b6   : > { %v3660_v20 = vadd.f32 %v3659_v19, %v3658_v16  ;;  %v3687_v21 = vpop.f32.mrf.mxu1 }
 0x1b7   : > { %v3688_v22 = vadd.f32 %v3687_v21, %v3686_v17  ;;  %v3661_v24 = vpop.f32.mrf.mxu0 }
 0x1b8   : > { %v3689_v25 = vpop.f32.mrf.mxu1 }
 0x1b9   : > { %v1618_v23 = vadd.f32 %v3688_v22, %v3660_v20  ;;  %v3662_v26 = vpop.f32.mrf.mxu0  ;;  %v5006_v19 = vmul.u32.u64.low 3435973837, %v3000_v35  ;;  %v5007_v20 = vmul.u32.u64.high 3435973837, %v3000_v35, %v5006_v19 }
 0x1ba   : > { %v3690_v28 = vpop.f32.mrf.mxu1  ;;  %v3663_v29 = vadd.f32 %v3662_v26, %v3661_v24 }
 0x1bb   : > { %v3691_v30 = vadd.f32 %v3690_v28, %v3689_v25  ;;  %v3664_v31 = vpop.f32.mrf.mxu0 }
 0x1bc   : > { %v3692_v32 = vpop.f32.mrf.mxu1  ;;  %v3002_v31 = vadd.s32 16, %v3000_v35 }
 0x1bd   : > { %v1623_v34 = vadd.f32 %v3691_v30, %v3663_v29  ;;  %v3665_v36 = vpop.f32.mrf.mxu0  ;;  %v3009_v29 = vshrl.u32 %v5007_v20, 2 }
 0x1be   : > { %v3693_v38 = vpop.f32.mrf.mxu1 }
 0x1bf   : > { %1630 = vst [vmem:[#allocation2 + $0x8] sm:$0xf] %v1623_v34  ;;  %v3010_v32 = vmul.u32 5, %v3009_v29  ;;  %v5014_v36 = vmul.u32.u64.low 3435973837, %v3002_v31  ;;  %v5015_v38 = vmul.u32.u64.high 3435973837, %v3002_v31, %v5014_v36 }
 0x1c6   : > { %v2087_v63 = vld [vmem:[#allocation2 + $0x8] sm:$0xf] }
 0x1cf   : > { %v3711_v39 = vpop.f32.mrf.mxu0 }
 0x1d0   : > { %v3739_v40 = vpop.f32.mrf.mxu1 }
 0x1d1   : > { %v3712_v41 = vpop.f32.mrf.mxu0 }
 0x1d2   : > { %v3713_v42 = vadd.f32 %v3712_v41, %v3711_v39  ;;  %v3740_v33 = vpop.f32.mrf.mxu1  ;;  %v3011_v39 = vsub.s32 %v3000_v35, %v3010_v32 }
 0x1d3   : > { %v3741_v43 = vadd.f32 %v3740_v33, %v3739_v40  ;;  %v3714_v44 = vpop.f32.mrf.mxu0 }
 0x1d4   : > { %v3742_v45 = vpop.f32.mrf.mxu1  ;;  %vm3036_vm3 = vcmp.ne.s32.totalorder %v3011_v39, 0  ;;  %vm3039_vm4 = vcmp.lt.s32.totalorder %v3011_v39, 0 }
 0x1d5   : > { %v2072_v46 = vadd.f32 %v3741_v43, %v3713_v42  ;;  %v3715_v47 = vpop.f32.mrf.mxu0  ;;  %vm5018_vm7 = vmand %vm3039_vm4, %vm3036_vm3 }
 0x1d6   : > { %v3716_v48 = vadd.f32 %v3715_v47, %v3714_v44  ;;  %v3743_v49 = vpop.f32.mrf.mxu1 }
 0x1d7   : > { %v5002_v50 = vadd.f32 %v2072_v46, %v1615_v18  ;;  %v3744_v51 = vadd.f32 %v3743_v49, %v3742_v45  ;;  %v3717_v52 = vpop.f32.mrf.mxu0  ;;  %v3031_v45 = vshrl.u32 %v5015_v38, 2 }
 0x1d8   : > { %v3745_v53 = vpop.f32.mrf.mxu1 }
 0x1d9   : > { %v2075_v54 = vadd.f32 %v3744_v51, %v3716_v48  ;;  %v3718_v55 = vpop.f32.mrf.mxu0 }
 0x1da   : > { %v3719_v37 = vadd.f32 %v3718_v55, %v3717_v52  ;;  %v3746_v56 = vpop.f32.mrf.mxu1  ;;  %v3045_v55 = vadd.s32 5, %v3011_v39 }
 0x1db   : > { %v5004_v57 = vadd.f32 %v2075_v54, %v1618_v23  ;;  %v3747_v58 = vadd.f32 %v3746_v56, %v3745_v53  ;;  %v3720_v59 = vpop.f32.mrf.mxu0  ;;  %v5009_v22 = vmul.u32.u64.low 3435973837, %v3001_v13  ;;  %v5010_v23 = vmul.u32.u64.high 3435973837, %v3001_v13, %v5009_v22 }
 0x1dc   : > { %v3748_v60 = vpop.f32.mrf.mxu1 }
 0x1dd   : > { %v2080_v61 = vadd.f32 %v3747_v58, %v3719_v37  ;;  %v3721_v62 = vpop.f32.mrf.mxu0  ;;  %v3020_v30 = vshrl.u32 %v5010_v23, 2  ;;  %v3032_v60 = vmul.u32 5, %v3031_v45 }
 0x1de   : > { %v3749_v0 = vpop.f32.mrf.mxu1 }
 0x1df   : > { %v2090_v1 = vadd.f32 %v2087_v63, %v2080_v61  ;;  %v3021_v34 = vmul.u32 5, %v3020_v30 }
 0x1e1   : > { %2093 = vst [vmem:[#allocation2 + $0x8] sm:$0xf] %v2090_v1  ;;  %v3022_v40 = vsub.s32 %v3001_v13, %v3021_v34 }
 0x1e3   : > { %vm3037_vm5 = vcmp.ne.s32.totalorder %v3022_v40, 0  ;;  %vm3040_vm6 = vcmp.lt.s32.totalorder %v3022_v40, 0  ;;  %v3046_v37 = vadd.s32 5, %v3022_v40 }
 0x1e4   : > { %vm5023_vm8 = vmand %vm3040_vm6, %vm3037_vm5 }
 0x1e8   : > { %v2566_v25 = vld [vmem:[#allocation2 + $0x8] sm:$0xf] }
 0x1ef   : > { %v3767_v2 = vpop.f32.mrf.mxu0 }
 0x1f1   : > { %v3768_v3 = vpop.f32.mrf.mxu0  ;;  %v3795_v4 = vpop.f32.mrf.mxu1 }
 0x1f2   : > { %v3769_v41 = vadd.f32 %v3768_v3, %v3767_v2 }
 0x1f3   : > { %v3770_v5 = vpop.f32.mrf.mxu0  ;;  %v3796_v27 = vpop.f32.mrf.mxu1 }
 0x1f4   : > { %v3797_v42 = vadd.f32 %v3796_v27, %v3795_v4  ;;  %v3048_v4 = vsel %vm5018_vm7, %v3045_v55, %v3011_v39  ;;  %v3049_v27 = vsel %vm5023_vm8, %v3046_v37, %v3022_v40 }
 0x1f5   : > { %v3771_v7 = vpop.f32.mrf.mxu0  ;;  %v3798_v8 = vpop.f32.mrf.mxu1  ;;  %vm5033_vm9 = vcmp.lt.s32.totalorder %v3048_v4, 4  ;;  %vm5037_vm10 = vcmp.lt.s32.totalorder %v3049_v27, 4 }
 0x1f6   : > { %v2551_v46 = vadd.f32 %v3797_v42, %v3769_v41  ;;  %v3772_v47 = vadd.f32 %v3771_v7, %v3770_v5 }
 0x1f7   : > { %v3773_v9 = vpop.f32.mrf.mxu0  ;;  %v3799_v10 = vpop.f32.mrf.mxu1 }
 0x1f8   : > { %v3800_v48 = vadd.f32 %v3799_v10, %v3798_v8  ;;  %v2567_v61 = vadd.f32 %v2551_v46, %v5002_v50  ;;  %v3033_v8 = vsub.s32 %v3002_v31, %v3032_v60 }
 0x1f9   : > { %v3774_v11 = vpop.f32.mrf.mxu0  ;;  %v3801_v12 = vpop.f32.mrf.mxu1 }
 0x1fa   : > { %v3775_v14 = vadd.f32 %v3774_v11, %v3773_v9  ;;  %v2554_v62 = vadd.f32 %v3800_v48, %v3772_v47  ;;  %vm3038_vm11 = vcmp.ne.s32.totalorder %v3033_v8, 0  ;;  %vm3041_vm12 = vcmp.lt.s32.totalorder %v3033_v8, 0 }
 0x1fb   : > { %v3776_v15 = vpop.f32.mrf.mxu0  ;;  %v3802_v16 = vpop.f32.mrf.mxu1  ;;  %vm3044_vm13 = vmand %vm3041_vm12, %vm3038_vm11 }
 0x1fc   : > { %v3803_v17 = vadd.f32 %v3802_v16, %v3801_v12  ;;  %v2568_v9 = vadd.f32 %v2554_v62, %v5004_v57 }
 0x1fd   : > { %v3777_v18 = vpop.f32.mrf.mxu0  ;;  %v3804_v21 = vpop.f32.mrf.mxu1 }
 0x1fe   : > { %v2559_v24 = vadd.f32 %v3803_v17, %v3775_v14 }
 0x1ff   : > { %v3805_v26 = vpop.f32.mrf.mxu1 }
 0x200   : > { %v2569_v28 = vadd.f32 %v2566_v25, %v2559_v24  ;;  %v3047_v24 = vadd.s32 5, %v3033_v8 }
 0x202   : > { %2572 = vst [vmem:[#allocation2 + $0x8] sm:$0xf] %v2569_v28  ;;  %v3050_v25 = vsel %vm3044_vm13, %v3047_v24, %v3033_v8 }
 0x203   : > { %vm5045_vm14 = vcmp.lt.s32.totalorder %v3050_v25, 4 }
 0x209   : > { %v2989_v21 = vld [vmem:[#allocation2 + $0x8] sm:$0xf] }
 0x20f   : > { %v3823_v33 = vpop.f32.mrf.mxu0 }
 0x211   : > { %v3851_v43 = vpop.f32.mrf.mxu1  ;;  %v3824_v44 = vpop.f32.mrf.mxu0 }
 0x212   : > { %v3825_v49 = vadd.f32 %v3824_v44, %v3823_v33 }
 0x213   : > { %v3852_v51 = vpop.f32.mrf.mxu1  ;;  %v3826_v52 = vpop.f32.mrf.mxu0 }
 0x214   : > { %v3853_v53 = vadd.f32 %v3852_v51, %v3851_v43 }
 0x215   : > { %v3854_v56 = vpop.f32.mrf.mxu1  ;;  %v3827_v58 = vpop.f32.mrf.mxu0 }
 0x216   : > { %v2974_v63 = vadd.f32 %v3853_v53, %v3825_v49  ;;  %v3828_v0 = vadd.f32 %v3827_v58, %v3826_v52 }
 0x217   : > { %v3855_v1 = vpop.f32.mrf.mxu1  ;;  %v3829_v2 = vpop.f32.mrf.mxu0 }
 0x218   : > { %v2990_v3 = vadd.f32 %v2974_v63, %v2567_v61  ;;  %v3856_v5 = vadd.f32 %v3855_v1, %v3854_v56 }
 0x219   : > { %v3857_v6 = vpop.f32.mrf.mxu1  ;;  %v3830_v7 = vpop.f32.mrf.mxu0 }
 0x21a   : > { %v2977_v10 = vadd.f32 %v3856_v5, %v3828_v0  ;;  %v3831_v50 = vadd.f32 %v3830_v7, %v3829_v2  ;;  %v3060_v57 = vsel %vm5033_vm9, %v2990_v3, 0.0 }
 0x21b   : > { %v3858_v12 = vpop.f32.mrf.mxu1  ;;  %v3832_v13 = vpop.f32.mrf.mxu0 }
 0x21c   : > { %v2991_v14 = vadd.f32 %v2977_v10, %v2568_v9  ;;  %v3859_v15 = vadd.f32 %v3858_v12, %v3857_v6 }
 0x21d   : > { %v3860_v16 = vpop.f32.mrf.mxu1  ;;  %v3833_v17 = vpop.f32.mrf.mxu0 }
 0x21e   : > { %v3061_v18 = vsel %vm5037_vm10, %v2991_v14, 0.0  ;;  %v2982_v19 = vadd.f32 %v3859_v15, %v3831_v50 }
 0x21f   : > { %v3063_v20 = vadd.f32 %v3061_v18, %v3060_v57  ;;  %v3861_v22 = vpop.f32.mrf.mxu1 }
 0x220   : > { %v2992_v23 = vadd.f32 %v2989_v21, %v2982_v19 }
 0x222   : > { %2995 = vst [vmem:[#allocation2 + $0x8] sm:$0xf] %v2992_v23 }
 0x229   : > { %v2998_v28 = vld [vmem:[#allocation2 + $0x8] sm:$0xf] }
 0x22a   : > { %v3062_v29 = vsel %vm5045_vm14, %v2998_v28, 0.0 }
 0x22b   : > { %v3065_v30 = vsel %vm3064_vm15, %v3062_v29, 0.0 }
 0x22c   : > { %v3066_v31 = vadd.f32 %v3065_v30, %v3063_v20 }
 0x22e   : > { %v3067_v32 = vrot.slane %v3066_v31, 4 }
 0x230   : > { %v3068_v34 = vadd.f32 %v3067_v32, %v3066_v31 }
 0x232   : > { %v3069_v36 = vrot.slane %v3068_v34, 2 }
 0x234   : > { %v3070_v38 = vadd.f32 %v3069_v36, %v3068_v34 }
 0x236   : > { %v3071_v39 = vrot.slane %v3070_v38, 1 }
 0x238   : > { %v3072_v40 = vadd.f32 %v3071_v39, %v3070_v38 }
 0x23a   : > { %v3073_v41 = vmul.f32 0.0625, %v3072_v40 }
 0x23c   : > { %v3074_v42 = vsub.f32 %v2990_v3, %v3073_v41  ;;  %v3075_v33 = vsub.f32 %v2991_v14, %v3073_v41  ;;  %v3076_v43 = vsub.f32 %v2998_v28, %v3073_v41 }
 0x23e   : > { %v3077_v44 = vsel %vm5033_vm9, %v3074_v42, 0.0  ;;  %v3078_v45 = vsel %vm5037_vm10, %v3075_v33, 0.0  ;;  %v3079_v46 = vsel %vm5045_vm14, %v3076_v43, 0.0 }
 0x23f   : > { %v3080_v47 = vmul.f32 %v3077_v44, %v3077_v44  ;;  %v3081_v48 = vmul.f32 %v3078_v45, %v3078_v45  ;;  %v3082_v49 = vmul.f32 %v3079_v46, %v3079_v46 }
 0x241   : > { %v3083_v51 = vadd.f32 %v3081_v48, %v3080_v47  ;;  %v3084_v52 = vsel %vm3064_vm15, %v3082_v49, 0.0 }
 0x243   : > { %v3085_v53 = vadd.f32 %v3084_v52, %v3083_v51 }
 0x245   : > { %v3086_v54 = vrot.slane %v3085_v53, 4 }
 0x247   : > { %v3087_v55 = vadd.f32 %v3086_v54, %v3085_v53 }
 0x249   : > { %v3088_v37 = vrot.slane %v3087_v55, 2 }
 0x24b   : > { %v3089_v56 = vadd.f32 %v3088_v37, %v3087_v55 }
 0x24d   : > { %v3090_v58 = vrot.slane %v3089_v56, 1 }
 0x24f   : > { %v3091_v59 = vadd.f32 %v3090_v58, %v3089_v56 }
 0x251   : > { %v3092_v60 = vmul.f32 0.0625, %v3091_v59 }
 0x253   : > { %v3093_v61 = vadd.f32 1e-05, %v3092_v60 }
 0x255   : > { %4101 = vrsqrt.f32 %v3093_v61 }
 0x262   : > { %v4102_v62 = vpop.eup %4101 }
 0x263   : > { %v3095_v63 = vmul.f32 %v4102_v62, %v3074_v42  ;;  %v3096_v0 = vmul.f32 %v4102_v62, %v3075_v33  ;;  %v3097_v1 = vmul.f32 %v4102_v62, %v3076_v43 }
 0x265   : > { %v3098_v2 = vmul.f32 0.2, %v3095_v63  ;;  %v3099_v3 = vmul.f32 0.2, %v3096_v0  ;;  %v3100_v4 = vmul.f32 0.2, %v3097_v1 }
 0x267   : > { %v3101_v5 = vmax.f32 %v3095_v63, %v3098_v2  ;;  %v3102_v27 = vmax.f32 %v3096_v0, %v3099_v3  ;;  %v3103_v6 = vmax.f32 %v3097_v1, %v3100_v4  ;;  %3126 = sbr.rel (!%p4257_p9) target bundleno = 629 (0x275), region = 73 }
 0x269   : > { %v3633_v7 = vpack.c.bf16 %v3103_v6, %v3103_v6  ;;  %v3637_v8 = vpack.c.bf16 %v3102_v27, %v3101_v5 }
 0x26b   : > { %3638 = vst [vmem:[%s1229_s3] sm:$0xff] %v3637_v8   ;;  %3119 = vst [vmem:[%s1229_s3 + $0x8] sm:$0x3] %v3633_v7 }
 0x272   : > { %v3147_v9 = vld [vmem:[%s1229_s3] sm:$0xf]  ;;  %v3149_v10 = vld [vmem:[%s1229_s3 + $0x4] sm:$0xf]  ;;  %v3151_v50 = vld [vmem:[%s1229_s3 + $0x8] sm:$0xf] }
 0x273   : > { %3148 = vst [vmem:[%s3130_s8] sm:$0xf] %v3147_v9  ;;  %3150 = vst [vmem:[%s3130_s8 + $0x8] sm:$0xf] %v3149_v10 }
 0x274   : > { %3152 = vst [vmem:[%s3130_s8 + $0x10] sm:$0xf] %v3151_v50 }
 0x275 PF: > { %s12_s17 = sadd.s32 1, %s4173_s17   ;;  %s5108_s9 = smov %s4145_s10 }
 0x276   : > { %p9_p1 = scmp.ge.s32.totalorder %s12_s17, 6   ;;  %s5109_s10 = smov %s4262_s28 }
 0x277   : > { %s5110_s11 = smov %s4153_s12  ;;  %s5111_s12 = smov %s4251_s24 }
 0x278   : > { %s5112_s13 = smov %s4165_s15  ;;  %s5113_s14 = smov %s4169_s16 }
 0x279   : > { %s5114_s15 = smov %s5117_s19  ;;  %s5115_s16 = smov %s5121_s20 }
 0x27a   :  { %11 = sbr.rel (!%p9_p1) target bundleno = 5 (0x5), region = 151 }

// kernel: discriminator_forward.8
= control target key start
LH: loop header
LB: loop body
LE: loop exit
PB: predicated region body
PF: predicated region fallthrough
CT: control target
= control target key end

     0   :  { %s8937_s9 = smov 0   ;;  %s8939_s10 = smov 0   ;;  %s10360_s0 = inlined_call_operand.vmem [shape: bf16[2,10,1024], index: 0, kind: input, shape index: {}]   ;;  %s10361_s1 = inlined_call_operand.vmem [shape: bf16[4,1024,512], index: 1, kind: input, shape index: {}]   ;;  %s10362_s2 = inlined_call_operand.vmem [shape: bf16[2,6,512], index: 2, kind: output, shape index: {}]  }
   0x1   :  { %s8941_s11 = smov 0   ;;  %s8943_s12 = smov 0  }
   0x2   :  { %s8945_s13 = smov 0   ;;  %s8947_s14 = smov 0  }
   0x3   :  { %s8949_s15 = smov 0  }
   0x4 LB: > { %s21_s16 = sadd.s32 1, %s8912_s13  ;;  %s24_s17 = sadd.s32 1, %s8916_s14  ;;  %s8920_s15 = sphi %s8949_s15, %s12_s15   ;;  %s8916_s14 = sphi %s8947_s14, %s10368_s14   ;;  %s8912_s13 = sphi %s8945_s13, %s10367_s13   ;;  %s8908_s12 = sphi %s8943_s12, %s10366_s12   ;;  %s8904_s11 = sphi %s8941_s11, %s10365_s11   ;;  %s8900_s10 = sphi %s8939_s10, %s10364_s10   ;;  %s8896_s9 = sphi %s8937_s9, %s10363_s9  }
   0x5   : > { %p22_p0 = scmp.ge.s32.totalorder %s21_s16, 4  ;;  %s57_s18 = sadd.s32 1, %s8900_s10 }
   0x6   : > { %p64_p1 = scmp.ne.s32.totalorder %s8900_s10, %s8896_s9  ;;  %p65_p2 = scmp.eq.s32.totalorder %s8920_s15, 0 }
   0x7   : > { %s10370_s16 = smov (%p22_p0, %s21_s16), 0  ;;  %s10372_s17 = smov (!%p22_p0, %s24_s17), %s8916_s14 }
   0x8   : > { %s54_s19 = ssub.s32 %s8912_s13, %s10370_s16  ;;  %p66_p3 = por %p65_p2, %p64_p1 }
   0x9   : > { %p26_p4 = scmp.ge.s32.totalorder %s10372_s17, 2  ;;  %p55_p5 = scmp.eq.s32.totalorder %s54_s19, 0 }
   0xa   : > { %p7498_p6 = scmp.ge.s32.totalorder %s8920_s15, 8 }
   0xb   : > { %s10374_s17 = smov (%p26_p4, %s10372_s17), 0 }
   0xc   : > { %s8986_s20 = scalar_select %p55_p5, %s8900_s10, %s57_s18  }
   0xd   : > { %118 = sbr.rel (%p7498_p6) target bundleno = 363 (0x16b), region = 16 }
  0x12   : > { %129 = sbr.rel (!%p66_p3) target bundleno = 363 (0x16b), region = 24  ;;  %s131_s21 = sand.u32 (%p66_p3), 1, %s8900_s10  }
  0x13   : > { %s7500_s22 = sshll.u32 (%p66_p3), %s8912_s13, 2  ;;  %s7499_s23 = sshll.u32 (%p66_p3), %s131_s21, 11 }
  0x14   : > { %s8994_s26 = scalar_lea.vmem (%p66_p3), %s10361_s1, %s7500_s22  ;;  %s8998_s27 = scalar_lea.vmem (%p66_p3), [#allocation3], %s7499_s23 }
  0x15   : > { %v152_v0 = vld [vmem:[%s8994_s26] sm:$0xf] (%p66_p3)  ;;  %v154_v1 = vld [vmem:[%s8994_s26 + $0x10] sm:$0xf] (%p66_p3) }
  0x16   : > { %153 = vst [vmem:[%s8998_s27] sm:$0xf] (%p66_p3), %v152_v0  ;;  %155 = vst [vmem:[%s8998_s27 + $0x4] sm:$0xf] (%p66_p3), %v154_v1  ;;  %v156_v2 = vld [vmem:[%s8994_s26 + $0x20] sm:$0xf] (%p66_p3) }
  0x17   : > { %v158_v3 = vld [vmem:[%s8994_s26 + $0x30] sm:$0xf]  ;;  %v160_v4 = vld [vmem:[%s8994_s26 + $0x40] sm:$0xf]  ;;  %157 = vst [vmem:[%s8998_s27 + $0x8] sm:$0xf] %v156_v2 }
  0x18   : > { %159 = vst [vmem:[%s8998_s27 + $0xc] sm:$0xf] %v158_v3  ;;  %161 = vst [vmem:[%s8998_s27 + $0x10] sm:$0xf] %v160_v4  ;;  %v162_v5 = vld [vmem:[%s8994_s26 + $0x50] sm:$0xf] }
  0x19   : > { %v164_v6 = vld [vmem:[%s8994_s26 + $0x60] sm:$0xf]  ;;  %v166_v7 = vld [vmem:[%s8994_s26 + $0x70] sm:$0xf]  ;;  %163 = vst [vmem:[%s8998_s27 + $0x14] sm:$0xf] %v162_v5 }
  0x1a   : > { %165 = vst [vmem:[%s8998_s27 + $0x18] sm:$0xf] %v164_v6  ;;  %167 = vst [vmem:[%s8998_s27 + $0x1c] sm:$0xf] %v166_v7  ;;  %v168_v8 = vld [vmem:[%s8994_s26 + $0x80] sm:$0xf] }
  0x1b   : > { %v170_v9 = vld [vmem:[%s8994_s26 + $0x90] sm:$0xf]  ;;  %v172_v10 = vld [vmem:[%s8994_s26 + $0xa0] sm:$0xf]  ;;  %169 = vst [vmem:[%s8998_s27 + $0x20] sm:$0xf] %v168_v8 }
  0x1c   : > { %171 = vst [vmem:[%s8998_s27 + $0x24] sm:$0xf] %v170_v9  ;;  %173 = vst [vmem:[%s8998_s27 + $0x28] sm:$0xf] %v172_v10  ;;  %v174_v11 = vld [vmem:[%s8994_s26 + $0xb0] sm:$0xf] }
  0x1d   : > { %v176_v12 = vld [vmem:[%s8994_s26 + $0xc0] sm:$0xf]  ;;  %v178_v13 = vld [vmem:[%s8994_s26 + $0xd0] sm:$0xf]  ;;  %175 = vst [vmem:[%s8998_s27 + $0x2c] sm:$0xf] %v174_v11 }
  0x1e   : > { %177 = vst [vmem:[%s8998_s27 + $0x30] sm:$0xf] %v176_v12  ;;  %179 = vst [vmem:[%s8998_s27 + $0x34] sm:$0xf] %v178_v13  ;;  %v180_v14 = vld [vmem:[%s8994_s26 + $0xe0] sm:$0xf] }
  0x1f   : > { %v182_v15 = vld [vmem:[%s8994_s26 + $0xf0] sm:$0xf]  ;;  %v184_v16 = vld [vmem:[%s8994_s26 + $0x100] sm:$0xf]  ;;  %181 = vst [vmem:[%s8998_s27 + $0x38] sm:$0xf] %v180_v14 }
  0x20   : > { %183 = vst [vmem:[%s8998_s27 + $0x3c] sm:$0xf] %v182_v15  ;;  %185 = vst [vmem:[%s8998_s27 + $0x40] sm:$0xf] %v184_v16  ;;  %v186_v17 = vld [vmem:[%s8994_s26 + $0x110] sm:$0xf] }
  0x21   : > { %v188_v18 = vld [vmem:[%s8994_s26 + $0x120] sm:$0xf]  ;;  %v190_v19 = vld [vmem:[%s8994_s26 + $0x130] sm:$0xf]  ;;  %187 = vst [vmem:[%s8998_s27 + $0x44] sm:$0xf] %v186_v17 }
  0x22   : > { %189 = vst [vmem:[%s8998_s27 + $0x48] sm:$0xf] %v188_v18  ;;  %191 = vst [vmem:[%s8998_s27 + $0x4c] sm:$0xf] %v190_v19  ;;  %v192_v20 = vld [vmem:[%s8994_s26 + $0x140] sm:$0xf] }
  0x23   : > { %v194_v21 = vld [vmem:[%s8994_s26 + $0x150] sm:$0xf]  ;;  %v196_v22 = vld [vmem:[%s8994_s26 + $0x160] sm:$0xf]  ;;  %193 = vst [vmem:[%s8998_s27 + $0x50] sm:$0xf] %v192_v20 }
  0x24   : > { %195 = vst [vmem:[%s8998_s27 + $0x54] sm:$0xf] %v194_v21  ;;  %197 = vst [vmem:[%s8998_s27 + $0x58] sm:$0xf] %v196_v22  ;;  %v198_v23 = vld [vmem:[%s8994_s26 + $0x170] sm:$0xf] }
  0x25   : > { %v200_v24 = vld [vmem:[%s8994_s26 + $0x180] sm:$0xf]  ;;  %v202_v25 = vld [vmem:[%s8994_s26 + $0x190] sm:$0xf]  ;;  %199 = vst [vmem:[%s8998_s27 + $0x5c] sm:$0xf] %v198_v23 }
  0x26   : > { %201 = vst [vmem:[%s8998_s27 + $0x60] sm:$0xf] %v200_v24  ;;  %203 = vst [vmem:[%s8998_s27 + $0x64] sm:$0xf] %v202_v25  ;;  %v204_v26 = vld [vmem:[%s8994_s26 + $0x1a0] sm:$0xf] }
  0x27   : > { %v206_v27 = vld [vmem:[%s8994_s26 + $0x1b0] sm:$0xf]  ;;  %v208_v28 = vld [vmem:[%s8994_s26 + $0x1c0] sm:$0xf]  ;;  %205 = vst [vmem:[%s8998_s27 + $0x68] sm:$0xf] %v204_v26 }
  0x28   : > { %207 = vst [vmem:[%s8998_s27 + $0x6c] sm:$0xf] %v206_v27  ;;  %209 = vst [vmem:[%s8998_s27 + $0x70] sm:$0xf] %v208_v28  ;;  %v210_v29 = vld [vmem:[%s8994_s26 + $0x1d0] sm:$0xf] }
  0x29   : > { %v212_v30 = vld [vmem:[%s8994_s26 + $0x1e0] sm:$0xf]  ;;  %v214_v31 = vld [vmem:[%s8994_s26 + $0x1f0] sm:$0xf]  ;;  %211 = vst [vmem:[%s8998_s27 + $0x74] sm:$0xf] %v210_v29 }
  0x2a   : > { %213 = vst [vmem:[%s8998_s27 + $0x78] sm:$0xf] %v212_v30  ;;  %215 = vst [vmem:[%s8998_s27 + $0x7c] sm:$0xf] %v214_v31  ;;  %v216_v32 = vld [vmem:[%s8994_s26 + $0x200] sm:$0xf] }
  0x2b   : > { %v218_v33 = vld [vmem:[%s8994_s26 + $0x210] sm:$0xf]  ;;  %v220_v34 = vld [vmem:[%s8994_s26 + $0x220] sm:$0xf]  ;;  %217 = vst [vmem:[%s8998_s27 + $0x80] sm:$0xf] %v216_v32 }
  0x2c   : > { %219 = vst [vmem:[%s8998_s27 + $0x84] sm:$0xf] %v218_v33  ;;  %221 = vst [vmem:[%s8998_s27 + $0x88] sm:$0xf] %v220_v34  ;;  %v222_v35 = vld [vmem:[%s8994_s26 + $0x230] sm:$0xf] }
  0x2d   : > { %v224_v36 = vld [vmem:[%s8994_s26 + $0x240] sm:$0xf]  ;;  %v226_v37 = vld [vmem:[%s8994_s26 + $0x250] sm:$0xf]  ;;  %223 = vst [vmem:[%s8998_s27 + $0x8c] sm:$0xf] %v222_v35 }
  0x2e   : > { %225 = vst [vmem:[%s8998_s27 + $0x90] sm:$0xf] %v224_v36  ;;  %227 = vst [vmem:[%s8998_s27 + $0x94] sm:$0xf] %v226_v37  ;;  %v228_v38 = vld [vmem:[%s8994_s26 + $0x260] sm:$0xf] }
  0x2f   : > { %v230_v39 = vld [vmem:[%s8994_s26 + $0x270] sm:$0xf]  ;;  %v232_v40 = vld [vmem:[%s8994_s26 + $0x280] sm:$0xf]  ;;  %229 = vst [vmem:[%s8998_s27 + $0x98] sm:$0xf] %v228_v38 }
  0x30   : > { %231 = vst [vmem:[%s8998_s27 + $0x9c] sm:$0xf] %v230_v39  ;;  %233 = vst [vmem:[%s8998_s27 + $0xa0] sm:$0xf] %v232_v40  ;;  %v234_v41 = vld [vmem:[%s8994_s26 + $0x290] sm:$0xf] }
  0x31   : > { %v236_v42 = vld [vmem:[%s8994_s26 + $0x2a0] sm:$0xf]  ;;  %v238_v43 = vld [vmem:[%s8994_s26 + $0x2b0] sm:$0xf]  ;;  %235 = vst [vmem:[%s8998_s27 + $0xa4] sm:$0xf] %v234_v41 }
  0x32   : > { %237 = vst [vmem:[%s8998_s27 + $0xa8] sm:$0xf] %v236_v42  ;;  %239 = vst [vmem:[%s8998_s27 + $0xac] sm:$0xf] %v238_v43  ;;  %v240_v44 = vld [vmem:[%s8994_s26 + $0x2c0] sm:$0xf] }
  0x33   : > { %v242_v45 = vld [vmem:[%s8994_s26 + $0x2d0] sm:$0xf]  ;;  %v244_v46 = vld [vmem:[%s8994_s26 + $0x2e0] sm:$0xf]  ;;  %241 = vst [vmem:[%s8998_s27 + $0xb0] sm:$0xf] %v240_v44 }
  0x34   : > { %243 = vst [vmem:[%s8998_s27 + $0xb4] sm:$0xf] %v242_v45  ;;  %245 = vst [vmem:[%s8998_s27 + $0xb8] sm:$0xf] %v244_v46  ;;  %v246_v47 = vld [vmem:[%s8994_s26 + $0x2f0] sm:$0xf] }
  0x35   : > { %v248_v48 = vld [vmem:[%s8994_s26 + $0x300] sm:$0xf]  ;;  %v250_v49 = vld [vmem:[%s8994_s26 + $0x310] sm:$0xf]  ;;  %247 = vst [vmem:[%s8998_s27 + $0xbc] sm:$0xf] %v246_v47 }
  0x36   : > { %249 = vst [vmem:[%s8998_s27 + $0xc0] sm:$0xf] %v248_v48  ;;  %251 = vst [vmem:[%s8998_s27 + $0xc4] sm:$0xf] %v250_v49  ;;  %v252_v50 = vld [vmem:[%s8994_s26 + $0x320] sm:$0xf] }
  0x37   : > { %v254_v51 = vld [vmem:[%s8994_s26 + $0x330] sm:$0xf]  ;;  %v256_v52 = vld [vmem:[%s8994_s26 + $0x340] sm:$0xf]  ;;  %253 = vst [vmem:[%s8998_s27 + $0xc8] sm:$0xf] %v252_v50 }
  0x38   : > { %255 = vst [vmem:[%s8998_s27 + $0xcc] sm:$0xf] %v254_v51  ;;  %257 = vst [vmem:[%s8998_s27 + $0xd0] sm:$0xf] %v256_v52  ;;  %v258_v53 = vld [vmem:[%s8994_s26 + $0x350] sm:$0xf] }
  0x39   : > { %v260_v54 = vld [vmem:[%s8994_s26 + $0x360] sm:$0xf]  ;;  %v262_v55 = vld [vmem:[%s8994_s26 + $0x370] sm:$0xf]  ;;  %259 = vst [vmem:[%s8998_s27 + $0xd4] sm:$0xf] %v258_v53 }
  0x3a   : > { %261 = vst [vmem:[%s8998_s27 + $0xd8] sm:$0xf] %v260_v54  ;;  %263 = vst [vmem:[%s8998_s27 + $0xdc] sm:$0xf] %v262_v55  ;;  %v264_v56 = vld [vmem:[%s8994_s26 + $0x380] sm:$0xf] }
  0x3b   : > { %v266_v57 = vld [vmem:[%s8994_s26 + $0x390] sm:$0xf]  ;;  %v268_v58 = vld [vmem:[%s8994_s26 + $0x3a0] sm:$0xf]  ;;  %265 = vst [vmem:[%s8998_s27 + $0xe0] sm:$0xf] %v264_v56 }
  0x3c   : > { %267 = vst [vmem:[%s8998_s27 + $0xe4] sm:$0xf] %v266_v57  ;;  %269 = vst [vmem:[%s8998_s27 + $0xe8] sm:$0xf] %v268_v58  ;;  %v270_v59 = vld [vmem:[%s8994_s26 + $0x3b0] sm:$0xf] }
  0x3d   : > { %v272_v60 = vld [vmem:[%s8994_s26 + $0x3c0] sm:$0xf]  ;;  %v274_v61 = vld [vmem:[%s8994_s26 + $0x3d0] sm:$0xf]  ;;  %271 = vst [vmem:[%s8998_s27 + $0xec] sm:$0xf] %v270_v59 }
  0x3e   : > { %273 = vst [vmem:[%s8998_s27 + $0xf0] sm:$0xf] %v272_v60  ;;  %275 = vst [vmem:[%s8998_s27 + $0xf4] sm:$0xf] %v274_v61  ;;  %v276_v62 = vld [vmem:[%s8994_s26 + $0x3e0] sm:$0xf] }
  0x3f   : > { %v278_v63 = vld [vmem:[%s8994_s26 + $0x3f0] sm:$0xf]  ;;  %v280_v0 = vld [vmem:[%s8994_s26 + $0x400] sm:$0xf]  ;;  %277 = vst [vmem:[%s8998_s27 + $0xf8] sm:$0xf] %v276_v62 }
  0x40   : > { %279 = vst [vmem:[%s8998_s27 + $0xfc] sm:$0xf] %v278_v63  ;;  %281 = vst [vmem:[%s8998_s27 + $0x100] sm:$0xf] %v280_v0  ;;  %v282_v1 = vld [vmem:[%s8994_s26 + $0x410] sm:$0xf] }
  0x41   : > { %v284_v2 = vld [vmem:[%s8994_s26 + $0x420] sm:$0xf]  ;;  %v286_v3 = vld [vmem:[%s8994_s26 + $0x430] sm:$0xf]  ;;  %283 = vst [vmem:[%s8998_s27 + $0x104] sm:$0xf] %v282_v1 }
  0x42   : > { %285 = vst [vmem:[%s8998_s27 + $0x108] sm:$0xf] %v284_v2  ;;  %287 = vst [vmem:[%s8998_s27 + $0x10c] sm:$0xf] %v286_v3  ;;  %v288_v4 = vld [vmem:[%s8994_s26 + $0x440] sm:$0xf] }
  0x43   : > { %v290_v5 = vld [vmem:[%s8994_s26 + $0x450] sm:$0xf]  ;;  %v292_v6 = vld [vmem:[%s8994_s26 + $0x460] sm:$0xf]  ;;  %289 = vst [vmem:[%s8998_s27 + $0x110] sm:$0xf] %v288_v4 }
  0x44   : > { %291 = vst [vmem:[%s8998_s27 + $0x114] sm:$0xf] %v290_v5  ;;  %293 = vst [vmem:[%s8998_s27 + $0x118] sm:$0xf] %v292_v6  ;;  %v294_v7 = vld [vmem:[%s8994_s26 + $0x470] sm:$0xf] }
  0x45   : > { %v296_v8 = vld [vmem:[%s8994_s26 + $0x480] sm:$0xf]  ;;  %v298_v9 = vld [vmem:[%s8994_s26 + $0x490] sm:$0xf]  ;;  %295 = vst [vmem:[%s8998_s27 + $0x11c] sm:$0xf] %v294_v7 }
  0x46   : > { %297 = vst [vmem:[%s8998_s27 + $0x120] sm:$0xf] %v296_v8  ;;  %299 = vst [vmem:[%s8998_s27 + $0x124] sm:$0xf] %v298_v9  ;;  %v300_v10 = vld [vmem:[%s8994_s26 + $0x4a0] sm:$0xf] }
  0x47   : > { %v302_v11 = vld [vmem:[%s8994_s26 + $0x4b0] sm:$0xf]  ;;  %v304_v12 = vld [vmem:[%s8994_s26 + $0x4c0] sm:$0xf]  ;;  %301 = vst [vmem:[%s8998_s27 + $0x128] sm:$0xf] %v300_v10 }
  0x48   : > { %303 = vst [vmem:[%s8998_s27 + $0x12c] sm:$0xf] %v302_v11  ;;  %305 = vst [vmem:[%s8998_s27 + $0x130] sm:$0xf] %v304_v12  ;;  %v306_v13 = vld [vmem:[%s8994_s26 + $0x4d0] sm:$0xf] }
  0x49   : > { %v308_v14 = vld [vmem:[%s8994_s26 + $0x4e0] sm:$0xf]  ;;  %v310_v15 = vld [vmem:[%s8994_s26 + $0x4f0] sm:$0xf]  ;;  %307 = vst [vmem:[%s8998_s27 + $0x134] sm:$0xf] %v306_v13 }
  0x4a   : > { %309 = vst [vmem:[%s8998_s27 + $0x138] sm:$0xf] %v308_v14  ;;  %311 = vst [vmem:[%s8998_s27 + $0x13c] sm:$0xf] %v310_v15  ;;  %v312_v16 = vld [vmem:[%s8994_s26 + $0x500] sm:$0xf] }
  0x4b   : > { %v314_v17 = vld [vmem:[%s8994_s26 + $0x510] sm:$0xf]  ;;  %v316_v18 = vld [vmem:[%s8994_s26 + $0x520] sm:$0xf]  ;;  %313 = vst [vmem:[%s8998_s27 + $0x140] sm:$0xf] %v312_v16 }
  0x4c   : > { %315 = vst [vmem:[%s8998_s27 + $0x144] sm:$0xf] %v314_v17  ;;  %317 = vst [vmem:[%s8998_s27 + $0x148] sm:$0xf] %v316_v18  ;;  %v318_v19 = vld [vmem:[%s8994_s26 + $0x530] sm:$0xf] }
  0x4d   : > { %v320_v20 = vld [vmem:[%s8994_s26 + $0x540] sm:$0xf]  ;;  %v322_v21 = vld [vmem:[%s8994_s26 + $0x550] sm:$0xf]  ;;  %319 = vst [vmem:[%s8998_s27 + $0x14c] sm:$0xf] %v318_v19 }
  0x4e   : > { %321 = vst [vmem:[%s8998_s27 + $0x150] sm:$0xf] %v320_v20  ;;  %323 = vst [vmem:[%s8998_s27 + $0x154] sm:$0xf] %v322_v21  ;;  %v324_v22 = vld [vmem:[%s8994_s26 + $0x560] sm:$0xf] }
  0x4f   : > { %v326_v23 = vld [vmem:[%s8994_s26 + $0x570] sm:$0xf]  ;;  %v328_v24 = vld [vmem:[%s8994_s26 + $0x580] sm:$0xf]  ;;  %325 = vst [vmem:[%s8998_s27 + $0x158] sm:$0xf] %v324_v22 }
  0x50   : > { %327 = vst [vmem:[%s8998_s27 + $0x15c] sm:$0xf] %v326_v23  ;;  %329 = vst [vmem:[%s8998_s27 + $0x160] sm:$0xf] %v328_v24  ;;  %v330_v25 = vld [vmem:[%s8994_s26 + $0x590] sm:$0xf] }
  0x51   : > { %v332_v26 = vld [vmem:[%s8994_s26 + $0x5a0] sm:$0xf]  ;;  %v334_v27 = vld [vmem:[%s8994_s26 + $0x5b0] sm:$0xf]  ;;  %331 = vst [vmem:[%s8998_s27 + $0x164] sm:$0xf] %v330_v25 }
  0x52   : > { %333 = vst [vmem:[%s8998_s27 + $0x168] sm:$0xf] %v332_v26  ;;  %335 = vst [vmem:[%s8998_s27 + $0x16c] sm:$0xf] %v334_v27  ;;  %v336_v28 = vld [vmem:[%s8994_s26 + $0x5c0] sm:$0xf] }
  0x53   : > { %v338_v29 = vld [vmem:[%s8994_s26 + $0x5d0] sm:$0xf]  ;;  %v340_v30 = vld [vmem:[%s8994_s26 + $0x5e0] sm:$0xf]  ;;  %337 = vst [vmem:[%s8998_s27 + $0x170] sm:$0xf] %v336_v28 }
  0x54   : > { %339 = vst [vmem:[%s8998_s27 + $0x174] sm:$0xf] %v338_v29  ;;  %341 = vst [vmem:[%s8998_s27 + $0x178] sm:$0xf] %v340_v30  ;;  %v342_v31 = vld [vmem:[%s8994_s26 + $0x5f0] sm:$0xf] }
  0x55   : > { %v344_v32 = vld [vmem:[%s8994_s26 + $0x600] sm:$0xf]  ;;  %v346_v33 = vld [vmem:[%s8994_s26 + $0x610] sm:$0xf]  ;;  %343 = vst [vmem:[%s8998_s27 + $0x17c] sm:$0xf] %v342_v31 }
  0x56   : > { %345 = vst [vmem:[%s8998_s27 + $0x180] sm:$0xf] %v344_v32  ;;  %347 = vst [vmem:[%s8998_s27 + $0x184] sm:$0xf] %v346_v33  ;;  %v348_v34 = vld [vmem:[%s8994_s26 + $0x620] sm:$0xf] }
  0x57   : > { %v350_v35 = vld [vmem:[%s8994_s26 + $0x630] sm:$0xf]  ;;  %v352_v36 = vld [vmem:[%s8994_s26 + $0x640] sm:$0xf]  ;;  %349 = vst [vmem:[%s8998_s27 + $0x188] sm:$0xf] %v348_v34 }
  0x58   : > { %351 = vst [vmem:[%s8998_s27 + $0x18c] sm:$0xf] %v350_v35  ;;  %353 = vst [vmem:[%s8998_s27 + $0x190] sm:$0xf] %v352_v36  ;;  %v354_v37 = vld [vmem:[%s8994_s26 + $0x650] sm:$0xf] }
  0x59   : > { %v356_v38 = vld [vmem:[%s8994_s26 + $0x660] sm:$0xf]  ;;  %v358_v39 = vld [vmem:[%s8994_s26 + $0x670] sm:$0xf]  ;;  %355 = vst [vmem:[%s8998_s27 + $0x194] sm:$0xf] %v354_v37 }
  0x5a   : > { %357 = vst [vmem:[%s8998_s27 + $0x198] sm:$0xf] %v356_v38  ;;  %359 = vst [vmem:[%s8998_s27 + $0x19c] sm:$0xf] %v358_v39  ;;  %v360_v40 = vld [vmem:[%s8994_s26 + $0x680] sm:$0xf] }
  0x5b   : > { %v362_v41 = vld [vmem:[%s8994_s26 + $0x690] sm:$0xf]  ;;  %v364_v42 = vld [vmem:[%s8994_s26 + $0x6a0] sm:$0xf]  ;;  %361 = vst [vmem:[%s8998_s27 + $0x1a0] sm:$0xf] %v360_v40 }
  0x5c   : > { %363 = vst [vmem:[%s8998_s27 + $0x1a4] sm:$0xf] %v362_v41  ;;  %365 = vst [vmem:[%s8998_s27 + $0x1a8] sm:$0xf] %v364_v42  ;;  %v366_v43 = vld [vmem:[%s8994_s26 + $0x6b0] sm:$0xf] }
  0x5d   : > { %v368_v44 = vld [vmem:[%s8994_s26 + $0x6c0] sm:$0xf]  ;;  %v370_v45 = vld [vmem:[%s8994_s26 + $0x6d0] sm:$0xf]  ;;  %367 = vst [vmem:[%s8998_s27 + $0x1ac] sm:$0xf] %v366_v43 }
  0x5e   : > { %369 = vst [vmem:[%s8998_s27 + $0x1b0] sm:$0xf] %v368_v44  ;;  %371 = vst [vmem:[%s8998_s27 + $0x1b4] sm:$0xf] %v370_v45  ;;  %v372_v46 = vld [vmem:[%s8994_s26 + $0x6e0] sm:$0xf] }
  0x5f   : > { %v374_v47 = vld [vmem:[%s8994_s26 + $0x6f0] sm:$0xf]  ;;  %v376_v48 = vld [vmem:[%s8994_s26 + $0x700] sm:$0xf]  ;;  %373 = vst [vmem:[%s8998_s27 + $0x1b8] sm:$0xf] %v372_v46 }
  0x60   : > { %375 = vst [vmem:[%s8998_s27 + $0x1bc] sm:$0xf] %v374_v47  ;;  %377 = vst [vmem:[%s8998_s27 + $0x1c0] sm:$0xf] %v376_v48  ;;  %v378_v49 = vld [vmem:[%s8994_s26 + $0x710] sm:$0xf] }
  0x61   : > { %v380_v50 = vld [vmem:[%s8994_s26 + $0x720] sm:$0xf]  ;;  %v382_v51 = vld [vmem:[%s8994_s26 + $0x730] sm:$0xf]  ;;  %379 = vst [vmem:[%s8998_s27 + $0x1c4] sm:$0xf] %v378_v49 }
  0x62   : > { %381 = vst [vmem:[%s8998_s27 + $0x1c8] sm:$0xf] %v380_v50  ;;  %383 = vst [vmem:[%s8998_s27 + $0x1cc] sm:$0xf] %v382_v51  ;;  %v384_v52 = vld [vmem:[%s8994_s26 + $0x740] sm:$0xf] }
  0x63   : > { %v386_v53 = vld [vmem:[%s8994_s26 + $0x750] sm:$0xf]  ;;  %v388_v54 = vld [vmem:[%s8994_s26 + $0x760] sm:$0xf]  ;;  %385 = vst [vmem:[%s8998_s27 + $0x1d0] sm:$0xf] %v384_v52 }
  0x64   : > { %387 = vst [vmem:[%s8998_s27 + $0x1d4] sm:$0xf] %v386_v53  ;;  %389 = vst [vmem:[%s8998_s27 + $0x1d8] sm:$0xf] %v388_v54  ;;  %v390_v55 = vld [vmem:[%s8994_s26 + $0x770] sm:$0xf] }
  0x65   : > { %v392_v56 = vld [vmem:[%s8994_s26 + $0x780] sm:$0xf]  ;;  %v394_v57 = vld [vmem:[%s8994_s26 + $0x790] sm:$0xf]  ;;  %391 = vst [vmem:[%s8998_s27 + $0x1dc] sm:$0xf] %v390_v55 }
  0x66   : > { %393 = vst [vmem:[%s8998_s27 + $0x1e0] sm:$0xf] %v392_v56  ;;  %395 = vst [vmem:[%s8998_s27 + $0x1e4] sm:$0xf] %v394_v57  ;;  %v396_v58 = vld [vmem:[%s8994_s26 + $0x7a0] sm:$0xf] }
  0x67   : > { %v398_v59 = vld [vmem:[%s8994_s26 + $0x7b0] sm:$0xf]  ;;  %v400_v60 = vld [vmem:[%s8994_s26 + $0x7c0] sm:$0xf]  ;;  %397 = vst [vmem:[%s8998_s27 + $0x1e8] sm:$0xf] %v396_v58 }
  0x68   : > { %399 = vst [vmem:[%s8998_s27 + $0x1ec] sm:$0xf] %v398_v59  ;;  %401 = vst [vmem:[%s8998_s27 + $0x1f0] sm:$0xf] %v400_v60  ;;  %v402_v61 = vld [vmem:[%s8994_s26 + $0x7d0] sm:$0xf] }
  0x69   : > { %v404_v62 = vld [vmem:[%s8994_s26 + $0x7e0] sm:$0xf]  ;;  %v406_v63 = vld [vmem:[%s8994_s26 + $0x7f0] sm:$0xf]  ;;  %403 = vst [vmem:[%s8998_s27 + $0x1f4] sm:$0xf] %v402_v61 }
  0x6a   : > { %405 = vst [vmem:[%s8998_s27 + $0x1f8] sm:$0xf] %v404_v62  ;;  %407 = vst [vmem:[%s8998_s27 + $0x1fc] sm:$0xf] %v406_v63  ;;  %v408_v0 = vld [vmem:[%s8994_s26 + $0x800] sm:$0xf] }
  0x6b   : > { %v410_v1 = vld [vmem:[%s8994_s26 + $0x810] sm:$0xf]  ;;  %v412_v2 = vld [vmem:[%s8994_s26 + $0x820] sm:$0xf]  ;;  %409 = vst [vmem:[%s8998_s27 + $0x200] sm:$0xf] %v408_v0 }
  0x6c   : > { %411 = vst [vmem:[%s8998_s27 + $0x204] sm:$0xf] %v410_v1  ;;  %413 = vst [vmem:[%s8998_s27 + $0x208] sm:$0xf] %v412_v2  ;;  %v414_v3 = vld [vmem:[%s8994_s26 + $0x830] sm:$0xf] }
  0x6d   : > { %v416_v4 = vld [vmem:[%s8994_s26 + $0x840] sm:$0xf]  ;;  %v418_v5 = vld [vmem:[%s8994_s26 + $0x850] sm:$0xf]  ;;  %415 = vst [vmem:[%s8998_s27 + $0x20c] sm:$0xf] %v414_v3 }
  0x6e   : > { %417 = vst [vmem:[%s8998_s27 + $0x210] sm:$0xf] %v416_v4  ;;  %419 = vst [vmem:[%s8998_s27 + $0x214] sm:$0xf] %v418_v5  ;;  %v420_v6 = vld [vmem:[%s8994_s26 + $0x860] sm:$0xf] }
  0x6f   : > { %v422_v7 = vld [vmem:[%s8994_s26 + $0x870] sm:$0xf]  ;;  %v424_v8 = vld [vmem:[%s8994_s26 + $0x880] sm:$0xf]  ;;  %421 = vst [vmem:[%s8998_s27 + $0x218] sm:$0xf] %v420_v6 }
  0x70   : > { %423 = vst [vmem:[%s8998_s27 + $0x21c] sm:$0xf] %v422_v7  ;;  %425 = vst [vmem:[%s8998_s27 + $0x220] sm:$0xf] %v424_v8  ;;  %v426_v9 = vld [vmem:[%s8994_s26 + $0x890] sm:$0xf] }
  0x71   : > { %v428_v10 = vld [vmem:[%s8994_s26 + $0x8a0] sm:$0xf]  ;;  %v430_v11 = vld [vmem:[%s8994_s26 + $0x8b0] sm:$0xf]  ;;  %427 = vst [vmem:[%s8998_s27 + $0x224] sm:$0xf] %v426_v9 }
  0x72   : > { %429 = vst [vmem:[%s8998_s27 + $0x228] sm:$0xf] %v428_v10  ;;  %431 = vst [vmem:[%s8998_s27 + $0x22c] sm:$0xf] %v430_v11  ;;  %v432_v12 = vld [vmem:[%s8994_s26 + $0x8c0] sm:$0xf] }
  0x73   : > { %v434_v13 = vld [vmem:[%s8994_s26 + $0x8d0] sm:$0xf]  ;;  %v436_v14 = vld [vmem:[%s8994_s26 + $0x8e0] sm:$0xf]  ;;  %433 = vst [vmem:[%s8998_s27 + $0x230] sm:$0xf] %v432_v12 }
  0x74   : > { %435 = vst [vmem:[%s8998_s27 + $0x234] sm:$0xf] %v434_v13  ;;  %437 = vst [vmem:[%s8998_s27 + $0x238] sm:$0xf] %v436_v14  ;;  %v438_v15 = vld [vmem:[%s8994_s26 + $0x8f0] sm:$0xf] }
  0x75   : > { %v440_v16 = vld [vmem:[%s8994_s26 + $0x900] sm:$0xf]  ;;  %v442_v17 = vld [vmem:[%s8994_s26 + $0x910] sm:$0xf]  ;;  %439 = vst [vmem:[%s8998_s27 + $0x23c] sm:$0xf] %v438_v15 }
  0x76   : > { %441 = vst [vmem:[%s8998_s27 + $0x240] sm:$0xf] %v440_v16  ;;  %443 = vst [vmem:[%s8998_s27 + $0x244] sm:$0xf] %v442_v17  ;;  %v444_v18 = vld [vmem:[%s8994_s26 + $0x920] sm:$0xf] }
  0x77   : > { %v446_v19 = vld [vmem:[%s8994_s26 + $0x930] sm:$0xf]  ;;  %v448_v20 = vld [vmem:[%s8994_s26 + $0x940] sm:$0xf]  ;;  %445 = vst [vmem:[%s8998_s27 + $0x248] sm:$0xf] %v444_v18 }
  0x78   : > { %447 = vst [vmem:[%s8998_s27 + $0x24c] sm:$0xf] %v446_v19  ;;  %449 = vst [vmem:[%s8998_s27 + $0x250] sm:$0xf] %v448_v20  ;;  %v450_v21 = vld [vmem:[%s8994_s26 + $0x950] sm:$0xf] }
  0x79   : > { %v452_v22 = vld [vmem:[%s8994_s26 + $0x960] sm:$0xf]  ;;  %v454_v23 = vld [vmem:[%s8994_s26 + $0x970] sm:$0xf]  ;;  %451 = vst [vmem:[%s8998_s27 + $0x254] sm:$0xf] %v450_v21 }
  0x7a   : > { %453 = vst [vmem:[%s8998_s27 + $0x258] sm:$0xf] %v452_v22  ;;  %455 = vst [vmem:[%s8998_s27 + $0x25c] sm:$0xf] %v454_v23  ;;  %v456_v24 = vld [vmem:[%s8994_s26 + $0x980] sm:$0xf] }
  0x7b   : > { %v458_v25 = vld [vmem:[%s8994_s26 + $0x990] sm:$0xf]  ;;  %v460_v26 = vld [vmem:[%s8994_s26 + $0x9a0] sm:$0xf]  ;;  %457 = vst [vmem:[%s8998_s27 + $0x260] sm:$0xf] %v456_v24 }
  0x7c   : > { %459 = vst [vmem:[%s8998_s27 + $0x264] sm:$0xf] %v458_v25  ;;  %461 = vst [vmem:[%s8998_s27 + $0x268] sm:$0xf] %v460_v26  ;;  %v462_v27 = vld [vmem:[%s8994_s26 + $0x9b0] sm:$0xf] }
  0x7d   : > { %v464_v28 = vld [vmem:[%s8994_s26 + $0x9c0] sm:$0xf]  ;;  %v466_v29 = vld [vmem:[%s8994_s26 + $0x9d0] sm:$0xf]  ;;  %463 = vst [vmem:[%s8998_s27 + $0x26c] sm:$0xf] %v462_v27 }
  0x7e   : > { %465 = vst [vmem:[%s8998_s27 + $0x270] sm:$0xf] %v464_v28  ;;  %467 = vst [vmem:[%s8998_s27 + $0x274] sm:$0xf] %v466_v29  ;;  %v468_v30 = vld [vmem:[%s8994_s26 + $0x9e0] sm:$0xf] }
  0x7f   : > { %v470_v31 = vld [vmem:[%s8994_s26 + $0x9f0] sm:$0xf]  ;;  %v472_v32 = vld [vmem:[%s8994_s26 + $0xa00] sm:$0xf]  ;;  %469 = vst [vmem:[%s8998_s27 + $0x278] sm:$0xf] %v468_v30 }
  0x80   : > { %471 = vst [vmem:[%s8998_s27 + $0x27c] sm:$0xf] %v470_v31  ;;  %473 = vst [vmem:[%s8998_s27 + $0x280] sm:$0xf] %v472_v32  ;;  %v474_v33 = vld [vmem:[%s8994_s26 + $0xa10] sm:$0xf] }
  0x81   : > { %v476_v34 = vld [vmem:[%s8994_s26 + $0xa20] sm:$0xf]  ;;  %v478_v35 = vld [vmem:[%s8994_s26 + $0xa30] sm:$0xf]  ;;  %475 = vst [vmem:[%s8998_s27 + $0x284] sm:$0xf] %v474_v33 }
  0x82   : > { %477 = vst [vmem:[%s8998_s27 + $0x288] sm:$0xf] %v476_v34  ;;  %479 = vst [vmem:[%s8998_s27 + $0x28c] sm:$0xf] %v478_v35  ;;  %v480_v36 = vld [vmem:[%s8994_s26 + $0xa40] sm:$0xf] }
  0x83   : > { %v482_v37 = vld [vmem:[%s8994_s26 + $0xa50] sm:$0xf]  ;;  %v484_v38 = vld [vmem:[%s8994_s26 + $0xa60] sm:$0xf]  ;;  %481 = vst [vmem:[%s8998_s27 + $0x290] sm:$0xf] %v480_v36 }
  0x84   : > { %483 = vst [vmem:[%s8998_s27 + $0x294] sm:$0xf] %v482_v37  ;;  %485 = vst [vmem:[%s8998_s27 + $0x298] sm:$0xf] %v484_v38  ;;  %v486_v39 = vld [vmem:[%s8994_s26 + $0xa70] sm:$0xf] }
  0x85   : > { %v488_v40 = vld [vmem:[%s8994_s26 + $0xa80] sm:$0xf]  ;;  %v490_v41 = vld [vmem:[%s8994_s26 + $0xa90] sm:$0xf]  ;;  %487 = vst [vmem:[%s8998_s27 + $0x29c] sm:$0xf] %v486_v39 }
  0x86   : > { %489 = vst [vmem:[%s8998_s27 + $0x2a0] sm:$0xf] %v488_v40  ;;  %491 = vst [vmem:[%s8998_s27 + $0x2a4] sm:$0xf] %v490_v41  ;;  %v492_v42 = vld [vmem:[%s8994_s26 + $0xaa0] sm:$0xf] }
  0x87   : > { %v494_v43 = vld [vmem:[%s8994_s26 + $0xab0] sm:$0xf]  ;;  %v496_v44 = vld [vmem:[%s8994_s26 + $0xac0] sm:$0xf]  ;;  %493 = vst [vmem:[%s8998_s27 + $0x2a8] sm:$0xf] %v492_v42 }
  0x88   : > { %495 = vst [vmem:[%s8998_s27 + $0x2ac] sm:$0xf] %v494_v43  ;;  %497 = vst [vmem:[%s8998_s27 + $0x2b0] sm:$0xf] %v496_v44  ;;  %v498_v45 = vld [vmem:[%s8994_s26 + $0xad0] sm:$0xf] }
  0x89   : > { %v500_v46 = vld [vmem:[%s8994_s26 + $0xae0] sm:$0xf]  ;;  %v502_v47 = vld [vmem:[%s8994_s26 + $0xaf0] sm:$0xf]  ;;  %499 = vst [vmem:[%s8998_s27 + $0x2b4] sm:$0xf] %v498_v45 }
  0x8a   : > { %501 = vst [vmem:[%s8998_s27 + $0x2b8] sm:$0xf] %v500_v46  ;;  %503 = vst [vmem:[%s8998_s27 + $0x2bc] sm:$0xf] %v502_v47  ;;  %v504_v48 = vld [vmem:[%s8994_s26 + $0xb00] sm:$0xf] }
  0x8b   : > { %v506_v49 = vld [vmem:[%s8994_s26 + $0xb10] sm:$0xf]  ;;  %v508_v50 = vld [vmem:[%s8994_s26 + $0xb20] sm:$0xf]  ;;  %505 = vst [vmem:[%s8998_s27 + $0x2c0] sm:$0xf] %v504_v48 }
  0x8c   : > { %507 = vst [vmem:[%s8998_s27 + $0x2c4] sm:$0xf] %v506_v49  ;;  %509 = vst [vmem:[%s8998_s27 + $0x2c8] sm:$0xf] %v508_v50  ;;  %v510_v51 = vld [vmem:[%s8994_s26 + $0xb30] sm:$0xf] }
  0x8d   : > { %v512_v52 = vld [vmem:[%s8994_s26 + $0xb40] sm:$0xf]  ;;  %v514_v53 = vld [vmem:[%s8994_s26 + $0xb50] sm:$0xf]  ;;  %511 = vst [vmem:[%s8998_s27 + $0x2cc] sm:$0xf] %v510_v51 }
  0x8e   : > { %513 = vst [vmem:[%s8998_s27 + $0x2d0] sm:$0xf] %v512_v52  ;;  %515 = vst [vmem:[%s8998_s27 + $0x2d4] sm:$0xf] %v514_v53  ;;  %v516_v54 = vld [vmem:[%s8994_s26 + $0xb60] sm:$0xf] }
  0x8f   : > { %v518_v55 = vld [vmem:[%s8994_s26 + $0xb70] sm:$0xf]  ;;  %v520_v56 = vld [vmem:[%s8994_s26 + $0xb80] sm:$0xf]  ;;  %517 = vst [vmem:[%s8998_s27 + $0x2d8] sm:$0xf] %v516_v54 }
  0x90   : > { %519 = vst [vmem:[%s8998_s27 + $0x2dc] sm:$0xf] %v518_v55  ;;  %521 = vst [vmem:[%s8998_s27 + $0x2e0] sm:$0xf] %v520_v56  ;;  %v522_v57 = vld [vmem:[%s8994_s26 + $0xb90] sm:$0xf] }
  0x91   : > { %v524_v58 = vld [vmem:[%s8994_s26 + $0xba0] sm:$0xf]  ;;  %v526_v59 = vld [vmem:[%s8994_s26 + $0xbb0] sm:$0xf]  ;;  %523 = vst [vmem:[%s8998_s27 + $0x2e4] sm:$0xf] %v522_v57 }
  0x92   : > { %525 = vst [vmem:[%s8998_s27 + $0x2e8] sm:$0xf] %v524_v58  ;;  %527 = vst [vmem:[%s8998_s27 + $0x2ec] sm:$0xf] %v526_v59  ;;  %v528_v60 = vld [vmem:[%s8994_s26 + $0xbc0] sm:$0xf] }
  0x93   : > { %v530_v61 = vld [vmem:[%s8994_s26 + $0xbd0] sm:$0xf]  ;;  %v532_v62 = vld [vmem:[%s8994_s26 + $0xbe0] sm:$0xf]  ;;  %529 = vst [vmem:[%s8998_s27 + $0x2f0] sm:$0xf] %v528_v60 }
  0x94   : > { %531 = vst [vmem:[%s8998_s27 + $0x2f4] sm:$0xf] %v530_v61  ;;  %533 = vst [vmem:[%s8998_s27 + $0x2f8] sm:$0xf] %v532_v62  ;;  %v534_v63 = vld [vmem:[%s8994_s26 + $0xbf0] sm:$0xf] }
  0x95   : > { %v536_v0 = vld [vmem:[%s8994_s26 + $0xc00] sm:$0xf]  ;;  %v538_v1 = vld [vmem:[%s8994_s26 + $0xc10] sm:$0xf]  ;;  %535 = vst [vmem:[%s8998_s27 + $0x2fc] sm:$0xf] %v534_v63 }
  0x96   : > { %537 = vst [vmem:[%s8998_s27 + $0x300] sm:$0xf] %v536_v0  ;;  %539 = vst [vmem:[%s8998_s27 + $0x304] sm:$0xf] %v538_v1  ;;  %v540_v2 = vld [vmem:[%s8994_s26 + $0xc20] sm:$0xf] }
  0x97   : > { %v542_v3 = vld [vmem:[%s8994_s26 + $0xc30] sm:$0xf]  ;;  %v544_v4 = vld [vmem:[%s8994_s26 + $0xc40] sm:$0xf]  ;;  %541 = vst [vmem:[%s8998_s27 + $0x308] sm:$0xf] %v540_v2 }
  0x98   : > { %543 = vst [vmem:[%s8998_s27 + $0x30c] sm:$0xf] %v542_v3  ;;  %545 = vst [vmem:[%s8998_s27 + $0x310] sm:$0xf] %v544_v4  ;;  %v546_v5 = vld [vmem:[%s8994_s26 + $0xc50] sm:$0xf] }
  0x99   : > { %v548_v6 = vld [vmem:[%s8994_s26 + $0xc60] sm:$0xf]  ;;  %v550_v7 = vld [vmem:[%s8994_s26 + $0xc70] sm:$0xf]  ;;  %547 = vst [vmem:[%s8998_s27 + $0x314] sm:$0xf] %v546_v5 }
  0x9a   : > { %549 = vst [vmem:[%s8998_s27 + $0x318] sm:$0xf] %v548_v6  ;;  %551 = vst [vmem:[%s8998_s27 + $0x31c] sm:$0xf] %v550_v7  ;;  %v552_v8 = vld [vmem:[%s8994_s26 + $0xc80] sm:$0xf] }
  0x9b   : > { %v554_v9 = vld [vmem:[%s8994_s26 + $0xc90] sm:$0xf]  ;;  %v556_v10 = vld [vmem:[%s8994_s26 + $0xca0] sm:$0xf]  ;;  %553 = vst [vmem:[%s8998_s27 + $0x320] sm:$0xf] %v552_v8 }
  0x9c   : > { %555 = vst [vmem:[%s8998_s27 + $0x324] sm:$0xf] %v554_v9  ;;  %557 = vst [vmem:[%s8998_s27 + $0x328] sm:$0xf] %v556_v10  ;;  %v558_v11 = vld [vmem:[%s8994_s26 + $0xcb0] sm:$0xf] }
  0x9d   : > { %v560_v12 = vld [vmem:[%s8994_s26 + $0xcc0] sm:$0xf]  ;;  %v562_v13 = vld [vmem:[%s8994_s26 + $0xcd0] sm:$0xf]  ;;  %559 = vst [vmem:[%s8998_s27 + $0x32c] sm:$0xf] %v558_v11 }
  0x9e   : > { %561 = vst [vmem:[%s8998_s27 + $0x330] sm:$0xf] %v560_v12  ;;  %563 = vst [vmem:[%s8998_s27 + $0x334] sm:$0xf] %v562_v13  ;;  %v564_v14 = vld [vmem:[%s8994_s26 + $0xce0] sm:$0xf] }
  0x9f   : > { %v566_v15 = vld [vmem:[%s8994_s26 + $0xcf0] sm:$0xf]  ;;  %v568_v16 = vld [vmem:[%s8994_s26 + $0xd00] sm:$0xf]  ;;  %565 = vst [vmem:[%s8998_s27 + $0x338] sm:$0xf] %v564_v14 }
  0xa0   : > { %567 = vst [vmem:[%s8998_s27 + $0x33c] sm:$0xf] %v566_v15  ;;  %569 = vst [vmem:[%s8998_s27 + $0x340] sm:$0xf] %v568_v16  ;;  %v570_v17 = vld [vmem:[%s8994_s26 + $0xd10] sm:$0xf] }
  0xa1   : > { %v572_v18 = vld [vmem:[%s8994_s26 + $0xd20] sm:$0xf]  ;;  %v574_v19 = vld [vmem:[%s8994_s26 + $0xd30] sm:$0xf]  ;;  %571 = vst [vmem:[%s8998_s27 + $0x344] sm:$0xf] %v570_v17 }
  0xa2   : > { %573 = vst [vmem:[%s8998_s27 + $0x348] sm:$0xf] %v572_v18  ;;  %575 = vst [vmem:[%s8998_s27 + $0x34c] sm:$0xf] %v574_v19  ;;  %v576_v20 = vld [vmem:[%s8994_s26 + $0xd40] sm:$0xf] }
  0xa3   : > { %v578_v21 = vld [vmem:[%s8994_s26 + $0xd50] sm:$0xf]  ;;  %v580_v22 = vld [vmem:[%s8994_s26 + $0xd60] sm:$0xf]  ;;  %577 = vst [vmem:[%s8998_s27 + $0x350] sm:$0xf] %v576_v20 }
  0xa4   : > { %579 = vst [vmem:[%s8998_s27 + $0x354] sm:$0xf] %v578_v21  ;;  %581 = vst [vmem:[%s8998_s27 + $0x358] sm:$0xf] %v580_v22  ;;  %v582_v23 = vld [vmem:[%s8994_s26 + $0xd70] sm:$0xf] }
  0xa5   : > { %v584_v24 = vld [vmem:[%s8994_s26 + $0xd80] sm:$0xf]  ;;  %v586_v25 = vld [vmem:[%s8994_s26 + $0xd90] sm:$0xf]  ;;  %583 = vst [vmem:[%s8998_s27 + $0x35c] sm:$0xf] %v582_v23 }
  0xa6   : > { %585 = vst [vmem:[%s8998_s27 + $0x360] sm:$0xf] %v584_v24  ;;  %587 = vst [vmem:[%s8998_s27 + $0x364] sm:$0xf] %v586_v25  ;;  %v588_v26 = vld [vmem:[%s8994_s26 + $0xda0] sm:$0xf] }
  0xa7   : > { %v590_v27 = vld [vmem:[%s8994_s26 + $0xdb0] sm:$0xf]  ;;  %v592_v28 = vld [vmem:[%s8994_s26 + $0xdc0] sm:$0xf]  ;;  %589 = vst [vmem:[%s8998_s27 + $0x368] sm:$0xf] %v588_v26 }
  0xa8   : > { %591 = vst [vmem:[%s8998_s27 + $0x36c] sm:$0xf] %v590_v27  ;;  %593 = vst [vmem:[%s8998_s27 + $0x370] sm:$0xf] %v592_v28  ;;  %v594_v29 = vld [vmem:[%s8994_s26 + $0xdd0] sm:$0xf] }
  0xa9   : > { %v596_v30 = vld [vmem:[%s8994_s26 + $0xde0] sm:$0xf]  ;;  %v598_v31 = vld [vmem:[%s8994_s26 + $0xdf0] sm:$0xf]  ;;  %595 = vst [vmem:[%s8998_s27 + $0x374] sm:$0xf] %v594_v29 }
  0xaa   : > { %597 = vst [vmem:[%s8998_s27 + $0x378] sm:$0xf] %v596_v30  ;;  %599 = vst [vmem:[%s8998_s27 + $0x37c] sm:$0xf] %v598_v31  ;;  %v600_v32 = vld [vmem:[%s8994_s26 + $0xe00] sm:$0xf] }
  0xab   : > { %v602_v33 = vld [vmem:[%s8994_s26 + $0xe10] sm:$0xf]  ;;  %v604_v34 = vld [vmem:[%s8994_s26 + $0xe20] sm:$0xf]  ;;  %601 = vst [vmem:[%s8998_s27 + $0x380] sm:$0xf] %v600_v32 }
  0xac   : > { %603 = vst [vmem:[%s8998_s27 + $0x384] sm:$0xf] %v602_v33  ;;  %605 = vst [vmem:[%s8998_s27 + $0x388] sm:$0xf] %v604_v34  ;;  %v606_v35 = vld [vmem:[%s8994_s26 + $0xe30] sm:$0xf] }
  0xad   : > { %v608_v36 = vld [vmem:[%s8994_s26 + $0xe40] sm:$0xf]  ;;  %v610_v37 = vld [vmem:[%s8994_s26 + $0xe50] sm:$0xf]  ;;  %607 = vst [vmem:[%s8998_s27 + $0x38c] sm:$0xf] %v606_v35 }
  0xae   : > { %609 = vst [vmem:[%s8998_s27 + $0x390] sm:$0xf] %v608_v36  ;;  %611 = vst [vmem:[%s8998_s27 + $0x394] sm:$0xf] %v610_v37  ;;  %v612_v38 = vld [vmem:[%s8994_s26 + $0xe60] sm:$0xf] }
  0xaf   : > { %v614_v39 = vld [vmem:[%s8994_s26 + $0xe70] sm:$0xf]  ;;  %v616_v40 = vld [vmem:[%s8994_s26 + $0xe80] sm:$0xf]  ;;  %613 = vst [vmem:[%s8998_s27 + $0x398] sm:$0xf] %v612_v38 }
  0xb0   : > { %615 = vst [vmem:[%s8998_s27 + $0x39c] sm:$0xf] %v614_v39  ;;  %617 = vst [vmem:[%s8998_s27 + $0x3a0] sm:$0xf] %v616_v40  ;;  %v618_v41 = vld [vmem:[%s8994_s26 + $0xe90] sm:$0xf] }
  0xb1   : > { %v620_v42 = vld [vmem:[%s8994_s26 + $0xea0] sm:$0xf]  ;;  %v622_v43 = vld [vmem:[%s8994_s26 + $0xeb0] sm:$0xf]  ;;  %619 = vst [vmem:[%s8998_s27 + $0x3a4] sm:$0xf] %v618_v41 }
  0xb2   : > { %621 = vst [vmem:[%s8998_s27 + $0x3a8] sm:$0xf] %v620_v42  ;;  %623 = vst [vmem:[%s8998_s27 + $0x3ac] sm:$0xf] %v622_v43  ;;  %v624_v44 = vld [vmem:[%s8994_s26 + $0xec0] sm:$0xf] }
  0xb3   : > { %v626_v45 = vld [vmem:[%s8994_s26 + $0xed0] sm:$0xf]  ;;  %v628_v46 = vld [vmem:[%s8994_s26 + $0xee0] sm:$0xf]  ;;  %625 = vst [vmem:[%s8998_s27 + $0x3b0] sm:$0xf] %v624_v44 }
  0xb4   : > { %627 = vst [vmem:[%s8998_s27 + $0x3b4] sm:$0xf] %v626_v45  ;;  %629 = vst [vmem:[%s8998_s27 + $0x3b8] sm:$0xf] %v628_v46  ;;  %v630_v47 = vld [vmem:[%s8994_s26 + $0xef0] sm:$0xf] }
  0xb5   : > { %v632_v48 = vld [vmem:[%s8994_s26 + $0xf00] sm:$0xf]  ;;  %v634_v49 = vld [vmem:[%s8994_s26 + $0xf10] sm:$0xf]  ;;  %631 = vst [vmem:[%s8998_s27 + $0x3bc] sm:$0xf] %v630_v47 }
  0xb6   : > { %633 = vst [vmem:[%s8998_s27 + $0x3c0] sm:$0xf] %v632_v48  ;;  %635 = vst [vmem:[%s8998_s27 + $0x3c4] sm:$0xf] %v634_v49  ;;  %v636_v50 = vld [vmem:[%s8994_s26 + $0xf20] sm:$0xf] }
  0xb7   : > { %v638_v51 = vld [vmem:[%s8994_s26 + $0xf30] sm:$0xf]  ;;  %v640_v52 = vld [vmem:[%s8994_s26 + $0xf40] sm:$0xf]  ;;  %637 = vst [vmem:[%s8998_s27 + $0x3c8] sm:$0xf] %v636_v50 }
  0xb8   : > { %639 = vst [vmem:[%s8998_s27 + $0x3cc] sm:$0xf] %v638_v51  ;;  %641 = vst [vmem:[%s8998_s27 + $0x3d0] sm:$0xf] %v640_v52  ;;  %v642_v53 = vld [vmem:[%s8994_s26 + $0xf50] sm:$0xf] }
  0xb9   : > { %v644_v54 = vld [vmem:[%s8994_s26 + $0xf60] sm:$0xf]  ;;  %v646_v55 = vld [vmem:[%s8994_s26 + $0xf70] sm:$0xf]  ;;  %643 = vst [vmem:[%s8998_s27 + $0x3d4] sm:$0xf] %v642_v53 }
  0xba   : > { %645 = vst [vmem:[%s8998_s27 + $0x3d8] sm:$0xf] %v644_v54  ;;  %647 = vst [vmem:[%s8998_s27 + $0x3dc] sm:$0xf] %v646_v55  ;;  %v648_v56 = vld [vmem:[%s8994_s26 + $0xf80] sm:$0xf] }
  0xbb   : > { %v650_v57 = vld [vmem:[%s8994_s26 + $0xf90] sm:$0xf]  ;;  %v652_v58 = vld [vmem:[%s8994_s26 + $0xfa0] sm:$0xf]  ;;  %649 = vst [vmem:[%s8998_s27 + $0x3e0] sm:$0xf] %v648_v56 }
  0xbc   : > { %651 = vst [vmem:[%s8998_s27 + $0x3e4] sm:$0xf] %v650_v57  ;;  %653 = vst [vmem:[%s8998_s27 + $0x3e8] sm:$0xf] %v652_v58  ;;  %v654_v59 = vld [vmem:[%s8994_s26 + $0xfb0] sm:$0xf] }
  0xbd   : > { %v656_v60 = vld [vmem:[%s8994_s26 + $0xfc0] sm:$0xf]  ;;  %v658_v61 = vld [vmem:[%s8994_s26 + $0xfd0] sm:$0xf]  ;;  %655 = vst [vmem:[%s8998_s27 + $0x3ec] sm:$0xf] %v654_v59 }
  0xbe   : > { %657 = vst [vmem:[%s8998_s27 + $0x3f0] sm:$0xf] %v656_v60  ;;  %659 = vst [vmem:[%s8998_s27 + $0x3f4] sm:$0xf] %v658_v61  ;;  %v660_v62 = vld [vmem:[%s8994_s26 + $0xfe0] sm:$0xf] }
  0xbf   : > { %v662_v63 = vld [vmem:[%s8994_s26 + $0xff0] sm:$0xf]  ;;  %v664_v0 = vld [vmem:[%s8994_s26 + $0x1000] sm:$0xf]  ;;  %661 = vst [vmem:[%s8998_s27 + $0x3f8] sm:$0xf] %v660_v62 }
  0xc0   : > { %663 = vst [vmem:[%s8998_s27 + $0x3fc] sm:$0xf] %v662_v63  ;;  %665 = vst [vmem:[%s8998_s27 + $0x400] sm:$0xf] %v664_v0  ;;  %v666_v1 = vld [vmem:[%s8994_s26 + $0x1010] sm:$0xf] }
  0xc1   : > { %v668_v2 = vld [vmem:[%s8994_s26 + $0x1020] sm:$0xf]  ;;  %v670_v3 = vld [vmem:[%s8994_s26 + $0x1030] sm:$0xf]  ;;  %667 = vst [vmem:[%s8998_s27 + $0x404] sm:$0xf] %v666_v1 }
  0xc2   : > { %669 = vst [vmem:[%s8998_s27 + $0x408] sm:$0xf] %v668_v2  ;;  %671 = vst [vmem:[%s8998_s27 + $0x40c] sm:$0xf] %v670_v3  ;;  %v672_v4 = vld [vmem:[%s8994_s26 + $0x1040] sm:$0xf] }
  0xc3   : > { %v674_v5 = vld [vmem:[%s8994_s26 + $0x1050] sm:$0xf]  ;;  %v676_v6 = vld [vmem:[%s8994_s26 + $0x1060] sm:$0xf]  ;;  %673 = vst [vmem:[%s8998_s27 + $0x410] sm:$0xf] %v672_v4 }
  0xc4   : > { %675 = vst [vmem:[%s8998_s27 + $0x414] sm:$0xf] %v674_v5  ;;  %677 = vst [vmem:[%s8998_s27 + $0x418] sm:$0xf] %v676_v6  ;;  %v678_v7 = vld [vmem:[%s8994_s26 + $0x1070] sm:$0xf] }
  0xc5   : > { %v680_v8 = vld [vmem:[%s8994_s26 + $0x1080] sm:$0xf]  ;;  %v682_v9 = vld [vmem:[%s8994_s26 + $0x1090] sm:$0xf]  ;;  %679 = vst [vmem:[%s8998_s27 + $0x41c] sm:$0xf] %v678_v7 }
  0xc6   : > { %681 = vst [vmem:[%s8998_s27 + $0x420] sm:$0xf] %v680_v8  ;;  %683 = vst [vmem:[%s8998_s27 + $0x424] sm:$0xf] %v682_v9  ;;  %v684_v10 = vld [vmem:[%s8994_s26 + $0x10a0] sm:$0xf] }
  0xc7   : > { %v686_v11 = vld [vmem:[%s8994_s26 + $0x10b0] sm:$0xf]  ;;  %v688_v12 = vld [vmem:[%s8994_s26 + $0x10c0] sm:$0xf]  ;;  %685 = vst [vmem:[%s8998_s27 + $0x428] sm:$0xf] %v684_v10 }
  0xc8   : > { %687 = vst [vmem:[%s8998_s27 + $0x42c] sm:$0xf] %v686_v11  ;;  %689 = vst [vmem:[%s8998_s27 + $0x430] sm:$0xf] %v688_v12  ;;  %v690_v13 = vld [vmem:[%s8994_s26 + $0x10d0] sm:$0xf] }
  0xc9   : > { %v692_v14 = vld [vmem:[%s8994_s26 + $0x10e0] sm:$0xf]  ;;  %v694_v15 = vld [vmem:[%s8994_s26 + $0x10f0] sm:$0xf]  ;;  %691 = vst [vmem:[%s8998_s27 + $0x434] sm:$0xf] %v690_v13 }
  0xca   : > { %693 = vst [vmem:[%s8998_s27 + $0x438] sm:$0xf] %v692_v14  ;;  %695 = vst [vmem:[%s8998_s27 + $0x43c] sm:$0xf] %v694_v15  ;;  %v696_v16 = vld [vmem:[%s8994_s26 + $0x1100] sm:$0xf] }
  0xcb   : > { %v698_v17 = vld [vmem:[%s8994_s26 + $0x1110] sm:$0xf]  ;;  %v700_v18 = vld [vmem:[%s8994_s26 + $0x1120] sm:$0xf]  ;;  %697 = vst [vmem:[%s8998_s27 + $0x440] sm:$0xf] %v696_v16 }
  0xcc   : > { %699 = vst [vmem:[%s8998_s27 + $0x444] sm:$0xf] %v698_v17  ;;  %701 = vst [vmem:[%s8998_s27 + $0x448] sm:$0xf] %v700_v18  ;;  %v702_v19 = vld [vmem:[%s8994_s26 + $0x1130] sm:$0xf] }
  0xcd   : > { %v704_v20 = vld [vmem:[%s8994_s26 + $0x1140] sm:$0xf]  ;;  %v706_v21 = vld [vmem:[%s8994_s26 + $0x1150] sm:$0xf]  ;;  %703 = vst [vmem:[%s8998_s27 + $0x44c] sm:$0xf] %v702_v19 }
  0xce   : > { %705 = vst [vmem:[%s8998_s27 + $0x450] sm:$0xf] %v704_v20  ;;  %707 = vst [vmem:[%s8998_s27 + $0x454] sm:$0xf] %v706_v21  ;;  %v708_v22 = vld [vmem:[%s8994_s26 + $0x1160] sm:$0xf] }
  0xcf   : > { %v710_v23 = vld [vmem:[%s8994_s26 + $0x1170] sm:$0xf]  ;;  %v712_v24 = vld [vmem:[%s8994_s26 + $0x1180] sm:$0xf]  ;;  %709 = vst [vmem:[%s8998_s27 + $0x458] sm:$0xf] %v708_v22 }
  0xd0   : > { %711 = vst [vmem:[%s8998_s27 + $0x45c] sm:$0xf] %v710_v23  ;;  %713 = vst [vmem:[%s8998_s27 + $0x460] sm:$0xf] %v712_v24  ;;  %v714_v25 = vld [vmem:[%s8994_s26 + $0x1190] sm:$0xf] }
  0xd1   : > { %v716_v26 = vld [vmem:[%s8994_s26 + $0x11a0] sm:$0xf]  ;;  %v718_v27 = vld [vmem:[%s8994_s26 + $0x11b0] sm:$0xf]  ;;  %715 = vst [vmem:[%s8998_s27 + $0x464] sm:$0xf] %v714_v25 }
  0xd2   : > { %717 = vst [vmem:[%s8998_s27 + $0x468] sm:$0xf] %v716_v26  ;;  %719 = vst [vmem:[%s8998_s27 + $0x46c] sm:$0xf] %v718_v27  ;;  %v720_v28 = vld [vmem:[%s8994_s26 + $0x11c0] sm:$0xf] }
  0xd3   : > { %v722_v29 = vld [vmem:[%s8994_s26 + $0x11d0] sm:$0xf]  ;;  %v724_v30 = vld [vmem:[%s8994_s26 + $0x11e0] sm:$0xf]  ;;  %721 = vst [vmem:[%s8998_s27 + $0x470] sm:$0xf] %v720_v28 }
  0xd4   : > { %723 = vst [vmem:[%s8998_s27 + $0x474] sm:$0xf] %v722_v29  ;;  %725 = vst [vmem:[%s8998_s27 + $0x478] sm:$0xf] %v724_v30  ;;  %v726_v31 = vld [vmem:[%s8994_s26 + $0x11f0] sm:$0xf] }
  0xd5   : > { %v728_v32 = vld [vmem:[%s8994_s26 + $0x1200] sm:$0xf]  ;;  %v730_v33 = vld [vmem:[%s8994_s26 + $0x1210] sm:$0xf]  ;;  %727 = vst [vmem:[%s8998_s27 + $0x47c] sm:$0xf] %v726_v31 }
  0xd6   : > { %729 = vst [vmem:[%s8998_s27 + $0x480] sm:$0xf] %v728_v32  ;;  %731 = vst [vmem:[%s8998_s27 + $0x484] sm:$0xf] %v730_v33  ;;  %v732_v34 = vld [vmem:[%s8994_s26 + $0x1220] sm:$0xf] }
  0xd7   : > { %v734_v35 = vld [vmem:[%s8994_s26 + $0x1230] sm:$0xf]  ;;  %v736_v36 = vld [vmem:[%s8994_s26 + $0x1240] sm:$0xf]  ;;  %733 = vst [vmem:[%s8998_s27 + $0x488] sm:$0xf] %v732_v34 }
  0xd8   : > { %735 = vst [vmem:[%s8998_s27 + $0x48c] sm:$0xf] %v734_v35  ;;  %737 = vst [vmem:[%s8998_s27 + $0x490] sm:$0xf] %v736_v36  ;;  %v738_v37 = vld [vmem:[%s8994_s26 + $0x1250] sm:$0xf] }
  0xd9   : > { %v740_v38 = vld [vmem:[%s8994_s26 + $0x1260] sm:$0xf]  ;;  %v742_v39 = vld [vmem:[%s8994_s26 + $0x1270] sm:$0xf]  ;;  %739 = vst [vmem:[%s8998_s27 + $0x494] sm:$0xf] %v738_v37 }
  0xda   : > { %741 = vst [vmem:[%s8998_s27 + $0x498] sm:$0xf] %v740_v38  ;;  %743 = vst [vmem:[%s8998_s27 + $0x49c] sm:$0xf] %v742_v39  ;;  %v744_v40 = vld [vmem:[%s8994_s26 + $0x1280] sm:$0xf] }
  0xdb   : > { %v746_v41 = vld [vmem:[%s8994_s26 + $0x1290] sm:$0xf]  ;;  %v748_v42 = vld [vmem:[%s8994_s26 + $0x12a0] sm:$0xf]  ;;  %745 = vst [vmem:[%s8998_s27 + $0x4a0] sm:$0xf] %v744_v40 }
  0xdc   : > { %747 = vst [vmem:[%s8998_s27 + $0x4a4] sm:$0xf] %v746_v41  ;;  %749 = vst [vmem:[%s8998_s27 + $0x4a8] sm:$0xf] %v748_v42  ;;  %v750_v43 = vld [vmem:[%s8994_s26 + $0x12b0] sm:$0xf] }
  0xdd   : > { %v752_v44 = vld [vmem:[%s8994_s26 + $0x12c0] sm:$0xf]  ;;  %v754_v45 = vld [vmem:[%s8994_s26 + $0x12d0] sm:$0xf]  ;;  %751 = vst [vmem:[%s8998_s27 + $0x4ac] sm:$0xf] %v750_v43 }
  0xde   : > { %753 = vst [vmem:[%s8998_s27 + $0x4b0] sm:$0xf] %v752_v44  ;;  %755 = vst [vmem:[%s8998_s27 + $0x4b4] sm:$0xf] %v754_v45  ;;  %v756_v46 = vld [vmem:[%s8994_s26 + $0x12e0] sm:$0xf] }
  0xdf   : > { %v758_v47 = vld [vmem:[%s8994_s26 + $0x12f0] sm:$0xf]  ;;  %v760_v48 = vld [vmem:[%s8994_s26 + $0x1300] sm:$0xf]  ;;  %757 = vst [vmem:[%s8998_s27 + $0x4b8] sm:$0xf] %v756_v46 }
  0xe0   : > { %759 = vst [vmem:[%s8998_s27 + $0x4bc] sm:$0xf] %v758_v47  ;;  %761 = vst [vmem:[%s8998_s27 + $0x4c0] sm:$0xf] %v760_v48  ;;  %v762_v49 = vld [vmem:[%s8994_s26 + $0x1310] sm:$0xf] }
  0xe1   : > { %v764_v50 = vld [vmem:[%s8994_s26 + $0x1320] sm:$0xf]  ;;  %v766_v51 = vld [vmem:[%s8994_s26 + $0x1330] sm:$0xf]  ;;  %763 = vst [vmem:[%s8998_s27 + $0x4c4] sm:$0xf] %v762_v49 }
  0xe2   : > { %765 = vst [vmem:[%s8998_s27 + $0x4c8] sm:$0xf] %v764_v50  ;;  %767 = vst [vmem:[%s8998_s27 + $0x4cc] sm:$0xf] %v766_v51  ;;  %v768_v52 = vld [vmem:[%s8994_s26 + $0x1340] sm:$0xf] }
  0xe3   : > { %v770_v53 = vld [vmem:[%s8994_s26 + $0x1350] sm:$0xf]  ;;  %v772_v54 = vld [vmem:[%s8994_s26 + $0x1360] sm:$0xf]  ;;  %769 = vst [vmem:[%s8998_s27 + $0x4d0] sm:$0xf] %v768_v52 }
  0xe4   : > { %771 = vst [vmem:[%s8998_s27 + $0x4d4] sm:$0xf] %v770_v53  ;;  %773 = vst [vmem:[%s8998_s27 + $0x4d8] sm:$0xf] %v772_v54  ;;  %v774_v55 = vld [vmem:[%s8994_s26 + $0x1370] sm:$0xf] }
  0xe5   : > { %v776_v56 = vld [vmem:[%s8994_s26 + $0x1380] sm:$0xf]  ;;  %v778_v57 = vld [vmem:[%s8994_s26 + $0x1390] sm:$0xf]  ;;  %775 = vst [vmem:[%s8998_s27 + $0x4dc] sm:$0xf] %v774_v55 }
  0xe6   : > { %777 = vst [vmem:[%s8998_s27 + $0x4e0] sm:$0xf] %v776_v56  ;;  %779 = vst [vmem:[%s8998_s27 + $0x4e4] sm:$0xf] %v778_v57  ;;  %v780_v58 = vld [vmem:[%s8994_s26 + $0x13a0] sm:$0xf] }
  0xe7   : > { %v782_v59 = vld [vmem:[%s8994_s26 + $0x13b0] sm:$0xf]  ;;  %v784_v60 = vld [vmem:[%s8994_s26 + $0x13c0] sm:$0xf]  ;;  %781 = vst [vmem:[%s8998_s27 + $0x4e8] sm:$0xf] %v780_v58 }
  0xe8   : > { %783 = vst [vmem:[%s8998_s27 + $0x4ec] sm:$0xf] %v782_v59  ;;  %785 = vst [vmem:[%s8998_s27 + $0x4f0] sm:$0xf] %v784_v60  ;;  %v786_v61 = vld [vmem:[%s8994_s26 + $0x13d0] sm:$0xf] }
  0xe9   : > { %v788_v62 = vld [vmem:[%s8994_s26 + $0x13e0] sm:$0xf]  ;;  %v790_v63 = vld [vmem:[%s8994_s26 + $0x13f0] sm:$0xf]  ;;  %787 = vst [vmem:[%s8998_s27 + $0x4f4] sm:$0xf] %v786_v61 }
  0xea   : > { %789 = vst [vmem:[%s8998_s27 + $0x4f8] sm:$0xf] %v788_v62  ;;  %791 = vst [vmem:[%s8998_s27 + $0x4fc] sm:$0xf] %v790_v63  ;;  %v792_v0 = vld [vmem:[%s8994_s26 + $0x1400] sm:$0xf] }
  0xeb   : > { %v794_v1 = vld [vmem:[%s8994_s26 + $0x1410] sm:$0xf]  ;;  %v796_v2 = vld [vmem:[%s8994_s26 + $0x1420] sm:$0xf]  ;;  %793 = vst [vmem:[%s8998_s27 + $0x500] sm:$0xf] %v792_v0 }
  0xec   : > { %795 = vst [vmem:[%s8998_s27 + $0x504] sm:$0xf] %v794_v1  ;;  %797 = vst [vmem:[%s8998_s27 + $0x508] sm:$0xf] %v796_v2  ;;  %v798_v3 = vld [vmem:[%s8994_s26 + $0x1430] sm:$0xf] }
  0xed   : > { %v800_v4 = vld [vmem:[%s8994_s26 + $0x1440] sm:$0xf]  ;;  %v802_v5 = vld [vmem:[%s8994_s26 + $0x1450] sm:$0xf]  ;;  %799 = vst [vmem:[%s8998_s27 + $0x50c] sm:$0xf] %v798_v3 }
  0xee   : > { %801 = vst [vmem:[%s8998_s27 + $0x510] sm:$0xf] %v800_v4  ;;  %803 = vst [vmem:[%s8998_s27 + $0x514] sm:$0xf] %v802_v5  ;;  %v804_v6 = vld [vmem:[%s8994_s26 + $0x1460] sm:$0xf] }
  0xef   : > { %v806_v7 = vld [vmem:[%s8994_s26 + $0x1470] sm:$0xf]  ;;  %v808_v8 = vld [vmem:[%s8994_s26 + $0x1480] sm:$0xf]  ;;  %805 = vst [vmem:[%s8998_s27 + $0x518] sm:$0xf] %v804_v6 }
  0xf0   : > { %807 = vst [vmem:[%s8998_s27 + $0x51c] sm:$0xf] %v806_v7  ;;  %809 = vst [vmem:[%s8998_s27 + $0x520] sm:$0xf] %v808_v8  ;;  %v810_v9 = vld [vmem:[%s8994_s26 + $0x1490] sm:$0xf] }
  0xf1   : > { %v812_v10 = vld [vmem:[%s8994_s26 + $0x14a0] sm:$0xf]  ;;  %v814_v11 = vld [vmem:[%s8994_s26 + $0x14b0] sm:$0xf]  ;;  %811 = vst [vmem:[%s8998_s27 + $0x524] sm:$0xf] %v810_v9 }
  0xf2   : > { %813 = vst [vmem:[%s8998_s27 + $0x528] sm:$0xf] %v812_v10  ;;  %815 = vst [vmem:[%s8998_s27 + $0x52c] sm:$0xf] %v814_v11  ;;  %v816_v12 = vld [vmem:[%s8994_s26 + $0x14c0] sm:$0xf] }
  0xf3   : > { %v818_v13 = vld [vmem:[%s8994_s26 + $0x14d0] sm:$0xf]  ;;  %v820_v14 = vld [vmem:[%s8994_s26 + $0x14e0] sm:$0xf]  ;;  %817 = vst [vmem:[%s8998_s27 + $0x530] sm:$0xf] %v816_v12 }
  0xf4   : > { %819 = vst [vmem:[%s8998_s27 + $0x534] sm:$0xf] %v818_v13  ;;  %821 = vst [vmem:[%s8998_s27 + $0x538] sm:$0xf] %v820_v14  ;;  %v822_v15 = vld [vmem:[%s8994_s26 + $0x14f0] sm:$0xf] }
  0xf5   : > { %v824_v16 = vld [vmem:[%s8994_s26 + $0x1500] sm:$0xf]  ;;  %v826_v17 = vld [vmem:[%s8994_s26 + $0x1510] sm:$0xf]  ;;  %823 = vst [vmem:[%s8998_s27 + $0x53c] sm:$0xf] %v822_v15 }
  0xf6   : > { %825 = vst [vmem:[%s8998_s27 + $0x540] sm:$0xf] %v824_v16  ;;  %827 = vst [vmem:[%s8998_s27 + $0x544] sm:$0xf] %v826_v17  ;;  %v828_v18 = vld [vmem:[%s8994_s26 + $0x1520] sm:$0xf] }
  0xf7   : > { %v830_v19 = vld [vmem:[%s8994_s26 + $0x1530] sm:$0xf]  ;;  %v832_v20 = vld [vmem:[%s8994_s26 + $0x1540] sm:$0xf]  ;;  %829 = vst [vmem:[%s8998_s27 + $0x548] sm:$0xf] %v828_v18 }
  0xf8   : > { %831 = vst [vmem:[%s8998_s27 + $0x54c] sm:$0xf] %v830_v19  ;;  %833 = vst [vmem:[%s8998_s27 + $0x550] sm:$0xf] %v832_v20  ;;  %v834_v21 = vld [vmem:[%s8994_s26 + $0x1550] sm:$0xf] }
  0xf9   : > { %v836_v22 = vld [vmem:[%s8994_s26 + $0x1560] sm:$0xf]  ;;  %v838_v23 = vld [vmem:[%s8994_s26 + $0x1570] sm:$0xf]  ;;  %835 = vst [vmem:[%s8998_s27 + $0x554] sm:$0xf] %v834_v21 }
  0xfa   : > { %837 = vst [vmem:[%s8998_s27 + $0x558] sm:$0xf] %v836_v22  ;;  %839 = vst [vmem:[%s8998_s27 + $0x55c] sm:$0xf] %v838_v23  ;;  %v840_v24 = vld [vmem:[%s8994_s26 + $0x1580] sm:$0xf] }
  0xfb   : > { %v842_v25 = vld [vmem:[%s8994_s26 + $0x1590] sm:$0xf]  ;;  %v844_v26 = vld [vmem:[%s8994_s26 + $0x15a0] sm:$0xf]  ;;  %841 = vst [vmem:[%s8998_s27 + $0x560] sm:$0xf] %v840_v24 }
  0xfc   : > { %843 = vst [vmem:[%s8998_s27 + $0x564] sm:$0xf] %v842_v25  ;;  %845 = vst [vmem:[%s8998_s27 + $0x568] sm:$0xf] %v844_v26  ;;  %v846_v27 = vld [vmem:[%s8994_s26 + $0x15b0] sm:$0xf] }
  0xfd   : > { %v848_v28 = vld [vmem:[%s8994_s26 + $0x15c0] sm:$0xf]  ;;  %v850_v29 = vld [vmem:[%s8994_s26 + $0x15d0] sm:$0xf]  ;;  %847 = vst [vmem:[%s8998_s27 + $0x56c] sm:$0xf] %v846_v27 }
  0xfe   : > { %849 = vst [vmem:[%s8998_s27 + $0x570] sm:$0xf] %v848_v28  ;;  %851 = vst [vmem:[%s8998_s27 + $0x574] sm:$0xf] %v850_v29  ;;  %v852_v30 = vld [vmem:[%s8994_s26 + $0x15e0] sm:$0xf] }
  0xff   : > { %v854_v31 = vld [vmem:[%s8994_s26 + $0x15f0] sm:$0xf]  ;;  %v856_v32 = vld [vmem:[%s8994_s26 + $0x1600] sm:$0xf]  ;;  %853 = vst [vmem:[%s8998_s27 + $0x578] sm:$0xf] %v852_v30 }
 0x100   : > { %855 = vst [vmem:[%s8998_s27 + $0x57c] sm:$0xf] %v854_v31  ;;  %857 = vst [vmem:[%s8998_s27 + $0x580] sm:$0xf] %v856_v32  ;;  %v858_v33 = vld [vmem:[%s8994_s26 + $0x1610] sm:$0xf] }
 0x101   : > { %v860_v34 = vld [vmem:[%s8994_s26 + $0x1620] sm:$0xf]  ;;  %v862_v35 = vld [vmem:[%s8994_s26 + $0x1630] sm:$0xf]  ;;  %859 = vst [vmem:[%s8998_s27 + $0x584] sm:$0xf] %v858_v33 }
 0x102   : > { %861 = vst [vmem:[%s8998_s27 + $0x588] sm:$0xf] %v860_v34  ;;  %863 = vst [vmem:[%s8998_s27 + $0x58c] sm:$0xf] %v862_v35  ;;  %v864_v36 = vld [vmem:[%s8994_s26 + $0x1640] sm:$0xf] }
 0x103   : > { %v866_v37 = vld [vmem:[%s8994_s26 + $0x1650] sm:$0xf]  ;;  %v868_v38 = vld [vmem:[%s8994_s26 + $0x1660] sm:$0xf]  ;;  %865 = vst [vmem:[%s8998_s27 + $0x590] sm:$0xf] %v864_v36 }
 0x104   : > { %867 = vst [vmem:[%s8998_s27 + $0x594] sm:$0xf] %v866_v37  ;;  %869 = vst [vmem:[%s8998_s27 + $0x598] sm:$0xf] %v868_v38  ;;  %v870_v39 = vld [vmem:[%s8994_s26 + $0x1670] sm:$0xf] }
 0x105   : > { %v872_v40 = vld [vmem:[%s8994_s26 + $0x1680] sm:$0xf]  ;;  %v874_v41 = vld [vmem:[%s8994_s26 + $0x1690] sm:$0xf]  ;;  %871 = vst [vmem:[%s8998_s27 + $0x59c] sm:$0xf] %v870_v39 }
 0x106   : > { %873 = vst [vmem:[%s8998_s27 + $0x5a0] sm:$0xf] %v872_v40  ;;  %875 = vst [vmem:[%s8998_s27 + $0x5a4] sm:$0xf] %v874_v41  ;;  %v876_v42 = vld [vmem:[%s8994_s26 + $0x16a0] sm:$0xf] }
 0x107   : > { %v878_v43 = vld [vmem:[%s8994_s26 + $0x16b0] sm:$0xf]  ;;  %v880_v44 = vld [vmem:[%s8994_s26 + $0x16c0] sm:$0xf]  ;;  %877 = vst [vmem:[%s8998_s27 + $0x5a8] sm:$0xf] %v876_v42 }
 0x108   : > { %879 = vst [vmem:[%s8998_s27 + $0x5ac] sm:$0xf] %v878_v43  ;;  %881 = vst [vmem:[%s8998_s27 + $0x5b0] sm:$0xf] %v880_v44  ;;  %v882_v45 = vld [vmem:[%s8994_s26 + $0x16d0] sm:$0xf] }
 0x109   : > { %v884_v46 = vld [vmem:[%s8994_s26 + $0x16e0] sm:$0xf]  ;;  %v886_v47 = vld [vmem:[%s8994_s26 + $0x16f0] sm:$0xf]  ;;  %883 = vst [vmem:[%s8998_s27 + $0x5b4] sm:$0xf] %v882_v45 }
 0x10a   : > { %885 = vst [vmem:[%s8998_s27 + $0x5b8] sm:$0xf] %v884_v46  ;;  %887 = vst [vmem:[%s8998_s27 + $0x5bc] sm:$0xf] %v886_v47  ;;  %v888_v48 = vld [vmem:[%s8994_s26 + $0x1700] sm:$0xf] }
 0x10b   : > { %v890_v49 = vld [vmem:[%s8994_s26 + $0x1710] sm:$0xf]  ;;  %v892_v50 = vld [vmem:[%s8994_s26 + $0x1720] sm:$0xf]  ;;  %889 = vst [vmem:[%s8998_s27 + $0x5c0] sm:$0xf] %v888_v48 }
 0x10c   : > { %891 = vst [vmem:[%s8998_s27 + $0x5c4] sm:$0xf] %v890_v49  ;;  %893 = vst [vmem:[%s8998_s27 + $0x5c8] sm:$0xf] %v892_v50  ;;  %v894_v51 = vld [vmem:[%s8994_s26 + $0x1730] sm:$0xf] }
 0x10d   : > { %v896_v52 = vld [vmem:[%s8994_s26 + $0x1740] sm:$0xf]  ;;  %v898_v53 = vld [vmem:[%s8994_s26 + $0x1750] sm:$0xf]  ;;  %895 = vst [vmem:[%s8998_s27 + $0x5cc] sm:$0xf] %v894_v51 }
 0x10e   : > { %897 = vst [vmem:[%s8998_s27 + $0x5d0] sm:$0xf] %v896_v52  ;;  %899 = vst [vmem:[%s8998_s27 + $0x5d4] sm:$0xf] %v898_v53  ;;  %v900_v54 = vld [vmem:[%s8994_s26 + $0x1760] sm:$0xf] }
 0x10f   : > { %v902_v55 = vld [vmem:[%s8994_s26 + $0x1770] sm:$0xf]  ;;  %v904_v56 = vld [vmem:[%s8994_s26 + $0x1780] sm:$0xf]  ;;  %901 = vst [vmem:[%s8998_s27 + $0x5d8] sm:$0xf] %v900_v54 }
 0x110   : > { %903 = vst [vmem:[%s8998_s27 + $0x5dc] sm:$0xf] %v902_v55  ;;  %905 = vst [vmem:[%s8998_s27 + $0x5e0] sm:$0xf] %v904_v56  ;;  %v906_v57 = vld [vmem:[%s8994_s26 + $0x1790] sm:$0xf] }
 0x111   : > { %v908_v58 = vld [vmem:[%s8994_s26 + $0x17a0] sm:$0xf]  ;;  %v910_v59 = vld [vmem:[%s8994_s26 + $0x17b0] sm:$0xf]  ;;  %907 = vst [vmem:[%s8998_s27 + $0x5e4] sm:$0xf] %v906_v57 }
 0x112   : > { %909 = vst [vmem:[%s8998_s27 + $0x5e8] sm:$0xf] %v908_v58  ;;  %911 = vst [vmem:[%s8998_s27 + $0x5ec] sm:$0xf] %v910_v59  ;;  %v912_v60 = vld [vmem:[%s8994_s26 + $0x17c0] sm:$0xf] }
 0x113   : > { %v914_v61 = vld [vmem:[%s8994_s26 + $0x17d0] sm:$0xf]  ;;  %v916_v62 = vld [vmem:[%s8994_s26 + $0x17e0] sm:$0xf]  ;;  %913 = vst [vmem:[%s8998_s27 + $0x5f0] sm:$0xf] %v912_v60 }
 0x114   : > { %915 = vst [vmem:[%s8998_s27 + $0x5f4] sm:$0xf] %v914_v61  ;;  %917 = vst [vmem:[%s8998_s27 + $0x5f8] sm:$0xf] %v916_v62  ;;  %v918_v63 = vld [vmem:[%s8994_s26 + $0x17f0] sm:$0xf] }
 0x115   : > { %v920_v0 = vld [vmem:[%s8994_s26 + $0x1800] sm:$0xf]  ;;  %v922_v1 = vld [vmem:[%s8994_s26 + $0x1810] sm:$0xf]  ;;  %919 = vst [vmem:[%s8998_s27 + $0x5fc] sm:$0xf] %v918_v63 }
 0x116   : > { %921 = vst [vmem:[%s8998_s27 + $0x600] sm:$0xf] %v920_v0  ;;  %923 = vst [vmem:[%s8998_s27 + $0x604] sm:$0xf] %v922_v1  ;;  %v924_v2 = vld [vmem:[%s8994_s26 + $0x1820] sm:$0xf] }
 0x117   : > { %v926_v3 = vld [vmem:[%s8994_s26 + $0x1830] sm:$0xf]  ;;  %v928_v4 = vld [vmem:[%s8994_s26 + $0x1840] sm:$0xf]  ;;  %925 = vst [vmem:[%s8998_s27 + $0x608] sm:$0xf] %v924_v2 }
 0x118   : > { %927 = vst [vmem:[%s8998_s27 + $0x60c] sm:$0xf] %v926_v3  ;;  %929 = vst [vmem:[%s8998_s27 + $0x610] sm:$0xf] %v928_v4  ;;  %v930_v5 = vld [vmem:[%s8994_s26 + $0x1850] sm:$0xf] }
 0x119   : > { %v932_v6 = vld [vmem:[%s8994_s26 + $0x1860] sm:$0xf]  ;;  %v934_v7 = vld [vmem:[%s8994_s26 + $0x1870] sm:$0xf]  ;;  %931 = vst [vmem:[%s8998_s27 + $0x614] sm:$0xf] %v930_v5 }
 0x11a   : > { %933 = vst [vmem:[%s8998_s27 + $0x618] sm:$0xf] %v932_v6  ;;  %935 = vst [vmem:[%s8998_s27 + $0x61c] sm:$0xf] %v934_v7  ;;  %v936_v8 = vld [vmem:[%s8994_s26 + $0x1880] sm:$0xf] }
 0x11b   : > { %v938_v9 = vld [vmem:[%s8994_s26 + $0x1890] sm:$0xf]  ;;  %v940_v10 = vld [vmem:[%s8994_s26 + $0x18a0] sm:$0xf]  ;;  %937 = vst [vmem:[%s8998_s27 + $0x620] sm:$0xf] %v936_v8 }
 0x11c   : > { %939 = vst [vmem:[%s8998_s27 + $0x624] sm:$0xf] %v938_v9  ;;  %941 = vst [vmem:[%s8998_s27 + $0x628] sm:$0xf] %v940_v10  ;;  %v942_v11 = vld [vmem:[%s8994_s26 + $0x18b0] sm:$0xf] }
 0x11d   : > { %v944_v12 = vld [vmem:[%s8994_s26 + $0x18c0] sm:$0xf]  ;;  %v946_v13 = vld [vmem:[%s8994_s26 + $0x18d0] sm:$0xf]  ;;  %943 = vst [vmem:[%s8998_s27 + $0x62c] sm:$0xf] %v942_v11 }
 0x11e   : > { %945 = vst [vmem:[%s8998_s27 + $0x630] sm:$0xf] %v944_v12  ;;  %947 = vst [vmem:[%s8998_s27 + $0x634] sm:$0xf] %v946_v13  ;;  %v948_v14 = vld [vmem:[%s8994_s26 + $0x18e0] sm:$0xf] }
 0x11f   : > { %v950_v15 = vld [vmem:[%s8994_s26 + $0x18f0] sm:$0xf]  ;;  %v952_v16 = vld [vmem:[%s8994_s26 + $0x1900] sm:$0xf]  ;;  %949 = vst [vmem:[%s8998_s27 + $0x638] sm:$0xf] %v948_v14 }
 0x120   : > { %951 = vst [vmem:[%s8998_s27 + $0x63c] sm:$0xf] %v950_v15  ;;  %953 = vst [vmem:[%s8998_s27 + $0x640] sm:$0xf] %v952_v16  ;;  %v954_v17 = vld [vmem:[%s8994_s26 + $0x1910] sm:$0xf] }
 0x121   : > { %v956_v18 = vld [vmem:[%s8994_s26 + $0x1920] sm:$0xf]  ;;  %v958_v19 = vld [vmem:[%s8994_s26 + $0x1930] sm:$0xf]  ;;  %955 = vst [vmem:[%s8998_s27 + $0x644] sm:$0xf] %v954_v17 }
 0x122   : > { %957 = vst [vmem:[%s8998_s27 + $0x648] sm:$0xf] %v956_v18  ;;  %959 = vst [vmem:[%s8998_s27 + $0x64c] sm:$0xf] %v958_v19  ;;  %v960_v20 = vld [vmem:[%s8994_s26 + $0x1940] sm:$0xf] }
 0x123   : > { %v962_v21 = vld [vmem:[%s8994_s26 + $0x1950] sm:$0xf]  ;;  %v964_v22 = vld [vmem:[%s8994_s26 + $0x1960] sm:$0xf]  ;;  %961 = vst [vmem:[%s8998_s27 + $0x650] sm:$0xf] %v960_v20 }
 0x124   : > { %963 = vst [vmem:[%s8998_s27 + $0x654] sm:$0xf] %v962_v21  ;;  %965 = vst [vmem:[%s8998_s27 + $0x658] sm:$0xf] %v964_v22  ;;  %v966_v23 = vld [vmem:[%s8994_s26 + $0x1970] sm:$0xf] }
 0x125   : > { %v968_v24 = vld [vmem:[%s8994_s26 + $0x1980] sm:$0xf]  ;;  %v970_v25 = vld [vmem:[%s8994_s26 + $0x1990] sm:$0xf]  ;;  %967 = vst [vmem:[%s8998_s27 + $0x65c] sm:$0xf] %v966_v23 }
 0x126   : > { %969 = vst [vmem:[%s8998_s27 + $0x660] sm:$0xf] %v968_v24  ;;  %971 = vst [vmem:[%s8998_s27 + $0x664] sm:$0xf] %v970_v25  ;;  %v972_v26 = vld [vmem:[%s8994_s26 + $0x19a0] sm:$0xf] }
 0x127   : > { %v974_v27 = vld [vmem:[%s8994_s26 + $0x19b0] sm:$0xf]  ;;  %v976_v28 = vld [vmem:[%s8994_s26 + $0x19c0] sm:$0xf]  ;;  %973 = vst [vmem:[%s8998_s27 + $0x668] sm:$0xf] %v972_v26 }
 0x128   : > { %975 = vst [vmem:[%s8998_s27 + $0x66c] sm:$0xf] %v974_v27  ;;  %977 = vst [vmem:[%s8998_s27 + $0x670] sm:$0xf] %v976_v28  ;;  %v978_v29 = vld [vmem:[%s8994_s26 + $0x19d0] sm:$0xf] }
 0x129   : > { %v980_v30 = vld [vmem:[%s8994_s26 + $0x19e0] sm:$0xf]  ;;  %v982_v31 = vld [vmem:[%s8994_s26 + $0x19f0] sm:$0xf]  ;;  %979 = vst [vmem:[%s8998_s27 + $0x674] sm:$0xf] %v978_v29 }
 0x12a   : > { %981 = vst [vmem:[%s8998_s27 + $0x678] sm:$0xf] %v980_v30  ;;  %983 = vst [vmem:[%s8998_s27 + $0x67c] sm:$0xf] %v982_v31  ;;  %v984_v32 = vld [vmem:[%s8994_s26 + $0x1a00] sm:$0xf] }
 0x12b   : > { %v986_v33 = vld [vmem:[%s8994_s26 + $0x1a10] sm:$0xf]  ;;  %v988_v34 = vld [vmem:[%s8994_s26 + $0x1a20] sm:$0xf]  ;;  %985 = vst [vmem:[%s8998_s27 + $0x680] sm:$0xf] %v984_v32 }
 0x12c   : > { %987 = vst [vmem:[%s8998_s27 + $0x684] sm:$0xf] %v986_v33  ;;  %989 = vst [vmem:[%s8998_s27 + $0x688] sm:$0xf] %v988_v34  ;;  %v990_v35 = vld [vmem:[%s8994_s26 + $0x1a30] sm:$0xf] }
 0x12d   : > { %v992_v36 = vld [vmem:[%s8994_s26 + $0x1a40] sm:$0xf]  ;;  %v994_v37 = vld [vmem:[%s8994_s26 + $0x1a50] sm:$0xf]  ;;  %991 = vst [vmem:[%s8998_s27 + $0x68c] sm:$0xf] %v990_v35 }
 0x12e   : > { %993 = vst [vmem:[%s8998_s27 + $0x690] sm:$0xf] %v992_v36  ;;  %995 = vst [vmem:[%s8998_s27 + $0x694] sm:$0xf] %v994_v37  ;;  %v996_v38 = vld [vmem:[%s8994_s26 + $0x1a60] sm:$0xf] }
 0x12f   : > { %v998_v39 = vld [vmem:[%s8994_s26 + $0x1a70] sm:$0xf]  ;;  %v1000_v40 = vld [vmem:[%s8994_s26 + $0x1a80] sm:$0xf]  ;;  %997 = vst [vmem:[%s8998_s27 + $0x698] sm:$0xf] %v996_v38 }
 0x130   : > { %999 = vst [vmem:[%s8998_s27 + $0x69c] sm:$0xf] %v998_v39  ;;  %1001 = vst [vmem:[%s8998_s27 + $0x6a0] sm:$0xf] %v1000_v40  ;;  %v1002_v41 = vld [vmem:[%s8994_s26 + $0x1a90] sm:$0xf] }
 0x131   : > { %v1004_v42 = vld [vmem:[%s8994_s26 + $0x1aa0] sm:$0xf]  ;;  %v1006_v43 = vld [vmem:[%s8994_s26 + $0x1ab0] sm:$0xf]  ;;  %1003 = vst [vmem:[%s8998_s27 + $0x6a4] sm:$0xf] %v1002_v41 }
 0x132   : > { %1005 = vst [vmem:[%s8998_s27 + $0x6a8] sm:$0xf] %v1004_v42  ;;  %1007 = vst [vmem:[%s8998_s27 + $0x6ac] sm:$0xf] %v1006_v43  ;;  %v1008_v44 = vld [vmem:[%s8994_s26 + $0x1ac0] sm:$0xf] }
 0x133   : > { %v1010_v45 = vld [vmem:[%s8994_s26 + $0x1ad0] sm:$0xf]  ;;  %v1012_v46 = vld [vmem:[%s8994_s26 + $0x1ae0] sm:$0xf]  ;;  %1009 = vst [vmem:[%s8998_s27 + $0x6b0] sm:$0xf] %v1008_v44 }
 0x134   : > { %1011 = vst [vmem:[%s8998_s27 + $0x6b4] sm:$0xf] %v1010_v45  ;;  %1013 = vst [vmem:[%s8998_s27 + $0x6b8] sm:$0xf] %v1012_v46  ;;  %v1014_v47 = vld [vmem:[%s8994_s26 + $0x1af0] sm:$0xf] }
 0x135   : > { %v1016_v48 = vld [vmem:[%s8994_s26 + $0x1b00] sm:$0xf]  ;;  %v1018_v49 = vld [vmem:[%s8994_s26 + $0x1b10] sm:$0xf]  ;;  %1015 = vst [vmem:[%s8998_s27 + $0x6bc] sm:$0xf] %v1014_v47 }
 0x136   : > { %1017 = vst [vmem:[%s8998_s27 + $0x6c0] sm:$0xf] %v1016_v48  ;;  %1019 = vst [vmem:[%s8998_s27 + $0x6c4] sm:$0xf] %v1018_v49  ;;  %v1020_v50 = vld [vmem:[%s8994_s26 + $0x1b20] sm:$0xf] }
 0x137   : > { %v1022_v51 = vld [vmem:[%s8994_s26 + $0x1b30] sm:$0xf]  ;;  %v1024_v52 = vld [vmem:[%s8994_s26 + $0x1b40] sm:$0xf]  ;;  %1021 = vst [vmem:[%s8998_s27 + $0x6c8] sm:$0xf] %v1020_v50 }
 0x138   : > { %1023 = vst [vmem:[%s8998_s27 + $0x6cc] sm:$0xf] %v1022_v51  ;;  %1025 = vst [vmem:[%s8998_s27 + $0x6d0] sm:$0xf] %v1024_v52  ;;  %v1026_v53 = vld [vmem:[%s8994_s26 + $0x1b50] sm:$0xf] }
 0x139   : > { %v1028_v54 = vld [vmem:[%s8994_s26 + $0x1b60] sm:$0xf]  ;;  %v1030_v55 = vld [vmem:[%s8994_s26 + $0x1b70] sm:$0xf]  ;;  %1027 = vst [vmem:[%s8998_s27 + $0x6d4] sm:$0xf] %v1026_v53 }
 0x13a   : > { %1029 = vst [vmem:[%s8998_s27 + $0x6d8] sm:$0xf] %v1028_v54  ;;  %1031 = vst [vmem:[%s8998_s27 + $0x6dc] sm:$0xf] %v1030_v55  ;;  %v1032_v56 = vld [vmem:[%s8994_s26 + $0x1b80] sm:$0xf] }
 0x13b   : > { %v1034_v57 = vld [vmem:[%s8994_s26 + $0x1b90] sm:$0xf]  ;;  %v1036_v58 = vld [vmem:[%s8994_s26 + $0x1ba0] sm:$0xf]  ;;  %1033 = vst [vmem:[%s8998_s27 + $0x6e0] sm:$0xf] %v1032_v56 }
 0x13c   : > { %1035 = vst [vmem:[%s8998_s27 + $0x6e4] sm:$0xf] %v1034_v57  ;;  %1037 = vst [vmem:[%s8998_s27 + $0x6e8] sm:$0xf] %v1036_v58  ;;  %v1038_v59 = vld [vmem:[%s8994_s26 + $0x1bb0] sm:$0xf] }
 0x13d   : > { %v1040_v60 = vld [vmem:[%s8994_s26 + $0x1bc0] sm:$0xf]  ;;  %v1042_v61 = vld [vmem:[%s8994_s26 + $0x1bd0] sm:$0xf]  ;;  %1039 = vst [vmem:[%s8998_s27 + $0x6ec] sm:$0xf] %v1038_v59 }
 0x13e   : > { %1041 = vst [vmem:[%s8998_s27 + $0x6f0] sm:$0xf] %v1040_v60  ;;  %1043 = vst [vmem:[%s8998_s27 + $0x6f4] sm:$0xf] %v1042_v61  ;;  %v1044_v62 = vld [vmem:[%s8994_s26 + $0x1be0] sm:$0xf] }
 0x13f   : > { %v1046_v63 = vld [vmem:[%s8994_s26 + $0x1bf0] sm:$0xf]  ;;  %v1048_v0 = vld [vmem:[%s8994_s26 + $0x1c00] sm:$0xf]  ;;  %1045 = vst [vmem:[%s8998_s27 + $0x6f8] sm:$0xf] %v1044_v62 }
 0x140   : > { %1047 = vst [vmem:[%s8998_s27 + $0x6fc] sm:$0xf] %v1046_v63  ;;  %1049 = vst [vmem:[%s8998_s27 + $0x700] sm:$0xf] %v1048_v0  ;;  %v1050_v1 = vld [vmem:[%s8994_s26 + $0x1c10] sm:$0xf] }
 0x141   : > { %v1052_v2 = vld [vmem:[%s8994_s26 + $0x1c20] sm:$0xf]  ;;  %v1054_v3 = vld [vmem:[%s8994_s26 + $0x1c30] sm:$0xf]  ;;  %1051 = vst [vmem:[%s8998_s27 + $0x704] sm:$0xf] %v1050_v1 }
 0x142   : > { %1053 = vst [vmem:[%s8998_s27 + $0x708] sm:$0xf] %v1052_v2  ;;  %1055 = vst [vmem:[%s8998_s27 + $0x70c] sm:$0xf] %v1054_v3  ;;  %v1056_v4 = vld [vmem:[%s8994_s26 + $0x1c40] sm:$0xf] }
 0x143   : > { %v1058_v5 = vld [vmem:[%s8994_s26 + $0x1c50] sm:$0xf]  ;;  %v1060_v6 = vld [vmem:[%s8994_s26 + $0x1c60] sm:$0xf]  ;;  %1057 = vst [vmem:[%s8998_s27 + $0x710] sm:$0xf] %v1056_v4 }
 0x144   : > { %1059 = vst [vmem:[%s8998_s27 + $0x714] sm:$0xf] %v1058_v5  ;;  %1061 = vst [vmem:[%s8998_s27 + $0x718] sm:$0xf] %v1060_v6  ;;  %v1062_v7 = vld [vmem:[%s8994_s26 + $0x1c70] sm:$0xf] }
 0x145   : > { %v1064_v8 = vld [vmem:[%s8994_s26 + $0x1c80] sm:$0xf]  ;;  %v1066_v9 = vld [vmem:[%s8994_s26 + $0x1c90] sm:$0xf]  ;;  %1063 = vst [vmem:[%s8998_s27 + $0x71c] sm:$0xf] %v1062_v7 }
 0x146   : > { %1065 = vst [vmem:[%s8998_s27 + $0x720] sm:$0xf] %v1064_v8  ;;  %1067 = vst [vmem:[%s8998_s27 + $0x724] sm:$0xf] %v1066_v9  ;;  %v1068_v10 = vld [vmem:[%s8994_s26 + $0x1ca0] sm:$0xf] }
 0x147   : > { %v1070_v11 = vld [vmem:[%s8994_s26 + $0x1cb0] sm:$0xf]  ;;  %v1072_v12 = vld [vmem:[%s8994_s26 + $0x1cc0] sm:$0xf]  ;;  %1069 = vst [vmem:[%s8998_s27 + $0x728] sm:$0xf] %v1068_v10 }
 0x148   : > { %1071 = vst [vmem:[%s8998_s27 + $0x72c] sm:$0xf] %v1070_v11  ;;  %1073 = vst [vmem:[%s8998_s27 + $0x730] sm:$0xf] %v1072_v12  ;;  %v1074_v13 = vld [vmem:[%s8994_s26 + $0x1cd0] sm:$0xf] }
 0x149   : > { %v1076_v14 = vld [vmem:[%s8994_s26 + $0x1ce0] sm:$0xf]  ;;  %v1078_v15 = vld [vmem:[%s8994_s26 + $0x1cf0] sm:$0xf]  ;;  %1075 = vst [vmem:[%s8998_s27 + $0x734] sm:$0xf] %v1074_v13 }
 0x14a   : > { %1077 = vst [vmem:[%s8998_s27 + $0x738] sm:$0xf] %v1076_v14  ;;  %1079 = vst [vmem:[%s8998_s27 + $0x73c] sm:$0xf] %v1078_v15  ;;  %v1080_v16 = vld [vmem:[%s8994_s26 + $0x1d00] sm:$0xf] }
 0x14b   : > { %v1082_v17 = vld [vmem:[%s8994_s26 + $0x1d10] sm:$0xf]  ;;  %v1084_v18 = vld [vmem:[%s8994_s26 + $0x1d20] sm:$0xf]  ;;  %1081 = vst [vmem:[%s8998_s27 + $0x740] sm:$0xf] %v1080_v16 }
 0x14c   : > { %1083 = vst [vmem:[%s8998_s27 + $0x744] sm:$0xf] %v1082_v17  ;;  %1085 = vst [vmem:[%s8998_s27 + $0x748] sm:$0xf] %v1084_v18  ;;  %v1086_v19 = vld [vmem:[%s8994_s26 + $0x1d30] sm:$0xf] }
 0x14d   : > { %v1088_v20 = vld [vmem:[%s8994_s26 + $0x1d40] sm:$0xf]  ;;  %v1090_v21 = vld [vmem:[%s8994_s26 + $0x1d50] sm:$0xf]  ;;  %1087 = vst [vmem:[%s8998_s27 + $0x74c] sm:$0xf] %v1086_v19 }
 0x14e   : > { %1089 = vst [vmem:[%s8998_s27 + $0x750] sm:$0xf] %v1088_v20  ;;  %1091 = vst [vmem:[%s8998_s27 + $0x754] sm:$0xf] %v1090_v21  ;;  %v1092_v22 = vld [vmem:[%s8994_s26 + $0x1d60] sm:$0xf] }
 0x14f   : > { %v1094_v23 = vld [vmem:[%s8994_s26 + $0x1d70] sm:$0xf]  ;;  %v1096_v24 = vld [vmem:[%s8994_s26 + $0x1d80] sm:$0xf]  ;;  %1093 = vst [vmem:[%s8998_s27 + $0x758] sm:$0xf] %v1092_v22 }
 0x150   : > { %1095 = vst [vmem:[%s8998_s27 + $0x75c] sm:$0xf] %v1094_v23  ;;  %1097 = vst [vmem:[%s8998_s27 + $0x760] sm:$0xf] %v1096_v24  ;;  %v1098_v25 = vld [vmem:[%s8994_s26 + $0x1d90] sm:$0xf] }
 0x151   : > { %v1100_v26 = vld [vmem:[%s8994_s26 + $0x1da0] sm:$0xf]  ;;  %v1102_v27 = vld [vmem:[%s8994_s26 + $0x1db0] sm:$0xf]  ;;  %1099 = vst [vmem:[%s8998_s27 + $0x764] sm:$0xf] %v1098_v25 }
 0x152   : > { %1101 = vst [vmem:[%s8998_s27 + $0x768] sm:$0xf] %v1100_v26  ;;  %1103 = vst [vmem:[%s8998_s27 + $0x76c] sm:$0xf] %v1102_v27  ;;  %v1104_v28 = vld [vmem:[%s8994_s26 + $0x1dc0] sm:$0xf] }
 0x153   : > { %v1106_v29 = vld [vmem:[%s8994_s26 + $0x1dd0] sm:$0xf]  ;;  %v1108_v30 = vld [vmem:[%s8994_s26 + $0x1de0] sm:$0xf]  ;;  %1105 = vst [vmem:[%s8998_s27 + $0x770] sm:$0xf] %v1104_v28 }
 0x154   : > { %1107 = vst [vmem:[%s8998_s27 + $0x774] sm:$0xf] %v1106_v29  ;;  %1109 = vst [vmem:[%s8998_s27 + $0x778] sm:$0xf] %v1108_v30  ;;  %v1110_v31 = vld [vmem:[%s8994_s26 + $0x1df0] sm:$0xf] }
 0x155   : > { %v1112_v32 = vld [vmem:[%s8994_s26 + $0x1e00] sm:$0xf]  ;;  %v1114_v33 = vld [vmem:[%s8994_s26 + $0x1e10] sm:$0xf]  ;;  %1111 = vst [vmem:[%s8998_s27 + $0x77c] sm:$0xf] %v1110_v31 }
 0x156   : > { %1113 = vst [vmem:[%s8998_s27 + $0x780] sm:$0xf] %v1112_v32  ;;  %1115 = vst [vmem:[%s8998_s27 + $0x784] sm:$0xf] %v1114_v33  ;;  %v1116_v34 = vld [vmem:[%s8994_s26 + $0x1e20] sm:$0xf] }
 0x157   : > { %v1118_v35 = vld [vmem:[%s8994_s26 + $0x1e30] sm:$0xf]  ;;  %v1120_v36 = vld [vmem:[%s8994_s26 + $0x1e40] sm:$0xf]  ;;  %1117 = vst [vmem:[%s8998_s27 + $0x788] sm:$0xf] %v1116_v34 }
 0x158   : > { %1119 = vst [vmem:[%s8998_s27 + $0x78c] sm:$0xf] %v1118_v35  ;;  %1121 = vst [vmem:[%s8998_s27 + $0x790] sm:$0xf] %v1120_v36  ;;  %v1122_v37 = vld [vmem:[%s8994_s26 + $0x1e50] sm:$0xf] }
 0x159   : > { %v1124_v38 = vld [vmem:[%s8994_s26 + $0x1e60] sm:$0xf]  ;;  %v1126_v39 = vld [vmem:[%s8994_s26 + $0x1e70] sm:$0xf]  ;;  %1123 = vst [vmem:[%s8998_s27 + $0x794] sm:$0xf] %v1122_v37 }
 0x15a   : > { %1125 = vst [vmem:[%s8998_s27 + $0x798] sm:$0xf] %v1124_v38  ;;  %1127 = vst [vmem:[%s8998_s27 + $0x79c] sm:$0xf] %v1126_v39  ;;  %v1128_v40 = vld [vmem:[%s8994_s26 + $0x1e80] sm:$0xf] }
 0x15b   : > { %v1130_v41 = vld [vmem:[%s8994_s26 + $0x1e90] sm:$0xf]  ;;  %v1132_v42 = vld [vmem:[%s8994_s26 + $0x1ea0] sm:$0xf]  ;;  %1129 = vst [vmem:[%s8998_s27 + $0x7a0] sm:$0xf] %v1128_v40 }
 0x15c   : > { %1131 = vst [vmem:[%s8998_s27 + $0x7a4] sm:$0xf] %v1130_v41  ;;  %1133 = vst [vmem:[%s8998_s27 + $0x7a8] sm:$0xf] %v1132_v42  ;;  %v1134_v43 = vld [vmem:[%s8994_s26 + $0x1eb0] sm:$0xf] }
 0x15d   : > { %v1136_v44 = vld [vmem:[%s8994_s26 + $0x1ec0] sm:$0xf]  ;;  %v1138_v45 = vld [vmem:[%s8994_s26 + $0x1ed0] sm:$0xf]  ;;  %1135 = vst [vmem:[%s8998_s27 + $0x7ac] sm:$0xf] %v1134_v43 }
 0x15e   : > { %1137 = vst [vmem:[%s8998_s27 + $0x7b0] sm:$0xf] %v1136_v44  ;;  %1139 = vst [vmem:[%s8998_s27 + $0x7b4] sm:$0xf] %v1138_v45  ;;  %v1140_v46 = vld [vmem:[%s8994_s26 + $0x1ee0] sm:$0xf] }
 0x15f   : > { %v1142_v47 = vld [vmem:[%s8994_s26 + $0x1ef0] sm:$0xf]  ;;  %v1144_v48 = vld [vmem:[%s8994_s26 + $0x1f00] sm:$0xf]  ;;  %1141 = vst [vmem:[%s8998_s27 + $0x7b8] sm:$0xf] %v1140_v46 }
 0x160   : > { %1143 = vst [vmem:[%s8998_s27 + $0x7bc] sm:$0xf] %v1142_v47  ;;  %1145 = vst [vmem:[%s8998_s27 + $0x7c0] sm:$0xf] %v1144_v48  ;;  %v1146_v49 = vld [vmem:[%s8994_s26 + $0x1f10] sm:$0xf] }
 0x161   : > { %v1148_v50 = vld [vmem:[%s8994_s26 + $0x1f20] sm:$0xf]  ;;  %v1150_v51 = vld [vmem:[%s8994_s26 + $0x1f30] sm:$0xf]  ;;  %1147 = vst [vmem:[%s8998_s27 + $0x7c4] sm:$0xf] %v1146_v49 }
 0x162   : > { %1149 = vst [vmem:[%s8998_s27 + $0x7c8] sm:$0xf] %v1148_v50  ;;  %1151 = vst [vmem:[%s8998_s27 + $0x7cc] sm:$0xf] %v1150_v51  ;;  %v1152_v52 = vld [vmem:[%s8994_s26 + $0x1f40] sm:$0xf] }
 0x163   : > { %v1154_v53 = vld [vmem:[%s8994_s26 + $0x1f50] sm:$0xf]  ;;  %v1156_v54 = vld [vmem:[%s8994_s26 + $0x1f60] sm:$0xf]  ;;  %1153 = vst [vmem:[%s8998_s27 + $0x7d0] sm:$0xf] %v1152_v52 }
 0x164   : > { %1155 = vst [vmem:[%s8998_s27 + $0x7d4] sm:$0xf] %v1154_v53  ;;  %1157 = vst [vmem:[%s8998_s27 + $0x7d8] sm:$0xf] %v1156_v54  ;;  %v1158_v55 = vld [vmem:[%s8994_s26 + $0x1f70] sm:$0xf] }
 0x165   : > { %v1160_v56 = vld [vmem:[%s8994_s26 + $0x1f80] sm:$0xf]  ;;  %v1162_v57 = vld [vmem:[%s8994_s26 + $0x1f90] sm:$0xf]  ;;  %1159 = vst [vmem:[%s8998_s27 + $0x7dc] sm:$0xf] %v1158_v55 }
 0x166   : > { %1161 = vst [vmem:[%s8998_s27 + $0x7e0] sm:$0xf] %v1160_v56  ;;  %1163 = vst [vmem:[%s8998_s27 + $0x7e4] sm:$0xf] %v1162_v57  ;;  %v1164_v58 = vld [vmem:[%s8994_s26 + $0x1fa0] sm:$0xf] }
 0x167   : > { %v1166_v59 = vld [vmem:[%s8994_s26 + $0x1fb0] sm:$0xf]  ;;  %v1168_v60 = vld [vmem:[%s8994_s26 + $0x1fc0] sm:$0xf]  ;;  %1165 = vst [vmem:[%s8998_s27 + $0x7e8] sm:$0xf] %v1164_v58 }
 0x168   : > { %1167 = vst [vmem:[%s8998_s27 + $0x7ec] sm:$0xf] %v1166_v59  ;;  %1169 = vst [vmem:[%s8998_s27 + $0x7f0] sm:$0xf] %v1168_v60  ;;  %v1170_v61 = vld [vmem:[%s8994_s26 + $0x1fd0] sm:$0xf] }
 0x169   : > { %v1172_v62 = vld [vmem:[%s8994_s26 + $0x1fe0] sm:$0xf]  ;;  %v1174_v63 = vld [vmem:[%s8994_s26 + $0x1ff0] sm:$0xf]  ;;  %1171 = vst [vmem:[%s8998_s27 + $0x7f4] sm:$0xf] %v1170_v61 }
 0x16a   : > { %1173 = vst [vmem:[%s8998_s27 + $0x7f8] sm:$0xf] %v1172_v62  ;;  %1175 = vst [vmem:[%s8998_s27 + $0x7fc] sm:$0xf] %v1174_v63 }
 0x16b PF: > { %p7501_p7 = scmp.ge.s32.totalorder %s8920_s15, 1  ;;  %p4300_p8 = scmp.lt.s32.totalorder %s8920_s15, 9 }
 0x16d   : > { %p4301_p9 = pnand %p7501_p7, %p4300_p8 }
 0x16e   : > { %s4307_s28 = sand.u32 (!%p4301_p9), 1, %s8896_s9   ;;  %p4336_p10 = scmp.lt.s32.totalorder (!%p4301_p9), %s8908_s12, 1 }
 0x16f   : > { %4304 = sbr.rel (%p4301_p9) target bundleno = 902 (0x386), region = 76  ;;  %s7502_s29 = sshll.u32 (!%p4301_p9), %s4307_s28, 11 }
 0x170   : > { %s10025_s30 = scalar_lea.vmem (!%p4301_p9), [#allocation3], %s7502_s29  ;;  %p4343_p11 = scmp.lt.s32.totalorder (!%p4301_p9), %s8904_s11, 3 }
 0x174   : > { %v8592_v0 = vld [vmem:[%s10025_s30 + $0x78] sm:$0xff]   ;;  %v8596_v4 = vld [vmem:[%s10025_s30 + $0x70] sm:$0xff]   ;;  %v8600_v8 = vld [vmem:[%s10025_s30 + $0x68] sm:$0xff]   ;;  %s10376_s12 = smov (!%p4336_p10, %s8908_s12), 1  ;;  %vm7362_vm4 = vcmask 1045504   ;;  %s10378_s11 = smov (!%p4343_p11, %s8904_s11), 3 }
 0x175   : > { %v8593_v1 = vld [vmem:[%s10025_s30 + $0xf8] sm:$0xff]   ;;  %8182 = vmatprep.subr.bf16.mxu0 %v8592_v0  ;;  %v8597_v5 = vld [vmem:[%s10025_s30 + $0xf0] sm:$0xff]   ;;  %v8601_v9 = vld [vmem:[%s10025_s30 + $0xe8] sm:$0xff]   ;;  %s8181_s3 = sshll.u32 %s10376_s12, 6  ;;  %s7505_s7 = sshll.u32 %s10376_s12, 2 }
 0x176   : > { %v8594_v2 = vld [vmem:[%s10025_s30 + $0x38] sm:$0xff]   ;;  %8204 = vmatprep.subr.bf16.mxu1 %v8593_v1  ;;  %v8598_v6 = vld [vmem:[%s10025_s30 + $0x30] sm:$0xff]   ;;  %v8602_v10 = vld [vmem:[%s10025_s30 + $0x28] sm:$0xff]   ;;  %s10065_s6 = scalar_lea.vmem %s10360_s0, %s8181_s3  ;;  %s4346_s8 = sadd.s32 %s7505_s7, %s10378_s11 }
 0x177   : > { %v8595_v3 = vld [vmem:[%s10025_s30 + $0xb8] sm:$0xff]   ;;  %8183 = vmatpush3.bf16.msra.mxu0 %v8594_v2  ;;  %v8599_v7 = vld [vmem:[%s10025_s30 + $0xb0] sm:$0xff]   ;;  %v8603_v11 = vld [vmem:[%s10025_s30 + $0xa8] sm:$0xff]   ;;  %s7506_s9 = sshll.u32 %s4346_s8, 2 }
 0x178   : > { %8205 = vmatpush3.bf16.msra.mxu1 %v8595_v3  ;;  %8184 = vmatprep.subr.bf16.mxu0 %v8596_v4  ;;  %v8604_v12 = vld [vmem:[%s10025_s30 + $0x60] sm:$0xff]   ;;  %v8608_v16 = vld [vmem:[%s10025_s30 + $0x58] sm:$0xff]   ;;  %v8612_v20 = vld [vmem:[%s10025_s30 + $0x50] sm:$0xff]   ;;  %s4348_s21 = scalar_lea.vmem %s10362_s2, %s7506_s9 }
 0x179   : > { %8206 = vmatprep.subr.bf16.mxu1 %v8597_v5  ;;  %v8605_v13 = vld [vmem:[%s10025_s30 + $0xe0] sm:$0xff]   ;;  %v8609_v17 = vld [vmem:[%s10025_s30 + $0xd8] sm:$0xff]   ;;  %v8613_v21 = vld [vmem:[%s10025_s30 + $0xd0] sm:$0xff]  }
 0x17a   : > { %v8606_v14 = vld [vmem:[%s10025_s30 + $0x20] sm:$0xff]   ;;  %v8610_v18 = vld [vmem:[%s10025_s30 + $0x18] sm:$0xff]   ;;  %v8614_v22 = vld [vmem:[%s10025_s30 + $0x10] sm:$0xff]  }
 0x17b   : > { %8185 = vmatpush3.bf16.msra.mxu0 %v8598_v6  ;;  %v8607_v15 = vld [vmem:[%s10025_s30 + $0xa0] sm:$0xff]   ;;  %v8611_v19 = vld [vmem:[%s10025_s30 + $0x98] sm:$0xff]   ;;  %v8615_v23 = vld [vmem:[%s10025_s30 + $0x90] sm:$0xff]  }
 0x17c   : > { %8207 = vmatpush3.bf16.msra.mxu1 %v8599_v7  ;;  %8186 = vmatprep.subr.bf16.mxu0 %v8600_v8  ;;  %v8616_v24 = vld [vmem:[%s10025_s30 + $0x48] sm:$0xff]   ;;  %v8620_v28 = vld [vmem:[%s10025_s30 + $0x40] sm:$0xff]   ;;  %v4350_v32 = vld [vmem:[%s10065_s6] sm:$0x77] }
 0x17d   : > { %8208 = vmatprep.subr.bf16.mxu1 %v8601_v9  ;;  %v8617_v25 = vld [vmem:[%s10025_s30 + $0xc8] sm:$0xff]   ;;  %v8621_v29 = vld [vmem:[%s10025_s30 + $0xc0] sm:$0xff]   ;;  %v7507_v34 = vcombine.low %v4350_v32, %v4350_v32  ;;  %v7508_v35 = vcombine.high %v4350_v32, %v4350_v32  ;;  %v8628_v38 = vld [vmem:[%s10025_s30 + $0x178] sm:$0xff]  }
 0x17e   : > { %v8618_v26 = vld [vmem:[%s10025_s30 + $0x8] sm:$0xff]   ;;  %v8622_v30 = vld [vmem:[%s10025_s30] sm:$0xff]   ;;  %v8629_v39 = vld [vmem:[%s10025_s30 + $0x1f8] sm:$0xff]  }
 0x17f   : > { %8187 = vmatpush3.bf16.msra.mxu0 %v8602_v10  ;;  %v8619_v27 = vld [vmem:[%s10025_s30 + $0x88] sm:$0xff]   ;;  %v8623_v31 = vld [vmem:[%s10025_s30 + $0x80] sm:$0xff]   ;;  %4926 = vmatprep.mubr.bf16.mxu0 %v7508_v35  ;;  %v8630_v40 = vld [vmem:[%s10025_s30 + $0x138] sm:$0xff]  }
 0x180   : > { %8209 = vmatpush3.bf16.msra.mxu1 %v8603_v11  ;;  %8188 = vmatprep.subr.bf16.mxu0 %v8604_v12  ;;  %v4351_v33 = vld [vmem:[%s10065_s6 + $0x8] sm:$0x77]  ;;  %v8631_v41 = vld [vmem:[%s10025_s30 + $0x1b8] sm:$0xff]   ;;  %v8632_v42 = vld [vmem:[%s10025_s30 + $0x170] sm:$0xff]  }
 0x181   : > { %8210 = vmatprep.subr.bf16.mxu1 %v8605_v13  ;;  %v7509_v36 = vcombine.low %v4351_v33, %v4351_v33  ;;  %v7510_v37 = vcombine.high %v4351_v33, %v4351_v33  ;;  %v8633_v43 = vld [vmem:[%s10025_s30 + $0x1f0] sm:$0xff]   ;;  %v8636_v46 = vld [vmem:[%s10025_s30 + $0x168] sm:$0xff]   ;;  %v8640_v50 = vld [vmem:[%s10025_s30 + $0x160] sm:$0xff]  }
 0x182   : > { %v8634_v44 = vld [vmem:[%s10025_s30 + $0x130] sm:$0xff]   ;;  %v8637_v47 = vld [vmem:[%s10025_s30 + $0x1e8] sm:$0xff]   ;;  %v8641_v51 = vld [vmem:[%s10025_s30 + $0x1e0] sm:$0xff]  }
 0x183   : > { %8189 = vmatpush3.bf16.msra.mxu0 %v8606_v14  ;;  %4966 = vmatprep.mubr.bf16.mxu1 %v7510_v37  ;;  %v8635_v45 = vld [vmem:[%s10025_s30 + $0x1b0] sm:$0xff]   ;;  %v8638_v48 = vld [vmem:[%s10025_s30 + $0x128] sm:$0xff]   ;;  %v8642_v52 = vld [vmem:[%s10025_s30 + $0x120] sm:$0xff]  }
 0x184   : > { %8211 = vmatpush3.bf16.msra.mxu1 %v8607_v15  ;;  %8190 = vmatprep.subr.bf16.mxu0 %v8608_v16  ;;  %v8639_v49 = vld [vmem:[%s10025_s30 + $0x1a8] sm:$0xff]   ;;  %v8643_v53 = vld [vmem:[%s10025_s30 + $0x1a0] sm:$0xff]   ;;  %v8644_v54 = vld [vmem:[%s10025_s30 + $0x158] sm:$0xff]  }
 0x185   : > { %8212 = vmatprep.subr.bf16.mxu1 %v8609_v17  ;;  %v8645_v55 = vld [vmem:[%s10025_s30 + $0x1d8] sm:$0xff]   ;;  %v8648_v58 = vld [vmem:[%s10025_s30 + $0x150] sm:$0xff]   ;;  %v8652_v62 = vld [vmem:[%s10025_s30 + $0x148] sm:$0xff]  }
 0x186   : > { %v8646_v56 = vld [vmem:[%s10025_s30 + $0x118] sm:$0xff]   ;;  %v8649_v59 = vld [vmem:[%s10025_s30 + $0x1d0] sm:$0xff]   ;;  %v8653_v63 = vld [vmem:[%s10025_s30 + $0x1c8] sm:$0xff]  }
 0x187   : > { %8191 = vmatpush3.bf16.msra.mxu0 %v8610_v18  ;;  %v8647_v57 = vld [vmem:[%s10025_s30 + $0x198] sm:$0xff]   ;;  %v8650_v60 = vld [vmem:[%s10025_s30 + $0x110] sm:$0xff]   ;;  %v8654_v0 = vld [vmem:[%s10025_s30 + $0x108] sm:$0xff]  }
 0x188   : > { %8213 = vmatpush3.bf16.msra.mxu1 %v8611_v19  ;;  %8192 = vmatprep.subr.bf16.mxu0 %v8612_v20  ;;  %v8651_v61 = vld [vmem:[%s10025_s30 + $0x190] sm:$0xff]   ;;  %v8655_v1 = vld [vmem:[%s10025_s30 + $0x188] sm:$0xff]   ;;  %v8656_v2 = vld [vmem:[%s10025_s30 + $0x140] sm:$0xff]  }
 0x189   : > { %8214 = vmatprep.subr.bf16.mxu1 %v8613_v21  ;;  %v8657_v3 = vld [vmem:[%s10025_s30 + $0x1c0] sm:$0xff]   ;;  %v4352_v6 = vld [vmem:[%s10065_s6 + $0x10] sm:$0x77]  ;;  %v4353_v9 = vld [vmem:[%s10065_s6 + $0x18] sm:$0x77] }
 0x18a   : > { %v8658_v4 = vld [vmem:[%s10025_s30 + $0x100] sm:$0xff]   ;;  %v7511_v7 = vcombine.low %v4352_v6, %v4352_v6  ;;  %v7512_v8 = vcombine.high %v4352_v6, %v4352_v6  ;;  %v7513_v10 = vcombine.low %v4353_v9, %v4353_v9  ;;  %v7514_v11 = vcombine.high %v4353_v9, %v4353_v9  ;;  %v8664_v12 = vld [vmem:[%s10025_s30 + $0x278] sm:$0xff]   ;;  %v8668_v16 = vld [vmem:[%s10025_s30 + $0x270] sm:$0xff]  }
 0x18b   : > { %8193 = vmatpush3.bf16.msra.mxu0 %v8614_v22  ;;  %v8659_v5 = vld [vmem:[%s10025_s30 + $0x180] sm:$0xff]   ;;  %v8665_v13 = vld [vmem:[%s10025_s30 + $0x2f8] sm:$0xff]   ;;  %v8669_v17 = vld [vmem:[%s10025_s30 + $0x2f0] sm:$0xff]  }
 0x18c   : > { %8215 = vmatpush3.bf16.msra.mxu1 %v8615_v23  ;;  %8194 = vmatprep.subr.bf16.mxu0 %v8616_v24  ;;  %v8666_v14 = vld [vmem:[%s10025_s30 + $0x238] sm:$0xff]   ;;  %v8670_v18 = vld [vmem:[%s10025_s30 + $0x230] sm:$0xff]   ;;  %v8672_v20 = vld [vmem:[%s10025_s30 + $0x268] sm:$0xff]  }
 0x18d   : > { %8216 = vmatprep.subr.bf16.mxu1 %v8617_v25  ;;  %v8667_v15 = vld [vmem:[%s10025_s30 + $0x2b8] sm:$0xff]   ;;  %v8671_v19 = vld [vmem:[%s10025_s30 + $0x2b0] sm:$0xff]   ;;  %v8673_v21 = vld [vmem:[%s10025_s30 + $0x2e8] sm:$0xff]  }
 0x18e   : > { %v8674_v22 = vld [vmem:[%s10025_s30 + $0x228] sm:$0xff]   ;;  %v8676_v24 = vld [vmem:[%s10025_s30 + $0x260] sm:$0xff]   ;;  %v8684_v32 = vld [vmem:[%s10025_s30 + $0x250] sm:$0xff]  }
 0x18f   : > { %8195 = vmatpush3.bf16.msra.mxu0 %v8618_v26  ;;  %v8675_v23 = vld [vmem:[%s10025_s30 + $0x2a8] sm:$0xff]   ;;  %v8677_v25 = vld [vmem:[%s10025_s30 + $0x2e0] sm:$0xff]   ;;  %v8685_v33 = vld [vmem:[%s10025_s30 + $0x2d0] sm:$0xff]  }
 0x190   : > { %8217 = vmatpush3.bf16.msra.mxu1 %v8619_v27  ;;  %8196 = vmatprep.subr.bf16.mxu0 %v8620_v28  ;;  %v8678_v26 = vld [vmem:[%s10025_s30 + $0x220] sm:$0xff]   ;;  %v8680_v28 = vld [vmem:[%s10025_s30 + $0x258] sm:$0xff]   ;;  %v8687_v35 = vld [vmem:[%s10025_s30 + $0x290] sm:$0xff]  }
 0x191   : > { %8218 = vmatprep.subr.bf16.mxu1 %v8621_v29  ;;  %v8679_v27 = vld [vmem:[%s10025_s30 + $0x2a0] sm:$0xff]   ;;  %v8681_v29 = vld [vmem:[%s10025_s30 + $0x2d8] sm:$0xff]   ;;  %v8689_v37 = vld [vmem:[%s10025_s30 + $0x2c8] sm:$0xff]  }
 0x192   : > { %v8707_v9 = vld [vmem:[%s10025_s30 + $0x3b0] sm:$0xff]  }
 0x193   : > { %8197 = vmatpush3.bf16.msra.mxu0 %v8622_v30  ;;  %v8682_v30 = vld [vmem:[%s10025_s30 + $0x218] sm:$0xff]  }
 0x194   : > { %8219 = vmatpush3.bf16.msra.mxu1 %v8623_v31  ;;  %8226 = vmatprep.subr.bf16.mxu0 %v8628_v38  ;;  %v8683_v31 = vld [vmem:[%s10025_s30 + $0x298] sm:$0xff]   ;;  %v8690_v38 = vld [vmem:[%s10025_s30 + $0x208] sm:$0xff]  }
 0x195   : > { %8248 = vmatprep.subr.bf16.mxu1 %v8629_v39  ;;  %v8691_v39 = vld [vmem:[%s10025_s30 + $0x288] sm:$0xff]  }
 0x196   : > { %4927 = vmatmul.mubr.bf16.vlgmr.msra.gmra.mxu0 %v7507_v34  ;;  %v8686_v34 = vld [vmem:[%s10025_s30 + $0x210] sm:$0xff]  }
 0x197   : > { %4967 = vmatmul.mubr.bf16.vlgmr.msra.gmra.mxu1 %v7509_v36  ;;  %8227 = vmatpush3.bf16.msra.mxu0 %v8630_v40  ;;  %v8688_v36 = vld [vmem:[%s10025_s30 + $0x248] sm:$0xff]   ;;  %v8692_v40 = vld [vmem:[%s10025_s30 + $0x240] sm:$0xff]  }
 0x198   : > { %8249 = vmatpush3.bf16.msra.mxu1 %v8631_v41  ;;  %8228 = vmatprep.subr.bf16.mxu0 %v8632_v42  ;;  %v8693_v41 = vld [vmem:[%s10025_s30 + $0x2c0] sm:$0xff]  }
 0x199   : > { %8250 = vmatprep.subr.bf16.mxu1 %v8633_v43  ;;  %5006 = vmatprep.mubr.bf16.mxu0 %v7512_v8  ;;  %v8694_v42 = vld [vmem:[%s10025_s30 + $0x200] sm:$0xff]   ;;  %v8706_v8 = vld [vmem:[%s10025_s30 + $0x330] sm:$0xff]  }
 0x19a   : > { %5046 = vmatprep.mubr.bf16.mxu1 %v7514_v11  ;;  %v8695_v43 = vld [vmem:[%s10025_s30 + $0x280] sm:$0xff]   ;;  %v8709_v11 = vld [vmem:[%s10025_s30 + $0x3e8] sm:$0xff]  }
 0x19b   : > { %8229 = vmatpush3.bf16.msra.mxu0 %v8634_v44  ;;  %v5055_v44 = vld [vmem:[%s10065_s6] sm:$0xff] }
 0x19c   : > { %8251 = vmatpush3.bf16.msra.mxu1 %v8635_v45  ;;  %8230 = vmatprep.subr.bf16.mxu0 %v8636_v46  ;;  %v5056_v45 = vld [vmem:[%s10065_s6 + $0x8] sm:$0xff]  ;;  %v7707_v46 = vcombine.low %v5055_v44, %v5055_v44 }
 0x19d   : > { %8252 = vmatprep.subr.bf16.mxu1 %v8637_v47  ;;  %v7708_v47 = vcombine.high %v5055_v44, %v5055_v44 }
 0x19f   : > { %8231 = vmatpush3.bf16.msra.mxu0 %v8638_v48  ;;  %v7709_v48 = vcombine.low %v5056_v45, %v5056_v45 }
 0x1a0   : > { %8253 = vmatpush3.bf16.msra.mxu1 %v8639_v49  ;;  %8232 = vmatprep.subr.bf16.mxu0 %v8640_v50  ;;  %v7710_v49 = vcombine.high %v5056_v45, %v5056_v45  ;;  %v8700_v50 = vld [vmem:[%s10025_s30 + $0x378] sm:$0xff]  }
 0x1a1   : > { %8254 = vmatprep.subr.bf16.mxu1 %v8641_v51  ;;  %v8701_v51 = vld [vmem:[%s10025_s30 + $0x3f8] sm:$0xff]  }
 0x1a2   : > { %v8737_v45 = vld [vmem:[%s10025_s30 + $0x4f8] sm:$0xff]  }
 0x1a3   : > { %8233 = vmatpush3.bf16.msra.mxu0 %v8642_v52  ;;  %v5216_v52 = vshrl.u32 %v7708_v47, 16 }
 0x1a4   : > { %8255 = vmatpush3.bf16.msra.mxu1 %v8643_v53  ;;  %8234 = vmatprep.subr.bf16.mxu0 %v8644_v54  ;;  %v5218_v53 = vshll.u32 %v7708_v47, 16  ;;  %v5230_v54 = vshrl.u32 %v7710_v49, 16 }
 0x1a5   : > { %8256 = vmatprep.subr.bf16.mxu1 %v8645_v55  ;;  %v5232_v55 = vshll.u32 %v7710_v49, 16 }
 0x1a7   : > { %8235 = vmatpush3.bf16.msra.mxu0 %v8646_v56  ;;  %v5209_v56 = vshrl.u32 %v7707_v46, 16 }
 0x1a8   : > { %8257 = vmatpush3.bf16.msra.mxu1 %v8647_v57  ;;  %8236 = vmatprep.subr.bf16.mxu0 %v8648_v58  ;;  %v5211_v57 = vshll.u32 %v7707_v46, 16  ;;  %v5223_v58 = vshrl.u32 %v7709_v48, 16 }
 0x1a9   : > { %8258 = vmatprep.subr.bf16.mxu1 %v8649_v59  ;;  %v5225_v59 = vshll.u32 %v7709_v48, 16 }
 0x1ab   : > { %8237 = vmatpush3.bf16.msra.mxu0 %v8650_v60  ;;  %v5220_v60 = vrot.slane %v5218_v53, 1 }
 0x1ac   : > { %8259 = vmatpush3.bf16.msra.mxu1 %v8651_v61  ;;  %8238 = vmatprep.subr.bf16.mxu0 %v8652_v62  ;;  %v5234_v61 = vrot.slane %v5232_v55, 1  ;;  %v8702_v62 = vld [vmem:[%s10025_s30 + $0x338] sm:$0xff]  }
 0x1ad   : > { %8260 = vmatprep.subr.bf16.mxu1 %v8653_v63  ;;  %v8703_v63 = vld [vmem:[%s10025_s30 + $0x3b8] sm:$0xff]  }
 0x1ae   : > { %v8739_v55 = vld [vmem:[%s10025_s30 + $0x4b8] sm:$0xff]  }
 0x1af   : > { %8239 = vmatpush3.bf16.msra.mxu0 %v8654_v0  ;;  %v5213_v0 = vrot.slane %v5211_v57, 1 }
 0x1b0   : > { %8261 = vmatpush3.bf16.msra.mxu1 %v8655_v1  ;;  %8240 = vmatprep.subr.bf16.mxu0 %v8656_v2  ;;  %v5227_v1 = vrot.slane %v5225_v59, 1  ;;  %v5221_v2 = vor.u32 %v5220_v60, %v5216_v52  ;;  %v8738_v52 = vld [vmem:[%s10025_s30 + $0x438] sm:$0xff]  }
 0x1b1   : > { %8262 = vmatprep.subr.bf16.mxu1 %v8657_v3  ;;  %v5235_v3 = vor.u32 %v5234_v61, %v5230_v54  ;;  %v8741_v61 = vld [vmem:[%s10025_s30 + $0x4f0] sm:$0xff]  }
 0x1b2   : > { %v5228_v6 = vor.u32 %v5227_v1, %v5223_v58  ;;  %v8745_v1 = vld [vmem:[%s10025_s30 + $0x4e8] sm:$0xff]  }
 0x1b3   : > { %8241 = vmatpush3.bf16.msra.mxu0 %v8658_v4  ;;  %v8704_v4 = vld [vmem:[%s10025_s30 + $0x370] sm:$0xff]  }
 0x1b4   : > { %8263 = vmatpush3.bf16.msra.mxu1 %v8659_v5  ;;  %8270 = vmatprep.subr.bf16.mxu0 %v8664_v12  ;;  %v5214_v5 = vor.u32 %v5213_v0, %v5209_v56  ;;  %v8710_v12 = vld [vmem:[%s10025_s30 + $0x328] sm:$0xff]   ;;  %v8740_v56 = vld [vmem:[%s10025_s30 + $0x470] sm:$0xff]  }
 0x1b5   : > { %8292 = vmatprep.subr.bf16.mxu1 %v8665_v13  ;;  %v8711_v13 = vld [vmem:[%s10025_s30 + $0x3a8] sm:$0xff]  }
 0x1b6   : > { %5007 = vmatmul.mubr.bf16.vlgmr.msra.gmra.mxu0 %v7511_v7  ;;  %v8705_v7 = vld [vmem:[%s10025_s30 + $0x3f0] sm:$0xff]   ;;  %v8744_v0 = vld [vmem:[%s10025_s30 + $0x468] sm:$0xff]  }
 0x1b7   : > { %5047 = vmatmul.mubr.bf16.vlgmr.msra.gmra.mxu1 %v7513_v10  ;;  %8271 = vmatpush3.bf16.msra.mxu0 %v8666_v14  ;;  %v8708_v10 = vld [vmem:[%s10025_s30 + $0x368] sm:$0xff]   ;;  %v8712_v14 = vld [vmem:[%s10025_s30 + $0x360] sm:$0xff]  }
 0x1b8   : > { %8293 = vmatpush3.bf16.msra.mxu1 %v8667_v15  ;;  %8272 = vmatprep.subr.bf16.mxu0 %v8668_v16  ;;  %v8713_v15 = vld [vmem:[%s10025_s30 + $0x3e0] sm:$0xff]  }
 0x1b9   : > { %8294 = vmatprep.subr.bf16.mxu1 %v8669_v17  ;;  %5688 = vmatprep.mubr.bf16.mxu0 %v5221_v2  ;;  %v8714_v16 = vld [vmem:[%s10025_s30 + $0x320] sm:$0xff]   ;;  %v8746_v2 = vld [vmem:[%s10025_s30 + $0x428] sm:$0xff]  }
 0x1ba   : > { %5728 = vmatprep.mubr.bf16.mxu1 %v5235_v3  ;;  %v8715_v17 = vld [vmem:[%s10025_s30 + $0x3a0] sm:$0xff]   ;;  %v8747_v3 = vld [vmem:[%s10025_s30 + $0x4a8] sm:$0xff]  }
 0x1bb   : > { %8273 = vmatpush3.bf16.msra.mxu0 %v8670_v18  ;;  %v8716_v18 = vld [vmem:[%s10025_s30 + $0x358] sm:$0xff]  }
 0x1bc   : > { %8295 = vmatpush3.bf16.msra.mxu1 %v8671_v19  ;;  %8274 = vmatprep.subr.bf16.mxu0 %v8672_v20  ;;  %v8717_v19 = vld [vmem:[%s10025_s30 + $0x3d8] sm:$0xff]  }
 0x1bd   : > { %8296 = vmatprep.subr.bf16.mxu1 %v8673_v21  ;;  %v8718_v20 = vld [vmem:[%s10025_s30 + $0x318] sm:$0xff]  }
 0x1be   : > { %v8719_v21 = vld [vmem:[%s10025_s30 + $0x398] sm:$0xff]  }
 0x1bf   : > { %8275 = vmatpush3.bf16.msra.mxu0 %v8674_v22  ;;  %v8720_v22 = vld [vmem:[%s10025_s30 + $0x350] sm:$0xff]  }
 0x1c0   : > { %8297 = vmatpush3.bf16.msra.mxu1 %v8675_v23  ;;  %8276 = vmatprep.subr.bf16.mxu0 %v8676_v24  ;;  %v8721_v23 = vld [vmem:[%s10025_s30 + $0x3d0] sm:$0xff]  }
 0x1c1   : > { %8298 = vmatprep.subr.bf16.mxu1 %v8677_v25  ;;  %v8722_v24 = vld [vmem:[%s10025_s30 + $0x310] sm:$0xff]  }
 0x1c2   : > { %v8723_v25 = vld [vmem:[%s10025_s30 + $0x390] sm:$0xff]  }
 0x1c3   : > { %8277 = vmatpush3.bf16.msra.mxu0 %v8678_v26  ;;  %v8724_v26 = vld [vmem:[%s10025_s30 + $0x348] sm:$0xff]  }
 0x1c4   : > { %8299 = vmatpush3.bf16.msra.mxu1 %v8679_v27  ;;  %8278 = vmatprep.subr.bf16.mxu0 %v8680_v28  ;;  %v8725_v27 = vld [vmem:[%s10025_s30 + $0x3c8] sm:$0xff]  }
 0x1c5   : > { %8300 = vmatprep.subr.bf16.mxu1 %v8681_v29  ;;  %v8726_v28 = vld [vmem:[%s10025_s30 + $0x308] sm:$0xff]  }
 0x1c6   : > { %v8727_v29 = vld [vmem:[%s10025_s30 + $0x388] sm:$0xff]  }
 0x1c7   : > { %8279 = vmatpush3.bf16.msra.mxu0 %v8682_v30  ;;  %v8728_v30 = vld [vmem:[%s10025_s30 + $0x340] sm:$0xff]  }
 0x1c8   : > { %8301 = vmatpush3.bf16.msra.mxu1 %v8683_v31  ;;  %8280 = vmatprep.subr.bf16.mxu0 %v8684_v32  ;;  %v8729_v31 = vld [vmem:[%s10025_s30 + $0x3c0] sm:$0xff]  }
 0x1c9   : > { %8302 = vmatprep.subr.bf16.mxu1 %v8685_v33  ;;  %v8730_v32 = vld [vmem:[%s10025_s30 + $0x300] sm:$0xff]  }
 0x1ca   : > { %v8731_v33 = vld [vmem:[%s10025_s30 + $0x380] sm:$0xff]  }
 0x1cb   : > { %8281 = vmatpush3.bf16.msra.mxu0 %v8686_v34  ;;  %v5057_v34 = vld [vmem:[%s10065_s6 + $0x10] sm:$0xff] }
 0x1cc   : > { %8303 = vmatpush3.bf16.msra.mxu1 %v8687_v35  ;;  %8282 = vmatprep.subr.bf16.mxu0 %v8688_v36  ;;  %v7711_v35 = vcombine.low %v5057_v34, %v5057_v34  ;;  %v7712_v36 = vcombine.high %v5057_v34, %v5057_v34 }
 0x1cd   : > { %8304 = vmatprep.subr.bf16.mxu1 %v8689_v37  ;;  %v5058_v37 = vld [vmem:[%s10065_s6 + $0x18] sm:$0xff] }
 0x1ce   : > { %v5239_v44 = vshll.u32 %v7711_v35, 16 }
 0x1cf   : > { %8283 = vmatpush3.bf16.msra.mxu0 %v8690_v38  ;;  %v7713_v38 = vcombine.low %v5058_v37, %v5058_v37 }
 0x1d0   : > { %8305 = vmatpush3.bf16.msra.mxu1 %v8691_v39  ;;  %8284 = vmatprep.subr.bf16.mxu0 %v8692_v40  ;;  %v7714_v39 = vcombine.high %v5058_v37, %v5058_v37  ;;  %v8736_v40 = vld [vmem:[%s10025_s30 + $0x478] sm:$0xff]  }
 0x1d1   : > { %8306 = vmatprep.subr.bf16.mxu1 %v8693_v41  ;;  %v5244_v41 = vshrl.u32 %v7712_v36, 16  ;;  %v5251_v48 = vshrl.u32 %v7713_v38, 16  ;;  %v5253_v49 = vshll.u32 %v7713_v38, 16 }
 0x1d2   : > { %v5258_v46 = vshrl.u32 %v7714_v39, 16  ;;  %v5260_v47 = vshll.u32 %v7714_v39, 16 }
 0x1d3   : > { %8285 = vmatpush3.bf16.msra.mxu0 %v8694_v42  ;;  %v5246_v42 = vshll.u32 %v7712_v36, 16  ;;  %v5255_v54 = vrot.slane %v5253_v49, 1 }
 0x1d4   : > { %8307 = vmatpush3.bf16.msra.mxu1 %v8695_v43  ;;  %8314 = vmatprep.subr.bf16.mxu0 %v8700_v50  ;;  %v5237_v43 = vshrl.u32 %v7711_v35, 16  ;;  %v5262_v53 = vrot.slane %v5260_v47, 1 }
 0x1d5   : > { %8336 = vmatprep.subr.bf16.mxu1 %v8701_v51  ;;  %v5248_v50 = vrot.slane %v5246_v42, 1  ;;  %v5241_v51 = vrot.slane %v5239_v44, 1  ;;  %v5256_v60 = vor.u32 %v5255_v54, %v5251_v48 }
 0x1d6   : > { %5689 = vmatmul.mubr.bf16.vlgmr.msra.gmra.mxu0 %v5214_v5  ;;  %v5263_v59 = vor.u32 %v5262_v53, %v5258_v46  ;;  %v8749_v5 = vld [vmem:[%s10025_s30 + $0x4e0] sm:$0xff]   ;;  %v8770_v46 = vld [vmem:[%s10025_s30 + $0x538] sm:$0xff]  }
 0x1d7   : > { %5729 = vmatmul.mubr.bf16.vlgmr.msra.gmra.mxu1 %v5228_v6  ;;  %8315 = vmatpush3.bf16.msra.mxu0 %v8702_v62  ;;  %v5249_v57 = vor.u32 %v5248_v50, %v5244_v41  ;;  %v5242_v58 = vor.u32 %v5241_v51, %v5237_v43  ;;  %v8742_v62 = vld [vmem:[%s10025_s30 + $0x430] sm:$0xff]   ;;  %v8750_v6 = vld [vmem:[%s10025_s30 + $0x420] sm:$0xff]   ;;  %v8771_v51 = vld [vmem:[%s10025_s30 + $0x5b8] sm:$0xff]  }
 0x1d8   : > { %8337 = vmatpush3.bf16.msra.mxu1 %v8703_v63  ;;  %8316 = vmatprep.subr.bf16.mxu0 %v8704_v4  ;;  %v8743_v63 = vld [vmem:[%s10025_s30 + $0x4b0] sm:$0xff]   ;;  %v8748_v4 = vld [vmem:[%s10025_s30 + $0x460] sm:$0xff]  }
 0x1d9   : > { %8338 = vmatprep.subr.bf16.mxu1 %v8705_v7  ;;  %5768 = vmatprep.mubr.bf16.mxu0 %v5249_v57  ;;  %v8751_v7 = vld [vmem:[%s10025_s30 + $0x4a0] sm:$0xff]   ;;  %v8773_v57 = vld [vmem:[%s10025_s30 + $0x5f0] sm:$0xff]  }
 0x1da   : > { %5808 = vmatprep.mubr.bf16.mxu1 %v5263_v59  ;;  %v8775_v59 = vld [vmem:[%s10025_s30 + $0x5b0] sm:$0xff]  }
 0x1db   : > { %8317 = vmatpush3.bf16.msra.mxu0 %v8706_v8  ;;  %v8752_v8 = vld [vmem:[%s10025_s30 + $0x458] sm:$0xff]  }
 0x1dc   : > { %8339 = vmatpush3.bf16.msra.mxu1 %v8707_v9  ;;  %8318 = vmatprep.subr.bf16.mxu0 %v8708_v10  ;;  %v8753_v9 = vld [vmem:[%s10025_s30 + $0x4d8] sm:$0xff]  }
 0x1dd   : > { %8340 = vmatprep.subr.bf16.mxu1 %v8709_v11  ;;  %v8754_v10 = vld [vmem:[%s10025_s30 + $0x418] sm:$0xff]  }
 0x1de   : > { %v8755_v11 = vld [vmem:[%s10025_s30 + $0x498] sm:$0xff]  }
 0x1df   : > { %8319 = vmatpush3.bf16.msra.mxu0 %v8710_v12  ;;  %v8756_v12 = vld [vmem:[%s10025_s30 + $0x450] sm:$0xff]  }
 0x1e0   : > { %8341 = vmatpush3.bf16.msra.mxu1 %v8711_v13  ;;  %8320 = vmatprep.subr.bf16.mxu0 %v8712_v14  ;;  %v8757_v13 = vld [vmem:[%s10025_s30 + $0x4d0] sm:$0xff]  }
 0x1e1   : > { %8342 = vmatprep.subr.bf16.mxu1 %v8713_v15  ;;  %v8758_v14 = vld [vmem:[%s10025_s30 + $0x410] sm:$0xff]  }
 0x1e2   : > { %v8759_v15 = vld [vmem:[%s10025_s30 + $0x490] sm:$0xff]  }
 0x1e3   : > { %8321 = vmatpush3.bf16.msra.mxu0 %v8714_v16  ;;  %v8760_v16 = vld [vmem:[%s10025_s30 + $0x448] sm:$0xff]  }
 0x1e4   : > { %8343 = vmatpush3.bf16.msra.mxu1 %v8715_v17  ;;  %8322 = vmatprep.subr.bf16.mxu0 %v8716_v18  ;;  %v8761_v17 = vld [vmem:[%s10025_s30 + $0x4c8] sm:$0xff]  }
 0x1e5   : > { %8344 = vmatprep.subr.bf16.mxu1 %v8717_v19  ;;  %v8762_v18 = vld [vmem:[%s10025_s30 + $0x408] sm:$0xff]  }
 0x1e6   : > { %v8763_v19 = vld [vmem:[%s10025_s30 + $0x488] sm:$0xff]  }
 0x1e7   : > { %8323 = vmatpush3.bf16.msra.mxu0 %v8718_v20  ;;  %v8764_v20 = vld [vmem:[%s10025_s30 + $0x440] sm:$0xff]  }
 0x1e8   : > { %8345 = vmatpush3.bf16.msra.mxu1 %v8719_v21  ;;  %8324 = vmatprep.subr.bf16.mxu0 %v8720_v22  ;;  %v8765_v21 = vld [vmem:[%s10025_s30 + $0x4c0] sm:$0xff]  }
 0x1e9   : > { %8346 = vmatprep.subr.bf16.mxu1 %v8721_v23  ;;  %v8766_v22 = vld [vmem:[%s10025_s30 + $0x400] sm:$0xff]  }
 0x1ea   : > { %v8767_v23 = vld [vmem:[%s10025_s30 + $0x480] sm:$0xff]  }
 0x1eb   : > { %8325 = vmatpush3.bf16.msra.mxu0 %v8722_v24  ;;  %v5819_v24 = vld [vmem:[%s10065_s6] sm:$0xee] }
 0x1ec   : > { %8347 = vmatpush3.bf16.msra.mxu1 %v8723_v25  ;;  %8326 = vmatprep.subr.bf16.mxu0 %v8724_v26  ;;  %v5823_v25 = vld [vmem:[%s10065_s6 + $0x20] sm:$0x11]  ;;  %v5820_v26 = vld [vmem:[%s10065_s6 + $0x8] sm:$0xee] }
 0x1ed   : > { %8348 = vmatprep.subr.bf16.mxu1 %v8725_v27  ;;  %v5824_v27 = vld [vmem:[%s10065_s6 + $0x28] sm:$0x11] }
 0x1ef   : > { %8327 = vmatpush3.bf16.msra.mxu0 %v8726_v28  ;;  %v7907_v28 = vcombine.low %v5819_v24, %v5823_v25 }
 0x1f0   : > { %8349 = vmatpush3.bf16.msra.mxu1 %v8727_v29  ;;  %8328 = vmatprep.subr.bf16.mxu0 %v8728_v30  ;;  %v7908_v29 = vcombine.high %v5819_v24, %v5823_v25  ;;  %v7909_v30 = vcombine.low %v5820_v26, %v5824_v27  ;;  %v5822_v24 = vld [vmem:[%s10065_s6 + $0x18] sm:$0xee]  ;;  %v5826_v25 = vld [vmem:[%s10065_s6 + $0x38] sm:$0x11] }
 0x1f1   : > { %8350 = vmatprep.subr.bf16.mxu1 %v8729_v31  ;;  %v8768_v31 = vld [vmem:[%s10025_s30 + $0x578] sm:$0xff]   ;;  %v5989_v36 = vshrl.u32 %v7907_v28, 16  ;;  %v5992_v37 = vshll.u32 %v7907_v28, 16 }
 0x1f2   : > { %v5997_v34 = vshrl.u32 %v7908_v29, 16  ;;  %v6000_v35 = vshll.u32 %v7908_v29, 16  ;;  %v6008_v41 = vshll.u32 %v7909_v30, 16  ;;  %v8800_v28 = vld [vmem:[%s10025_s30 + $0x678] sm:$0xff]  }
 0x1f3   : > { %8329 = vmatpush3.bf16.msra.mxu0 %v8730_v32  ;;  %v7910_v32 = vcombine.high %v5820_v26, %v5824_v27  ;;  %v5991_v44 = vrot.slane %v5989_v36, 1  ;;  %v7913_v26 = vcombine.low %v5822_v24, %v5826_v25  ;;  %v7914_v27 = vcombine.high %v5822_v24, %v5826_v25  ;;  %v6607_v24 = vld [vmem:[%s10065_s6] sm:$0xcc]  ;;  %v6611_v25 = vld [vmem:[%s10065_s6 + $0x20] sm:$0x11] }
 0x1f4   : > { %8351 = vmatpush3.bf16.msra.mxu1 %v8731_v33  ;;  %8358 = vmatprep.subr.bf16.mxu0 %v8736_v40  ;;  %v8769_v33 = vld [vmem:[%s10025_s30 + $0x5f8] sm:$0xff]   ;;  %v6005_v40 = vshrl.u32 %v7909_v30, 16  ;;  %v5999_v42 = vrot.slane %v5997_v34, 1  ;;  %v6002_v43 = vrot.slane %v6000_v35, 2  ;;  %v6010_v50 = vrot.slane %v6008_v41, 2 }
 0x1f5   : > { %8380 = vmatprep.subr.bf16.mxu1 %v8737_v45  ;;  %v6013_v38 = vshrl.u32 %v7910_v32, 16  ;;  %v6016_v39 = vshll.u32 %v7910_v32, 16  ;;  %v5994_v45 = vrot.slane %v5992_v37, 2  ;;  %v6048_v34 = vshll.u32 %v7914_v27, 16  ;;  %v8801_v37 = vld [vmem:[%s10025_s30 + $0x6f8] sm:$0xff]  }
 0x1f6   : > { %5769 = vmatmul.mubr.bf16.vlgmr.msra.gmra.mxu0 %v5242_v58  ;;  %v6007_v49 = vrot.slane %v6005_v40, 1  ;;  %v8774_v58 = vld [vmem:[%s10025_s30 + $0x530] sm:$0xff]   ;;  %v6037_v35 = vshrl.u32 %v7913_v26, 16  ;;  %v6040_v36 = vshll.u32 %v7913_v26, 16  ;;  %v6608_v26 = vld [vmem:[%s10065_s6 + $0x8] sm:$0xcc] }
 0x1f7   : > { %5809 = vmatmul.mubr.bf16.vlgmr.msra.gmra.mxu1 %v5256_v60  ;;  %8359 = vmatpush3.bf16.msra.mxu0 %v8738_v52  ;;  %v6015_v47 = vrot.slane %v6013_v38, 1  ;;  %v6018_v48 = vrot.slane %v6016_v39, 2  ;;  %v6003_v52 = vor.u32 %v6002_v43, %v5999_v42  ;;  %v5995_v53 = vor.u32 %v5994_v45, %v5991_v44  ;;  %v8776_v60 = vld [vmem:[%s10025_s30 + $0x568] sm:$0xff]   ;;  %v8802_v42 = vld [vmem:[%s10025_s30 + $0x638] sm:$0xff]  }
 0x1f8   : > { %8381 = vmatpush3.bf16.msra.mxu1 %v8739_v55  ;;  %8360 = vmatprep.subr.bf16.mxu0 %v8740_v56  ;;  %v6011_v55 = vor.u32 %v6010_v50, %v6007_v49  ;;  %v8772_v56 = vld [vmem:[%s10025_s30 + $0x570] sm:$0xff]   ;;  %v6050_v44 = vrot.slane %v6048_v34, 2  ;;  %v6039_v45 = vrot.slane %v6037_v35, 1  ;;  %v8803_v49 = vld [vmem:[%s10025_s30 + $0x6b8] sm:$0xff]  }
 0x1f9   : > { %8382 = vmatprep.subr.bf16.mxu1 %v8741_v61  ;;  %v6019_v54 = vor.u32 %v6018_v48, %v6015_v47  ;;  %6476 = vmatprep.mubr.bf16.mxu0 %v6003_v52  ;;  %v8777_v61 = vld [vmem:[%s10025_s30 + $0x5e8] sm:$0xff]   ;;  %v8804_v52 = vld [vmem:[%s10025_s30 + $0x670] sm:$0xff]   ;;  %v8833_v35 = vld [vmem:[%s10025_s30 + $0x7f8] sm:$0xff]  }
 0x1fb   : > { %8361 = vmatpush3.bf16.msra.mxu0 %v8742_v62  ;;  %6516 = vmatprep.mubr.bf16.mxu1 %v6019_v54  ;;  %v8778_v62 = vld [vmem:[%s10025_s30 + $0x528] sm:$0xff]   ;;  %v8806_v54 = vld [vmem:[%s10025_s30 + $0x630] sm:$0xff]  }
 0x1fc   : > { %8383 = vmatpush3.bf16.msra.mxu1 %v8743_v63  ;;  %8362 = vmatprep.subr.bf16.mxu0 %v8744_v0  ;;  %v8779_v63 = vld [vmem:[%s10025_s30 + $0x5a8] sm:$0xff]   ;;  %v8780_v0 = vld [vmem:[%s10025_s30 + $0x560] sm:$0xff]  }
 0x1fd   : > { %8384 = vmatprep.subr.bf16.mxu1 %v8745_v1  ;;  %v8781_v1 = vld [vmem:[%s10025_s30 + $0x5e0] sm:$0xff]  }
 0x1ff   : > { %8363 = vmatpush3.bf16.msra.mxu0 %v8746_v2  ;;  %v8782_v2 = vld [vmem:[%s10025_s30 + $0x520] sm:$0xff]  }
 0x200   : > { %8385 = vmatpush3.bf16.msra.mxu1 %v8747_v3  ;;  %8364 = vmatprep.subr.bf16.mxu0 %v8748_v4  ;;  %v8783_v3 = vld [vmem:[%s10025_s30 + $0x5a0] sm:$0xff]   ;;  %v8784_v4 = vld [vmem:[%s10025_s30 + $0x558] sm:$0xff]  }
 0x201   : > { %8386 = vmatprep.subr.bf16.mxu1 %v8749_v5  ;;  %v8785_v5 = vld [vmem:[%s10025_s30 + $0x5d8] sm:$0xff]  }
 0x203   : > { %8365 = vmatpush3.bf16.msra.mxu0 %v8750_v6  ;;  %v8786_v6 = vld [vmem:[%s10025_s30 + $0x518] sm:$0xff]  }
 0x204   : > { %8387 = vmatpush3.bf16.msra.mxu1 %v8751_v7  ;;  %8366 = vmatprep.subr.bf16.mxu0 %v8752_v8  ;;  %v8787_v7 = vld [vmem:[%s10025_s30 + $0x598] sm:$0xff]   ;;  %v8788_v8 = vld [vmem:[%s10025_s30 + $0x550] sm:$0xff]  }
 0x205   : > { %8388 = vmatprep.subr.bf16.mxu1 %v8753_v9  ;;  %v8789_v9 = vld [vmem:[%s10025_s30 + $0x5d0] sm:$0xff]  }
 0x207   : > { %8367 = vmatpush3.bf16.msra.mxu0 %v8754_v10  ;;  %v8790_v10 = vld [vmem:[%s10025_s30 + $0x510] sm:$0xff]  }
 0x208   : > { %8389 = vmatpush3.bf16.msra.mxu1 %v8755_v11  ;;  %8368 = vmatprep.subr.bf16.mxu0 %v8756_v12  ;;  %v8791_v11 = vld [vmem:[%s10025_s30 + $0x590] sm:$0xff]   ;;  %v8792_v12 = vld [vmem:[%s10025_s30 + $0x548] sm:$0xff]  }
 0x209   : > { %8390 = vmatprep.subr.bf16.mxu1 %v8757_v13  ;;  %v8793_v13 = vld [vmem:[%s10025_s30 + $0x5c8] sm:$0xff]  }
 0x20b   : > { %8369 = vmatpush3.bf16.msra.mxu0 %v8758_v14  ;;  %v8794_v14 = vld [vmem:[%s10025_s30 + $0x508] sm:$0xff]  }
 0x20c   : > { %8391 = vmatpush3.bf16.msra.mxu1 %v8759_v15  ;;  %8370 = vmatprep.subr.bf16.mxu0 %v8760_v16  ;;  %v8795_v15 = vld [vmem:[%s10025_s30 + $0x588] sm:$0xff]   ;;  %v8796_v16 = vld [vmem:[%s10025_s30 + $0x540] sm:$0xff]  }
 0x20d   : > { %8392 = vmatprep.subr.bf16.mxu1 %v8761_v17  ;;  %v8797_v17 = vld [vmem:[%s10025_s30 + $0x5c0] sm:$0xff]  }
 0x20f   : > { %8371 = vmatpush3.bf16.msra.mxu0 %v8762_v18  ;;  %v8798_v18 = vld [vmem:[%s10025_s30 + $0x500] sm:$0xff]  }
 0x210   : > { %8393 = vmatpush3.bf16.msra.mxu1 %v8763_v19  ;;  %8372 = vmatprep.subr.bf16.mxu0 %v8764_v20  ;;  %v8799_v19 = vld [vmem:[%s10025_s30 + $0x580] sm:$0xff]   ;;  %v5821_v20 = vld [vmem:[%s10065_s6 + $0x10] sm:$0xee] }
 0x211   : > { %8394 = vmatprep.subr.bf16.mxu1 %v8765_v21  ;;  %v5825_v21 = vld [vmem:[%s10065_s6 + $0x30] sm:$0x11] }
 0x213   : > { %8373 = vmatpush3.bf16.msra.mxu0 %v8766_v22  ;;  %v7911_v22 = vcombine.low %v5821_v20, %v5825_v21 }
 0x214   : > { %8395 = vmatpush3.bf16.msra.mxu1 %v8767_v23  ;;  %8402 = vmatprep.subr.bf16.mxu0 %v8768_v31  ;;  %v7912_v23 = vcombine.high %v5821_v20, %v5825_v21 }
 0x215   : > { %8424 = vmatprep.subr.bf16.mxu1 %v8769_v33  ;;  %v6021_v31 = vshrl.u32 %v7911_v22, 16  ;;  %v6024_v32 = vshll.u32 %v7911_v22, 16  ;;  %v6045_v33 = vshrl.u32 %v7914_v27, 16  ;;  %v8830_v22 = vld [vmem:[%s10025_s30 + $0x600] sm:$0xff]   ;;  %v8107_v27 = vcombine.low %v6607_v24, %v6611_v25 }
 0x216   : > { %6477 = vmatmul.mubr.bf16.vlgmr.msra.gmra.mxu0 %v5995_v53  ;;  %v6029_v29 = vshrl.u32 %v7912_v23, 16  ;;  %v6032_v30 = vshll.u32 %v7912_v23, 16  ;;  %v8805_v53 = vld [vmem:[%s10025_s30 + $0x6f0] sm:$0xff]   ;;  %v8831_v23 = vld [vmem:[%s10025_s30 + $0x680] sm:$0xff]  }
 0x217   : > { %6517 = vmatmul.mubr.bf16.vlgmr.msra.gmra.mxu1 %v6011_v55  ;;  %8403 = vmatpush3.bf16.msra.mxu0 %v8770_v46  ;;  %v6023_v40 = vrot.slane %v6021_v31, 1  ;;  %v6026_v41 = vrot.slane %v6024_v32, 2  ;;  %v6047_v43 = vrot.slane %v6045_v33, 1  ;;  %v6042_v46 = vrot.slane %v6040_v36, 2  ;;  %v8807_v55 = vld [vmem:[%s10025_s30 + $0x6b0] sm:$0xff]   ;;  %v8832_v32 = vld [vmem:[%s10025_s30 + $0x778] sm:$0xff]  }
 0x218   : > { %8425 = vmatpush3.bf16.msra.mxu1 %v8771_v51  ;;  %8404 = vmatprep.subr.bf16.mxu0 %v8772_v56  ;;  %v6031_v38 = vrot.slane %v6029_v29, 1  ;;  %v6034_v39 = vrot.slane %v6032_v30, 2  ;;  %v8808_v56 = vld [vmem:[%s10025_s30 + $0x668] sm:$0xff]   ;;  %v6612_v29 = vld [vmem:[%s10065_s6 + $0x28] sm:$0x11]  ;;  %v6776_v33 = vrot.slane %v8107_v27, 2 }
 0x219   : > { %8426 = vmatprep.subr.bf16.mxu1 %v8773_v57  ;;  %v6027_v48 = vor.u32 %v6026_v41, %v6023_v40  ;;  %v6051_v50 = vor.u32 %v6050_v44, %v6047_v43  ;;  %v6043_v51 = vor.u32 %v6042_v46, %v6039_v45  ;;  %v8809_v57 = vld [vmem:[%s10025_s30 + $0x6e8] sm:$0xff]   ;;  %v8109_v30 = vcombine.low %v6608_v26, %v6612_v29  ;;  %v8834_v36 = vld [vmem:[%s10025_s30 + $0x738] sm:$0xff]   ;;  %v8836_v40 = vld [vmem:[%s10025_s30 + $0x770] sm:$0xff]  }
 0x21a   : > { %v6035_v47 = vor.u32 %v6034_v39, %v6031_v38  ;;  %v8110_v31 = vcombine.high %v6608_v26, %v6612_v29  ;;  %v8835_v39 = vld [vmem:[%s10025_s30 + $0x7b8] sm:$0xff]   ;;  %v8837_v41 = vld [vmem:[%s10025_s30 + $0x7f0] sm:$0xff]   ;;  %v8840_v44 = vld [vmem:[%s10025_s30 + $0x768] sm:$0xff]  }
 0x21b   : > { %8405 = vmatpush3.bf16.msra.mxu0 %v8774_v58  ;;  %6596 = vmatprep.mubr.bf16.mxu1 %v6051_v50  ;;  %v8810_v58 = vld [vmem:[%s10025_s30 + $0x628] sm:$0xff]   ;;  %v8839_v43 = vld [vmem:[%s10025_s30 + $0x7b0] sm:$0xff]   ;;  %v8846_v50 = vld [vmem:[%s10025_s30 + $0x720] sm:$0xff]  }
 0x21c   : > { %8427 = vmatpush3.bf16.msra.mxu1 %v8775_v59  ;;  %8406 = vmatprep.subr.bf16.mxu0 %v8776_v60  ;;  %v8811_v59 = vld [vmem:[%s10025_s30 + $0x6a8] sm:$0xff]   ;;  %v8812_v60 = vld [vmem:[%s10025_s30 + $0x660] sm:$0xff]   ;;  %v6779_v38 = vrot.slane %v8110_v31, 2 }
 0x21d   : > { %8428 = vmatprep.subr.bf16.mxu1 %v8777_v61  ;;  %6556 = vmatprep.mubr.bf16.mxu0 %v6035_v47  ;;  %v8813_v61 = vld [vmem:[%s10025_s30 + $0x6e0] sm:$0xff]   ;;  %v8841_v45 = vld [vmem:[%s10025_s30 + $0x7e8] sm:$0xff]  }
 0x21e   : > { %v8842_v46 = vld [vmem:[%s10025_s30 + $0x728] sm:$0xff]  }
 0x21f   : > { %8407 = vmatpush3.bf16.msra.mxu0 %v8778_v62  ;;  %v8814_v62 = vld [vmem:[%s10025_s30 + $0x620] sm:$0xff]   ;;  %v8843_v47 = vld [vmem:[%s10025_s30 + $0x7a8] sm:$0xff]  }
 0x220   : > { %8429 = vmatpush3.bf16.msra.mxu1 %v8779_v63  ;;  %8408 = vmatprep.subr.bf16.mxu0 %v8780_v0  ;;  %v8815_v63 = vld [vmem:[%s10025_s30 + $0x6a0] sm:$0xff]   ;;  %v8816_v0 = vld [vmem:[%s10025_s30 + $0x658] sm:$0xff]  }
 0x221   : > { %8430 = vmatprep.subr.bf16.mxu1 %v8781_v1  ;;  %v8817_v1 = vld [vmem:[%s10025_s30 + $0x6d8] sm:$0xff]  }
 0x223   : > { %8409 = vmatpush3.bf16.msra.mxu0 %v8782_v2  ;;  %v8818_v2 = vld [vmem:[%s10025_s30 + $0x618] sm:$0xff]  }
 0x224   : > { %8431 = vmatpush3.bf16.msra.mxu1 %v8783_v3  ;;  %8410 = vmatprep.subr.bf16.mxu0 %v8784_v4  ;;  %v8819_v3 = vld [vmem:[%s10025_s30 + $0x698] sm:$0xff]   ;;  %v8820_v4 = vld [vmem:[%s10025_s30 + $0x650] sm:$0xff]  }
 0x225   : > { %8432 = vmatprep.subr.bf16.mxu1 %v8785_v5  ;;  %v8821_v5 = vld [vmem:[%s10025_s30 + $0x6d0] sm:$0xff]  }
 0x227   : > { %8411 = vmatpush3.bf16.msra.mxu0 %v8786_v6  ;;  %v8822_v6 = vld [vmem:[%s10025_s30 + $0x610] sm:$0xff]  }
 0x228   : > { %8433 = vmatpush3.bf16.msra.mxu1 %v8787_v7  ;;  %8412 = vmatprep.subr.bf16.mxu0 %v8788_v8  ;;  %v8823_v7 = vld [vmem:[%s10025_s30 + $0x690] sm:$0xff]  }
 0x229   : > { %8434 = vmatprep.subr.bf16.mxu1 %v8789_v9 }
 0x22b   : > { %8413 = vmatpush3.bf16.msra.mxu0 %v8790_v10  ;;  %v8824_v10 = vld [vmem:[%s10025_s30 + $0x648] sm:$0xff]  }
 0x22c   : > { %8435 = vmatpush3.bf16.msra.mxu1 %v8791_v11  ;;  %8414 = vmatprep.subr.bf16.mxu0 %v8792_v12  ;;  %v8825_v11 = vld [vmem:[%s10025_s30 + $0x6c8] sm:$0xff]  }
 0x22d   : > { %8436 = vmatprep.subr.bf16.mxu1 %v8793_v13 }
 0x22f   : > { %8415 = vmatpush3.bf16.msra.mxu0 %v8794_v14  ;;  %v8826_v14 = vld [vmem:[%s10025_s30 + $0x608] sm:$0xff]  }
 0x230   : > { %8437 = vmatpush3.bf16.msra.mxu1 %v8795_v15  ;;  %8416 = vmatprep.subr.bf16.mxu0 %v8796_v16  ;;  %v8827_v15 = vld [vmem:[%s10025_s30 + $0x688] sm:$0xff]  }
 0x231   : > { %8438 = vmatprep.subr.bf16.mxu1 %v8797_v17 }
 0x233   : > { %8417 = vmatpush3.bf16.msra.mxu0 %v8798_v18  ;;  %v8828_v18 = vld [vmem:[%s10025_s30 + $0x640] sm:$0xff]  }
 0x234   : > { %8439 = vmatpush3.bf16.msra.mxu1 %v8799_v19  ;;  %8446 = vmatprep.subr.bf16.mxu0 %v8800_v28  ;;  %v8829_v19 = vld [vmem:[%s10025_s30 + $0x6c0] sm:$0xff]   ;;  %v8108_v28 = vcombine.high %v6607_v24, %v6611_v25 }
 0x235   : > { %8468 = vmatprep.subr.bf16.mxu1 %v8801_v37  ;;  %v6778_v37 = vrot.slane %v8109_v30, 2 }
 0x236   : > { %6557 = vmatmul.mubr.bf16.vlgmr.msra.gmra.mxu0 %v6027_v48  ;;  %v6777_v34 = vrot.slane %v8108_v28, 2  ;;  %v8844_v48 = vld [vmem:[%s10025_s30 + $0x760] sm:$0xff]  }
 0x237   : > { %6597 = vmatmul.mubr.bf16.vlgmr.msra.gmra.mxu1 %v6043_v51  ;;  %8447 = vmatpush3.bf16.msra.mxu0 %v8802_v42  ;;  %v8838_v42 = vld [vmem:[%s10025_s30 + $0x730] sm:$0xff]   ;;  %v8847_v51 = vld [vmem:[%s10025_s30 + $0x7a0] sm:$0xff]  }
 0x238   : > { %8469 = vmatpush3.bf16.msra.mxu1 %v8803_v49  ;;  %8448 = vmatprep.subr.bf16.mxu0 %v8804_v52  ;;  %v8845_v49 = vld [vmem:[%s10025_s30 + $0x7e0] sm:$0xff]   ;;  %v8848_v52 = vld [vmem:[%s10025_s30 + $0x758] sm:$0xff]  }
 0x239   : > { %8470 = vmatprep.subr.bf16.mxu1 %v8805_v53  ;;  %7208 = vmatprep.mubr.bf16.mxu0 %v6777_v34  ;;  %v8849_v53 = vld [vmem:[%s10025_s30 + $0x7d8] sm:$0xff]  }
 0x23a   : > { %7248 = vmatprep.mubr.bf16.mxu1 %v6779_v38 }
 0x23b   : > { %8449 = vmatpush3.bf16.msra.mxu0 %v8806_v54  ;;  %v8850_v54 = vld [vmem:[%s10025_s30 + $0x718] sm:$0xff]  }
 0x23c   : > { %8471 = vmatpush3.bf16.msra.mxu1 %v8807_v55  ;;  %8450 = vmatprep.subr.bf16.mxu0 %v8808_v56  ;;  %v8851_v55 = vld [vmem:[%s10025_s30 + $0x798] sm:$0xff]   ;;  %v8852_v56 = vld [vmem:[%s10025_s30 + $0x750] sm:$0xff]  }
 0x23d   : > { %8472 = vmatprep.subr.bf16.mxu1 %v8809_v57 }
 0x23f   : > { %8451 = vmatpush3.bf16.msra.mxu0 %v8810_v58 }
 0x240   : > { %8473 = vmatpush3.bf16.msra.mxu1 %v8811_v59  ;;  %8452 = vmatprep.subr.bf16.mxu0 %v8812_v60  ;;  %v8853_v59 = vld [vmem:[%s10025_s30 + $0x7d0] sm:$0xff]  }
 0x241   : > { %8474 = vmatprep.subr.bf16.mxu1 %v8813_v61  ;;  %v8854_v60 = vld [vmem:[%s10025_s30 + $0x710] sm:$0xff]  }
 0x243   : > { %8453 = vmatpush3.bf16.msra.mxu0 %v8814_v62 }
 0x244   : > { %8475 = vmatpush3.bf16.msra.mxu1 %v8815_v63  ;;  %8454 = vmatprep.subr.bf16.mxu0 %v8816_v0  ;;  %v8855_v63 = vld [vmem:[%s10025_s30 + $0x790] sm:$0xff]   ;;  %v8856_v0 = vld [vmem:[%s10025_s30 + $0x748] sm:$0xff]  }
 0x245   : > { %8476 = vmatprep.subr.bf16.mxu1 %v8817_v1 }
 0x247   : > { %8455 = vmatpush3.bf16.msra.mxu0 %v8818_v2 }
 0x248   : > { %8477 = vmatpush3.bf16.msra.mxu1 %v8819_v3  ;;  %8456 = vmatprep.subr.bf16.mxu0 %v8820_v4  ;;  %v8857_v4 = vld [vmem:[%s10025_s30 + $0x7c8] sm:$0xff]  }
 0x249   : > { %8478 = vmatprep.subr.bf16.mxu1 %v8821_v5 }
 0x24b   : > { %8457 = vmatpush3.bf16.msra.mxu0 %v8822_v6 }
 0x24c   : > { %8479 = vmatpush3.bf16.msra.mxu1 %v8823_v7  ;;  %8458 = vmatprep.subr.bf16.mxu0 %v8824_v10  ;;  %v8858_v7 = vld [vmem:[%s10025_s30 + $0x708] sm:$0xff]  }
 0x24d   : > { %8480 = vmatprep.subr.bf16.mxu1 %v8825_v11  ;;  %v8859_v10 = vld [vmem:[%s10025_s30 + $0x788] sm:$0xff]  }
 0x24f   : > { %8459 = vmatpush3.bf16.msra.mxu0 %v8826_v14 }
 0x250   : > { %8481 = vmatpush3.bf16.msra.mxu1 %v8827_v15  ;;  %8460 = vmatprep.subr.bf16.mxu0 %v8828_v18  ;;  %v8861_v15 = vld [vmem:[%s10025_s30 + $0x7c0] sm:$0xff]  }
 0x251   : > { %8482 = vmatprep.subr.bf16.mxu1 %v8829_v19  ;;  %v8863_v18 = vld [vmem:[%s10025_s30 + $0x780] sm:$0xff]   ;;  %v6609_v19 = vld [vmem:[%s10065_s6 + $0x10] sm:$0xcc] }
 0x253   : > { %8461 = vmatpush3.bf16.msra.mxu0 %v8830_v22  ;;  %v6614_v22 = vld [vmem:[%s10065_s6 + $0x38] sm:$0x11] }
 0x254   : > { %8483 = vmatpush3.bf16.msra.mxu1 %v8831_v23  ;;  %8490 = vmatprep.subr.bf16.mxu0 %v8832_v32 }
 0x255   : > { %8512 = vmatprep.subr.bf16.mxu1 %v8833_v35 }
 0x256   : > { %v10269_v8 = vpop.f32.mrf.mxu0  ;;  %7209 = vmatmul.mubr.bf16.vlgmr.msra.gmra.mxu0 %v6776_v33 }
 0x257   : > { %v10271_v9 = vpop.f32.mrf.mxu1  ;;  %7249 = vmatmul.mubr.bf16.vlgmr.msra.gmra.mxu1 %v6778_v37  ;;  %8491 = vmatpush3.bf16.msra.mxu0 %v8834_v36 }
 0x258   : > { %v10275_v12 = vpop.f32.mrf.mxu0  ;;  %8513 = vmatpush3.bf16.msra.mxu1 %v8835_v39  ;;  %8492 = vmatprep.subr.bf16.mxu0 %v8836_v40 }
 0x259   : > { %v10277_v13 = vpop.f32.mrf.mxu1  ;;  %8514 = vmatprep.subr.bf16.mxu1 %v8837_v41  ;;  %v8200_v57 = vadd.f32 %v10275_v12, %v10269_v8  ;;  %v8860_v12 = vld [vmem:[%s10025_s30 + $0x740] sm:$0xff]  }
 0x25a   : > { %v8201_v16 = vpop.f32.mrf.mxu0  ;;  %v8222_v58 = vadd.f32 %v10277_v13, %v10271_v9 }
 0x25b   : > { %v8223_v17 = vpop.f32.mrf.mxu1  ;;  %8493 = vmatpush3.bf16.msra.mxu0 %v8838_v42 }
 0x25c   : > { %v8202_v20 = vpop.f32.mrf.mxu0  ;;  %8515 = vmatpush3.bf16.msra.mxu1 %v8839_v43  ;;  %8494 = vmatprep.subr.bf16.mxu0 %v8840_v44  ;;  %v4969_v3 = vadd.f32 %v8222_v58, %v8200_v57  ;;  %v8862_v17 = vld [vmem:[%s10025_s30 + $0x700] sm:$0xff]  }
 0x25d   : > { %v8224_v21 = vpop.f32.mrf.mxu1  ;;  %8516 = vmatprep.subr.bf16.mxu1 %v8841_v45  ;;  %v6613_v20 = vld [vmem:[%s10065_s6 + $0x30] sm:$0x11] }
 0x25e   : > { %v6610_v21 = vld [vmem:[%s10065_s6 + $0x18] sm:$0xcc]  ;;  %v8111_v23 = vcombine.low %v6609_v19, %v6613_v20  ;;  %v8112_v24 = vcombine.high %v6609_v19, %v6613_v20 }
 0x25f   : > { %8495 = vmatpush3.bf16.msra.mxu0 %v8842_v46  ;;  %v8113_v25 = vcombine.low %v6610_v21, %v6614_v22  ;;  %v8114_v26 = vcombine.high %v6610_v21, %v6614_v22 }
 0x260   : > { %8517 = vmatpush3.bf16.msra.mxu1 %v8843_v47  ;;  %8496 = vmatprep.subr.bf16.mxu0 %v8844_v48  ;;  %v6780_v27 = vrot.slane %v8111_v23, 2  ;;  %v6781_v28 = vrot.slane %v8112_v24, 2 }
 0x261   : > { %8518 = vmatprep.subr.bf16.mxu1 %v8845_v49  ;;  %v6782_v29 = vrot.slane %v8113_v25, 2  ;;  %v6783_v30 = vrot.slane %v8114_v26, 2  ;;  %v7340_v25 = vlaneseq }
 0x262   : > { %7288 = vmatprep.mubr.bf16.mxu0 %v6781_v28 }
 0x263   : > { %8497 = vmatpush3.bf16.msra.mxu0 %v8846_v50  ;;  %7328 = vmatprep.mubr.bf16.mxu1 %v6783_v30  ;;  %v7341_v26 = vshrl.u32 %v7340_v25, 7 }
 0x264   : > { %8519 = vmatpush3.bf16.msra.mxu1 %v8847_v51  ;;  %8498 = vmatprep.subr.bf16.mxu0 %v8848_v52 }
 0x265   : > { %8520 = vmatprep.subr.bf16.mxu1 %v8849_v53 }
 0x267   : > { %8499 = vmatpush3.bf16.msra.mxu0 %v8850_v54 }
 0x268   : > { %8521 = vmatpush3.bf16.msra.mxu1 %v8851_v55  ;;  %8500 = vmatprep.subr.bf16.mxu0 %v8852_v56 }
 0x269   : > { %8522 = vmatprep.subr.bf16.mxu1 %v8853_v59 }
 0x26b   : > { %8501 = vmatpush3.bf16.msra.mxu0 %v8854_v60 }
 0x26c   : > { %8523 = vmatpush3.bf16.msra.mxu1 %v8855_v63  ;;  %8502 = vmatprep.subr.bf16.mxu0 %v8856_v0 }
 0x26d   : > { %8524 = vmatprep.subr.bf16.mxu1 %v8857_v4 }
 0x26f   : > { %8503 = vmatpush3.bf16.msra.mxu0 %v8858_v7 }
 0x270   : > { %8525 = vmatpush3.bf16.msra.mxu1 %v8859_v10  ;;  %8504 = vmatprep.subr.bf16.mxu0 %v8860_v12 }
 0x271   : > { %8526 = vmatprep.subr.bf16.mxu1 %v8861_v15 }
 0x273   : > { %8505 = vmatpush3.bf16.msra.mxu0 %v8862_v17 }
 0x274   : > { %8527 = vmatpush3.bf16.msra.mxu1 %v8863_v18 }
 0x276   : > { %v8242_v61 = vpop.f32.mrf.mxu0  ;;  %7289 = vmatmul.mubr.bf16.vlgmr.msra.gmra.mxu0 %v6780_v27  ;;  %v10329_v27 = vmul.u32.u64.low 2863311531, %v7341_v26  ;;  %v10330_v28 = vmul.u32.u64.high 2863311531, %v7341_v26, %v10329_v27 }
 0x277   : > { %v8264_v62 = vpop.f32.mrf.mxu1  ;;  %7329 = vmatmul.mubr.bf16.vlgmr.msra.gmra.mxu1 %v6782_v29 }
 0x278   : > { %v8243_v1 = vpop.f32.mrf.mxu0  ;;  %v7348_v29 = vshrl.u32 %v10330_v28, 1 }
 0x279   : > { %v8265_v2 = vpop.f32.mrf.mxu1  ;;  %v8244_v5 = vadd.f32 %v8243_v1, %v8242_v61 }
 0x27a   : > { %v8266_v6 = vadd.f32 %v8265_v2, %v8264_v62  ;;  %v8245_v8 = vpop.f32.mrf.mxu0 }
 0x27b   : > { %v8267_v9 = vpop.f32.mrf.mxu1  ;;  %v5009_v11 = vadd.f32 %v8244_v5, %v4969_v3 }
 0x27c   : > { %v8246_v13 = vpop.f32.mrf.mxu0 }
 0x27d   : > { %v8268_v14 = vpop.f32.mrf.mxu1  ;;  %v5049_v16 = vadd.f32 %v8266_v6, %v5009_v11 }
 0x27f   : > { %5054 = vst [vmem:[#allocation2] sm:$0x3f] %v5049_v16 }
 0x286   : > { %v5816_v54 = vld [vmem:[#allocation2] sm:$0x3f] }
 0x296   : > { %v8286_v31 = vpop.f32.mrf.mxu0 }
 0x297   : > { %v8308_v32 = vpop.f32.mrf.mxu1 }
 0x298   : > { %v8287_v33 = vpop.f32.mrf.mxu0 }
 0x299   : > { %v8309_v34 = vpop.f32.mrf.mxu1  ;;  %v8288_v39 = vadd.f32 %v8287_v33, %v8286_v31 }
 0x29a   : > { %v8289_v35 = vpop.f32.mrf.mxu0  ;;  %v8310_v40 = vadd.f32 %v8309_v34, %v8308_v32  ;;  %v7349_v32 = vmul.u32 3, %v7348_v29 }
 0x29b   : > { %v8311_v36 = vpop.f32.mrf.mxu1 }
 0x29c   : > { %v8290_v37 = vpop.f32.mrf.mxu0  ;;  %v5731_v44 = vadd.f32 %v8310_v40, %v8288_v39  ;;  %v7350_v39 = vsub.s32 %v7341_v26, %v7349_v32 }
 0x29d   : > { %v8312_v38 = vpop.f32.mrf.mxu1 }
 0x29e   : > { %vm7353_vm0 = vcmp.ne.s32.totalorder %v7350_v39, 0  ;;  %vm7354_vm1 = vcmp.lt.s32.totalorder %v7350_v39, 0 }
 0x29f   : > { %vm7355_vm2 = vmand %vm7354_vm1, %vm7353_vm0 }
 0x2b6   : > { %v8330_v41 = vpop.f32.mrf.mxu0 }
 0x2b7   : > { %v8352_v42 = vpop.f32.mrf.mxu1 }
 0x2b8   : > { %v8331_v43 = vpop.f32.mrf.mxu0 }
 0x2b9   : > { %v8332_v45 = vadd.f32 %v8331_v43, %v8330_v41  ;;  %v8353_v46 = vpop.f32.mrf.mxu1 }
 0x2ba   : > { %v8354_v47 = vadd.f32 %v8353_v46, %v8352_v42  ;;  %v8333_v48 = vpop.f32.mrf.mxu0 }
 0x2bb   : > { %v5771_v49 = vadd.f32 %v8332_v45, %v5731_v44  ;;  %v8355_v50 = vpop.f32.mrf.mxu1 }
 0x2bc   : > { %v8334_v51 = vpop.f32.mrf.mxu0 }
 0x2bd   : > { %v5811_v52 = vadd.f32 %v8354_v47, %v5771_v49  ;;  %v8356_v53 = vpop.f32.mrf.mxu1  ;;  %v7356_v49 = vadd.s32 3, %v7350_v39 }
 0x2bf   : > { %v5817_v55 = vadd.f32 %v5816_v54, %v5811_v52  ;;  %v7357_v50 = vsel %vm7355_vm2, %v7356_v49, %v7350_v39 }
 0x2c0   : > { %vm7358_vm3 = vcmp.lt.s32.totalorder %v7357_v50, 2 }
 0x2c1   : > { %5818 = vst [vmem:[#allocation2] sm:$0x3f] %v5817_v55 }
 0x2c8   : > { %v6604_v15 = vld [vmem:[#allocation2] sm:$0x3f] }
 0x2d6   : > { %v8374_v56 = vpop.f32.mrf.mxu0 }
 0x2d7   : > { %v8396_v57 = vpop.f32.mrf.mxu1 }
 0x2d8   : > { %v8375_v58 = vpop.f32.mrf.mxu0 }
 0x2d9   : > { %v8397_v59 = vpop.f32.mrf.mxu1  ;;  %v8376_v0 = vadd.f32 %v8375_v58, %v8374_v56 }
 0x2da   : > { %v8377_v60 = vpop.f32.mrf.mxu0  ;;  %v8398_v1 = vadd.f32 %v8397_v59, %v8396_v57 }
 0x2db   : > { %v8399_v61 = vpop.f32.mrf.mxu1 }
 0x2dc   : > { %v8378_v62 = vpop.f32.mrf.mxu0  ;;  %v6519_v5 = vadd.f32 %v8398_v1, %v8376_v0 }
 0x2dd   : > { %v8400_v63 = vpop.f32.mrf.mxu1 }
 0x2f6   : > { %v8418_v2 = vpop.f32.mrf.mxu0 }
 0x2f7   : > { %v8440_v3 = vpop.f32.mrf.mxu1 }
 0x2f8   : > { %v8419_v4 = vpop.f32.mrf.mxu0 }
 0x2f9   : > { %v8420_v6 = vadd.f32 %v8419_v4, %v8418_v2  ;;  %v8441_v7 = vpop.f32.mrf.mxu1 }
 0x2fa   : > { %v8442_v8 = vadd.f32 %v8441_v7, %v8440_v3  ;;  %v8421_v9 = vpop.f32.mrf.mxu0 }
 0x2fb   : > { %v6559_v10 = vadd.f32 %v8420_v6, %v6519_v5  ;;  %v8443_v11 = vpop.f32.mrf.mxu1 }
 0x2fc   : > { %v8422_v12 = vpop.f32.mrf.mxu0 }
 0x2fd   : > { %v6599_v13 = vadd.f32 %v8442_v8, %v6559_v10  ;;  %v8444_v14 = vpop.f32.mrf.mxu1 }
 0x2ff   : > { %v6605_v16 = vadd.f32 %v6604_v15, %v6599_v13 }
 0x301   : > { %6606 = vst [vmem:[#allocation2] sm:$0x3f] %v6605_v16 }
 0x308   : > { %v7336_v47 = vld [vmem:[#allocation2] sm:$0x3f] }
 0x316   : > { %v8462_v17 = vpop.f32.mrf.mxu0 }
 0x317   : > { %v8484_v18 = vpop.f32.mrf.mxu1 }
 0x318   : > { %v8463_v19 = vpop.f32.mrf.mxu0 }
 0x319   : > { %v8485_v20 = vpop.f32.mrf.mxu1  ;;  %v8464_v30 = vadd.f32 %v8463_v19, %v8462_v17 }
 0x31a   : > { %v8465_v21 = vpop.f32.mrf.mxu0  ;;  %v8486_v31 = vadd.f32 %v8485_v20, %v8484_v18 }
 0x31b   : > { %v8487_v22 = vpop.f32.mrf.mxu1 }
 0x31c   : > { %v8466_v23 = vpop.f32.mrf.mxu0  ;;  %v7251_v37 = vadd.f32 %v8486_v31, %v8464_v30 }
 0x31d   : > { %v8488_v24 = vpop.f32.mrf.mxu1 }
 0x336   : > { %v8506_v33 = vpop.f32.mrf.mxu0 }
 0x337   : > { %v8528_v34 = vpop.f32.mrf.mxu1 }
 0x338   : > { %v8507_v35 = vpop.f32.mrf.mxu0 }
 0x339   : > { %v8529_v36 = vpop.f32.mrf.mxu1  ;;  %v8508_v38 = vadd.f32 %v8507_v35, %v8506_v33 }
 0x33a   : > { %v8509_v40 = vpop.f32.mrf.mxu0  ;;  %v8530_v43 = vadd.f32 %v8529_v36, %v8528_v34 }
 0x33b   : > { %v8531_v41 = vpop.f32.mrf.mxu1  ;;  %v7291_v42 = vadd.f32 %v8508_v38, %v7251_v37 }
 0x33c   : > { %v8510_v44 = vpop.f32.mrf.mxu0 }
 0x33d   : > { %v8532_v45 = vpop.f32.mrf.mxu1  ;;  %v7331_v46 = vadd.f32 %v8530_v43, %v7291_v42 }
 0x33f   : > { %v7337_v48 = vadd.f32 %v7336_v47, %v7331_v46 }
 0x341   : > { %7338 = vst [vmem:[#allocation2] sm:$0x3f] %v7337_v48 }
 0x348   : > { %v7339_v51 = vld [vmem:[#allocation2] sm:$0x3f] }
 0x349   : > { %v7361_v52 = vsel %vm7358_vm3, %v7339_v51, 0.0 }
 0x34a   : > { %v7363_v53 = vsel %vm7362_vm4, %v7361_v52, 0.0 }
 0x34b   : > { %v7364_v54 = vrot.slane %v7363_v53, 4 }
 0x34d   : > { %v7365_v55 = vadd.f32 %v7364_v54, %v7363_v53 }
 0x34f   : > { %v7366_v56 = vrot.slane %v7365_v55, 2 }
 0x351   : > { %v7367_v57 = vadd.f32 %v7366_v56, %v7365_v55 }
 0x353   : > { %v7368_v58 = vrot.slane %v7367_v57, 1 }
 0x355   : > { %v7369_v59 = vadd.f32 %v7368_v58, %v7367_v57 }
 0x357   : > { %v7370_v60 = vmul.f32 0.25, %v7369_v59 }
 0x359   : > { %v7371_v61 = vsub.f32 %v7339_v51, %v7370_v60 }
 0x35b   : > { %v7372_v62 = vsel %vm7358_vm3, %v7371_v61, 0.0 }
 0x35c   : > { %v7373_v63 = vmul.f32 %v7372_v62, %v7372_v62 }
 0x35e   : > { %v7374_v0 = vsel %vm7362_vm4, %v7373_v63, 0.0 }
 0x35f   : > { %v7375_v1 = vrot.slane %v7374_v0, 4 }
 0x361   : > { %v7376_v2 = vadd.f32 %v7375_v1, %v7374_v0 }
 0x363   : > { %v7377_v3 = vrot.slane %v7376_v2, 2 }
 0x365   : > { %v7378_v4 = vadd.f32 %v7377_v3, %v7376_v2 }
 0x367   : > { %v7379_v5 = vrot.slane %v7378_v4, 1 }
 0x369   : > { %v7380_v6 = vadd.f32 %v7379_v5, %v7378_v4 }
 0x36b   : > { %v7381_v7 = vmul.f32 0.25, %v7380_v6 }
 0x36d   : > { %v7382_v8 = vadd.f32 1e-05, %v7381_v7 }
 0x36f   : > { %8864 = vrsqrt.f32 %v7382_v8 }
 0x37c   : > { %v8865_v9 = vpop.eup %8864 }
 0x37d   : > { %v7384_v10 = vmul.f32 %v8865_v9, %v7371_v61 }
 0x37f   : > { %v7385_v11 = vmul.f32 0.2, %v7384_v10 }
 0x381   : > { %v7386_v12 = vmax.f32 %v7384_v10, %v7385_v11 }
 0x383   : > { %v7387_v13 = vpack.c.bf16 %v7386_v12, %v7386_v12 }
 0x385   : > { %7388 = vst [vmem:[%s4348_s21] sm:$0x7] %v7387_v13 }
 0x386 PF: > { %s12_s15 = sadd.s32 1, %s8920_s15   ;;  %s10363_s9 = smov %s8900_s10 }
 0x387   : > { %p9_p12 = scmp.ge.s32.totalorder %s12_s15, 10   ;;  %s10364_s10 = smov %s8986_s20 }
 0x388   : > { %s10365_s11 = smov %s8912_s13  ;;  %s10366_s12 = smov %s8916_s14 }
 0x389   : > { %s10367_s13 = smov %s10370_s16  ;;  %s10368_s14 = smov %s10374_s17 }
 0x38a   :  { %11 = sbr.rel (!%p9_p12) target bundleno = 4 (0x4), region = 125 }

// kernel: discriminator_forward.9
= control target key start
LH: loop header
LB: loop body
LE: loop exit
PB: predicated region body
PF: predicated region fallthrough
CT: control target
= control target key end

     0   :  { %s5349_s12 = smov 0   ;;  %s5351_s13 = smov 0   ;;  %s6325_s0 = inlined_call_operand.vmem [shape: bf16[2,18,512], index: 0, kind: input, shape index: {}]   ;;  %s6326_s1 = inlined_call_operand.vmem [shape: bf16[9,512,128], index: 1, kind: input, shape index: {}]   ;;  %s6327_s2 = inlined_call_operand.vmem [shape: f32[1,128], index: 2, kind: input, shape index: {}]   ;;  %s6328_s3 = inlined_call_operand.vmem [shape: f32[2,8,128], index: 3, kind: output, shape index: {}]  }
   0x1   :  { %s5353_s14 = smov 0  }
   0x2 LB: > { %s25_s15 = sadd.s32 1, %s5323_s13  ;;  %p3703_p0 = scmp.ge.s32.totalorder %s5327_s14, 1  ;;  %s5327_s14 = sphi %s5353_s14, %s13_s14   ;;  %s5323_s13 = sphi %s5351_s13, %s6330_s13   ;;  %s5319_s12 = sphi %s5349_s12, %s6329_s12  }
   0x3   : > { %p27_p1 = scmp.ge.s32.totalorder %s25_s15, 2  ;;  %p168_p2 = scmp.lt.s32.totalorder %s5327_s14, 3 }
   0x5   : > { %s6332_s15 = smov (%p27_p1, %s25_s15), 0  ;;  %p169_p3 = pnand %p3703_p0, %p168_p2 }
   0x6   : > { %p201_p4 = scmp.lt.s32.totalorder (!%p169_p3), %s5319_s12, 1 }
   0x7   : > { %172 = sbr.rel (%p169_p3) target bundleno = 552 (0x228), region = 32 }
   0xc   : > { %v4967_v0 = vld [vmem:[%s6326_s1 + $0x78] sm:$0xff]   ;;  %v4971_v4 = vld [vmem:[%s6326_s1 + $0x70] sm:$0xff]   ;;  %v4975_v8 = vld [vmem:[%s6326_s1 + $0x68] sm:$0xff]   ;;  %s6334_s12 = smov (!%p201_p4, %s5319_s12), 1 }
   0xd   : > { %v4968_v1 = vld [vmem:[%s6326_s1 + $0xf8] sm:$0xff]   ;;  %4546 = vmatprep.subr.bf16.mxu0 %v4967_v0  ;;  %v4972_v5 = vld [vmem:[%s6326_s1 + $0xf0] sm:$0xff]   ;;  %v4976_v9 = vld [vmem:[%s6326_s1 + $0xe8] sm:$0xff]   ;;  %s4942_s22 = smul.u32 48, %s6334_s12 }
   0xe   : > { %v4969_v2 = vld [vmem:[%s6326_s1 + $0x38] sm:$0xff]   ;;  %4568 = vmatprep.subr.bf16.mxu1 %v4968_v1  ;;  %v4973_v6 = vld [vmem:[%s6326_s1 + $0x30] sm:$0xff]   ;;  %v4977_v10 = vld [vmem:[%s6326_s1 + $0x28] sm:$0xff]  }
   0xf   : > { %v4970_v3 = vld [vmem:[%s6326_s1 + $0xb8] sm:$0xff]   ;;  %4547 = vmatpush3.bf16.msra.mxu0 %v4969_v2  ;;  %v4974_v7 = vld [vmem:[%s6326_s1 + $0xb0] sm:$0xff]   ;;  %v4978_v11 = vld [vmem:[%s6326_s1 + $0xa8] sm:$0xff]   ;;  %s5467_s6 = scalar_lea.vmem %s6325_s0, %s4942_s22  ;;  %s3705_s22 = sshll.u32 %s6334_s12, 3 }
  0x10   : > { %4569 = vmatpush3.bf16.msra.mxu1 %v4970_v3  ;;  %4548 = vmatprep.subr.bf16.mxu0 %v4971_v4  ;;  %v4979_v12 = vld [vmem:[%s6326_s1 + $0x60] sm:$0xff]   ;;  %v4983_v16 = vld [vmem:[%s6326_s1 + $0x58] sm:$0xff]   ;;  %v4987_v20 = vld [vmem:[%s6326_s1 + $0x50] sm:$0xff]   ;;  %s219_s25 = scalar_lea.vmem %s6328_s3, %s3705_s22 }
  0x11   : > { %4570 = vmatprep.subr.bf16.mxu1 %v4972_v5  ;;  %v4980_v13 = vld [vmem:[%s6326_s1 + $0xe0] sm:$0xff]   ;;  %v4984_v17 = vld [vmem:[%s6326_s1 + $0xd8] sm:$0xff]   ;;  %v4988_v21 = vld [vmem:[%s6326_s1 + $0xd0] sm:$0xff]  }
  0x12   : > { %v4981_v14 = vld [vmem:[%s6326_s1 + $0x20] sm:$0xff]   ;;  %v4985_v18 = vld [vmem:[%s6326_s1 + $0x18] sm:$0xff]   ;;  %v4989_v22 = vld [vmem:[%s6326_s1 + $0x10] sm:$0xff]  }
  0x13   : > { %4549 = vmatpush3.bf16.msra.mxu0 %v4973_v6  ;;  %v4982_v15 = vld [vmem:[%s6326_s1 + $0xa0] sm:$0xff]   ;;  %v4986_v19 = vld [vmem:[%s6326_s1 + $0x98] sm:$0xff]   ;;  %v4990_v23 = vld [vmem:[%s6326_s1 + $0x90] sm:$0xff]  }
  0x14   : > { %4571 = vmatpush3.bf16.msra.mxu1 %v4974_v7  ;;  %4550 = vmatprep.subr.bf16.mxu0 %v4975_v8  ;;  %v4991_v24 = vld [vmem:[%s6326_s1 + $0x48] sm:$0xff]   ;;  %v4995_v28 = vld [vmem:[%s6326_s1 + $0x40] sm:$0xff]   ;;  %v5003_v38 = vld [vmem:[%s6326_s1 + $0x178] sm:$0xff]  }
  0x15   : > { %4572 = vmatprep.subr.bf16.mxu1 %v4976_v9  ;;  %v4992_v25 = vld [vmem:[%s6326_s1 + $0xc8] sm:$0xff]   ;;  %v4996_v29 = vld [vmem:[%s6326_s1 + $0xc0] sm:$0xff]   ;;  %v5004_v39 = vld [vmem:[%s6326_s1 + $0x1f8] sm:$0xff]  }
  0x16   : > { %v4993_v26 = vld [vmem:[%s6326_s1 + $0x8] sm:$0xff]   ;;  %v4997_v30 = vld [vmem:[%s6326_s1] sm:$0xff]   ;;  %v5005_v40 = vld [vmem:[%s6326_s1 + $0x138] sm:$0xff]  }
  0x17   : > { %4551 = vmatpush3.bf16.msra.mxu0 %v4977_v10  ;;  %v4994_v27 = vld [vmem:[%s6326_s1 + $0x88] sm:$0xff]   ;;  %v4998_v31 = vld [vmem:[%s6326_s1 + $0x80] sm:$0xff]   ;;  %v5006_v41 = vld [vmem:[%s6326_s1 + $0x1b8] sm:$0xff]  }
  0x18   : > { %4573 = vmatpush3.bf16.msra.mxu1 %v4978_v11  ;;  %4552 = vmatprep.subr.bf16.mxu0 %v4979_v12  ;;  %v5476_v32 = vld [vmem:[%s5467_s6] sm:$0xff]  ;;  %v5479_v33 = vld [vmem:[%s5467_s6 + $0x8] sm:$0xff]  ;;  %v5007_v42 = vld [vmem:[%s6326_s1 + $0x170] sm:$0xff]  }
  0x19   : > { %4574 = vmatprep.subr.bf16.mxu1 %v4980_v13  ;;  %v3706_v34 = vcombine.low %v5476_v32, %v5476_v32  ;;  %v3707_v35 = vcombine.high %v5476_v32, %v5476_v32  ;;  %v3708_v36 = vcombine.low %v5479_v33, %v5479_v33  ;;  %v3709_v37 = vcombine.high %v5479_v33, %v5479_v33  ;;  %v5008_v43 = vld [vmem:[%s6326_s1 + $0x1f0] sm:$0xff]   ;;  %v5011_v46 = vld [vmem:[%s6326_s1 + $0x168] sm:$0xff]   ;;  %v5015_v50 = vld [vmem:[%s6326_s1 + $0x160] sm:$0xff]  }
  0x1a   : > { %v5009_v44 = vld [vmem:[%s6326_s1 + $0x130] sm:$0xff]   ;;  %v5012_v47 = vld [vmem:[%s6326_s1 + $0x1e8] sm:$0xff]   ;;  %v5016_v51 = vld [vmem:[%s6326_s1 + $0x1e0] sm:$0xff]  }
  0x1b   : > { %4553 = vmatpush3.bf16.msra.mxu0 %v4981_v14  ;;  %525 = vmatprep.mubr.bf16.mxu0 %v3707_v35  ;;  %v5010_v45 = vld [vmem:[%s6326_s1 + $0x1b0] sm:$0xff]   ;;  %v5013_v48 = vld [vmem:[%s6326_s1 + $0x128] sm:$0xff]   ;;  %v5017_v52 = vld [vmem:[%s6326_s1 + $0x120] sm:$0xff]  }
  0x1c   : > { %4575 = vmatpush3.bf16.msra.mxu1 %v4982_v15  ;;  %4554 = vmatprep.subr.bf16.mxu0 %v4983_v16  ;;  %v5014_v49 = vld [vmem:[%s6326_s1 + $0x1a8] sm:$0xff]   ;;  %v5018_v53 = vld [vmem:[%s6326_s1 + $0x1a0] sm:$0xff]   ;;  %v5019_v54 = vld [vmem:[%s6326_s1 + $0x158] sm:$0xff]  }
  0x1d   : > { %4576 = vmatprep.subr.bf16.mxu1 %v4984_v17  ;;  %565 = vmatprep.mubr.bf16.mxu1 %v3709_v37  ;;  %v5020_v55 = vld [vmem:[%s6326_s1 + $0x1d8] sm:$0xff]   ;;  %v5023_v58 = vld [vmem:[%s6326_s1 + $0x150] sm:$0xff]   ;;  %v5027_v62 = vld [vmem:[%s6326_s1 + $0x148] sm:$0xff]  }
  0x1e   : > { %v5021_v56 = vld [vmem:[%s6326_s1 + $0x118] sm:$0xff]   ;;  %v5024_v59 = vld [vmem:[%s6326_s1 + $0x1d0] sm:$0xff]   ;;  %v5028_v63 = vld [vmem:[%s6326_s1 + $0x1c8] sm:$0xff]  }
  0x1f   : > { %4555 = vmatpush3.bf16.msra.mxu0 %v4985_v18  ;;  %v5022_v57 = vld [vmem:[%s6326_s1 + $0x198] sm:$0xff]   ;;  %v5025_v60 = vld [vmem:[%s6326_s1 + $0x110] sm:$0xff]   ;;  %v5029_v0 = vld [vmem:[%s6326_s1 + $0x108] sm:$0xff]  }
  0x20   : > { %4577 = vmatpush3.bf16.msra.mxu1 %v4986_v19  ;;  %4556 = vmatprep.subr.bf16.mxu0 %v4987_v20  ;;  %v5026_v61 = vld [vmem:[%s6326_s1 + $0x190] sm:$0xff]   ;;  %v5030_v1 = vld [vmem:[%s6326_s1 + $0x188] sm:$0xff]   ;;  %v5031_v2 = vld [vmem:[%s6326_s1 + $0x140] sm:$0xff]  }
  0x21   : > { %4578 = vmatprep.subr.bf16.mxu1 %v4988_v21  ;;  %v5032_v3 = vld [vmem:[%s6326_s1 + $0x1c0] sm:$0xff]   ;;  %v576_v6 = vld [vmem:[%s5467_s6 + $0x10] sm:$0x11]  ;;  %v577_v9 = vld [vmem:[%s5467_s6 + $0x18] sm:$0x11] }
  0x22   : > { %v5033_v4 = vld [vmem:[%s6326_s1 + $0x100] sm:$0xff]   ;;  %v3806_v7 = vcombine.low %v5476_v32, %v576_v6  ;;  %v3807_v8 = vcombine.high %v5476_v32, %v576_v6  ;;  %v3808_v10 = vcombine.low %v5479_v33, %v577_v9  ;;  %v3809_v11 = vcombine.high %v5479_v33, %v577_v9  ;;  %v5039_v12 = vld [vmem:[%s6326_s1 + $0x278] sm:$0xff]   ;;  %v5044_v33 = vld [vmem:[%s6326_s1 + $0x2f0] sm:$0xff]  }
  0x23   : > { %4557 = vmatpush3.bf16.msra.mxu0 %v4989_v22  ;;  %v5034_v5 = vld [vmem:[%s6326_s1 + $0x180] sm:$0xff]   ;;  %v5040_v17 = vld [vmem:[%s6326_s1 + $0x2f8] sm:$0xff]   ;;  %v5046_v35 = vld [vmem:[%s6326_s1 + $0x2b0] sm:$0xff]  }
  0x24   : > { %4579 = vmatpush3.bf16.msra.mxu1 %v4990_v23  ;;  %4558 = vmatprep.subr.bf16.mxu0 %v4991_v24  ;;  %v667_v13 = vshrl.u32 %v3807_v8, 16  ;;  %v669_v14 = vshll.u32 %v3807_v8, 16  ;;  %v660_v15 = vshrl.u32 %v3806_v7, 16  ;;  %v662_v16 = vshll.u32 %v3806_v7, 16  ;;  %v5041_v24 = vld [vmem:[%s6326_s1 + $0x238] sm:$0xff]   ;;  %v5048_v37 = vld [vmem:[%s6326_s1 + $0x2e8] sm:$0xff]  }
  0x25   : > { %4580 = vmatprep.subr.bf16.mxu1 %v4992_v25  ;;  %v681_v18 = vshrl.u32 %v3809_v11, 16  ;;  %v683_v19 = vshll.u32 %v3809_v11, 16  ;;  %v674_v20 = vshrl.u32 %v3808_v10, 16  ;;  %v676_v21 = vshll.u32 %v3808_v10, 16  ;;  %v5080_v7 = vld [vmem:[%s6326_s1 + $0x3b8] sm:$0xff]   ;;  %v5081_v8 = vld [vmem:[%s6326_s1 + $0x370] sm:$0xff]  }
  0x26   : > { %v671_v22 = vrot.slane %v669_v14, 1  ;;  %v664_v23 = vrot.slane %v662_v16, 1  ;;  %v5082_v9 = vld [vmem:[%s6326_s1 + $0x3f0] sm:$0xff]   ;;  %v5087_v14 = vld [vmem:[%s6326_s1 + $0x328] sm:$0xff]   ;;  %v5089_v16 = vld [vmem:[%s6326_s1 + $0x360] sm:$0xff]  }
  0x27   : > { %4559 = vmatpush3.bf16.msra.mxu0 %v4993_v26  ;;  %v685_v25 = vrot.slane %v683_v19, 1  ;;  %v678_v26 = vrot.slane %v676_v21, 1  ;;  %v5083_v10 = vld [vmem:[%s6326_s1 + $0x330] sm:$0xff]   ;;  %v5092_v19 = vld [vmem:[%s6326_s1 + $0x3a0] sm:$0xff]   ;;  %v5094_v21 = vld [vmem:[%s6326_s1 + $0x3d8] sm:$0xff]  }
  0x28   : > { %4581 = vmatpush3.bf16.msra.mxu1 %v4994_v27  ;;  %4560 = vmatprep.subr.bf16.mxu0 %v4995_v28  ;;  %v5042_v27 = vld [vmem:[%s6326_s1 + $0x2b8] sm:$0xff]   ;;  %v5043_v28 = vld [vmem:[%s6326_s1 + $0x270] sm:$0xff]  }
  0x29   : > { %4582 = vmatprep.subr.bf16.mxu1 %v4996_v29  ;;  %v672_v29 = vor.u32 %v671_v22, %v667_v13  ;;  %v679_v32 = vor.u32 %v678_v26, %v674_v20  ;;  %v5084_v11 = vld [vmem:[%s6326_s1 + $0x3b0] sm:$0xff]   ;;  %v5086_v13 = vld [vmem:[%s6326_s1 + $0x3e8] sm:$0xff]   ;;  %v5093_v20 = vld [vmem:[%s6326_s1 + $0x358] sm:$0xff]  }
  0x2a   : > { %v5095_v22 = vld [vmem:[%s6326_s1 + $0x318] sm:$0xff]   ;;  %v5099_v26 = vld [vmem:[%s6326_s1 + $0x310] sm:$0xff]  }
  0x2b   : > { %4561 = vmatpush3.bf16.msra.mxu0 %v4997_v30  ;;  %v665_v30 = vor.u32 %v664_v23, %v660_v15  ;;  %v5088_v15 = vld [vmem:[%s6326_s1 + $0x3a8] sm:$0xff]   ;;  %v5096_v23 = vld [vmem:[%s6326_s1 + $0x398] sm:$0xff]  }
  0x2c   : > { %4583 = vmatpush3.bf16.msra.mxu1 %v4998_v31  ;;  %4590 = vmatprep.subr.bf16.mxu0 %v5003_v38  ;;  %v686_v31 = vor.u32 %v685_v25, %v681_v18  ;;  %v5049_v38 = vld [vmem:[%s6326_s1 + $0x228] sm:$0xff]   ;;  %v5091_v18 = vld [vmem:[%s6326_s1 + $0x320] sm:$0xff]   ;;  %v5098_v25 = vld [vmem:[%s6326_s1 + $0x3d0] sm:$0xff]  }
  0x2d   : > { %4612 = vmatprep.subr.bf16.mxu1 %v5004_v39  ;;  %v5050_v39 = vld [vmem:[%s6326_s1 + $0x2a8] sm:$0xff]  }
  0x2e   : > { %526 = vmatmul.mubr.bf16.vlgmr.msra.gmra.mxu0 %v3706_v34  ;;  %v5045_v34 = vld [vmem:[%s6326_s1 + $0x230] sm:$0xff]  }
  0x2f   : > { %566 = vmatmul.mubr.bf16.vlgmr.msra.gmra.mxu1 %v3708_v36  ;;  %4591 = vmatpush3.bf16.msra.mxu0 %v5005_v40  ;;  %v5047_v36 = vld [vmem:[%s6326_s1 + $0x268] sm:$0xff]   ;;  %v5051_v40 = vld [vmem:[%s6326_s1 + $0x260] sm:$0xff]  }
  0x30   : > { %4613 = vmatpush3.bf16.msra.mxu1 %v5006_v41  ;;  %4592 = vmatprep.subr.bf16.mxu0 %v5007_v42  ;;  %v5052_v41 = vld [vmem:[%s6326_s1 + $0x2e0] sm:$0xff]  }
  0x31   : > { %4614 = vmatprep.subr.bf16.mxu1 %v5008_v43  ;;  %915 = vmatprep.mubr.bf16.mxu0 %v672_v29  ;;  %v5053_v42 = vld [vmem:[%s6326_s1 + $0x220] sm:$0xff]   ;;  %v5102_v29 = vld [vmem:[%s6326_s1 + $0x3c8] sm:$0xff]  }
  0x32   : > { %955 = vmatprep.mubr.bf16.mxu1 %v686_v31  ;;  %v5054_v43 = vld [vmem:[%s6326_s1 + $0x2a0] sm:$0xff]   ;;  %v5104_v31 = vld [vmem:[%s6326_s1 + $0x388] sm:$0xff]  }
  0x33   : > { %4593 = vmatpush3.bf16.msra.mxu0 %v5009_v44  ;;  %v5055_v44 = vld [vmem:[%s6326_s1 + $0x258] sm:$0xff]  }
  0x34   : > { %4615 = vmatpush3.bf16.msra.mxu1 %v5010_v45  ;;  %4594 = vmatprep.subr.bf16.mxu0 %v5011_v46  ;;  %v5056_v45 = vld [vmem:[%s6326_s1 + $0x2d8] sm:$0xff]  }
  0x35   : > { %4616 = vmatprep.subr.bf16.mxu1 %v5012_v47  ;;  %v5057_v46 = vld [vmem:[%s6326_s1 + $0x218] sm:$0xff]  }
  0x36   : > { %v5058_v47 = vld [vmem:[%s6326_s1 + $0x298] sm:$0xff]  }
  0x37   : > { %4595 = vmatpush3.bf16.msra.mxu0 %v5013_v48  ;;  %v5059_v48 = vld [vmem:[%s6326_s1 + $0x250] sm:$0xff]  }
  0x38   : > { %4617 = vmatpush3.bf16.msra.mxu1 %v5014_v49  ;;  %4596 = vmatprep.subr.bf16.mxu0 %v5015_v50  ;;  %v5060_v49 = vld [vmem:[%s6326_s1 + $0x2d0] sm:$0xff]  }
  0x39   : > { %4618 = vmatprep.subr.bf16.mxu1 %v5016_v51  ;;  %v5061_v50 = vld [vmem:[%s6326_s1 + $0x210] sm:$0xff]  }
  0x3a   : > { %v5062_v51 = vld [vmem:[%s6326_s1 + $0x290] sm:$0xff]  }
  0x3b   : > { %4597 = vmatpush3.bf16.msra.mxu0 %v5017_v52  ;;  %v5063_v52 = vld [vmem:[%s6326_s1 + $0x248] sm:$0xff]  }
  0x3c   : > { %4619 = vmatpush3.bf16.msra.mxu1 %v5018_v53  ;;  %4598 = vmatprep.subr.bf16.mxu0 %v5019_v54  ;;  %v5064_v53 = vld [vmem:[%s6326_s1 + $0x2c8] sm:$0xff]  }
  0x3d   : > { %4620 = vmatprep.subr.bf16.mxu1 %v5020_v55  ;;  %v5065_v54 = vld [vmem:[%s6326_s1 + $0x208] sm:$0xff]  }
  0x3e   : > { %v5066_v55 = vld [vmem:[%s6326_s1 + $0x288] sm:$0xff]  }
  0x3f   : > { %4599 = vmatpush3.bf16.msra.mxu0 %v5021_v56  ;;  %v5067_v56 = vld [vmem:[%s6326_s1 + $0x240] sm:$0xff]  }
  0x40   : > { %4621 = vmatpush3.bf16.msra.mxu1 %v5022_v57  ;;  %4600 = vmatprep.subr.bf16.mxu0 %v5023_v58  ;;  %v5068_v57 = vld [vmem:[%s6326_s1 + $0x2c0] sm:$0xff]  }
  0x41   : > { %4622 = vmatprep.subr.bf16.mxu1 %v5024_v59  ;;  %v5069_v58 = vld [vmem:[%s6326_s1 + $0x200] sm:$0xff]  }
  0x42   : > { %v5070_v59 = vld [vmem:[%s6326_s1 + $0x280] sm:$0xff]  }
  0x43   : > { %4601 = vmatpush3.bf16.msra.mxu0 %v5025_v60  ;;  %v5071_v60 = vld [vmem:[%s5467_s6] ss:$16 sps:$4 sm:$0x1e]  }
  0x44   : > { %4623 = vmatpush3.bf16.msra.mxu1 %v5026_v61  ;;  %4602 = vmatprep.subr.bf16.mxu0 %v5027_v62  ;;  %v5077_v61 = vld [vmem:[%s6326_s1 + $0x378] sm:$0xff]   ;;  %v5073_v62 = vld [vmem:[%s5467_s6 + $0x4] ss:$16 sps:$4 sm:$0x1e]  }
  0x45   : > { %4624 = vmatprep.subr.bf16.mxu1 %v5028_v63  ;;  %v5078_v63 = vld [vmem:[%s6326_s1 + $0x3f8] sm:$0xff]  }
  0x47   : > { %4603 = vmatpush3.bf16.msra.mxu0 %v5029_v0  ;;  %v1051_v0 = vrot.slane %v5071_v60, 1  ;;  %v5131_v60 = vld [vmem:[%s6326_s1 + $0x458] sm:$0xff]  }
  0x48   : > { %4625 = vmatpush3.bf16.msra.mxu1 %v5030_v1  ;;  %4604 = vmatprep.subr.bf16.mxu0 %v5031_v2  ;;  %v5074_v1 = vld [vmem:[%s5467_s6 + $0x8] ss:$16 sps:$4 sm:$0x1e]   ;;  %v1052_v2 = vrot.slane %v5073_v62, 1 }
  0x49   : > { %4626 = vmatprep.subr.bf16.mxu1 %v5032_v3  ;;  %v5076_v3 = vld [vmem:[%s5467_s6 + $0xc] ss:$16 sps:$4 sm:$0x1e]  }
  0x4a   : > { %v1054_v6 = vrot.slane %v5076_v3, 1  ;;  %v5133_v62 = vld [vmem:[%s6326_s1 + $0x418] sm:$0xff]   ;;  %v5138_v3 = vld [vmem:[%s6326_s1 + $0x490] sm:$0xff]  }
  0x4b   : > { %4605 = vmatpush3.bf16.msra.mxu0 %v5033_v4  ;;  %v1053_v4 = vrot.slane %v5074_v1, 1  ;;  %v5136_v1 = vld [vmem:[%s6326_s1 + $0x4d0] sm:$0xff]  }
  0x4c   : > { %4627 = vmatpush3.bf16.msra.mxu1 %v5034_v5  ;;  %4634 = vmatprep.subr.bf16.mxu0 %v5039_v12  ;;  %v5079_v5 = vld [vmem:[%s6326_s1 + $0x338] sm:$0xff]   ;;  %v5085_v12 = vld [vmem:[%s6326_s1 + $0x368] sm:$0xff]  }
  0x4d   : > { %4656 = vmatprep.subr.bf16.mxu1 %v5040_v17  ;;  %v5090_v17 = vld [vmem:[%s6326_s1 + $0x3e0] sm:$0xff]  }
  0x4e   : > { %916 = vmatmul.mubr.bf16.vlgmr.msra.gmra.mxu0 %v665_v30  ;;  %v5103_v30 = vld [vmem:[%s6326_s1 + $0x308] sm:$0xff]  }
  0x4f   : > { %956 = vmatmul.mubr.bf16.vlgmr.msra.gmra.mxu1 %v679_v32  ;;  %4635 = vmatpush3.bf16.msra.mxu0 %v5041_v24  ;;  %v5097_v24 = vld [vmem:[%s6326_s1 + $0x350] sm:$0xff]   ;;  %v5105_v32 = vld [vmem:[%s6326_s1 + $0x340] sm:$0xff]  }
  0x50   : > { %4657 = vmatpush3.bf16.msra.mxu1 %v5042_v27  ;;  %4636 = vmatprep.subr.bf16.mxu0 %v5043_v28  ;;  %v5100_v27 = vld [vmem:[%s6326_s1 + $0x390] sm:$0xff]   ;;  %v5101_v28 = vld [vmem:[%s6326_s1 + $0x348] sm:$0xff]  }
  0x51   : > { %4658 = vmatprep.subr.bf16.mxu1 %v5044_v33  ;;  %1283 = vmatprep.mubr.bf16.mxu0 %v1052_v2  ;;  %v5106_v33 = vld [vmem:[%s6326_s1 + $0x3c0] sm:$0xff]   ;;  %v5137_v2 = vld [vmem:[%s6326_s1 + $0x410] sm:$0xff]  }
  0x52   : > { %1323 = vmatprep.mubr.bf16.mxu1 %v1054_v6  ;;  %v5141_v6 = vld [vmem:[%s6326_s1 + $0x408] sm:$0xff]  }
  0x53   : > { %4637 = vmatpush3.bf16.msra.mxu0 %v5045_v34  ;;  %v5107_v34 = vld [vmem:[%s6326_s1 + $0x300] sm:$0xff]  }
  0x54   : > { %4659 = vmatpush3.bf16.msra.mxu1 %v5046_v35  ;;  %4638 = vmatprep.subr.bf16.mxu0 %v5047_v36  ;;  %v5108_v35 = vld [vmem:[%s6326_s1 + $0x380] sm:$0xff]  }
  0x55   : > { %4660 = vmatprep.subr.bf16.mxu1 %v5048_v37  ;;  %v5109_v36 = vld [vmem:[%s5467_s6] ss:$16 sps:$4 sm:$0x3c]   ;;  %v5111_v37 = vld [vmem:[%s5467_s6 + $0x4] ss:$16 sps:$4 sm:$0x3c]  }
  0x57   : > { %4639 = vmatpush3.bf16.msra.mxu0 %v5049_v38  ;;  %v5112_v38 = vld [vmem:[%s5467_s6 + $0x8] ss:$16 sps:$4 sm:$0x3c]  }
  0x58   : > { %4661 = vmatpush3.bf16.msra.mxu1 %v5050_v39  ;;  %4640 = vmatprep.subr.bf16.mxu0 %v5051_v40  ;;  %v5115_v39 = vld [vmem:[%s6326_s1 + $0x478] sm:$0xff]   ;;  %v1419_v40 = vrot.slane %v5109_v36, 2 }
  0x59   : > { %4662 = vmatprep.subr.bf16.mxu1 %v5052_v41  ;;  %v1420_v41 = vrot.slane %v5111_v37, 2  ;;  %v5156_v37 = vld [vmem:[%s6326_s1 + $0x5b8] sm:$0xff]  }
  0x5b   : > { %4641 = vmatpush3.bf16.msra.mxu0 %v5053_v42  ;;  %v5114_v42 = vld [vmem:[%s5467_s6 + $0xc] ss:$16 sps:$4 sm:$0x3c]  }
  0x5c   : > { %4663 = vmatpush3.bf16.msra.mxu1 %v5054_v43  ;;  %4642 = vmatprep.subr.bf16.mxu0 %v5055_v44  ;;  %v5116_v43 = vld [vmem:[%s6326_s1 + $0x4f8] sm:$0xff]   ;;  %v1421_v44 = vrot.slane %v5112_v38, 2 }
  0x5d   : > { %4664 = vmatprep.subr.bf16.mxu1 %v5056_v45  ;;  %v5117_v45 = vld [vmem:[%s6326_s1 + $0x438] sm:$0xff]  }
  0x5f   : > { %4643 = vmatpush3.bf16.msra.mxu0 %v5057_v46  ;;  %v1422_v46 = vrot.slane %v5114_v42, 2  ;;  %v5159_v42 = vld [vmem:[%s6326_s1 + $0x530] sm:$0xff]  }
  0x60   : > { %4665 = vmatpush3.bf16.msra.mxu1 %v5058_v47  ;;  %4644 = vmatprep.subr.bf16.mxu0 %v5059_v48  ;;  %v5118_v47 = vld [vmem:[%s6326_s1 + $0x4b8] sm:$0xff]   ;;  %v5119_v48 = vld [vmem:[%s6326_s1 + $0x470] sm:$0xff]  }
  0x61   : > { %4666 = vmatprep.subr.bf16.mxu1 %v5060_v49  ;;  %v5120_v49 = vld [vmem:[%s6326_s1 + $0x4f0] sm:$0xff]  }
  0x63   : > { %4645 = vmatpush3.bf16.msra.mxu0 %v5061_v50  ;;  %v5121_v50 = vld [vmem:[%s6326_s1 + $0x430] sm:$0xff]  }
  0x64   : > { %4667 = vmatpush3.bf16.msra.mxu1 %v5062_v51  ;;  %4646 = vmatprep.subr.bf16.mxu0 %v5063_v52  ;;  %v5122_v51 = vld [vmem:[%s6326_s1 + $0x4b0] sm:$0xff]   ;;  %v5123_v52 = vld [vmem:[%s6326_s1 + $0x468] sm:$0xff]  }
  0x65   : > { %4668 = vmatprep.subr.bf16.mxu1 %v5064_v53  ;;  %v5124_v53 = vld [vmem:[%s6326_s1 + $0x4e8] sm:$0xff]  }
  0x67   : > { %4647 = vmatpush3.bf16.msra.mxu0 %v5065_v54  ;;  %v5125_v54 = vld [vmem:[%s6326_s1 + $0x428] sm:$0xff]  }
  0x68   : > { %4669 = vmatpush3.bf16.msra.mxu1 %v5066_v55  ;;  %4648 = vmatprep.subr.bf16.mxu0 %v5067_v56  ;;  %v5126_v55 = vld [vmem:[%s6326_s1 + $0x4a8] sm:$0xff]   ;;  %v5127_v56 = vld [vmem:[%s6326_s1 + $0x460] sm:$0xff]  }
  0x69   : > { %4670 = vmatprep.subr.bf16.mxu1 %v5068_v57  ;;  %v5128_v57 = vld [vmem:[%s6326_s1 + $0x4e0] sm:$0xff]  }
  0x6b   : > { %4649 = vmatpush3.bf16.msra.mxu0 %v5069_v58  ;;  %v5129_v58 = vld [vmem:[%s6326_s1 + $0x420] sm:$0xff]  }
  0x6c   : > { %4671 = vmatpush3.bf16.msra.mxu1 %v5070_v59  ;;  %4678 = vmatprep.subr.bf16.mxu0 %v5077_v61  ;;  %v5130_v59 = vld [vmem:[%s6326_s1 + $0x4a0] sm:$0xff]   ;;  %v5132_v61 = vld [vmem:[%s6326_s1 + $0x4d8] sm:$0xff]  }
  0x6d   : > { %4700 = vmatprep.subr.bf16.mxu1 %v5078_v63  ;;  %v5134_v63 = vld [vmem:[%s6326_s1 + $0x498] sm:$0xff]  }
  0x6e   : > { %1284 = vmatmul.mubr.bf16.vlgmr.msra.gmra.mxu0 %v1051_v0  ;;  %v5135_v0 = vld [vmem:[%s6326_s1 + $0x450] sm:$0xff]  }
  0x6f   : > { %1324 = vmatmul.mubr.bf16.vlgmr.msra.gmra.mxu1 %v1053_v4  ;;  %4679 = vmatpush3.bf16.msra.mxu0 %v5079_v5  ;;  %v5139_v4 = vld [vmem:[%s6326_s1 + $0x448] sm:$0xff]  }
  0x70   : > { %4701 = vmatpush3.bf16.msra.mxu1 %v5080_v7  ;;  %4680 = vmatprep.subr.bf16.mxu0 %v5081_v8  ;;  %v5140_v5 = vld [vmem:[%s6326_s1 + $0x4c8] sm:$0xff]   ;;  %v5143_v8 = vld [vmem:[%s6326_s1 + $0x440] sm:$0xff]  }
  0x71   : > { %4702 = vmatprep.subr.bf16.mxu1 %v5082_v9  ;;  %1651 = vmatprep.mubr.bf16.mxu0 %v1420_v41  ;;  %v5142_v7 = vld [vmem:[%s6326_s1 + $0x488] sm:$0xff]   ;;  %v5144_v9 = vld [vmem:[%s6326_s1 + $0x4c0] sm:$0xff]   ;;  %v5158_v41 = vld [vmem:[%s6326_s1 + $0x5f0] sm:$0xff]  }
  0x72   : > { %1691 = vmatprep.mubr.bf16.mxu1 %v1422_v46  ;;  %v5163_v46 = vld [vmem:[%s6326_s1 + $0x528] sm:$0xff]  }
  0x73   : > { %4681 = vmatpush3.bf16.msra.mxu0 %v5083_v10  ;;  %v5145_v10 = vld [vmem:[%s6326_s1 + $0x400] sm:$0xff]  }
  0x74   : > { %4703 = vmatpush3.bf16.msra.mxu1 %v5084_v11  ;;  %4682 = vmatprep.subr.bf16.mxu0 %v5085_v12  ;;  %v5146_v11 = vld [vmem:[%s6326_s1 + $0x480] sm:$0xff]  }
  0x75   : > { %4704 = vmatprep.subr.bf16.mxu1 %v5086_v13  ;;  %v5147_v12 = vld [vmem:[%s5467_s6] ss:$16 sps:$4 sm:$0x7c]   ;;  %v5149_v13 = vld [vmem:[%s5467_s6 + $0x4] ss:$16 sps:$4 sm:$0x7c]  }
  0x77   : > { %4683 = vmatpush3.bf16.msra.mxu0 %v5087_v14  ;;  %v1796_v14 = vshrl.u32 %v5149_v13, 16 }
  0x78   : > { %4705 = vmatpush3.bf16.msra.mxu1 %v5088_v15  ;;  %4684 = vmatprep.subr.bf16.mxu0 %v5089_v16  ;;  %v1799_v15 = vshll.u32 %v5149_v13, 16  ;;  %v5150_v16 = vld [vmem:[%s5467_s6 + $0x8] ss:$16 sps:$4 sm:$0x7c]  }
  0x79   : > { %4706 = vmatprep.subr.bf16.mxu1 %v5090_v17  ;;  %v1788_v17 = vshrl.u32 %v5147_v12, 16  ;;  %v5193_v13 = vld [vmem:[%s6326_s1 + $0x638] sm:$0xff]  }
  0x7b   : > { %4685 = vmatpush3.bf16.msra.mxu0 %v5091_v18  ;;  %v5152_v18 = vld [vmem:[%s5467_s6 + $0xc] ss:$16 sps:$4 sm:$0x7c]  }
  0x7c   : > { %4707 = vmatpush3.bf16.msra.mxu1 %v5092_v19  ;;  %4686 = vmatprep.subr.bf16.mxu0 %v5093_v20  ;;  %v1791_v19 = vshll.u32 %v5147_v12, 16  ;;  %v1798_v20 = vrot.slane %v1796_v14, 2 }
  0x7d   : > { %4708 = vmatprep.subr.bf16.mxu1 %v5094_v21  ;;  %v1801_v21 = vrot.slane %v1799_v15, 3  ;;  %v5194_v15 = vld [vmem:[%s6326_s1 + $0x6b8] sm:$0xff]  }
  0x7f   : > { %4687 = vmatpush3.bf16.msra.mxu0 %v5095_v22  ;;  %v1790_v22 = vrot.slane %v1788_v17, 2  ;;  %v5196_v17 = vld [vmem:[%s6326_s1 + $0x6f0] sm:$0xff]  }
  0x80   : > { %4709 = vmatpush3.bf16.msra.mxu1 %v5096_v23  ;;  %4688 = vmatprep.subr.bf16.mxu0 %v5097_v24  ;;  %v1804_v23 = vshrl.u32 %v5150_v16, 16  ;;  %v5153_v24 = vld [vmem:[%s6326_s1 + $0x578] sm:$0xff]  }
  0x81   : > { %4710 = vmatprep.subr.bf16.mxu1 %v5098_v25  ;;  %v5154_v25 = vld [vmem:[%s6326_s1 + $0x5f8] sm:$0xff]  }
  0x83   : > { %4689 = vmatpush3.bf16.msra.mxu0 %v5099_v26  ;;  %v1812_v26 = vshrl.u32 %v5152_v18, 16 }
  0x84   : > { %4711 = vmatpush3.bf16.msra.mxu1 %v5100_v27  ;;  %4690 = vmatprep.subr.bf16.mxu0 %v5101_v28  ;;  %v1815_v27 = vshll.u32 %v5152_v18, 16  ;;  %v1793_v28 = vrot.slane %v1791_v19, 3  ;;  %v5197_v18 = vld [vmem:[%s6326_s1 + $0x630] sm:$0xff]  }
  0x85   : > { %4712 = vmatprep.subr.bf16.mxu1 %v5102_v29  ;;  %v1807_v29 = vshll.u32 %v5150_v16, 16  ;;  %v5195_v16 = vld [vmem:[%s6326_s1 + $0x670] sm:$0xff]  }
  0x86   : > { %v5198_v19 = vld [vmem:[%s6326_s1 + $0x6b0] sm:$0xff]  }
  0x87   : > { %4691 = vmatpush3.bf16.msra.mxu0 %v5103_v30  ;;  %v1802_v30 = vor.u32 %v1801_v21, %v1798_v20  ;;  %v1809_v36 = vrot.slane %v1807_v29, 3  ;;  %v5199_v20 = vld [vmem:[%s6326_s1 + $0x668] sm:$0xff]   ;;  %v5208_v29 = vld [vmem:[%s6326_s1 + $0x6d8] sm:$0xff]  }
  0x88   : > { %4713 = vmatpush3.bf16.msra.mxu1 %v5104_v31  ;;  %4692 = vmatprep.subr.bf16.mxu0 %v5105_v32  ;;  %v1806_v31 = vrot.slane %v1804_v23, 2  ;;  %v5155_v32 = vld [vmem:[%s6326_s1 + $0x538] sm:$0xff]   ;;  %v5200_v21 = vld [vmem:[%s6326_s1 + $0x6e8] sm:$0xff]  }
  0x89   : > { %4714 = vmatprep.subr.bf16.mxu1 %v5106_v33  ;;  %v1814_v33 = vrot.slane %v1812_v26, 2  ;;  %v5202_v23 = vld [vmem:[%s6326_s1 + $0x6a8] sm:$0xff]   ;;  %v5205_v26 = vld [vmem:[%s6326_s1 + $0x620] sm:$0xff]  }
  0x8b   : > { %4693 = vmatpush3.bf16.msra.mxu0 %v5107_v34  ;;  %v1817_v34 = vrot.slane %v1815_v27, 3  ;;  %v5206_v27 = vld [vmem:[%s6326_s1 + $0x6a0] sm:$0xff]  }
  0x8c   : > { %4715 = vmatpush3.bf16.msra.mxu1 %v5108_v35  ;;  %4722 = vmatprep.subr.bf16.mxu0 %v5115_v39  ;;  %v1794_v35 = vor.u32 %v1793_v28, %v1790_v22  ;;  %v1810_v39 = vor.u32 %v1809_v36, %v1806_v31  ;;  %v5201_v22 = vld [vmem:[%s6326_s1 + $0x628] sm:$0xff]   ;;  %v5207_v28 = vld [vmem:[%s6326_s1 + $0x658] sm:$0xff]  }
  0x8d   : > { %4744 = vmatprep.subr.bf16.mxu1 %v5116_v43  ;;  %v1818_v38 = vor.u32 %v1817_v34, %v1814_v33  ;;  %v5160_v43 = vld [vmem:[%s6326_s1 + $0x5b0] sm:$0xff]   ;;  %v5210_v33 = vld [vmem:[%s6326_s1 + $0x698] sm:$0xff]  }
  0x8e   : > { %1652 = vmatmul.mubr.bf16.vlgmr.msra.gmra.mxu0 %v1419_v40  ;;  %v5157_v40 = vld [vmem:[%s6326_s1 + $0x570] sm:$0xff]  }
  0x8f   : > { %4723 = vmatpush3.bf16.msra.mxu0 %v5117_v45  ;;  %1692 = vmatmul.mubr.bf16.vlgmr.msra.gmra.mxu1 %v1421_v44  ;;  %v5161_v44 = vld [vmem:[%s6326_s1 + $0x568] sm:$0xff]   ;;  %v5211_v34 = vld [vmem:[%s6326_s1 + $0x650] sm:$0xff]  }
  0x90   : > { %4745 = vmatpush3.bf16.msra.mxu1 %v5118_v47  ;;  %4724 = vmatprep.subr.bf16.mxu0 %v5119_v48  ;;  %v5162_v45 = vld [vmem:[%s6326_s1 + $0x5e8] sm:$0xff]   ;;  %v5165_v48 = vld [vmem:[%s6326_s1 + $0x560] sm:$0xff]  }
  0x91   : > { %4746 = vmatprep.subr.bf16.mxu1 %v5120_v49  ;;  %2047 = vmatprep.mubr.bf16.mxu0 %v1802_v30  ;;  %v5164_v47 = vld [vmem:[%s6326_s1 + $0x5a8] sm:$0xff]   ;;  %v5166_v49 = vld [vmem:[%s6326_s1 + $0x5e0] sm:$0xff]   ;;  %v5209_v30 = vld [vmem:[%s6326_s1 + $0x618] sm:$0xff]  }
  0x92   : > { %2087 = vmatprep.mubr.bf16.mxu1 %v1818_v38 }
  0x93   : > { %4725 = vmatpush3.bf16.msra.mxu0 %v5121_v50  ;;  %v5167_v50 = vld [vmem:[%s6326_s1 + $0x520] sm:$0xff]  }
  0x94   : > { %4747 = vmatpush3.bf16.msra.mxu1 %v5122_v51  ;;  %4726 = vmatprep.subr.bf16.mxu0 %v5123_v52  ;;  %v5168_v51 = vld [vmem:[%s6326_s1 + $0x5a0] sm:$0xff]   ;;  %v5169_v52 = vld [vmem:[%s6326_s1 + $0x558] sm:$0xff]  }
  0x95   : > { %4748 = vmatprep.subr.bf16.mxu1 %v5124_v53  ;;  %v5170_v53 = vld [vmem:[%s6326_s1 + $0x5d8] sm:$0xff]  }
  0x97   : > { %4727 = vmatpush3.bf16.msra.mxu0 %v5125_v54  ;;  %v5171_v54 = vld [vmem:[%s6326_s1 + $0x518] sm:$0xff]  }
  0x98   : > { %4749 = vmatpush3.bf16.msra.mxu1 %v5126_v55  ;;  %4728 = vmatprep.subr.bf16.mxu0 %v5127_v56  ;;  %v5172_v55 = vld [vmem:[%s6326_s1 + $0x598] sm:$0xff]   ;;  %v5173_v56 = vld [vmem:[%s6326_s1 + $0x550] sm:$0xff]  }
  0x99   : > { %4750 = vmatprep.subr.bf16.mxu1 %v5128_v57  ;;  %v5174_v57 = vld [vmem:[%s6326_s1 + $0x5d0] sm:$0xff]  }
  0x9b   : > { %4729 = vmatpush3.bf16.msra.mxu0 %v5129_v58  ;;  %v5175_v58 = vld [vmem:[%s6326_s1 + $0x510] sm:$0xff]  }
  0x9c   : > { %4751 = vmatpush3.bf16.msra.mxu1 %v5130_v59  ;;  %4730 = vmatprep.subr.bf16.mxu0 %v5131_v60  ;;  %v5176_v59 = vld [vmem:[%s6326_s1 + $0x590] sm:$0xff]   ;;  %v5177_v60 = vld [vmem:[%s6326_s1 + $0x548] sm:$0xff]  }
  0x9d   : > { %4752 = vmatprep.subr.bf16.mxu1 %v5132_v61  ;;  %v5178_v61 = vld [vmem:[%s6326_s1 + $0x5c8] sm:$0xff]  }
  0x9f   : > { %4731 = vmatpush3.bf16.msra.mxu0 %v5133_v62  ;;  %v5179_v62 = vld [vmem:[%s6326_s1 + $0x508] sm:$0xff]  }
  0xa0   : > { %4753 = vmatpush3.bf16.msra.mxu1 %v5134_v63  ;;  %4732 = vmatprep.subr.bf16.mxu0 %v5135_v0  ;;  %v5180_v63 = vld [vmem:[%s6326_s1 + $0x588] sm:$0xff]   ;;  %v5181_v0 = vld [vmem:[%s6326_s1 + $0x540] sm:$0xff]  }
  0xa1   : > { %4754 = vmatprep.subr.bf16.mxu1 %v5136_v1  ;;  %v5182_v1 = vld [vmem:[%s6326_s1 + $0x5c0] sm:$0xff]  }
  0xa3   : > { %4733 = vmatpush3.bf16.msra.mxu0 %v5137_v2  ;;  %v5183_v2 = vld [vmem:[%s6326_s1 + $0x500] sm:$0xff]  }
  0xa4   : > { %4755 = vmatpush3.bf16.msra.mxu1 %v5138_v3  ;;  %4734 = vmatprep.subr.bf16.mxu0 %v5139_v4  ;;  %v5184_v3 = vld [vmem:[%s6326_s1 + $0x580] sm:$0xff]  }
  0xa5   : > { %4756 = vmatprep.subr.bf16.mxu1 %v5140_v5  ;;  %v5185_v4 = vld [vmem:[%s5467_s6] ss:$16 sps:$4 sm:$0x78]   ;;  %v5191_v5 = vld [vmem:[%s6326_s1 + $0x678] sm:$0xff]  }
  0xa7   : > { %4735 = vmatpush3.bf16.msra.mxu0 %v5141_v6  ;;  %v5187_v6 = vld [vmem:[%s5467_s6 + $0x4] ss:$16 sps:$4 sm:$0x78]  }
  0xa8   : > { %4757 = vmatpush3.bf16.msra.mxu1 %v5142_v7  ;;  %4736 = vmatprep.subr.bf16.mxu0 %v5143_v8  ;;  %v5192_v7 = vld [vmem:[%s6326_s1 + $0x6f8] sm:$0xff]   ;;  %v2183_v8 = vrot.slane %v5185_v4, 3  ;;  %v5234_v4 = vld [vmem:[%s6326_s1 + $0x7b0] sm:$0xff]  }
  0xa9   : > { %4758 = vmatprep.subr.bf16.mxu1 %v5144_v9  ;;  %v5188_v9 = vld [vmem:[%s5467_s6 + $0x8] ss:$16 sps:$4 sm:$0x78]  }
  0xaa   : > { %v2185_v12 = vrot.slane %v5188_v9, 3  ;;  %v5239_v9 = vld [vmem:[%s6326_s1 + $0x760] sm:$0xff]  }
  0xab   : > { %4737 = vmatpush3.bf16.msra.mxu0 %v5145_v10  ;;  %v2184_v10 = vrot.slane %v5187_v6, 3  ;;  %v5236_v6 = vld [vmem:[%s6326_s1 + $0x7e8] sm:$0xff]  }
  0xac   : > { %4759 = vmatpush3.bf16.msra.mxu1 %v5146_v11  ;;  %4766 = vmatprep.subr.bf16.mxu0 %v5153_v24  ;;  %v5190_v11 = vld [vmem:[%s5467_s6 + $0xc] ss:$16 sps:$4 sm:$0x78]   ;;  %v5203_v24 = vld [vmem:[%s6326_s1 + $0x660] sm:$0xff]  }
  0xad   : > { %4788 = vmatprep.subr.bf16.mxu1 %v5154_v25  ;;  %v2186_v14 = vrot.slane %v5190_v11, 3  ;;  %v5204_v25 = vld [vmem:[%s6326_s1 + $0x6e0] sm:$0xff]  }
  0xae   : > { %2048 = vmatmul.mubr.bf16.vlgmr.msra.gmra.mxu0 %v1794_v35  ;;  %v5241_v11 = vld [vmem:[%s6326_s1 + $0x720] sm:$0xff]  }
  0xaf   : > { %4767 = vmatpush3.bf16.msra.mxu0 %v5155_v32  ;;  %2088 = vmatmul.mubr.bf16.vlgmr.msra.gmra.mxu1 %v1810_v39 }
  0xb0   : > { %4768 = vmatprep.subr.bf16.mxu0 %v5157_v40  ;;  %4789 = vmatpush3.bf16.msra.mxu1 %v5156_v37  ;;  %v5212_v37 = vld [vmem:[%s6326_s1 + $0x6d0] sm:$0xff]  }
  0xb1   : > { %4790 = vmatprep.subr.bf16.mxu1 %v5158_v41  ;;  %2415 = vmatprep.mubr.bf16.mxu0 %v2184_v10  ;;  %v5213_v40 = vld [vmem:[%s6326_s1 + $0x610] sm:$0xff]   ;;  %v5240_v10 = vld [vmem:[%s6326_s1 + $0x7e0] sm:$0xff]  }
  0xb2   : > { %2455 = vmatprep.mubr.bf16.mxu1 %v2186_v14  ;;  %v5244_v14 = vld [vmem:[%s6326_s1 + $0x7d8] sm:$0xff]  }
  0xb3   : > { %4769 = vmatpush3.bf16.msra.mxu0 %v5159_v42 }
  0xb4   : > { %4770 = vmatprep.subr.bf16.mxu0 %v5161_v44  ;;  %4791 = vmatpush3.bf16.msra.mxu1 %v5160_v43  ;;  %v5214_v43 = vld [vmem:[%s6326_s1 + $0x690] sm:$0xff]  }
  0xb5   : > { %4792 = vmatprep.subr.bf16.mxu1 %v5162_v45  ;;  %v5215_v45 = vld [vmem:[%s6326_s1 + $0x648] sm:$0xff]  }
  0xb7   : > { %4771 = vmatpush3.bf16.msra.mxu0 %v5163_v46 }
  0xb8   : > { %4772 = vmatprep.subr.bf16.mxu0 %v5165_v48  ;;  %4793 = vmatpush3.bf16.msra.mxu1 %v5164_v47  ;;  %v5216_v48 = vld [vmem:[%s6326_s1 + $0x6c8] sm:$0xff]  }
  0xb9   : > { %4794 = vmatprep.subr.bf16.mxu1 %v5166_v49  ;;  %v5217_v49 = vld [vmem:[%s6326_s1 + $0x608] sm:$0xff]  }
  0xbb   : > { %4773 = vmatpush3.bf16.msra.mxu0 %v5167_v50  ;;  %v5218_v50 = vld [vmem:[%s6326_s1 + $0x688] sm:$0xff]  }
  0xbc   : > { %4774 = vmatprep.subr.bf16.mxu0 %v5169_v52  ;;  %4795 = vmatpush3.bf16.msra.mxu1 %v5168_v51  ;;  %v5219_v51 = vld [vmem:[%s6326_s1 + $0x640] sm:$0xff]  }
  0xbd   : > { %4796 = vmatprep.subr.bf16.mxu1 %v5170_v53  ;;  %v5220_v52 = vld [vmem:[%s6326_s1 + $0x6c0] sm:$0xff]  }
  0xbe   : > { %v5221_v53 = vld [vmem:[%s6326_s1 + $0x600] sm:$0xff]  }
  0xbf   : > { %4775 = vmatpush3.bf16.msra.mxu0 %v5171_v54  ;;  %v5222_v54 = vld [vmem:[%s6326_s1 + $0x680] sm:$0xff]  }
  0xc0   : > { %4776 = vmatprep.subr.bf16.mxu0 %v5173_v56  ;;  %4797 = vmatpush3.bf16.msra.mxu1 %v5172_v55  ;;  %v6090_v55 = vld [vmem:[%s5467_s6 + $0x10] sm:$0xff]  ;;  %v6093_v56 = vld [vmem:[%s5467_s6 + $0x18] sm:$0xff] }
  0xc1   : > { %4798 = vmatprep.subr.bf16.mxu1 %v5174_v57  ;;  %v4306_v57 = vcombine.low %v6090_v55, %v6090_v55 }
  0xc3   : > { %4777 = vmatpush3.bf16.msra.mxu0 %v5175_v58  ;;  %v4307_v58 = vcombine.high %v6090_v55, %v6090_v55 }
  0xc4   : > { %4778 = vmatprep.subr.bf16.mxu0 %v5177_v60  ;;  %4799 = vmatpush3.bf16.msra.mxu1 %v5176_v59  ;;  %v4308_v59 = vcombine.low %v6093_v56, %v6093_v56  ;;  %v4309_v60 = vcombine.high %v6093_v56, %v6093_v56 }
  0xc5   : > { %4800 = vmatprep.subr.bf16.mxu1 %v5178_v61  ;;  %v5227_v61 = vld [vmem:[%s6326_s1 + $0x778] sm:$0xff]  }
  0xc7   : > { %4779 = vmatpush3.bf16.msra.mxu0 %v5179_v62  ;;  %v5228_v62 = vld [vmem:[%s6326_s1 + $0x7f8] sm:$0xff]  }
  0xc8   : > { %4780 = vmatprep.subr.bf16.mxu0 %v5181_v0  ;;  %4801 = vmatpush3.bf16.msra.mxu1 %v5180_v63  ;;  %v5229_v63 = vld [vmem:[%s6326_s1 + $0x738] sm:$0xff]  }
  0xc9   : > { %4802 = vmatprep.subr.bf16.mxu1 %v5182_v1  ;;  %v5230_v0 = vld [vmem:[%s6326_s1 + $0x7b8] sm:$0xff]   ;;  %v5231_v1 = vld [vmem:[%s6326_s1 + $0x770] sm:$0xff]  }
  0xcb   : > { %4781 = vmatpush3.bf16.msra.mxu0 %v5183_v2  ;;  %v5232_v2 = vld [vmem:[%s6326_s1 + $0x7f0] sm:$0xff]  }
  0xcc   : > { %4810 = vmatprep.subr.bf16.mxu0 %v5191_v5  ;;  %4803 = vmatpush3.bf16.msra.mxu1 %v5184_v3  ;;  %v5233_v3 = vld [vmem:[%s6326_s1 + $0x730] sm:$0xff]   ;;  %v5235_v5 = vld [vmem:[%s6326_s1 + $0x768] sm:$0xff]  }
  0xcd   : > { %4832 = vmatprep.subr.bf16.mxu1 %v5192_v7  ;;  %v5237_v7 = vld [vmem:[%s6326_s1 + $0x728] sm:$0xff]  }
  0xce   : > { %2416 = vmatmul.mubr.bf16.vlgmr.msra.gmra.mxu0 %v2183_v8  ;;  %v5238_v8 = vld [vmem:[%s6326_s1 + $0x7a8] sm:$0xff]  }
  0xcf   : > { %4811 = vmatpush3.bf16.msra.mxu0 %v5193_v13  ;;  %2456 = vmatmul.mubr.bf16.vlgmr.msra.gmra.mxu1 %v2185_v12  ;;  %v5242_v12 = vld [vmem:[%s6326_s1 + $0x7a0] sm:$0xff]   ;;  %v5243_v13 = vld [vmem:[%s6326_s1 + $0x758] sm:$0xff]  }
  0xd0   : > { %4833 = vmatpush3.bf16.msra.mxu1 %v5194_v15  ;;  %4812 = vmatprep.subr.bf16.mxu0 %v5195_v16  ;;  %v5245_v15 = vld [vmem:[%s6326_s1 + $0x718] sm:$0xff]  }
  0xd1   : > { %4834 = vmatprep.subr.bf16.mxu1 %v5196_v17  ;;  %2771 = vmatprep.mubr.bf16.mxu0 %v4307_v58  ;;  %v5246_v16 = vld [vmem:[%s6326_s1 + $0x798] sm:$0xff]   ;;  %v5247_v17 = vld [vmem:[%s6326_s1 + $0x750] sm:$0xff]  }
  0xd2   : > { %2811 = vmatprep.mubr.bf16.mxu1 %v4309_v60 }
  0xd3   : > { %4813 = vmatpush3.bf16.msra.mxu0 %v5197_v18  ;;  %v5248_v18 = vld [vmem:[%s6326_s1 + $0x7d0] sm:$0xff]  }
  0xd4   : > { %4835 = vmatpush3.bf16.msra.mxu1 %v5198_v19  ;;  %4814 = vmatprep.subr.bf16.mxu0 %v5199_v20  ;;  %v5249_v19 = vld [vmem:[%s6326_s1 + $0x710] sm:$0xff]  }
  0xd5   : > { %4836 = vmatprep.subr.bf16.mxu1 %v5200_v21  ;;  %v5250_v20 = vld [vmem:[%s6326_s1 + $0x790] sm:$0xff]  }
  0xd7   : > { %4815 = vmatpush3.bf16.msra.mxu0 %v5201_v22  ;;  %v5251_v22 = vld [vmem:[%s6326_s1 + $0x748] sm:$0xff]  }
  0xd8   : > { %4837 = vmatpush3.bf16.msra.mxu1 %v5202_v23  ;;  %4816 = vmatprep.subr.bf16.mxu0 %v5203_v24  ;;  %v5252_v24 = vld [vmem:[%s6326_s1 + $0x7c8] sm:$0xff]  }
  0xd9   : > { %4838 = vmatprep.subr.bf16.mxu1 %v5204_v25 }
  0xdb   : > { %4817 = vmatpush3.bf16.msra.mxu0 %v5205_v26  ;;  %v5253_v26 = vld [vmem:[%s6326_s1 + $0x708] sm:$0xff]  }
  0xdc   : > { %4839 = vmatpush3.bf16.msra.mxu1 %v5206_v27  ;;  %4818 = vmatprep.subr.bf16.mxu0 %v5207_v28 }
  0xdd   : > { %4840 = vmatprep.subr.bf16.mxu1 %v5208_v29  ;;  %v5254_v29 = vld [vmem:[%s6326_s1 + $0x788] sm:$0xff]  }
  0xdf   : > { %4819 = vmatpush3.bf16.msra.mxu0 %v5209_v30 }
  0xe0   : > { %4841 = vmatpush3.bf16.msra.mxu1 %v5210_v33  ;;  %4820 = vmatprep.subr.bf16.mxu0 %v5211_v34  ;;  %v5256_v34 = vld [vmem:[%s6326_s1 + $0x7c0] sm:$0xff]  }
  0xe1   : > { %4842 = vmatprep.subr.bf16.mxu1 %v5212_v37  ;;  %v5257_v37 = vld [vmem:[%s6326_s1 + $0x700] sm:$0xff]  }
  0xe3   : > { %4821 = vmatpush3.bf16.msra.mxu0 %v5213_v40  ;;  %v2824_v40 = vld [vmem:[%s5467_s6 + $0x20] sm:$0x11] }
  0xe4   : > { %4843 = vmatpush3.bf16.msra.mxu1 %v5214_v43  ;;  %4822 = vmatprep.subr.bf16.mxu0 %v5215_v45  ;;  %v4407_v43 = vcombine.high %v6090_v55, %v2824_v40  ;;  %v2825_v45 = vld [vmem:[%s5467_s6 + $0x28] sm:$0x11] }
  0xe5   : > { %4844 = vmatprep.subr.bf16.mxu1 %v5216_v48  ;;  %v5263_v48 = vld [vmem:[%s6326_s1 + $0x878] sm:$0xff]  }
  0xe7   : > { %4823 = vmatpush3.bf16.msra.mxu0 %v5217_v49  ;;  %v2915_v49 = vshrl.u32 %v4407_v43, 16 }
  0xe8   : > { %4845 = vmatpush3.bf16.msra.mxu1 %v5218_v50  ;;  %4824 = vmatprep.subr.bf16.mxu0 %v5219_v51  ;;  %v2917_v50 = vshll.u32 %v4407_v43, 16  ;;  %v5295_v43 = vld [vmem:[%s5467_s6 + $0x10] ss:$16 sps:$4 sm:$0x1e]  }
  0xe9   : > { %4846 = vmatprep.subr.bf16.mxu1 %v5220_v52  ;;  %v5264_v52 = vld [vmem:[%s6326_s1 + $0x8f8] sm:$0xff]  }
  0xea   : > { %v2919_v58 = vrot.slane %v2917_v50, 1 }
  0xeb   : > { %4825 = vmatpush3.bf16.msra.mxu0 %v5221_v53 }
  0xec   : > { %4847 = vmatpush3.bf16.msra.mxu1 %v5222_v54  ;;  %4854 = vmatprep.subr.bf16.mxu0 %v5227_v61  ;;  %v5265_v61 = vld [vmem:[%s6326_s1 + $0x838] sm:$0xff]  }
  0xed   : > { %4876 = vmatprep.subr.bf16.mxu1 %v5228_v62  ;;  %v5266_v62 = vld [vmem:[%s6326_s1 + $0x8b8] sm:$0xff]  }
  0xee   : > { %v4562_v31 = vpop.f32.mrf.mxu0  ;;  %2772 = vmatmul.mubr.bf16.vlgmr.msra.gmra.mxu0 %v4306_v57 }
  0xef   : > { %v4584_v32 = vpop.f32.mrf.mxu1  ;;  %2812 = vmatmul.mubr.bf16.vlgmr.msra.gmra.mxu1 %v4308_v59  ;;  %4855 = vmatpush3.bf16.msra.mxu0 %v5229_v63  ;;  %v2920_v63 = vor.u32 %v2919_v58, %v2915_v49  ;;  %v5300_v49 = vld [vmem:[%s5467_s6 + $0x1c] ss:$16 sps:$4 sm:$0x1e]  }
  0xf0   : > { %v4563_v35 = vpop.f32.mrf.mxu0  ;;  %4877 = vmatpush3.bf16.msra.mxu1 %v5230_v0  ;;  %4856 = vmatprep.subr.bf16.mxu0 %v5231_v1 }
  0xf1   : > { %v4585_v36 = vpop.f32.mrf.mxu1  ;;  %v4564_v38 = vadd.f32 %v4563_v35, %v4562_v31  ;;  %4878 = vmatprep.subr.bf16.mxu1 %v5232_v2  ;;  %3163 = vmatprep.mubr.bf16.mxu0 %v2920_v63 }
  0xf2   : > { %v4586_v39 = vadd.f32 %v4585_v36, %v4584_v32  ;;  %v4565_v41 = vpop.f32.mrf.mxu0  ;;  %v5255_v32 = vld [vmem:[%s6326_s1 + $0x740] sm:$0xff]  }
  0xf3   : > { %v4587_v42 = vpop.f32.mrf.mxu1  ;;  %4857 = vmatpush3.bf16.msra.mxu0 %v5233_v3  ;;  %v5267_v3 = vld [vmem:[%s6326_s1 + $0x870] sm:$0xff]  }
  0xf4   : > { %v6063_v44 = vadd.f32 %v4586_v39, %v4564_v38  ;;  %v4566_v46 = vpop.f32.mrf.mxu0  ;;  %4879 = vmatpush3.bf16.msra.mxu1 %v5234_v4  ;;  %4858 = vmatprep.subr.bf16.mxu0 %v5235_v5  ;;  %v5258_v39 = vld [vmem:[%s6326_s1 + $0x780] sm:$0xff]   ;;  %v4406_v42 = vcombine.low %v6090_v55, %v2824_v40  ;;  %v5268_v4 = vld [vmem:[%s6326_s1 + $0x8f0] sm:$0xff]  }
  0xf5   : > { %v4588_v47 = vpop.f32.mrf.mxu1  ;;  %4880 = vmatprep.subr.bf16.mxu1 %v5236_v6  ;;  %v4408_v46 = vcombine.low %v6093_v56, %v2825_v45  ;;  %v5269_v5 = vld [vmem:[%s6326_s1 + $0x830] sm:$0xff]   ;;  %v5292_v40 = vld [vmem:[%s6326_s1 + $0x8c0] sm:$0xff]  }
  0xf6   : > { %v4409_v47 = vcombine.high %v6093_v56, %v2825_v45  ;;  %v2908_v51 = vshrl.u32 %v4406_v42, 16  ;;  %v5270_v6 = vld [vmem:[%s6326_s1 + $0x8b0] sm:$0xff]   ;;  %v5294_v45 = vld [vmem:[%s6326_s1 + $0x880] sm:$0xff]  }
  0xf7   : > { %4859 = vmatpush3.bf16.msra.mxu0 %v5237_v7  ;;  %v2922_v55 = vshrl.u32 %v4408_v46, 16  ;;  %v2924_v57 = vshll.u32 %v4408_v46, 16  ;;  %v5271_v7 = vld [vmem:[%s6326_s1 + $0x868] sm:$0xff]   ;;  %v5297_v46 = vld [vmem:[%s5467_s6 + $0x14] ss:$16 sps:$4 sm:$0x1e]  }
  0xf8   : > { %4881 = vmatpush3.bf16.msra.mxu1 %v5238_v8  ;;  %4860 = vmatprep.subr.bf16.mxu0 %v5239_v9  ;;  %v2929_v53 = vshrl.u32 %v4409_v47, 16  ;;  %v2931_v54 = vshll.u32 %v4409_v47, 16  ;;  %v5272_v8 = vld [vmem:[%s6326_s1 + $0x8e8] sm:$0xff]   ;;  %v3299_v47 = vrot.slane %v5295_v43, 1 }
  0xf9   : > { %4882 = vmatprep.subr.bf16.mxu1 %v5240_v10  ;;  %v2926_v60 = vrot.slane %v2924_v57, 1  ;;  %v5273_v9 = vld [vmem:[%s6326_s1 + $0x828] sm:$0xff]  }
  0xfa   : > { %v2933_v56 = vrot.slane %v2931_v54, 1  ;;  %v5274_v10 = vld [vmem:[%s6326_s1 + $0x8a8] sm:$0xff]  }
  0xfb   : > { %4861 = vmatpush3.bf16.msra.mxu0 %v5241_v11  ;;  %v2927_v2 = vor.u32 %v2926_v60, %v2922_v55  ;;  %v5275_v11 = vld [vmem:[%s6326_s1 + $0x860] sm:$0xff]  }
  0xfc   : > { %4883 = vmatpush3.bf16.msra.mxu1 %v5242_v12  ;;  %4862 = vmatprep.subr.bf16.mxu0 %v5243_v13  ;;  %v2934_v1 = vor.u32 %v2933_v56, %v2929_v53  ;;  %v5276_v12 = vld [vmem:[%s6326_s1 + $0x8e0] sm:$0xff]  }
  0xfd   : > { %4884 = vmatprep.subr.bf16.mxu1 %v5244_v14  ;;  %v5277_v13 = vld [vmem:[%s6326_s1 + $0x820] sm:$0xff]  }
  0xfe   : > { %3203 = vmatprep.mubr.bf16.mxu1 %v2934_v1  ;;  %v5278_v14 = vld [vmem:[%s6326_s1 + $0x8a0] sm:$0xff]  }
  0xff   : > { %4863 = vmatpush3.bf16.msra.mxu0 %v5245_v15  ;;  %v5279_v15 = vld [vmem:[%s6326_s1 + $0x858] sm:$0xff]  }
 0x100   : > { %4885 = vmatpush3.bf16.msra.mxu1 %v5246_v16  ;;  %4864 = vmatprep.subr.bf16.mxu0 %v5247_v17  ;;  %v5280_v16 = vld [vmem:[%s6326_s1 + $0x8d8] sm:$0xff]  }
 0x101   : > { %4886 = vmatprep.subr.bf16.mxu1 %v5248_v18  ;;  %v5281_v17 = vld [vmem:[%s6326_s1 + $0x818] sm:$0xff]  }
 0x102   : > { %v5282_v18 = vld [vmem:[%s6326_s1 + $0x898] sm:$0xff]  }
 0x103   : > { %4865 = vmatpush3.bf16.msra.mxu0 %v5249_v19  ;;  %v5283_v19 = vld [vmem:[%s6326_s1 + $0x850] sm:$0xff]  }
 0x104   : > { %4887 = vmatpush3.bf16.msra.mxu1 %v5250_v20  ;;  %4866 = vmatprep.subr.bf16.mxu0 %v5251_v22 }
 0x105   : > { %4888 = vmatprep.subr.bf16.mxu1 %v5252_v24 }
 0x107   : > { %4867 = vmatpush3.bf16.msra.mxu0 %v5253_v26 }
 0x108   : > { %4889 = vmatpush3.bf16.msra.mxu1 %v5254_v29  ;;  %4868 = vmatprep.subr.bf16.mxu0 %v5255_v32 }
 0x109   : > { %4890 = vmatprep.subr.bf16.mxu1 %v5256_v34 }
 0x10b   : > { %4869 = vmatpush3.bf16.msra.mxu0 %v5257_v37 }
 0x10c   : > { %4891 = vmatpush3.bf16.msra.mxu1 %v5258_v39  ;;  %4898 = vmatprep.subr.bf16.mxu0 %v5263_v48  ;;  %v3300_v48 = vrot.slane %v5297_v46, 1 }
 0x10d   : > { %4920 = vmatprep.subr.bf16.mxu1 %v5264_v52 }
 0x10e   : > { %v4606_v21 = vpop.f32.mrf.mxu0 }
 0x10f   : > { %v4628_v23 = vpop.f32.mrf.mxu1  ;;  %3204 = vmatmul.mubr.bf16.vlgmr.msra.gmra.mxu1 %v2927_v2 }
 0x110   : > { %v4607_v25 = vpop.f32.mrf.mxu0  ;;  %4921 = vmatpush3.bf16.msra.mxu1 %v5266_v62 }
 0x111   : > { %v4608_v27 = vadd.f32 %v4607_v25, %v4606_v21  ;;  %v4629_v28 = vpop.f32.mrf.mxu1  ;;  %4922 = vmatprep.subr.bf16.mxu1 %v5268_v4  ;;  %v5284_v21 = vld [vmem:[%s6326_s1 + $0x8d0] sm:$0xff]  }
 0x112   : > { %v4630_v30 = vadd.f32 %v4629_v28, %v4628_v23  ;;  %v4609_v31 = vpop.f32.mrf.mxu0  ;;  %v5285_v23 = vld [vmem:[%s6326_s1 + $0x810] sm:$0xff]   ;;  %v5287_v28 = vld [vmem:[%s6326_s1 + $0x848] sm:$0xff]  }
 0x113   : > { %v4631_v33 = vpop.f32.mrf.mxu1  ;;  %v5286_v25 = vld [vmem:[%s6326_s1 + $0x890] sm:$0xff]   ;;  %v5288_v31 = vld [vmem:[%s6326_s1 + $0x8c8] sm:$0xff]  }
 0x114   : > { %v958_v35 = vadd.f32 %v4630_v30, %v4608_v27  ;;  %v4610_v36 = vpop.f32.mrf.mxu0  ;;  %4923 = vmatpush3.bf16.msra.mxu1 %v5270_v6  ;;  %v5289_v33 = vld [vmem:[%s6326_s1 + $0x808] sm:$0xff]  }
 0x115   : > { %v4632_v38 = vpop.f32.mrf.mxu1  ;;  %4924 = vmatprep.subr.bf16.mxu1 %v5272_v8  ;;  %v5290_v36 = vld [vmem:[%s6326_s1 + $0x888] sm:$0xff]  }
 0x116   : > { %v6201_v41 = vadd.f32 %v958_v35, %v6063_v44  ;;  %v2910_v44 = vshll.u32 %v4406_v42, 16  ;;  %v5291_v38 = vld [vmem:[%s6326_s1 + $0x840] sm:$0xff]  }
 0x117   : > { %v5293_v42 = vld [vmem:[%s6326_s1 + $0x800] sm:$0xff]  }
 0x118   : > { %v2912_v59 = vrot.slane %v2910_v44, 1  ;;  %4925 = vmatpush3.bf16.msra.mxu1 %v5274_v10 }
 0x119   : > { %4926 = vmatprep.subr.bf16.mxu1 %v5276_v12 }
 0x11a   : > { %v2913_v0 = vor.u32 %v2912_v59, %v2908_v51  ;;  %v3302_v51 = vrot.slane %v5300_v49, 1 }
 0x11c   : > { %3164 = vmatmul.mubr.bf16.vlgmr.msra.gmra.mxu0 %v2913_v0  ;;  %4927 = vmatpush3.bf16.msra.mxu1 %v5278_v14 }
 0x11d   : > { %4899 = vmatpush3.bf16.msra.mxu0 %v5265_v61  ;;  %4928 = vmatprep.subr.bf16.mxu1 %v5280_v16 }
 0x11e   : > { %4900 = vmatprep.subr.bf16.mxu0 %v5267_v3  ;;  %3531 = vmatprep.mubr.bf16.mxu0 %v3300_v48 }
 0x11f   : > { %3571 = vmatprep.mubr.bf16.mxu1 %v3302_v51 }
 0x120   : > { %4929 = vmatpush3.bf16.msra.mxu1 %v5282_v18 }
 0x121   : > { %4901 = vmatpush3.bf16.msra.mxu0 %v5269_v5  ;;  %4930 = vmatprep.subr.bf16.mxu1 %v5284_v21 }
 0x122   : > { %4902 = vmatprep.subr.bf16.mxu0 %v5271_v7 }
 0x124   : > { %4931 = vmatpush3.bf16.msra.mxu1 %v5286_v25 }
 0x125   : > { %4903 = vmatpush3.bf16.msra.mxu0 %v5273_v9  ;;  %4932 = vmatprep.subr.bf16.mxu1 %v5288_v31 }
 0x126   : > { %4904 = vmatprep.subr.bf16.mxu0 %v5275_v11 }
 0x128   : > { %4933 = vmatpush3.bf16.msra.mxu1 %v5290_v36 }
 0x129   : > { %4905 = vmatpush3.bf16.msra.mxu0 %v5277_v13  ;;  %4934 = vmatprep.subr.bf16.mxu1 %v5292_v40 }
 0x12a   : > { %4906 = vmatprep.subr.bf16.mxu0 %v5279_v15 }
 0x12c   : > { %4935 = vmatpush3.bf16.msra.mxu1 %v5294_v45 }
 0x12d   : > { %4907 = vmatpush3.bf16.msra.mxu0 %v5281_v17 }
 0x12e   : > { %v4650_v20 = vpop.f32.mrf.mxu0  ;;  %4908 = vmatprep.subr.bf16.mxu0 %v5283_v19 }
 0x12f   : > { %v4672_v22 = vpop.f32.mrf.mxu1 }
 0x130   : > { %v4651_v24 = vpop.f32.mrf.mxu0 }
 0x131   : > { %v4652_v26 = vadd.f32 %v4651_v24, %v4650_v20  ;;  %v4673_v27 = vpop.f32.mrf.mxu1  ;;  %4909 = vmatpush3.bf16.msra.mxu0 %v5285_v23 }
 0x132   : > { %v4674_v29 = vadd.f32 %v4673_v27, %v4672_v22  ;;  %v4653_v30 = vpop.f32.mrf.mxu0  ;;  %4910 = vmatprep.subr.bf16.mxu0 %v5287_v28 }
 0x133   : > { %v4675_v32 = vpop.f32.mrf.mxu1 }
 0x134   : > { %v1326_v34 = vadd.f32 %v4674_v29, %v4652_v26  ;;  %v4654_v35 = vpop.f32.mrf.mxu0 }
 0x135   : > { %v4676_v37 = vpop.f32.mrf.mxu1  ;;  %4911 = vmatpush3.bf16.msra.mxu0 %v5289_v33 }
 0x136   : > { %v1332_v39 = vadd.f32 %v1326_v34, %v6201_v41  ;;  %4912 = vmatprep.subr.bf16.mxu0 %v5291_v38  ;;  %v5298_v41 = vld [vmem:[%s5467_s6 + $0x18] ss:$16 sps:$4 sm:$0x1e]  }
 0x137   : > { %v3301_v50 = vrot.slane %v5298_v41, 1 }
 0x139   : > { %4913 = vmatpush3.bf16.msra.mxu0 %v5293_v42  ;;  %3572 = vmatmul.mubr.bf16.vlgmr.msra.gmra.mxu1 %v3301_v50 }
 0x13c   : > { %3532 = vmatmul.mubr.bf16.vlgmr.msra.gmra.mxu0 %v3299_v47 }
 0x14e   : > { %v4694_v44 = vpop.f32.mrf.mxu0 }
 0x14f   : > { %v4716_v52 = vpop.f32.mrf.mxu1 }
 0x150   : > { %v4695_v53 = vpop.f32.mrf.mxu0 }
 0x151   : > { %v4696_v54 = vadd.f32 %v4695_v53, %v4694_v44  ;;  %v4717_v55 = vpop.f32.mrf.mxu1 }
 0x152   : > { %v4697_v57 = vpop.f32.mrf.mxu0  ;;  %v4718_v58 = vadd.f32 %v4717_v55, %v4716_v52 }
 0x153   : > { %v4719_v59 = vpop.f32.mrf.mxu1 }
 0x154   : > { %v4698_v56 = vpop.f32.mrf.mxu0  ;;  %v1694_v60 = vadd.f32 %v4718_v58, %v4696_v54  ;;  %v4542_v58 = vld [vmem:[%s6327_s2] ss:$0 sm:$0xff] }
 0x155   : > { %v4720_v61 = vpop.f32.mrf.mxu1 }
 0x156   : > { %v1700_v62 = vadd.f32 %v1694_v60, %v1332_v39 }
 0x16e   : > { %v4738_v63 = vpop.f32.mrf.mxu0 }
 0x16f   : > { %v4760_v1 = vpop.f32.mrf.mxu1 }
 0x170   : > { %v4739_v0 = vpop.f32.mrf.mxu0 }
 0x171   : > { %v4740_v2 = vadd.f32 %v4739_v0, %v4738_v63  ;;  %v4761_v4 = vpop.f32.mrf.mxu1 }
 0x172   : > { %v4741_v3 = vpop.f32.mrf.mxu0  ;;  %v4762_v5 = vadd.f32 %v4761_v4, %v4760_v1 }
 0x173   : > { %v4763_v7 = vpop.f32.mrf.mxu1 }
 0x174   : > { %v4742_v6 = vpop.f32.mrf.mxu0  ;;  %v2090_v8 = vadd.f32 %v4762_v5, %v4740_v2 }
 0x175   : > { %v4764_v9 = vpop.f32.mrf.mxu1 }
 0x176   : > { %v2096_v10 = vadd.f32 %v2090_v8, %v1700_v62 }
 0x18e   : > { %v4782_v11 = vpop.f32.mrf.mxu0 }
 0x18f   : > { %v4804_v12 = vpop.f32.mrf.mxu1 }
 0x190   : > { %v4783_v13 = vpop.f32.mrf.mxu0 }
 0x191   : > { %v4784_v14 = vadd.f32 %v4783_v13, %v4782_v11  ;;  %v4805_v15 = vpop.f32.mrf.mxu1 }
 0x192   : > { %v4785_v16 = vpop.f32.mrf.mxu0  ;;  %v4806_v17 = vadd.f32 %v4805_v15, %v4804_v12 }
 0x193   : > { %v4807_v18 = vpop.f32.mrf.mxu1 }
 0x194   : > { %v4786_v19 = vpop.f32.mrf.mxu0  ;;  %v2458_v20 = vadd.f32 %v4806_v17, %v4784_v14 }
 0x195   : > { %v4808_v21 = vpop.f32.mrf.mxu1 }
 0x196   : > { %v2464_v22 = vadd.f32 %v2458_v20, %v2096_v10 }
 0x1ae   : > { %v4826_v23 = vpop.f32.mrf.mxu0 }
 0x1af   : > { %v4848_v24 = vpop.f32.mrf.mxu1 }
 0x1b0   : > { %v4827_v25 = vpop.f32.mrf.mxu0 }
 0x1b1   : > { %v4828_v26 = vadd.f32 %v4827_v25, %v4826_v23  ;;  %v4849_v27 = vpop.f32.mrf.mxu1 }
 0x1b2   : > { %v4850_v28 = vadd.f32 %v4849_v27, %v4848_v24  ;;  %v4829_v29 = vpop.f32.mrf.mxu0 }
 0x1b3   : > { %v4851_v30 = vpop.f32.mrf.mxu1 }
 0x1b4   : > { %v2814_v31 = vadd.f32 %v4850_v28, %v4828_v26  ;;  %v4830_v32 = vpop.f32.mrf.mxu0 }
 0x1b5   : > { %v4852_v33 = vpop.f32.mrf.mxu1 }
 0x1b6   : > { %v2820_v34 = vadd.f32 %v2814_v31, %v2464_v22 }
 0x1cf   : > { %v4892_v36 = vpop.f32.mrf.mxu1 }
 0x1d1   : > { %v4893_v38 = vpop.f32.mrf.mxu1 }
 0x1d2   : > { %v4894_v46 = vadd.f32 %v4893_v38, %v4892_v36 }
 0x1d3   : > { %v4895_v40 = vpop.f32.mrf.mxu1 }
 0x1d5   : > { %v4896_v43 = vpop.f32.mrf.mxu1 }
 0x1dc   : > { %v4870_v35 = vpop.f32.mrf.mxu0 }
 0x1de   : > { %v4871_v37 = vpop.f32.mrf.mxu0 }
 0x1df   : > { %v4872_v45 = vadd.f32 %v4871_v37, %v4870_v35 }
 0x1e0   : > { %v4873_v39 = vpop.f32.mrf.mxu0 }
 0x1e1   : > { %v3206_v48 = vadd.f32 %v4894_v46, %v4872_v45 }
 0x1e2   : > { %v4874_v42 = vpop.f32.mrf.mxu0 }
 0x1e3   : > { %v3212_v54 = vadd.f32 %v3206_v48, %v2820_v34 }
 0x1f9   : > { %v4936_v47 = vpop.f32.mrf.mxu1 }
 0x1fb   : > { %v4937_v51 = vpop.f32.mrf.mxu1 }
 0x1fc   : > { %v4914_v41 = vpop.f32.mrf.mxu0  ;;  %v4938_v44 = vadd.f32 %v4937_v51, %v4936_v47 }
 0x1fd   : > { %v4939_v53 = vpop.f32.mrf.mxu1 }
 0x1fe   : > { %v4915_v49 = vpop.f32.mrf.mxu0 }
 0x1ff   : > { %v4916_v50 = vadd.f32 %v4915_v49, %v4914_v41  ;;  %v4940_v59 = vpop.f32.mrf.mxu1 }
 0x200   : > { %v4917_v52 = vpop.f32.mrf.mxu0 }
 0x201   : > { %v3574_v55 = vadd.f32 %v4938_v44, %v4916_v50 }
 0x202   : > { %v4918_v57 = vpop.f32.mrf.mxu0 }
 0x203   : > { %v3580_v56 = vadd.f32 %v3574_v55, %v3212_v54 }
 0x205   : > { %v3590_v60 = vadd.f32 %v4542_v58, %v3580_v56 }
 0x207   : > { %v4543_v61 = vmul.f32 -1.442695, %v3590_v60 }
 0x209   : > { %5301 = vpow2.f32 %v4543_v61 }
 0x216   : > { %v5302_v62 = vpop.eup %5301 }
 0x217   : > { %v3594_v63 = vadd.f32 1.0, %v5302_v62 }
 0x219   : > { %5303 = vrcp.f32 %v3594_v63 }
 0x226   : > { %v5304_v0 = vpop.eup %5303 }
 0x227   : > { %3597 = vst [vmem:[%s219_s25] sm:$0xff] %v5304_v0 }
 0x228 PF: > { %s13_s14 = sadd.s32 1, %s5327_s14   ;;  %s6329_s12 = smov %s5323_s13 }
 0x229   : > { %p10_p5 = scmp.ge.s32.totalorder %s13_s14, 4   ;;  %s6330_s13 = smov %s6332_s15 }
 0x22b   :  { %12 = sbr.rel (!%p10_p5) target bundleno = 2 (0x2), region = 76 }

</bundles_post_ra>
